<compile_context>
chip_gen: v6e
topology: v6e:2x2x1
jax: 0.10.0
libtpu: 0.0.40
codegen_flags: <defaults>
</compile_context>

<pallas_src>
import numpy as np
import jax
import jax.numpy as jnp
from jax import lax
from jax.experimental import pallas as pl
from jax.experimental.pallas import tpu as pltpu

EPS = 1e-5
SLOPE = 0.1  # LeakyReLU negative slope (explicit in Sors7.forward)

# (cin, cout, ksize, stride, pad) for conv1..conv7, from Sors7.__init__
CONV_CFG = [(1, 128, 7, 2, 3), (128, 128, 7, 2, 3), (128, 128, 7, 2, 3),
            (128, 128, 7, 2, 2), (128, 128, 7, 2, 2), (128, 128, 7, 2, 3),
            (128, 256, 7, 2, 3)]
N_CONV = len(CONV_CFG)
KS = 7


def _lrelu(x):
    return jnp.where(x > 0, x, SLOPE * x)


def _layer_dims(l0):
    """[(l_in, l_out), ...] for the 7 conv layers given input length l0."""
    dims, l = [], l0
    for (_, _, ks, st, pad) in CONV_CFG:
        lo = (l + 2 * pad - ks) // st + 1
        assert lo >= 1, "input length too small for Sors7"
        dims.append((l, lo))
        l = lo
    return dims


def _round_up(v, m):
    return ((v + m - 1) // m) * m


def _selection_mats(l_in, pad, ph):
    """0/1 matrices gathering even/odd rows of the zero-padded layer input.

    E = Se @ x gives E[j] = xpad[2j]   (= x[2j - pad]   or 0 in the halo)
    O = So @ x gives O[j] = xpad[2j+1] (= x[2j + 1 - pad] or 0 in the halo)
    """
    se = np.zeros((ph, l_in), np.float32)
    so = np.zeros((ph, l_in), np.float32)
    for j in range(ph):
        re = 2 * j - pad
        ro = 2 * j + 1 - pad
        if 0 <= re < l_in:
            se[j, re] = 1.0
        if 0 <= ro < l_in:
            so[j, ro] = 1.0
    return se, so


# ----------------------------- fused Pallas kernel --------------------------

def _build_kernel(batch, l0, dims, ph1):
    """Fused Sors7 forward; closes over static batch size and layer dims."""
    h0 = l0 // 2
    lo1 = dims[0][1]
    cout1 = CONV_CFG[0][1]

    def kernel(*refs):
        it = iter(refs)
        xe_ref, xo_ref, w1_ref = next(it), next(it), next(it)
        layer_refs = []
        for _ in range(1, N_CONV):
            layer_refs.append((next(it), next(it), next(it)))  # (Se, So, Wcat)
        fw1, fb1, fw2, fb2 = next(it), next(it), next(it), next(it)
        o_ref = next(it)

        def pad_rows(v, before, after):
            parts = []
            if before:
                parts.append(jnp.zeros((before, v.shape[1]), v.dtype))
            parts.append(v)
            if after:
                parts.append(jnp.zeros((after, v.shape[1]), v.dtype))
            return jnp.concatenate(parts, axis=0) if len(parts) > 1 else v

        def bn_lrelu(y, rows):
            # BatchNorm1d (training): per-channel biased stats over all rows,
            # gamma=1 / beta=0, eps=1e-5.  Streamed two-pass on resident f32.
            inv_n = 1.0 / rows
            mu = jnp.sum(y, axis=0, keepdims=True) * inv_n
            d = y - mu
            var = jnp.sum(d * d, axis=0, keepdims=True) * inv_n
            return _lrelu(d * lax.rsqrt(var + EPS))

        # ---- norm0: BatchNorm1d(1) in training mode == stats over all (N, L)
        xe = xe_ref[...]                          # (batch*h0, 1) even samples
        xo = xo_ref[...]                          # (batch*h0, 1) odd samples
        inv_cnt0 = 1.0 / float(batch * l0)
        mu0 = (jnp.sum(xe, keepdims=True) + jnp.sum(xo, keepdims=True)) * inv_cnt0
        de, do = xe - mu0, xo - mu0
        var0 = (jnp.sum(de * de, keepdims=True)
                + jnp.sum(do * do, keepdims=True)) * inv_cnt0
        inv0 = lax.rsqrt(var0 + EPS)
        xen, xon = de * inv0, do * inv0

        # ---- conv1 (cin=1, pad=3): VPU shifted multiply-adds.
        # xpad[p] = xn[p-3]; pad is odd, so even rows of xpad are the odd
        # samples of xn and vice-versa.
        w1 = w1_ref[...]                          # (7, cout1)
        parts = []
        for n in range(batch):
            sl = slice(n * h0, (n + 1) * h0)
            e_n = pad_rows(xon[sl, :], 2, ph1 - 2 - h0)   # E[j] = xn[2j-3]
            o_n = pad_rows(xen[sl, :], 1, ph1 - 1 - h0)   # O[j] = xn[2j-2]
            acc = jnp.zeros((lo1, cout1), jnp.float32)
            for k in range(KS):
                src, off = (e_n, k // 2) if k % 2 == 0 else (o_n, (k - 1) // 2)
                acc = acc + src[off:off + lo1, :] * w1[k:k + 1, :]
            parts.append(acc)
        y = jnp.concatenate(parts, axis=0)        # (batch*lo1, cout1)
        act = bn_lrelu(y, float(batch * lo1))

        # ---- conv2..conv7: parity-plane selection matmuls + ONE tap-folded
        #      (batch*l_out, 7*cin) x (7*cin, cout) MXU matmul per layer,
        #      then streamed BN + LeakyReLU.  (Conv bias dropped: exact under
        #      default-affine train-mode BN.)
        for li in range(1, N_CONV):
            cin, cout, ks, st, pad = CONV_CFG[li]
            l_in, l_out = dims[li]
            se_ref, so_ref, wc_ref = layer_refs[li - 1]
            se, so, wc = se_ref[...], so_ref[...], wc_ref[...]
            cols_parts = []
            for n in range(batch):
                a_n = act[n * l_in:(n + 1) * l_in, :]             # (l_in, cin)
                e_n = jnp.dot(se, a_n, preferred_element_type=jnp.float32)
                o_n = jnp.dot(so, a_n, preferred_element_type=jnp.float32)
                wins = []
                for k in range(ks):
                    src, off = (e_n, k // 2) if k % 2 == 0 else (o_n, (k - 1) // 2)
                    wins.append(src[off:off + l_out, :])
                cols_parts.append(jnp.concatenate(wins, axis=1))  # (l_out, ks*cin)
            cols = jnp.concatenate(cols_parts, axis=0)            # (batch*l_out, ks*cin)
            y = jnp.dot(cols, wc, preferred_element_type=jnp.float32)
            act = bn_lrelu(y, float(batch * l_out))

        # ---- head: torch.max(x, 2)[0] -> fc1 -> LeakyReLU -> fc2
        l_last = dims[-1][1]
        hmax = jnp.concatenate(
            [jnp.max(act[n * l_last:(n + 1) * l_last, :], axis=0, keepdims=True)
             for n in range(batch)], axis=0)                      # (batch, 256)
        z = _lrelu(jnp.dot(hmax, fw1[...],
                           preferred_element_type=jnp.float32) + fb1[...])
        o_ref[...] = jnp.dot(z, fw2[...],
                             preferred_element_type=jnp.float32) + fb2[...]

    return kernel


# ------------------------------ pallas_call wrapper -------------------------

def _full_spec(shape):
    return pl.BlockSpec(shape, lambda i: (0,) * len(shape))


def sors7_forward(x, params):
    """x: (N, 1, L) float32 -> (N, 4) float32 via a single fused Pallas kernel."""
    batch, c, l0 = x.shape
    assert c == 1 and l0 % 2 == 0
    dims = _layer_dims(l0)
    x = x.astype(jnp.float32)
    h0 = l0 // 2

    # Host-side parity split of the raw input (pure layout plumbing, no compute).
    xe = x[:, 0, 0::2].reshape(batch * h0, 1)
    xo = x[:, 0, 1::2].reshape(batch * h0, 1)

    ph1 = _round_up(dims[0][1] + 3, 8)   # even/odd plane rows for conv1

    # conv1 weight as (ks, cout); conv2..7 as tap-folded (ks*cin, cout).
    inputs = [xe, xo, jnp.transpose(params["conv_w"][0][:, 0, :], (1, 0))]
    for li in range(1, N_CONV):
        cin, cout, ks, st, pad = CONV_CFG[li]
        l_in, l_out = dims[li]
        ph = _round_up(l_out + 3, 8)
        se, so = _selection_mats(l_in, pad, ph)
        wcat = jnp.transpose(params["conv_w"][li], (2, 1, 0)).reshape(ks * cin, cout)
        inputs += [jnp.asarray(se), jnp.asarray(so), wcat]
    inputs += [jnp.transpose(params["fc1_w"], (1, 0)), params["fc1_b"].reshape(1, -1),
               jnp.transpose(params["fc2_w"], (1, 0)), params["fc2_b"].reshape(1, -1)]

    out_features = params["fc2_w"].shape[0]
    return pl.pallas_call(
        _build_kernel(batch, l0, dims, ph1),
        grid=(1,),
        in_specs=[_full_spec(tuple(a.shape)) for a in inputs],
        out_specs=_full_spec((batch, out_features)),
        out_shape=jax.ShapeDtypeStruct((batch, out_features), jnp.float32),
        compiler_params=pltpu.CompilerParams(
            dimension_semantics=("arbitrary",),
            vmem_limit_bytes=32 * 1024 * 1024),
    )(*inputs)


# ------------------------------ params & reference --------------------------

def init_params(key):
    """Torch-layout parameters (as a freshly initialized Sors7 would have)."""
    params = {"conv_w": [], "conv_b": []}
    keys = jax.random.split(key, N_CONV + 2)
    for i, (cin, cout, ks, st, pad) in enumerate(CONV_CFG):
        kw, kb = jax.random.split(keys[i])
        bound = 1.0 / np.sqrt(cin * ks)
        params["conv_w"].append(
            jax.random.uniform(kw, (cout, cin, ks), jnp.float32, -bound, bound))
        params["conv_b"].append(
            jax.random.uniform(kb, (cout,), jnp.float32, -bound, bound))
    for name, kk, fin, fout in (("fc1", keys[-2], 256, 100),
                                ("fc2", keys[-1], 100, 4)):
        kw, kb = jax.random.split(kk)
        bound = 1.0 / np.sqrt(fin)
        params[name + "_w"] = jax.random.uniform(kw, (fout, fin), jnp.float32,
                                                 -bound, bound)
        params[name + "_b"] = jax.random.uniform(kb, (fout,), jnp.float32,
                                                 -bound, bound)
    return params


def _bn_train_ref(x_ncl):
    mu = jnp.mean(x_ncl, axis=(0, 2), keepdims=True)
    var = jnp.mean((x_ncl - mu) ** 2, axis=(0, 2), keepdims=True)
    return (x_ncl - mu) * jax.lax.rsqrt(var + EPS)


def sors7_reference(x, params):
    """Pure-JAX/XLA reference mirroring the PyTorch forward (train-mode BN)."""
    hi = jax.lax.Precision.HIGHEST
    h = _bn_train_ref(x.astype(jnp.float32))
    for li, (cin, cout, ks, st, pad) in enumerate(CONV_CFG):
        h = jax.lax.conv_general_dilated(
            h, params["conv_w"][li], window_strides=(st,), padding=[(pad, pad)],
            dimension_numbers=("NCH", "OIH", "NCH"), precision=hi)
        h = h + params["conv_b"][li][None, :, None]
        h = _lrelu(_bn_train_ref(h))
    hmax = jnp.max(h, axis=2)
    z = _lrelu(jnp.dot(hmax, params["fc1_w"].T, precision=hi) + params["fc1_b"])
    return jnp.dot(z, params["fc2_w"].T, precision=hi) + params["fc2_b"]


if __name__ == "__main__":
    key = jax.random.PRNGKey(0)
    kparam, kdata = jax.random.split(key)
    params = init_params(kparam)

    # small deterministic input: batch=2, 1 channel, length=256
    x = jax.random.normal(kdata, (2, 1, 256), dtype=jnp.float32)

    out = jax.block_until_ready(sors7_forward(x, params))
    assert out.shape == (2, 4) and out.dtype == jnp.float32

    ref = jax.block_until_ready(sors7_reference(x, params))
    assert jnp.allclose(out, ref, atol=3e-2, rtol=3e-2), (
        "Pallas kernel diverges from reference", out, ref)
    print("KERNEL_OK")
</pallas_src>

<mosaic_0001>
module attributes {stable_mosaic.version = 11 : i64} {
  func.func @kernel(%arg0: i32, %arg1: memref<256x1xf32, #tpu.memory_space<vmem>>, %arg2: memref<256x1xf32, #tpu.memory_space<vmem>>, %arg3: memref<7x128xf32, #tpu.memory_space<vmem>>, %arg4: memref<72x128xf32, #tpu.memory_space<vmem>>, %arg5: memref<72x128xf32, #tpu.memory_space<vmem>>, %arg6: memref<896x128xf32, #tpu.memory_space<vmem>>, %arg7: memref<40x64xf32, #tpu.memory_space<vmem>>, %arg8: memref<40x64xf32, #tpu.memory_space<vmem>>, %arg9: memref<896x128xf32, #tpu.memory_space<vmem>>, %arg10: memref<24x32xf32, #tpu.memory_space<vmem>>, %arg11: memref<24x32xf32, #tpu.memory_space<vmem>>, %arg12: memref<896x128xf32, #tpu.memory_space<vmem>>, %arg13: memref<16x15xf32, #tpu.memory_space<vmem>>, %arg14: memref<16x15xf32, #tpu.memory_space<vmem>>, %arg15: memref<896x128xf32, #tpu.memory_space<vmem>>, %arg16: memref<8x7xf32, #tpu.memory_space<vmem>>, %arg17: memref<8x7xf32, #tpu.memory_space<vmem>>, %arg18: memref<896x128xf32, #tpu.memory_space<vmem>>, %arg19: memref<8x4xf32, #tpu.memory_space<vmem>>, %arg20: memref<8x4xf32, #tpu.memory_space<vmem>>, %arg21: memref<896x256xf32, #tpu.memory_space<vmem>>, %arg22: memref<256x100xf32, #tpu.memory_space<vmem>>, %arg23: memref<1x100xf32, #tpu.memory_space<vmem>>, %arg24: memref<100x4xf32, #tpu.memory_space<vmem>>, %arg25: memref<1x4xf32, #tpu.memory_space<vmem>>, %arg26: memref<2x4xf32, #tpu.memory_space<vmem>>) attributes {dimension_semantics = [#tpu.dimension_semantics<arbitrary>], iteration_bounds = array<i64: 1>, scalar_prefetch = 0 : i64, scratch_operands = 0 : i64, tpu.core_type = #tpu.core_type<tc>, window_params = [{pipeline_mode = #tpu.pipeline_mode<synchronous>, transform_indices = @transform_0, window_bounds = array<i64: 256, 1>}, {pipeline_mode = #tpu.pipeline_mode<synchronous>, transform_indices = @transform_1, window_bounds = array<i64: 256, 1>}, {pipeline_mode = #tpu.pipeline_mode<synchronous>, transform_indices = @transform_2, window_bounds = array<i64: 7, 128>}, {pipeline_mode = #tpu.pipeline_mode<synchronous>, transform_indices = @transform_3, window_bounds = array<i64: 72, 128>}, {pipeline_mode = #tpu.pipeline_mode<synchronous>, transform_indices = @transform_4, window_bounds = array<i64: 72, 128>}, {pipeline_mode = #tpu.pipeline_mode<synchronous>, transform_indices = @transform_5, window_bounds = array<i64: 896, 128>}, {pipeline_mode = #tpu.pipeline_mode<synchronous>, transform_indices = @transform_6, window_bounds = array<i64: 40, 64>}, {pipeline_mode = #tpu.pipeline_mode<synchronous>, transform_indices = @transform_7, window_bounds = array<i64: 40, 64>}, {pipeline_mode = #tpu.pipeline_mode<synchronous>, transform_indices = @transform_8, window_bounds = array<i64: 896, 128>}, {pipeline_mode = #tpu.pipeline_mode<synchronous>, transform_indices = @transform_9, window_bounds = array<i64: 24, 32>}, {pipeline_mode = #tpu.pipeline_mode<synchronous>, transform_indices = @transform_10, window_bounds = array<i64: 24, 32>}, {pipeline_mode = #tpu.pipeline_mode<synchronous>, transform_indices = @transform_11, window_bounds = array<i64: 896, 128>}, {pipeline_mode = #tpu.pipeline_mode<synchronous>, transform_indices = @transform_12, window_bounds = array<i64: 16, 15>}, {pipeline_mode = #tpu.pipeline_mode<synchronous>, transform_indices = @transform_13, window_bounds = array<i64: 16, 15>}, {pipeline_mode = #tpu.pipeline_mode<synchronous>, transform_indices = @transform_14, window_bounds = array<i64: 896, 128>}, {pipeline_mode = #tpu.pipeline_mode<synchronous>, transform_indices = @transform_15, window_bounds = array<i64: 8, 7>}, {pipeline_mode = #tpu.pipeline_mode<synchronous>, transform_indices = @transform_16, window_bounds = array<i64: 8, 7>}, {pipeline_mode = #tpu.pipeline_mode<synchronous>, transform_indices = @transform_17, window_bounds = array<i64: 896, 128>}, {pipeline_mode = #tpu.pipeline_mode<synchronous>, transform_indices = @transform_18, window_bounds = array<i64: 8, 4>}, {pipeline_mode = #tpu.pipeline_mode<synchronous>, transform_indices = @transform_19, window_bounds = array<i64: 8, 4>}, {pipeline_mode = #tpu.pipeline_mode<synchronous>, transform_indices = @transform_20, window_bounds = array<i64: 896, 256>}, {pipeline_mode = #tpu.pipeline_mode<synchronous>, transform_indices = @transform_21, window_bounds = array<i64: 256, 100>}, {pipeline_mode = #tpu.pipeline_mode<synchronous>, transform_indices = @transform_22, window_bounds = array<i64: 1, 100>}, {pipeline_mode = #tpu.pipeline_mode<synchronous>, transform_indices = @transform_23, window_bounds = array<i64: 100, 4>}, {pipeline_mode = #tpu.pipeline_mode<synchronous>, transform_indices = @transform_24, window_bounds = array<i64: 1, 4>}, {pipeline_mode = #tpu.pipeline_mode<synchronous>, transform_indices = @transform_25, window_bounds = array<i64: 2, 4>}]} {
    %c0 = arith.constant 0 : index
    %c0_0 = arith.constant 0 : index
    %0 = vector.load %arg1[%c0, %c0_0] : memref<256x1xf32, #tpu.memory_space<vmem>>, vector<256x1xf32>
    %c0_1 = arith.constant 0 : index
    %c0_2 = arith.constant 0 : index
    %1 = vector.load %arg2[%c0_1, %c0_2] : memref<256x1xf32, #tpu.memory_space<vmem>>, vector<256x1xf32>
    %2 = vector.shape_cast %0 : vector<256x1xf32> to vector<1x256x1xf32>
    %cst = arith.constant dense<0.000000e+00> : vector<1xf32>
    %3 = vector.multi_reduction <add>, %2, %cst [1, 2] : vector<1x256x1xf32> to vector<1xf32>
    %4 = vector.shape_cast %3 : vector<1xf32> to vector<1x1x1xf32>
    %5 = vector.extract %4[0, 0, 0] : f32 from vector<1x1x1xf32>
    %6 = vector.broadcast %5 : f32 to vector<1x1xf32>
    %7 = vector.shape_cast %1 : vector<256x1xf32> to vector<1x256x1xf32>
    %cst_3 = arith.constant dense<0.000000e+00> : vector<1xf32>
    %8 = vector.multi_reduction <add>, %7, %cst_3 [1, 2] : vector<1x256x1xf32> to vector<1xf32>
    %9 = vector.shape_cast %8 : vector<1xf32> to vector<1x1x1xf32>
    %10 = vector.extract %9[0, 0, 0] : f32 from vector<1x1x1xf32>
    %11 = vector.broadcast %10 : f32 to vector<1x1xf32>
    %12 = arith.addf %6, %11 : vector<1x1xf32>
    %cst_4 = arith.constant 0.001953125 : f32
    %13 = vector.broadcast %cst_4 : f32 to vector<1x1xf32>
    %14 = arith.mulf %12, %13 : vector<1x1xf32>
    %15 = vector.broadcast %14 : vector<1x1xf32> to vector<256x1xf32>
    %16 = arith.subf %0, %15 : vector<256x1xf32>
    %17 = vector.broadcast %14 : vector<1x1xf32> to vector<256x1xf32>
    %18 = arith.subf %1, %17 : vector<256x1xf32>
    %19 = arith.mulf %16, %16 : vector<256x1xf32>
    %20 = vector.shape_cast %19 : vector<256x1xf32> to vector<1x256x1xf32>
    %cst_5 = arith.constant dense<0.000000e+00> : vector<1xf32>
    %21 = vector.multi_reduction <add>, %20, %cst_5 [1, 2] : vector<1x256x1xf32> to vector<1xf32>
    %22 = vector.shape_cast %21 : vector<1xf32> to vector<1x1x1xf32>
    %23 = vector.extract %22[0, 0, 0] : f32 from vector<1x1x1xf32>
    %24 = vector.broadcast %23 : f32 to vector<1x1xf32>
    %25 = arith.mulf %18, %18 : vector<256x1xf32>
    %26 = vector.shape_cast %25 : vector<256x1xf32> to vector<1x256x1xf32>
    %cst_6 = arith.constant dense<0.000000e+00> : vector<1xf32>
    %27 = vector.multi_reduction <add>, %26, %cst_6 [1, 2] : vector<1x256x1xf32> to vector<1xf32>
    %28 = vector.shape_cast %27 : vector<1xf32> to vector<1x1x1xf32>
    %29 = vector.extract %28[0, 0, 0] : f32 from vector<1x1x1xf32>
    %30 = vector.broadcast %29 : f32 to vector<1x1xf32>
    %31 = arith.addf %24, %30 : vector<1x1xf32>
    %cst_7 = arith.constant 0.001953125 : f32
    %32 = vector.broadcast %cst_7 : f32 to vector<1x1xf32>
    %33 = arith.mulf %31, %32 : vector<1x1xf32>
    %cst_8 = arith.constant 9.99999974E-6 : f32
    %34 = vector.broadcast %cst_8 : f32 to vector<1x1xf32>
    %35 = arith.addf %33, %34 : vector<1x1xf32>
    %36 = math.rsqrt %35 : vector<1x1xf32>
    %37 = vector.broadcast %36 : vector<1x1xf32> to vector<256x1xf32>
    %38 = arith.mulf %16, %37 : vector<256x1xf32>
    %39 = vector.broadcast %36 : vector<1x1xf32> to vector<256x1xf32>
    %40 = arith.mulf %18, %39 : vector<256x1xf32>
    %c0_9 = arith.constant 0 : index
    %c0_10 = arith.constant 0 : index
    %41 = vector.load %arg3[%c0_9, %c0_10] : memref<7x128xf32, #tpu.memory_space<vmem>>, vector<7x128xf32>
    %42 = vector.extract_strided_slice %40 {offsets = [0, 0], sizes = [128, 1], strides = [1, 1]} : vector<256x1xf32> to vector<128x1xf32>
    %cst_11 = arith.constant 0.000000e+00 : f32
    %43 = vector.broadcast %cst_11 : f32 to vector<2x1xf32>
    %cst_12 = arith.constant 0.000000e+00 : f32
    %44 = vector.broadcast %cst_12 : f32 to vector<6x1xf32>
    %45 = tpu.concatenate %43, %42, %44 in 0 : vector<2x1xf32>, vector<128x1xf32>, vector<6x1xf32> -> vector<136x1xf32>
    %46 = vector.extract_strided_slice %38 {offsets = [0, 0], sizes = [128, 1], strides = [1, 1]} : vector<256x1xf32> to vector<128x1xf32>
    %cst_13 = arith.constant 0.000000e+00 : f32
    %47 = vector.broadcast %cst_13 : f32 to vector<1x1xf32>
    %cst_14 = arith.constant 0.000000e+00 : f32
    %48 = vector.broadcast %cst_14 : f32 to vector<7x1xf32>
    %49 = tpu.concatenate %47, %46, %48 in 0 : vector<1x1xf32>, vector<128x1xf32>, vector<7x1xf32> -> vector<136x1xf32>
    %cst_15 = arith.constant 0.000000e+00 : f32
    %50 = vector.broadcast %cst_15 : f32 to vector<128x128xf32>
    %51 = vector.extract_strided_slice %45 {offsets = [0, 0], sizes = [128, 1], strides = [1, 1]} : vector<136x1xf32> to vector<128x1xf32>
    %52 = vector.extract_strided_slice %41 {offsets = [0, 0], sizes = [1, 128], strides = [1, 1]} : vector<7x128xf32> to vector<1x128xf32>
    %53 = vector.broadcast %51 : vector<128x1xf32> to vector<128x128xf32>
    %54 = vector.broadcast %52 : vector<1x128xf32> to vector<128x128xf32>
    %55 = arith.mulf %53, %54 : vector<128x128xf32>
    %56 = arith.addf %50, %55 : vector<128x128xf32>
    %57 = vector.extract_strided_slice %49 {offsets = [0, 0], sizes = [128, 1], strides = [1, 1]} : vector<136x1xf32> to vector<128x1xf32>
    %58 = vector.extract_strided_slice %41 {offsets = [1, 0], sizes = [1, 128], strides = [1, 1]} : vector<7x128xf32> to vector<1x128xf32>
    %59 = vector.broadcast %57 : vector<128x1xf32> to vector<128x128xf32>
    %60 = vector.broadcast %58 : vector<1x128xf32> to vector<128x128xf32>
    %61 = arith.mulf %59, %60 : vector<128x128xf32>
    %62 = arith.addf %56, %61 : vector<128x128xf32>
    %63 = vector.extract_strided_slice %45 {offsets = [1, 0], sizes = [128, 1], strides = [1, 1]} : vector<136x1xf32> to vector<128x1xf32>
    %64 = vector.extract_strided_slice %41 {offsets = [2, 0], sizes = [1, 128], strides = [1, 1]} : vector<7x128xf32> to vector<1x128xf32>
    %65 = vector.broadcast %63 : vector<128x1xf32> to vector<128x128xf32>
    %66 = vector.broadcast %64 : vector<1x128xf32> to vector<128x128xf32>
    %67 = arith.mulf %65, %66 : vector<128x128xf32>
    %68 = arith.addf %62, %67 : vector<128x128xf32>
    %69 = vector.extract_strided_slice %49 {offsets = [1, 0], sizes = [128, 1], strides = [1, 1]} : vector<136x1xf32> to vector<128x1xf32>
    %70 = vector.extract_strided_slice %41 {offsets = [3, 0], sizes = [1, 128], strides = [1, 1]} : vector<7x128xf32> to vector<1x128xf32>
    %71 = vector.broadcast %69 : vector<128x1xf32> to vector<128x128xf32>
    %72 = vector.broadcast %70 : vector<1x128xf32> to vector<128x128xf32>
    %73 = arith.mulf %71, %72 : vector<128x128xf32>
    %74 = arith.addf %68, %73 : vector<128x128xf32>
    %75 = vector.extract_strided_slice %45 {offsets = [2, 0], sizes = [128, 1], strides = [1, 1]} : vector<136x1xf32> to vector<128x1xf32>
    %76 = vector.extract_strided_slice %41 {offsets = [4, 0], sizes = [1, 128], strides = [1, 1]} : vector<7x128xf32> to vector<1x128xf32>
    %77 = vector.broadcast %75 : vector<128x1xf32> to vector<128x128xf32>
    %78 = vector.broadcast %76 : vector<1x128xf32> to vector<128x128xf32>
    %79 = arith.mulf %77, %78 : vector<128x128xf32>
    %80 = arith.addf %74, %79 : vector<128x128xf32>
    %81 = vector.extract_strided_slice %49 {offsets = [2, 0], sizes = [128, 1], strides = [1, 1]} : vector<136x1xf32> to vector<128x1xf32>
    %82 = vector.extract_strided_slice %41 {offsets = [5, 0], sizes = [1, 128], strides = [1, 1]} : vector<7x128xf32> to vector<1x128xf32>
    %83 = vector.broadcast %81 : vector<128x1xf32> to vector<128x128xf32>
    %84 = vector.broadcast %82 : vector<1x128xf32> to vector<128x128xf32>
    %85 = arith.mulf %83, %84 : vector<128x128xf32>
    %86 = arith.addf %80, %85 : vector<128x128xf32>
    %87 = vector.extract_strided_slice %45 {offsets = [3, 0], sizes = [128, 1], strides = [1, 1]} : vector<136x1xf32> to vector<128x1xf32>
    %88 = vector.extract_strided_slice %41 {offsets = [6, 0], sizes = [1, 128], strides = [1, 1]} : vector<7x128xf32> to vector<1x128xf32>
    %89 = vector.broadcast %87 : vector<128x1xf32> to vector<128x128xf32>
    %90 = vector.broadcast %88 : vector<1x128xf32> to vector<128x128xf32>
    %91 = arith.mulf %89, %90 : vector<128x128xf32>
    %92 = arith.addf %86, %91 : vector<128x128xf32>
    %93 = vector.extract_strided_slice %40 {offsets = [128, 0], sizes = [128, 1], strides = [1, 1]} : vector<256x1xf32> to vector<128x1xf32>
    %cst_16 = arith.constant 0.000000e+00 : f32
    %94 = vector.broadcast %cst_16 : f32 to vector<2x1xf32>
    %cst_17 = arith.constant 0.000000e+00 : f32
    %95 = vector.broadcast %cst_17 : f32 to vector<6x1xf32>
    %96 = tpu.concatenate %94, %93, %95 in 0 : vector<2x1xf32>, vector<128x1xf32>, vector<6x1xf32> -> vector<136x1xf32>
    %97 = vector.extract_strided_slice %38 {offsets = [128, 0], sizes = [128, 1], strides = [1, 1]} : vector<256x1xf32> to vector<128x1xf32>
    %cst_18 = arith.constant 0.000000e+00 : f32
    %98 = vector.broadcast %cst_18 : f32 to vector<1x1xf32>
    %cst_19 = arith.constant 0.000000e+00 : f32
    %99 = vector.broadcast %cst_19 : f32 to vector<7x1xf32>
    %100 = tpu.concatenate %98, %97, %99 in 0 : vector<1x1xf32>, vector<128x1xf32>, vector<7x1xf32> -> vector<136x1xf32>
    %cst_20 = arith.constant 0.000000e+00 : f32
    %101 = vector.broadcast %cst_20 : f32 to vector<128x128xf32>
    %102 = vector.extract_strided_slice %96 {offsets = [0, 0], sizes = [128, 1], strides = [1, 1]} : vector<136x1xf32> to vector<128x1xf32>
    %103 = vector.extract_strided_slice %41 {offsets = [0, 0], sizes = [1, 128], strides = [1, 1]} : vector<7x128xf32> to vector<1x128xf32>
    %104 = vector.broadcast %102 : vector<128x1xf32> to vector<128x128xf32>
    %105 = vector.broadcast %103 : vector<1x128xf32> to vector<128x128xf32>
    %106 = arith.mulf %104, %105 : vector<128x128xf32>
    %107 = arith.addf %101, %106 : vector<128x128xf32>
    %108 = vector.extract_strided_slice %100 {offsets = [0, 0], sizes = [128, 1], strides = [1, 1]} : vector<136x1xf32> to vector<128x1xf32>
    %109 = vector.extract_strided_slice %41 {offsets = [1, 0], sizes = [1, 128], strides = [1, 1]} : vector<7x128xf32> to vector<1x128xf32>
    %110 = vector.broadcast %108 : vector<128x1xf32> to vector<128x128xf32>
    %111 = vector.broadcast %109 : vector<1x128xf32> to vector<128x128xf32>
    %112 = arith.mulf %110, %111 : vector<128x128xf32>
    %113 = arith.addf %107, %112 : vector<128x128xf32>
    %114 = vector.extract_strided_slice %96 {offsets = [1, 0], sizes = [128, 1], strides = [1, 1]} : vector<136x1xf32> to vector<128x1xf32>
    %115 = vector.extract_strided_slice %41 {offsets = [2, 0], sizes = [1, 128], strides = [1, 1]} : vector<7x128xf32> to vector<1x128xf32>
    %116 = vector.broadcast %114 : vector<128x1xf32> to vector<128x128xf32>
    %117 = vector.broadcast %115 : vector<1x128xf32> to vector<128x128xf32>
    %118 = arith.mulf %116, %117 : vector<128x128xf32>
    %119 = arith.addf %113, %118 : vector<128x128xf32>
    %120 = vector.extract_strided_slice %100 {offsets = [1, 0], sizes = [128, 1], strides = [1, 1]} : vector<136x1xf32> to vector<128x1xf32>
    %121 = vector.extract_strided_slice %41 {offsets = [3, 0], sizes = [1, 128], strides = [1, 1]} : vector<7x128xf32> to vector<1x128xf32>
    %122 = vector.broadcast %120 : vector<128x1xf32> to vector<128x128xf32>
    %123 = vector.broadcast %121 : vector<1x128xf32> to vector<128x128xf32>
    %124 = arith.mulf %122, %123 : vector<128x128xf32>
    %125 = arith.addf %119, %124 : vector<128x128xf32>
    %126 = vector.extract_strided_slice %96 {offsets = [2, 0], sizes = [128, 1], strides = [1, 1]} : vector<136x1xf32> to vector<128x1xf32>
    %127 = vector.extract_strided_slice %41 {offsets = [4, 0], sizes = [1, 128], strides = [1, 1]} : vector<7x128xf32> to vector<1x128xf32>
    %128 = vector.broadcast %126 : vector<128x1xf32> to vector<128x128xf32>
    %129 = vector.broadcast %127 : vector<1x128xf32> to vector<128x128xf32>
    %130 = arith.mulf %128, %129 : vector<128x128xf32>
    %131 = arith.addf %125, %130 : vector<128x128xf32>
    %132 = vector.extract_strided_slice %100 {offsets = [2, 0], sizes = [128, 1], strides = [1, 1]} : vector<136x1xf32> to vector<128x1xf32>
    %133 = vector.extract_strided_slice %41 {offsets = [5, 0], sizes = [1, 128], strides = [1, 1]} : vector<7x128xf32> to vector<1x128xf32>
    %134 = vector.broadcast %132 : vector<128x1xf32> to vector<128x128xf32>
    %135 = vector.broadcast %133 : vector<1x128xf32> to vector<128x128xf32>
    %136 = arith.mulf %134, %135 : vector<128x128xf32>
    %137 = arith.addf %131, %136 : vector<128x128xf32>
    %138 = vector.extract_strided_slice %96 {offsets = [3, 0], sizes = [128, 1], strides = [1, 1]} : vector<136x1xf32> to vector<128x1xf32>
    %139 = vector.extract_strided_slice %41 {offsets = [6, 0], sizes = [1, 128], strides = [1, 1]} : vector<7x128xf32> to vector<1x128xf32>
    %140 = vector.broadcast %138 : vector<128x1xf32> to vector<128x128xf32>
    %141 = vector.broadcast %139 : vector<1x128xf32> to vector<128x128xf32>
    %142 = arith.mulf %140, %141 : vector<128x128xf32>
    %143 = arith.addf %137, %142 : vector<128x128xf32>
    %144 = tpu.concatenate %92, %143 in 0 : vector<128x128xf32>, vector<128x128xf32> -> vector<256x128xf32>
    %cst_21 = arith.constant dense<0.000000e+00> : vector<128xf32>
    %145 = vector.multi_reduction <add>, %144, %cst_21 [0] : vector<256x128xf32> to vector<128xf32>
    %146 = vector.shape_cast %145 : vector<128xf32> to vector<1x128xf32>
    %cst_22 = arith.constant 3.906250e-03 : f32
    %147 = vector.broadcast %cst_22 : f32 to vector<1x128xf32>
    %148 = arith.mulf %146, %147 : vector<1x128xf32>
    %149 = vector.broadcast %148 : vector<1x128xf32> to vector<256x128xf32>
    %150 = arith.subf %144, %149 : vector<256x128xf32>
    %151 = arith.mulf %150, %150 : vector<256x128xf32>
    %cst_23 = arith.constant dense<0.000000e+00> : vector<128xf32>
    %152 = vector.multi_reduction <add>, %151, %cst_23 [0] : vector<256x128xf32> to vector<128xf32>
    %153 = vector.shape_cast %152 : vector<128xf32> to vector<1x128xf32>
    %cst_24 = arith.constant 3.906250e-03 : f32
    %154 = vector.broadcast %cst_24 : f32 to vector<1x128xf32>
    %155 = arith.mulf %153, %154 : vector<1x128xf32>
    %cst_25 = arith.constant 9.99999974E-6 : f32
    %156 = vector.broadcast %cst_25 : f32 to vector<1x128xf32>
    %157 = arith.addf %155, %156 : vector<1x128xf32>
    %158 = math.rsqrt %157 : vector<1x128xf32>
    %159 = vector.broadcast %158 : vector<1x128xf32> to vector<256x128xf32>
    %160 = arith.mulf %150, %159 : vector<256x128xf32>
    %cst_26 = arith.constant 0.000000e+00 : f32
    %161 = vector.broadcast %cst_26 : f32 to vector<256x128xf32>
    %162 = arith.cmpf ogt, %160, %161 : vector<256x128xf32>
    %cst_27 = arith.constant 1.000000e-01 : f32
    %163 = vector.broadcast %cst_27 : f32 to vector<256x128xf32>
    %164 = arith.mulf %163, %160 : vector<256x128xf32>
    %165 = arith.select %162, %160, %164 : vector<256x128xi1>, vector<256x128xf32>
    %c0_28 = arith.constant 0 : index
    %c0_29 = arith.constant 0 : index
    %166 = vector.load %arg4[%c0_28, %c0_29] : memref<72x128xf32, #tpu.memory_space<vmem>>, vector<72x128xf32>
    %c0_30 = arith.constant 0 : index
    %c0_31 = arith.constant 0 : index
    %167 = vector.load %arg5[%c0_30, %c0_31] : memref<72x128xf32, #tpu.memory_space<vmem>>, vector<72x128xf32>
    %c0_32 = arith.constant 0 : index
    %c0_33 = arith.constant 0 : index
    %168 = vector.load %arg6[%c0_32, %c0_33] : memref<896x128xf32, #tpu.memory_space<vmem>>, vector<896x128xf32>
    %169 = vector.extract_strided_slice %165 {offsets = [0, 0], sizes = [128, 128], strides = [1, 1]} : vector<256x128xf32> to vector<128x128xf32>
    %cst_34 = arith.constant dense<0.000000e+00> : vector<72x128xf32>
    %170 = tpu.matmul %166, %169, %cst_34 {dimension_numbers = #tpu.dot_dimension_numbers<[1], [0], [0], [1], [0, 0, 1, 1], [], []>} : vector<72x128xf32>, vector<128x128xf32>, vector<72x128xf32> -> vector<72x128xf32>
    %cst_35 = arith.constant dense<0.000000e+00> : vector<72x128xf32>
    %171 = tpu.matmul %167, %169, %cst_35 {dimension_numbers = #tpu.dot_dimension_numbers<[1], [0], [0], [1], [0, 0, 1, 1], [], []>} : vector<72x128xf32>, vector<128x128xf32>, vector<72x128xf32> -> vector<72x128xf32>
    %172 = vector.extract_strided_slice %170 {offsets = [0, 0], sizes = [64, 128], strides = [1, 1]} : vector<72x128xf32> to vector<64x128xf32>
    %173 = vector.extract_strided_slice %171 {offsets = [0, 0], sizes = [64, 128], strides = [1, 1]} : vector<72x128xf32> to vector<64x128xf32>
    %174 = vector.extract_strided_slice %170 {offsets = [1, 0], sizes = [64, 128], strides = [1, 1]} : vector<72x128xf32> to vector<64x128xf32>
    %175 = vector.extract_strided_slice %171 {offsets = [1, 0], sizes = [64, 128], strides = [1, 1]} : vector<72x128xf32> to vector<64x128xf32>
    %176 = vector.extract_strided_slice %170 {offsets = [2, 0], sizes = [64, 128], strides = [1, 1]} : vector<72x128xf32> to vector<64x128xf32>
    %177 = vector.extract_strided_slice %171 {offsets = [2, 0], sizes = [64, 128], strides = [1, 1]} : vector<72x128xf32> to vector<64x128xf32>
    %178 = vector.extract_strided_slice %170 {offsets = [3, 0], sizes = [64, 128], strides = [1, 1]} : vector<72x128xf32> to vector<64x128xf32>
    %179 = tpu.concatenate %172, %173, %174, %175, %176, %177, %178 in 1 : vector<64x128xf32>, vector<64x128xf32>, vector<64x128xf32>, vector<64x128xf32>, vector<64x128xf32>, vector<64x128xf32>, vector<64x128xf32> -> vector<64x896xf32>
    %180 = vector.extract_strided_slice %165 {offsets = [128, 0], sizes = [128, 128], strides = [1, 1]} : vector<256x128xf32> to vector<128x128xf32>
    %cst_36 = arith.constant dense<0.000000e+00> : vector<72x128xf32>
    %181 = tpu.matmul %166, %180, %cst_36 {dimension_numbers = #tpu.dot_dimension_numbers<[1], [0], [0], [1], [0, 0, 1, 1], [], []>} : vector<72x128xf32>, vector<128x128xf32>, vector<72x128xf32> -> vector<72x128xf32>
    %cst_37 = arith.constant dense<0.000000e+00> : vector<72x128xf32>
    %182 = tpu.matmul %167, %180, %cst_37 {dimension_numbers = #tpu.dot_dimension_numbers<[1], [0], [0], [1], [0, 0, 1, 1], [], []>} : vector<72x128xf32>, vector<128x128xf32>, vector<72x128xf32> -> vector<72x128xf32>
    %183 = vector.extract_strided_slice %181 {offsets = [0, 0], sizes = [64, 128], strides = [1, 1]} : vector<72x128xf32> to vector<64x128xf32>
    %184 = vector.extract_strided_slice %182 {offsets = [0, 0], sizes = [64, 128], strides = [1, 1]} : vector<72x128xf32> to vector<64x128xf32>
    %185 = vector.extract_strided_slice %181 {offsets = [1, 0], sizes = [64, 128], strides = [1, 1]} : vector<72x128xf32> to vector<64x128xf32>
    %186 = vector.extract_strided_slice %182 {offsets = [1, 0], sizes = [64, 128], strides = [1, 1]} : vector<72x128xf32> to vector<64x128xf32>
    %187 = vector.extract_strided_slice %181 {offsets = [2, 0], sizes = [64, 128], strides = [1, 1]} : vector<72x128xf32> to vector<64x128xf32>
    %188 = vector.extract_strided_slice %182 {offsets = [2, 0], sizes = [64, 128], strides = [1, 1]} : vector<72x128xf32> to vector<64x128xf32>
    %189 = vector.extract_strided_slice %181 {offsets = [3, 0], sizes = [64, 128], strides = [1, 1]} : vector<72x128xf32> to vector<64x128xf32>
    %190 = tpu.concatenate %183, %184, %185, %186, %187, %188, %189 in 1 : vector<64x128xf32>, vector<64x128xf32>, vector<64x128xf32>, vector<64x128xf32>, vector<64x128xf32>, vector<64x128xf32>, vector<64x128xf32> -> vector<64x896xf32>
    %191 = tpu.concatenate %179, %190 in 0 : vector<64x896xf32>, vector<64x896xf32> -> vector<128x896xf32>
    %cst_38 = arith.constant dense<0.000000e+00> : vector<128x128xf32>
    %192 = tpu.matmul %191, %168, %cst_38 {dimension_numbers = #tpu.dot_dimension_numbers<[1], [0], [0], [1], [0, 0, 1, 1], [], []>} : vector<128x896xf32>, vector<896x128xf32>, vector<128x128xf32> -> vector<128x128xf32>
    %cst_39 = arith.constant dense<0.000000e+00> : vector<128xf32>
    %193 = vector.multi_reduction <add>, %192, %cst_39 [0] : vector<128x128xf32> to vector<128xf32>
    %194 = vector.shape_cast %193 : vector<128xf32> to vector<1x128xf32>
    %cst_40 = arith.constant 7.812500e-03 : f32
    %195 = vector.broadcast %cst_40 : f32 to vector<1x128xf32>
    %196 = arith.mulf %194, %195 : vector<1x128xf32>
    %197 = vector.broadcast %196 : vector<1x128xf32> to vector<128x128xf32>
    %198 = arith.subf %192, %197 : vector<128x128xf32>
    %199 = arith.mulf %198, %198 : vector<128x128xf32>
    %cst_41 = arith.constant dense<0.000000e+00> : vector<128xf32>
    %200 = vector.multi_reduction <add>, %199, %cst_41 [0] : vector<128x128xf32> to vector<128xf32>
    %201 = vector.shape_cast %200 : vector<128xf32> to vector<1x128xf32>
    %cst_42 = arith.constant 7.812500e-03 : f32
    %202 = vector.broadcast %cst_42 : f32 to vector<1x128xf32>
    %203 = arith.mulf %201, %202 : vector<1x128xf32>
    %cst_43 = arith.constant 9.99999974E-6 : f32
    %204 = vector.broadcast %cst_43 : f32 to vector<1x128xf32>
    %205 = arith.addf %203, %204 : vector<1x128xf32>
    %206 = math.rsqrt %205 : vector<1x128xf32>
    %207 = vector.broadcast %206 : vector<1x128xf32> to vector<128x128xf32>
    %208 = arith.mulf %198, %207 : vector<128x128xf32>
    %cst_44 = arith.constant 0.000000e+00 : f32
    %209 = vector.broadcast %cst_44 : f32 to vector<128x128xf32>
    %210 = arith.cmpf ogt, %208, %209 : vector<128x128xf32>
    %cst_45 = arith.constant 1.000000e-01 : f32
    %211 = vector.broadcast %cst_45 : f32 to vector<128x128xf32>
    %212 = arith.mulf %211, %208 : vector<128x128xf32>
    %213 = arith.select %210, %208, %212 : vector<128x128xi1>, vector<128x128xf32>
    %c0_46 = arith.constant 0 : index
    %c0_47 = arith.constant 0 : index
    %214 = vector.load %arg7[%c0_46, %c0_47] : memref<40x64xf32, #tpu.memory_space<vmem>>, vector<40x64xf32>
    %c0_48 = arith.constant 0 : index
    %c0_49 = arith.constant 0 : index
    %215 = vector.load %arg8[%c0_48, %c0_49] : memref<40x64xf32, #tpu.memory_space<vmem>>, vector<40x64xf32>
    %c0_50 = arith.constant 0 : index
    %c0_51 = arith.constant 0 : index
    %216 = vector.load %arg9[%c0_50, %c0_51] : memref<896x128xf32, #tpu.memory_space<vmem>>, vector<896x128xf32>
    %217 = vector.extract_strided_slice %213 {offsets = [0, 0], sizes = [64, 128], strides = [1, 1]} : vector<128x128xf32> to vector<64x128xf32>
    %cst_52 = arith.constant dense<0.000000e+00> : vector<40x128xf32>
    %218 = tpu.matmul %214, %217, %cst_52 {dimension_numbers = #tpu.dot_dimension_numbers<[1], [0], [0], [1], [0, 0, 1, 1], [], []>} : vector<40x64xf32>, vector<64x128xf32>, vector<40x128xf32> -> vector<40x128xf32>
    %cst_53 = arith.constant dense<0.000000e+00> : vector<40x128xf32>
    %219 = tpu.matmul %215, %217, %cst_53 {dimension_numbers = #tpu.dot_dimension_numbers<[1], [0], [0], [1], [0, 0, 1, 1], [], []>} : vector<40x64xf32>, vector<64x128xf32>, vector<40x128xf32> -> vector<40x128xf32>
    %220 = vector.extract_strided_slice %218 {offsets = [0, 0], sizes = [32, 128], strides = [1, 1]} : vector<40x128xf32> to vector<32x128xf32>
    %221 = vector.extract_strided_slice %219 {offsets = [0, 0], sizes = [32, 128], strides = [1, 1]} : vector<40x128xf32> to vector<32x128xf32>
    %222 = vector.extract_strided_slice %218 {offsets = [1, 0], sizes = [32, 128], strides = [1, 1]} : vector<40x128xf32> to vector<32x128xf32>
    %223 = vector.extract_strided_slice %219 {offsets = [1, 0], sizes = [32, 128], strides = [1, 1]} : vector<40x128xf32> to vector<32x128xf32>
    %224 = vector.extract_strided_slice %218 {offsets = [2, 0], sizes = [32, 128], strides = [1, 1]} : vector<40x128xf32> to vector<32x128xf32>
    %225 = vector.extract_strided_slice %219 {offsets = [2, 0], sizes = [32, 128], strides = [1, 1]} : vector<40x128xf32> to vector<32x128xf32>
    %226 = vector.extract_strided_slice %218 {offsets = [3, 0], sizes = [32, 128], strides = [1, 1]} : vector<40x128xf32> to vector<32x128xf32>
    %227 = tpu.concatenate %220, %221, %222, %223, %224, %225, %226 in 1 : vector<32x128xf32>, vector<32x128xf32>, vector<32x128xf32>, vector<32x128xf32>, vector<32x128xf32>, vector<32x128xf32>, vector<32x128xf32> -> vector<32x896xf32>
    %228 = vector.extract_strided_slice %213 {offsets = [64, 0], sizes = [64, 128], strides = [1, 1]} : vector<128x128xf32> to vector<64x128xf32>
    %cst_54 = arith.constant dense<0.000000e+00> : vector<40x128xf32>
    %229 = tpu.matmul %214, %228, %cst_54 {dimension_numbers = #tpu.dot_dimension_numbers<[1], [0], [0], [1], [0, 0, 1, 1], [], []>} : vector<40x64xf32>, vector<64x128xf32>, vector<40x128xf32> -> vector<40x128xf32>
    %cst_55 = arith.constant dense<0.000000e+00> : vector<40x128xf32>
    %230 = tpu.matmul %215, %228, %cst_55 {dimension_numbers = #tpu.dot_dimension_numbers<[1], [0], [0], [1], [0, 0, 1, 1], [], []>} : vector<40x64xf32>, vector<64x128xf32>, vector<40x128xf32> -> vector<40x128xf32>
    %231 = vector.extract_strided_slice %229 {offsets = [0, 0], sizes = [32, 128], strides = [1, 1]} : vector<40x128xf32> to vector<32x128xf32>
    %232 = vector.extract_strided_slice %230 {offsets = [0, 0], sizes = [32, 128], strides = [1, 1]} : vector<40x128xf32> to vector<32x128xf32>
    %233 = vector.extract_strided_slice %229 {offsets = [1, 0], sizes = [32, 128], strides = [1, 1]} : vector<40x128xf32> to vector<32x128xf32>
    %234 = vector.extract_strided_slice %230 {offsets = [1, 0], sizes = [32, 128], strides = [1, 1]} : vector<40x128xf32> to vector<32x128xf32>
    %235 = vector.extract_strided_slice %229 {offsets = [2, 0], sizes = [32, 128], strides = [1, 1]} : vector<40x128xf32> to vector<32x128xf32>
    %236 = vector.extract_strided_slice %230 {offsets = [2, 0], sizes = [32, 128], strides = [1, 1]} : vector<40x128xf32> to vector<32x128xf32>
    %237 = vector.extract_strided_slice %229 {offsets = [3, 0], sizes = [32, 128], strides = [1, 1]} : vector<40x128xf32> to vector<32x128xf32>
    %238 = tpu.concatenate %231, %232, %233, %234, %235, %236, %237 in 1 : vector<32x128xf32>, vector<32x128xf32>, vector<32x128xf32>, vector<32x128xf32>, vector<32x128xf32>, vector<32x128xf32>, vector<32x128xf32> -> vector<32x896xf32>
    %239 = tpu.concatenate %227, %238 in 0 : vector<32x896xf32>, vector<32x896xf32> -> vector<64x896xf32>
    %cst_56 = arith.constant dense<0.000000e+00> : vector<64x128xf32>
    %240 = tpu.matmul %239, %216, %cst_56 {dimension_numbers = #tpu.dot_dimension_numbers<[1], [0], [0], [1], [0, 0, 1, 1], [], []>} : vector<64x896xf32>, vector<896x128xf32>, vector<64x128xf32> -> vector<64x128xf32>
    %cst_57 = arith.constant dense<0.000000e+00> : vector<128xf32>
    %241 = vector.multi_reduction <add>, %240, %cst_57 [0] : vector<64x128xf32> to vector<128xf32>
    %242 = vector.shape_cast %241 : vector<128xf32> to vector<1x128xf32>
    %cst_58 = arith.constant 1.562500e-02 : f32
    %243 = vector.broadcast %cst_58 : f32 to vector<1x128xf32>
    %244 = arith.mulf %242, %243 : vector<1x128xf32>
    %245 = vector.broadcast %244 : vector<1x128xf32> to vector<64x128xf32>
    %246 = arith.subf %240, %245 : vector<64x128xf32>
    %247 = arith.mulf %246, %246 : vector<64x128xf32>
    %cst_59 = arith.constant dense<0.000000e+00> : vector<128xf32>
    %248 = vector.multi_reduction <add>, %247, %cst_59 [0] : vector<64x128xf32> to vector<128xf32>
    %249 = vector.shape_cast %248 : vector<128xf32> to vector<1x128xf32>
    %cst_60 = arith.constant 1.562500e-02 : f32
    %250 = vector.broadcast %cst_60 : f32 to vector<1x128xf32>
    %251 = arith.mulf %249, %250 : vector<1x128xf32>
    %cst_61 = arith.constant 9.99999974E-6 : f32
    %252 = vector.broadcast %cst_61 : f32 to vector<1x128xf32>
    %253 = arith.addf %251, %252 : vector<1x128xf32>
    %254 = math.rsqrt %253 : vector<1x128xf32>
    %255 = vector.broadcast %254 : vector<1x128xf32> to vector<64x128xf32>
    %256 = arith.mulf %246, %255 : vector<64x128xf32>
    %cst_62 = arith.constant 0.000000e+00 : f32
    %257 = vector.broadcast %cst_62 : f32 to vector<64x128xf32>
    %258 = arith.cmpf ogt, %256, %257 : vector<64x128xf32>
    %cst_63 = arith.constant 1.000000e-01 : f32
    %259 = vector.broadcast %cst_63 : f32 to vector<64x128xf32>
    %260 = arith.mulf %259, %256 : vector<64x128xf32>
    %261 = arith.select %258, %256, %260 : vector<64x128xi1>, vector<64x128xf32>
    %c0_64 = arith.constant 0 : index
    %c0_65 = arith.constant 0 : index
    %262 = vector.load %arg10[%c0_64, %c0_65] : memref<24x32xf32, #tpu.memory_space<vmem>>, vector<24x32xf32>
    %c0_66 = arith.constant 0 : index
    %c0_67 = arith.constant 0 : index
    %263 = vector.load %arg11[%c0_66, %c0_67] : memref<24x32xf32, #tpu.memory_space<vmem>>, vector<24x32xf32>
    %c0_68 = arith.constant 0 : index
    %c0_69 = arith.constant 0 : index
    %264 = vector.load %arg12[%c0_68, %c0_69] : memref<896x128xf32, #tpu.memory_space<vmem>>, vector<896x128xf32>
    %265 = vector.extract_strided_slice %261 {offsets = [0, 0], sizes = [32, 128], strides = [1, 1]} : vector<64x128xf32> to vector<32x128xf32>
    %cst_70 = arith.constant dense<0.000000e+00> : vector<24x128xf32>
    %266 = tpu.matmul %262, %265, %cst_70 {dimension_numbers = #tpu.dot_dimension_numbers<[1], [0], [0], [1], [0, 0, 1, 1], [], []>} : vector<24x32xf32>, vector<32x128xf32>, vector<24x128xf32> -> vector<24x128xf32>
    %cst_71 = arith.constant dense<0.000000e+00> : vector<24x128xf32>
    %267 = tpu.matmul %263, %265, %cst_71 {dimension_numbers = #tpu.dot_dimension_numbers<[1], [0], [0], [1], [0, 0, 1, 1], [], []>} : vector<24x32xf32>, vector<32x128xf32>, vector<24x128xf32> -> vector<24x128xf32>
    %268 = vector.extract_strided_slice %266 {offsets = [0, 0], sizes = [15, 128], strides = [1, 1]} : vector<24x128xf32> to vector<15x128xf32>
    %269 = vector.extract_strided_slice %267 {offsets = [0, 0], sizes = [15, 128], strides = [1, 1]} : vector<24x128xf32> to vector<15x128xf32>
    %270 = vector.extract_strided_slice %266 {offsets = [1, 0], sizes = [15, 128], strides = [1, 1]} : vector<24x128xf32> to vector<15x128xf32>
    %271 = vector.extract_strided_slice %267 {offsets = [1, 0], sizes = [15, 128], strides = [1, 1]} : vector<24x128xf32> to vector<15x128xf32>
    %272 = vector.extract_strided_slice %266 {offsets = [2, 0], sizes = [15, 128], strides = [1, 1]} : vector<24x128xf32> to vector<15x128xf32>
    %273 = vector.extract_strided_slice %267 {offsets = [2, 0], sizes = [15, 128], strides = [1, 1]} : vector<24x128xf32> to vector<15x128xf32>
    %274 = vector.extract_strided_slice %266 {offsets = [3, 0], sizes = [15, 128], strides = [1, 1]} : vector<24x128xf32> to vector<15x128xf32>
    %275 = tpu.concatenate %268, %269, %270, %271, %272, %273, %274 in 1 : vector<15x128xf32>, vector<15x128xf32>, vector<15x128xf32>, vector<15x128xf32>, vector<15x128xf32>, vector<15x128xf32>, vector<15x128xf32> -> vector<15x896xf32>
    %276 = vector.extract_strided_slice %261 {offsets = [32, 0], sizes = [32, 128], strides = [1, 1]} : vector<64x128xf32> to vector<32x128xf32>
    %cst_72 = arith.constant dense<0.000000e+00> : vector<24x128xf32>
    %277 = tpu.matmul %262, %276, %cst_72 {dimension_numbers = #tpu.dot_dimension_numbers<[1], [0], [0], [1], [0, 0, 1, 1], [], []>} : vector<24x32xf32>, vector<32x128xf32>, vector<24x128xf32> -> vector<24x128xf32>
    %cst_73 = arith.constant dense<0.000000e+00> : vector<24x128xf32>
    %278 = tpu.matmul %263, %276, %cst_73 {dimension_numbers = #tpu.dot_dimension_numbers<[1], [0], [0], [1], [0, 0, 1, 1], [], []>} : vector<24x32xf32>, vector<32x128xf32>, vector<24x128xf32> -> vector<24x128xf32>
    %279 = vector.extract_strided_slice %277 {offsets = [0, 0], sizes = [15, 128], strides = [1, 1]} : vector<24x128xf32> to vector<15x128xf32>
    %280 = vector.extract_strided_slice %278 {offsets = [0, 0], sizes = [15, 128], strides = [1, 1]} : vector<24x128xf32> to vector<15x128xf32>
    %281 = vector.extract_strided_slice %277 {offsets = [1, 0], sizes = [15, 128], strides = [1, 1]} : vector<24x128xf32> to vector<15x128xf32>
    %282 = vector.extract_strided_slice %278 {offsets = [1, 0], sizes = [15, 128], strides = [1, 1]} : vector<24x128xf32> to vector<15x128xf32>
    %283 = vector.extract_strided_slice %277 {offsets = [2, 0], sizes = [15, 128], strides = [1, 1]} : vector<24x128xf32> to vector<15x128xf32>
    %284 = vector.extract_strided_slice %278 {offsets = [2, 0], sizes = [15, 128], strides = [1, 1]} : vector<24x128xf32> to vector<15x128xf32>
    %285 = vector.extract_strided_slice %277 {offsets = [3, 0], sizes = [15, 128], strides = [1, 1]} : vector<24x128xf32> to vector<15x128xf32>
    %286 = tpu.concatenate %279, %280, %281, %282, %283, %284, %285 in 1 : vector<15x128xf32>, vector<15x128xf32>, vector<15x128xf32>, vector<15x128xf32>, vector<15x128xf32>, vector<15x128xf32>, vector<15x128xf32> -> vector<15x896xf32>
    %287 = tpu.concatenate %275, %286 in 0 : vector<15x896xf32>, vector<15x896xf32> -> vector<30x896xf32>
    %cst_74 = arith.constant dense<0.000000e+00> : vector<30x128xf32>
    %288 = tpu.matmul %287, %264, %cst_74 {dimension_numbers = #tpu.dot_dimension_numbers<[1], [0], [0], [1], [0, 0, 1, 1], [], []>} : vector<30x896xf32>, vector<896x128xf32>, vector<30x128xf32> -> vector<30x128xf32>
    %cst_75 = arith.constant dense<0.000000e+00> : vector<128xf32>
    %289 = vector.multi_reduction <add>, %288, %cst_75 [0] : vector<30x128xf32> to vector<128xf32>
    %290 = vector.shape_cast %289 : vector<128xf32> to vector<1x128xf32>
    %cst_76 = arith.constant 0.0333333351 : f32
    %291 = vector.broadcast %cst_76 : f32 to vector<1x128xf32>
    %292 = arith.mulf %290, %291 : vector<1x128xf32>
    %293 = vector.broadcast %292 : vector<1x128xf32> to vector<30x128xf32>
    %294 = arith.subf %288, %293 : vector<30x128xf32>
    %295 = arith.mulf %294, %294 : vector<30x128xf32>
    %cst_77 = arith.constant dense<0.000000e+00> : vector<128xf32>
    %296 = vector.multi_reduction <add>, %295, %cst_77 [0] : vector<30x128xf32> to vector<128xf32>
    %297 = vector.shape_cast %296 : vector<128xf32> to vector<1x128xf32>
    %cst_78 = arith.constant 0.0333333351 : f32
    %298 = vector.broadcast %cst_78 : f32 to vector<1x128xf32>
    %299 = arith.mulf %297, %298 : vector<1x128xf32>
    %cst_79 = arith.constant 9.99999974E-6 : f32
    %300 = vector.broadcast %cst_79 : f32 to vector<1x128xf32>
    %301 = arith.addf %299, %300 : vector<1x128xf32>
    %302 = math.rsqrt %301 : vector<1x128xf32>
    %303 = vector.broadcast %302 : vector<1x128xf32> to vector<30x128xf32>
    %304 = arith.mulf %294, %303 : vector<30x128xf32>
    %cst_80 = arith.constant 0.000000e+00 : f32
    %305 = vector.broadcast %cst_80 : f32 to vector<30x128xf32>
    %306 = arith.cmpf ogt, %304, %305 : vector<30x128xf32>
    %cst_81 = arith.constant 1.000000e-01 : f32
    %307 = vector.broadcast %cst_81 : f32 to vector<30x128xf32>
    %308 = arith.mulf %307, %304 : vector<30x128xf32>
    %309 = arith.select %306, %304, %308 : vector<30x128xi1>, vector<30x128xf32>
    %c0_82 = arith.constant 0 : index
    %c0_83 = arith.constant 0 : index
    %310 = vector.load %arg13[%c0_82, %c0_83] : memref<16x15xf32, #tpu.memory_space<vmem>>, vector<16x15xf32>
    %c0_84 = arith.constant 0 : index
    %c0_85 = arith.constant 0 : index
    %311 = vector.load %arg14[%c0_84, %c0_85] : memref<16x15xf32, #tpu.memory_space<vmem>>, vector<16x15xf32>
    %c0_86 = arith.constant 0 : index
    %c0_87 = arith.constant 0 : index
    %312 = vector.load %arg15[%c0_86, %c0_87] : memref<896x128xf32, #tpu.memory_space<vmem>>, vector<896x128xf32>
    %313 = vector.extract_strided_slice %309 {offsets = [0, 0], sizes = [15, 128], strides = [1, 1]} : vector<30x128xf32> to vector<15x128xf32>
    %cst_88 = arith.constant dense<0.000000e+00> : vector<16x128xf32>
    %314 = tpu.matmul %310, %313, %cst_88 {dimension_numbers = #tpu.dot_dimension_numbers<[1], [0], [0], [1], [0, 0, 1, 1], [], []>} : vector<16x15xf32>, vector<15x128xf32>, vector<16x128xf32> -> vector<16x128xf32>
    %cst_89 = arith.constant dense<0.000000e+00> : vector<16x128xf32>
    %315 = tpu.matmul %311, %313, %cst_89 {dimension_numbers = #tpu.dot_dimension_numbers<[1], [0], [0], [1], [0, 0, 1, 1], [], []>} : vector<16x15xf32>, vector<15x128xf32>, vector<16x128xf32> -> vector<16x128xf32>
    %316 = vector.extract_strided_slice %314 {offsets = [0, 0], sizes = [7, 128], strides = [1, 1]} : vector<16x128xf32> to vector<7x128xf32>
    %317 = vector.extract_strided_slice %315 {offsets = [0, 0], sizes = [7, 128], strides = [1, 1]} : vector<16x128xf32> to vector<7x128xf32>
    %318 = vector.extract_strided_slice %314 {offsets = [1, 0], sizes = [7, 128], strides = [1, 1]} : vector<16x128xf32> to vector<7x128xf32>
    %319 = vector.extract_strided_slice %315 {offsets = [1, 0], sizes = [7, 128], strides = [1, 1]} : vector<16x128xf32> to vector<7x128xf32>
    %320 = vector.extract_strided_slice %314 {offsets = [2, 0], sizes = [7, 128], strides = [1, 1]} : vector<16x128xf32> to vector<7x128xf32>
    %321 = vector.extract_strided_slice %315 {offsets = [2, 0], sizes = [7, 128], strides = [1, 1]} : vector<16x128xf32> to vector<7x128xf32>
    %322 = vector.extract_strided_slice %314 {offsets = [3, 0], sizes = [7, 128], strides = [1, 1]} : vector<16x128xf32> to vector<7x128xf32>
    %323 = tpu.concatenate %316, %317, %318, %319, %320, %321, %322 in 1 : vector<7x128xf32>, vector<7x128xf32>, vector<7x128xf32>, vector<7x128xf32>, vector<7x128xf32>, vector<7x128xf32>, vector<7x128xf32> -> vector<7x896xf32>
    %324 = vector.extract_strided_slice %309 {offsets = [15, 0], sizes = [15, 128], strides = [1, 1]} : vector<30x128xf32> to vector<15x128xf32>
    %cst_90 = arith.constant dense<0.000000e+00> : vector<16x128xf32>
    %325 = tpu.matmul %310, %324, %cst_90 {dimension_numbers = #tpu.dot_dimension_numbers<[1], [0], [0], [1], [0, 0, 1, 1], [], []>} : vector<16x15xf32>, vector<15x128xf32>, vector<16x128xf32> -> vector<16x128xf32>
    %cst_91 = arith.constant dense<0.000000e+00> : vector<16x128xf32>
    %326 = tpu.matmul %311, %324, %cst_91 {dimension_numbers = #tpu.dot_dimension_numbers<[1], [0], [0], [1], [0, 0, 1, 1], [], []>} : vector<16x15xf32>, vector<15x128xf32>, vector<16x128xf32> -> vector<16x128xf32>
    %327 = vector.extract_strided_slice %325 {offsets = [0, 0], sizes = [7, 128], strides = [1, 1]} : vector<16x128xf32> to vector<7x128xf32>
    %328 = vector.extract_strided_slice %326 {offsets = [0, 0], sizes = [7, 128], strides = [1, 1]} : vector<16x128xf32> to vector<7x128xf32>
    %329 = vector.extract_strided_slice %325 {offsets = [1, 0], sizes = [7, 128], strides = [1, 1]} : vector<16x128xf32> to vector<7x128xf32>
    %330 = vector.extract_strided_slice %326 {offsets = [1, 0], sizes = [7, 128], strides = [1, 1]} : vector<16x128xf32> to vector<7x128xf32>
    %331 = vector.extract_strided_slice %325 {offsets = [2, 0], sizes = [7, 128], strides = [1, 1]} : vector<16x128xf32> to vector<7x128xf32>
    %332 = vector.extract_strided_slice %326 {offsets = [2, 0], sizes = [7, 128], strides = [1, 1]} : vector<16x128xf32> to vector<7x128xf32>
    %333 = vector.extract_strided_slice %325 {offsets = [3, 0], sizes = [7, 128], strides = [1, 1]} : vector<16x128xf32> to vector<7x128xf32>
    %334 = tpu.concatenate %327, %328, %329, %330, %331, %332, %333 in 1 : vector<7x128xf32>, vector<7x128xf32>, vector<7x128xf32>, vector<7x128xf32>, vector<7x128xf32>, vector<7x128xf32>, vector<7x128xf32> -> vector<7x896xf32>
    %335 = tpu.concatenate %323, %334 in 0 : vector<7x896xf32>, vector<7x896xf32> -> vector<14x896xf32>
    %cst_92 = arith.constant dense<0.000000e+00> : vector<14x128xf32>
    %336 = tpu.matmul %335, %312, %cst_92 {dimension_numbers = #tpu.dot_dimension_numbers<[1], [0], [0], [1], [0, 0, 1, 1], [], []>} : vector<14x896xf32>, vector<896x128xf32>, vector<14x128xf32> -> vector<14x128xf32>
    %cst_93 = arith.constant dense<0.000000e+00> : vector<128xf32>
    %337 = vector.multi_reduction <add>, %336, %cst_93 [0] : vector<14x128xf32> to vector<128xf32>
    %338 = vector.shape_cast %337 : vector<128xf32> to vector<1x128xf32>
    %cst_94 = arith.constant 0.0714285746 : f32
    %339 = vector.broadcast %cst_94 : f32 to vector<1x128xf32>
    %340 = arith.mulf %338, %339 : vector<1x128xf32>
    %341 = vector.broadcast %340 : vector<1x128xf32> to vector<14x128xf32>
    %342 = arith.subf %336, %341 : vector<14x128xf32>
    %343 = arith.mulf %342, %342 : vector<14x128xf32>
    %cst_95 = arith.constant dense<0.000000e+00> : vector<128xf32>
    %344 = vector.multi_reduction <add>, %343, %cst_95 [0] : vector<14x128xf32> to vector<128xf32>
    %345 = vector.shape_cast %344 : vector<128xf32> to vector<1x128xf32>
    %cst_96 = arith.constant 0.0714285746 : f32
    %346 = vector.broadcast %cst_96 : f32 to vector<1x128xf32>
    %347 = arith.mulf %345, %346 : vector<1x128xf32>
    %cst_97 = arith.constant 9.99999974E-6 : f32
    %348 = vector.broadcast %cst_97 : f32 to vector<1x128xf32>
    %349 = arith.addf %347, %348 : vector<1x128xf32>
    %350 = math.rsqrt %349 : vector<1x128xf32>
    %351 = vector.broadcast %350 : vector<1x128xf32> to vector<14x128xf32>
    %352 = arith.mulf %342, %351 : vector<14x128xf32>
    %cst_98 = arith.constant 0.000000e+00 : f32
    %353 = vector.broadcast %cst_98 : f32 to vector<14x128xf32>
    %354 = arith.cmpf ogt, %352, %353 : vector<14x128xf32>
    %cst_99 = arith.constant 1.000000e-01 : f32
    %355 = vector.broadcast %cst_99 : f32 to vector<14x128xf32>
    %356 = arith.mulf %355, %352 : vector<14x128xf32>
    %357 = arith.select %354, %352, %356 : vector<14x128xi1>, vector<14x128xf32>
    %c0_100 = arith.constant 0 : index
    %c0_101 = arith.constant 0 : index
    %358 = vector.load %arg16[%c0_100, %c0_101] : memref<8x7xf32, #tpu.memory_space<vmem>>, vector<8x7xf32>
    %c0_102 = arith.constant 0 : index
    %c0_103 = arith.constant 0 : index
    %359 = vector.load %arg17[%c0_102, %c0_103] : memref<8x7xf32, #tpu.memory_space<vmem>>, vector<8x7xf32>
    %c0_104 = arith.constant 0 : index
    %c0_105 = arith.constant 0 : index
    %360 = vector.load %arg18[%c0_104, %c0_105] : memref<896x128xf32, #tpu.memory_space<vmem>>, vector<896x128xf32>
    %361 = vector.extract_strided_slice %357 {offsets = [0, 0], sizes = [7, 128], strides = [1, 1]} : vector<14x128xf32> to vector<7x128xf32>
    %cst_106 = arith.constant dense<0.000000e+00> : vector<8x128xf32>
    %362 = tpu.matmul %358, %361, %cst_106 {dimension_numbers = #tpu.dot_dimension_numbers<[1], [0], [0], [1], [0, 0, 1, 1], [], []>} : vector<8x7xf32>, vector<7x128xf32>, vector<8x128xf32> -> vector<8x128xf32>
    %cst_107 = arith.constant dense<0.000000e+00> : vector<8x128xf32>
    %363 = tpu.matmul %359, %361, %cst_107 {dimension_numbers = #tpu.dot_dimension_numbers<[1], [0], [0], [1], [0, 0, 1, 1], [], []>} : vector<8x7xf32>, vector<7x128xf32>, vector<8x128xf32> -> vector<8x128xf32>
    %364 = vector.extract_strided_slice %362 {offsets = [0, 0], sizes = [4, 128], strides = [1, 1]} : vector<8x128xf32> to vector<4x128xf32>
    %365 = vector.extract_strided_slice %363 {offsets = [0, 0], sizes = [4, 128], strides = [1, 1]} : vector<8x128xf32> to vector<4x128xf32>
    %366 = vector.extract_strided_slice %362 {offsets = [1, 0], sizes = [4, 128], strides = [1, 1]} : vector<8x128xf32> to vector<4x128xf32>
    %367 = vector.extract_strided_slice %363 {offsets = [1, 0], sizes = [4, 128], strides = [1, 1]} : vector<8x128xf32> to vector<4x128xf32>
    %368 = vector.extract_strided_slice %362 {offsets = [2, 0], sizes = [4, 128], strides = [1, 1]} : vector<8x128xf32> to vector<4x128xf32>
    %369 = vector.extract_strided_slice %363 {offsets = [2, 0], sizes = [4, 128], strides = [1, 1]} : vector<8x128xf32> to vector<4x128xf32>
    %370 = vector.extract_strided_slice %362 {offsets = [3, 0], sizes = [4, 128], strides = [1, 1]} : vector<8x128xf32> to vector<4x128xf32>
    %371 = tpu.concatenate %364, %365, %366, %367, %368, %369, %370 in 1 : vector<4x128xf32>, vector<4x128xf32>, vector<4x128xf32>, vector<4x128xf32>, vector<4x128xf32>, vector<4x128xf32>, vector<4x128xf32> -> vector<4x896xf32>
    %372 = vector.extract_strided_slice %357 {offsets = [7, 0], sizes = [7, 128], strides = [1, 1]} : vector<14x128xf32> to vector<7x128xf32>
    %cst_108 = arith.constant dense<0.000000e+00> : vector<8x128xf32>
    %373 = tpu.matmul %358, %372, %cst_108 {dimension_numbers = #tpu.dot_dimension_numbers<[1], [0], [0], [1], [0, 0, 1, 1], [], []>} : vector<8x7xf32>, vector<7x128xf32>, vector<8x128xf32> -> vector<8x128xf32>
    %cst_109 = arith.constant dense<0.000000e+00> : vector<8x128xf32>
    %374 = tpu.matmul %359, %372, %cst_109 {dimension_numbers = #tpu.dot_dimension_numbers<[1], [0], [0], [1], [0, 0, 1, 1], [], []>} : vector<8x7xf32>, vector<7x128xf32>, vector<8x128xf32> -> vector<8x128xf32>
    %375 = vector.extract_strided_slice %373 {offsets = [0, 0], sizes = [4, 128], strides = [1, 1]} : vector<8x128xf32> to vector<4x128xf32>
    %376 = vector.extract_strided_slice %374 {offsets = [0, 0], sizes = [4, 128], strides = [1, 1]} : vector<8x128xf32> to vector<4x128xf32>
    %377 = vector.extract_strided_slice %373 {offsets = [1, 0], sizes = [4, 128], strides = [1, 1]} : vector<8x128xf32> to vector<4x128xf32>
    %378 = vector.extract_strided_slice %374 {offsets = [1, 0], sizes = [4, 128], strides = [1, 1]} : vector<8x128xf32> to vector<4x128xf32>
    %379 = vector.extract_strided_slice %373 {offsets = [2, 0], sizes = [4, 128], strides = [1, 1]} : vector<8x128xf32> to vector<4x128xf32>
    %380 = vector.extract_strided_slice %374 {offsets = [2, 0], sizes = [4, 128], strides = [1, 1]} : vector<8x128xf32> to vector<4x128xf32>
    %381 = vector.extract_strided_slice %373 {offsets = [3, 0], sizes = [4, 128], strides = [1, 1]} : vector<8x128xf32> to vector<4x128xf32>
    %382 = tpu.concatenate %375, %376, %377, %378, %379, %380, %381 in 1 : vector<4x128xf32>, vector<4x128xf32>, vector<4x128xf32>, vector<4x128xf32>, vector<4x128xf32>, vector<4x128xf32>, vector<4x128xf32> -> vector<4x896xf32>
    %383 = tpu.concatenate %371, %382 in 0 : vector<4x896xf32>, vector<4x896xf32> -> vector<8x896xf32>
    %cst_110 = arith.constant dense<0.000000e+00> : vector<8x128xf32>
    %384 = tpu.matmul %383, %360, %cst_110 {dimension_numbers = #tpu.dot_dimension_numbers<[1], [0], [0], [1], [0, 0, 1, 1], [], []>} : vector<8x896xf32>, vector<896x128xf32>, vector<8x128xf32> -> vector<8x128xf32>
    %cst_111 = arith.constant dense<0.000000e+00> : vector<128xf32>
    %385 = vector.multi_reduction <add>, %384, %cst_111 [0] : vector<8x128xf32> to vector<128xf32>
    %386 = vector.shape_cast %385 : vector<128xf32> to vector<1x128xf32>
    %cst_112 = arith.constant 1.250000e-01 : f32
    %387 = vector.broadcast %cst_112 : f32 to vector<1x128xf32>
    %388 = arith.mulf %386, %387 : vector<1x128xf32>
    %389 = vector.broadcast %388 : vector<1x128xf32> to vector<8x128xf32>
    %390 = arith.subf %384, %389 : vector<8x128xf32>
    %391 = arith.mulf %390, %390 : vector<8x128xf32>
    %cst_113 = arith.constant dense<0.000000e+00> : vector<128xf32>
    %392 = vector.multi_reduction <add>, %391, %cst_113 [0] : vector<8x128xf32> to vector<128xf32>
    %393 = vector.shape_cast %392 : vector<128xf32> to vector<1x128xf32>
    %cst_114 = arith.constant 1.250000e-01 : f32
    %394 = vector.broadcast %cst_114 : f32 to vector<1x128xf32>
    %395 = arith.mulf %393, %394 : vector<1x128xf32>
    %cst_115 = arith.constant 9.99999974E-6 : f32
    %396 = vector.broadcast %cst_115 : f32 to vector<1x128xf32>
    %397 = arith.addf %395, %396 : vector<1x128xf32>
    %398 = math.rsqrt %397 : vector<1x128xf32>
    %399 = vector.broadcast %398 : vector<1x128xf32> to vector<8x128xf32>
    %400 = arith.mulf %390, %399 : vector<8x128xf32>
    %cst_116 = arith.constant 0.000000e+00 : f32
    %401 = vector.broadcast %cst_116 : f32 to vector<8x128xf32>
    %402 = arith.cmpf ogt, %400, %401 : vector<8x128xf32>
    %cst_117 = arith.constant 1.000000e-01 : f32
    %403 = vector.broadcast %cst_117 : f32 to vector<8x128xf32>
    %404 = arith.mulf %403, %400 : vector<8x128xf32>
    %405 = arith.select %402, %400, %404 : vector<8x128xi1>, vector<8x128xf32>
    %c0_118 = arith.constant 0 : index
    %c0_119 = arith.constant 0 : index
    %406 = vector.load %arg19[%c0_118, %c0_119] : memref<8x4xf32, #tpu.memory_space<vmem>>, vector<8x4xf32>
    %c0_120 = arith.constant 0 : index
    %c0_121 = arith.constant 0 : index
    %407 = vector.load %arg20[%c0_120, %c0_121] : memref<8x4xf32, #tpu.memory_space<vmem>>, vector<8x4xf32>
    %c0_122 = arith.constant 0 : index
    %c0_123 = arith.constant 0 : index
    %408 = vector.load %arg21[%c0_122, %c0_123] : memref<896x256xf32, #tpu.memory_space<vmem>>, vector<896x256xf32>
    %409 = vector.extract_strided_slice %405 {offsets = [0, 0], sizes = [4, 128], strides = [1, 1]} : vector<8x128xf32> to vector<4x128xf32>
    %cst_124 = arith.constant dense<0.000000e+00> : vector<8x128xf32>
    %410 = tpu.matmul %406, %409, %cst_124 {dimension_numbers = #tpu.dot_dimension_numbers<[1], [0], [0], [1], [0, 0, 1, 1], [], []>} : vector<8x4xf32>, vector<4x128xf32>, vector<8x128xf32> -> vector<8x128xf32>
    %cst_125 = arith.constant dense<0.000000e+00> : vector<8x128xf32>
    %411 = tpu.matmul %407, %409, %cst_125 {dimension_numbers = #tpu.dot_dimension_numbers<[1], [0], [0], [1], [0, 0, 1, 1], [], []>} : vector<8x4xf32>, vector<4x128xf32>, vector<8x128xf32> -> vector<8x128xf32>
    %412 = vector.extract_strided_slice %410 {offsets = [0, 0], sizes = [2, 128], strides = [1, 1]} : vector<8x128xf32> to vector<2x128xf32>
    %413 = vector.extract_strided_slice %411 {offsets = [0, 0], sizes = [2, 128], strides = [1, 1]} : vector<8x128xf32> to vector<2x128xf32>
    %414 = vector.extract_strided_slice %410 {offsets = [1, 0], sizes = [2, 128], strides = [1, 1]} : vector<8x128xf32> to vector<2x128xf32>
    %415 = vector.extract_strided_slice %411 {offsets = [1, 0], sizes = [2, 128], strides = [1, 1]} : vector<8x128xf32> to vector<2x128xf32>
    %416 = vector.extract_strided_slice %410 {offsets = [2, 0], sizes = [2, 128], strides = [1, 1]} : vector<8x128xf32> to vector<2x128xf32>
    %417 = vector.extract_strided_slice %411 {offsets = [2, 0], sizes = [2, 128], strides = [1, 1]} : vector<8x128xf32> to vector<2x128xf32>
    %418 = vector.extract_strided_slice %410 {offsets = [3, 0], sizes = [2, 128], strides = [1, 1]} : vector<8x128xf32> to vector<2x128xf32>
    %419 = tpu.concatenate %412, %413, %414, %415, %416, %417, %418 in 1 : vector<2x128xf32>, vector<2x128xf32>, vector<2x128xf32>, vector<2x128xf32>, vector<2x128xf32>, vector<2x128xf32>, vector<2x128xf32> -> vector<2x896xf32>
    %420 = vector.extract_strided_slice %405 {offsets = [4, 0], sizes = [4, 128], strides = [1, 1]} : vector<8x128xf32> to vector<4x128xf32>
    %cst_126 = arith.constant dense<0.000000e+00> : vector<8x128xf32>
    %421 = tpu.matmul %406, %420, %cst_126 {dimension_numbers = #tpu.dot_dimension_numbers<[1], [0], [0], [1], [0, 0, 1, 1], [], []>} : vector<8x4xf32>, vector<4x128xf32>, vector<8x128xf32> -> vector<8x128xf32>
    %cst_127 = arith.constant dense<0.000000e+00> : vector<8x128xf32>
    %422 = tpu.matmul %407, %420, %cst_127 {dimension_numbers = #tpu.dot_dimension_numbers<[1], [0], [0], [1], [0, 0, 1, 1], [], []>} : vector<8x4xf32>, vector<4x128xf32>, vector<8x128xf32> -> vector<8x128xf32>
    %423 = vector.extract_strided_slice %421 {offsets = [0, 0], sizes = [2, 128], strides = [1, 1]} : vector<8x128xf32> to vector<2x128xf32>
    %424 = vector.extract_strided_slice %422 {offsets = [0, 0], sizes = [2, 128], strides = [1, 1]} : vector<8x128xf32> to vector<2x128xf32>
    %425 = vector.extract_strided_slice %421 {offsets = [1, 0], sizes = [2, 128], strides = [1, 1]} : vector<8x128xf32> to vector<2x128xf32>
    %426 = vector.extract_strided_slice %422 {offsets = [1, 0], sizes = [2, 128], strides = [1, 1]} : vector<8x128xf32> to vector<2x128xf32>
    %427 = vector.extract_strided_slice %421 {offsets = [2, 0], sizes = [2, 128], strides = [1, 1]} : vector<8x128xf32> to vector<2x128xf32>
    %428 = vector.extract_strided_slice %422 {offsets = [2, 0], sizes = [2, 128], strides = [1, 1]} : vector<8x128xf32> to vector<2x128xf32>
    %429 = vector.extract_strided_slice %421 {offsets = [3, 0], sizes = [2, 128], strides = [1, 1]} : vector<8x128xf32> to vector<2x128xf32>
    %430 = tpu.concatenate %423, %424, %425, %426, %427, %428, %429 in 1 : vector<2x128xf32>, vector<2x128xf32>, vector<2x128xf32>, vector<2x128xf32>, vector<2x128xf32>, vector<2x128xf32>, vector<2x128xf32> -> vector<2x896xf32>
    %431 = tpu.concatenate %419, %430 in 0 : vector<2x896xf32>, vector<2x896xf32> -> vector<4x896xf32>
    %cst_128 = arith.constant dense<0.000000e+00> : vector<4x256xf32>
    %432 = tpu.matmul %431, %408, %cst_128 {dimension_numbers = #tpu.dot_dimension_numbers<[1], [0], [0], [1], [0, 0, 1, 1], [], []>} : vector<4x896xf32>, vector<896x256xf32>, vector<4x256xf32> -> vector<4x256xf32>
    %cst_129 = arith.constant dense<0.000000e+00> : vector<256xf32>
    %433 = vector.multi_reduction <add>, %432, %cst_129 [0] : vector<4x256xf32> to vector<256xf32>
    %434 = vector.shape_cast %433 : vector<256xf32> to vector<1x256xf32>
    %cst_130 = arith.constant 2.500000e-01 : f32
    %435 = vector.broadcast %cst_130 : f32 to vector<1x256xf32>
    %436 = arith.mulf %434, %435 : vector<1x256xf32>
    %437 = vector.broadcast %436 : vector<1x256xf32> to vector<4x256xf32>
    %438 = arith.subf %432, %437 : vector<4x256xf32>
    %439 = arith.mulf %438, %438 : vector<4x256xf32>
    %cst_131 = arith.constant dense<0.000000e+00> : vector<256xf32>
    %440 = vector.multi_reduction <add>, %439, %cst_131 [0] : vector<4x256xf32> to vector<256xf32>
    %441 = vector.shape_cast %440 : vector<256xf32> to vector<1x256xf32>
    %cst_132 = arith.constant 2.500000e-01 : f32
    %442 = vector.broadcast %cst_132 : f32 to vector<1x256xf32>
    %443 = arith.mulf %441, %442 : vector<1x256xf32>
    %cst_133 = arith.constant 9.99999974E-6 : f32
    %444 = vector.broadcast %cst_133 : f32 to vector<1x256xf32>
    %445 = arith.addf %443, %444 : vector<1x256xf32>
    %446 = math.rsqrt %445 : vector<1x256xf32>
    %447 = vector.broadcast %446 : vector<1x256xf32> to vector<4x256xf32>
    %448 = arith.mulf %438, %447 : vector<4x256xf32>
    %cst_134 = arith.constant 0.000000e+00 : f32
    %449 = vector.broadcast %cst_134 : f32 to vector<4x256xf32>
    %450 = arith.cmpf ogt, %448, %449 : vector<4x256xf32>
    %cst_135 = arith.constant 1.000000e-01 : f32
    %451 = vector.broadcast %cst_135 : f32 to vector<4x256xf32>
    %452 = arith.mulf %451, %448 : vector<4x256xf32>
    %453 = arith.select %450, %448, %452 : vector<4x256xi1>, vector<4x256xf32>
    %454 = vector.extract_strided_slice %453 {offsets = [0, 0], sizes = [2, 256], strides = [1, 1]} : vector<4x256xf32> to vector<2x256xf32>
    %cst_136 = arith.constant dense<0xFF800000> : vector<256xf32>
    %455 = vector.multi_reduction <maximumf>, %454, %cst_136 [0] : vector<2x256xf32> to vector<256xf32>
    %456 = vector.shape_cast %455 : vector<256xf32> to vector<1x256xf32>
    %457 = vector.extract_strided_slice %453 {offsets = [2, 0], sizes = [2, 256], strides = [1, 1]} : vector<4x256xf32> to vector<2x256xf32>
    %cst_137 = arith.constant dense<0xFF800000> : vector<256xf32>
    %458 = vector.multi_reduction <maximumf>, %457, %cst_137 [0] : vector<2x256xf32> to vector<256xf32>
    %459 = vector.shape_cast %458 : vector<256xf32> to vector<1x256xf32>
    %460 = tpu.concatenate %456, %459 in 0 : vector<1x256xf32>, vector<1x256xf32> -> vector<2x256xf32>
    %c0_138 = arith.constant 0 : index
    %c0_139 = arith.constant 0 : index
    %461 = vector.load %arg22[%c0_138, %c0_139] : memref<256x100xf32, #tpu.memory_space<vmem>>, vector<256x100xf32>
    %cst_140 = arith.constant dense<0.000000e+00> : vector<2x100xf32>
    %462 = tpu.matmul %460, %461, %cst_140 {dimension_numbers = #tpu.dot_dimension_numbers<[1], [0], [0], [1], [0, 0, 1, 1], [], []>} : vector<2x256xf32>, vector<256x100xf32>, vector<2x100xf32> -> vector<2x100xf32>
    %c0_141 = arith.constant 0 : index
    %c0_142 = arith.constant 0 : index
    %463 = vector.load %arg23[%c0_141, %c0_142] : memref<1x100xf32, #tpu.memory_space<vmem>>, vector<1x100xf32>
    %464 = vector.broadcast %463 : vector<1x100xf32> to vector<2x100xf32>
    %465 = arith.addf %462, %464 : vector<2x100xf32>
    %cst_143 = arith.constant 0.000000e+00 : f32
    %466 = vector.broadcast %cst_143 : f32 to vector<2x100xf32>
    %467 = arith.cmpf ogt, %465, %466 : vector<2x100xf32>
    %cst_144 = arith.constant 1.000000e-01 : f32
    %468 = vector.broadcast %cst_144 : f32 to vector<2x100xf32>
    %469 = arith.mulf %468, %465 : vector<2x100xf32>
    %470 = arith.select %467, %465, %469 : vector<2x100xi1>, vector<2x100xf32>
    %c0_145 = arith.constant 0 : index
    %c0_146 = arith.constant 0 : index
    %471 = vector.load %arg24[%c0_145, %c0_146] : memref<100x4xf32, #tpu.memory_space<vmem>>, vector<100x4xf32>
    %cst_147 = arith.constant dense<0.000000e+00> : vector<2x4xf32>
    %472 = tpu.matmul %470, %471, %cst_147 {dimension_numbers = #tpu.dot_dimension_numbers<[1], [0], [0], [1], [0, 0, 1, 1], [], []>} : vector<2x100xf32>, vector<100x4xf32>, vector<2x4xf32> -> vector<2x4xf32>
    %c0_148 = arith.constant 0 : index
    %c0_149 = arith.constant 0 : index
    %473 = vector.load %arg25[%c0_148, %c0_149] : memref<1x4xf32, #tpu.memory_space<vmem>>, vector<1x4xf32>
    %474 = vector.broadcast %473 : vector<1x4xf32> to vector<2x4xf32>
    %475 = arith.addf %472, %474 : vector<2x4xf32>
    %c0_150 = arith.constant 0 : index
    %c0_151 = arith.constant 0 : index
    %476 = vector.load %arg26[%c0_150, %c0_151] : memref<2x4xf32, #tpu.memory_space<vmem>>, vector<2x4xf32>
    tpu.vector_store %arg26[%c0_150, %c0_151], %475 {strides = array<i32>} : memref<2x4xf32, #tpu.memory_space<vmem>>, vector<2x4xf32>,
    return
  }
  func.func @transform_0(%arg0: i32) -> (i32, i32) {
    %c0_i32 = arith.constant 0 : i32
    %c0_i32_0 = arith.constant 0 : i32
    %c0_i32_1 = arith.constant 0 : i32
    return %c0_i32, %c0_i32_0 : i32, i32
  }
  func.func @transform_1(%arg0: i32) -> (i32, i32) {
    %c0_i32 = arith.constant 0 : i32
    %c0_i32_0 = arith.constant 0 : i32
    %c0_i32_1 = arith.constant 0 : i32
    return %c0_i32, %c0_i32_0 : i32, i32
  }
  func.func @transform_2(%arg0: i32) -> (i32, i32) {
    %c0_i32 = arith.constant 0 : i32
    %c0_i32_0 = arith.constant 0 : i32
    %c0_i32_1 = arith.constant 0 : i32
    return %c0_i32, %c0_i32_0 : i32, i32
  }
  func.func @transform_3(%arg0: i32) -> (i32, i32) {
    %c0_i32 = arith.constant 0 : i32
    %c0_i32_0 = arith.constant 0 : i32
    %c0_i32_1 = arith.constant 0 : i32
    return %c0_i32, %c0_i32_0 : i32, i32
  }
  func.func @transform_4(%arg0: i32) -> (i32, i32) {
    %c0_i32 = arith.constant 0 : i32
    %c0_i32_0 = arith.constant 0 : i32
    %c0_i32_1 = arith.constant 0 : i32
    return %c0_i32, %c0_i32_0 : i32, i32
  }
  func.func @transform_5(%arg0: i32) -> (i32, i32) {
    %c0_i32 = arith.constant 0 : i32
    %c0_i32_0 = arith.constant 0 : i32
    %c0_i32_1 = arith.constant 0 : i32
    return %c0_i32, %c0_i32_0 : i32, i32
  }
  func.func @transform_6(%arg0: i32) -> (i32, i32) {
    %c0_i32 = arith.constant 0 : i32
    %c0_i32_0 = arith.constant 0 : i32
    %c0_i32_1 = arith.constant 0 : i32
    return %c0_i32, %c0_i32_0 : i32, i32
  }
  func.func @transform_7(%arg0: i32) -> (i32, i32) {
    %c0_i32 = arith.constant 0 : i32
    %c0_i32_0 = arith.constant 0 : i32
    %c0_i32_1 = arith.constant 0 : i32
    return %c0_i32, %c0_i32_0 : i32, i32
  }
  func.func @transform_8(%arg0: i32) -> (i32, i32) {
    %c0_i32 = arith.constant 0 : i32
    %c0_i32_0 = arith.constant 0 : i32
    %c0_i32_1 = arith.constant 0 : i32
    return %c0_i32, %c0_i32_0 : i32, i32
  }
  func.func @transform_9(%arg0: i32) -> (i32, i32) {
    %c0_i32 = arith.constant 0 : i32
    %c0_i32_0 = arith.constant 0 : i32
    %c0_i32_1 = arith.constant 0 : i32
    return %c0_i32, %c0_i32_0 : i32, i32
  }
  func.func @transform_10(%arg0: i32) -> (i32, i32) {
    %c0_i32 = arith.constant 0 : i32
    %c0_i32_0 = arith.constant 0 : i32
    %c0_i32_1 = arith.constant 0 : i32
    return %c0_i32, %c0_i32_0 : i32, i32
  }
  func.func @transform_11(%arg0: i32) -> (i32, i32) {
    %c0_i32 = arith.constant 0 : i32
    %c0_i32_0 = arith.constant 0 : i32
    %c0_i32_1 = arith.constant 0 : i32
    return %c0_i32, %c0_i32_0 : i32, i32
  }
  func.func @transform_12(%arg0: i32) -> (i32, i32) {
    %c0_i32 = arith.constant 0 : i32
    %c0_i32_0 = arith.constant 0 : i32
    %c0_i32_1 = arith.constant 0 : i32
    return %c0_i32, %c0_i32_0 : i32, i32
  }
  func.func @transform_13(%arg0: i32) -> (i32, i32) {
    %c0_i32 = arith.constant 0 : i32
    %c0_i32_0 = arith.constant 0 : i32
    %c0_i32_1 = arith.constant 0 : i32
    return %c0_i32, %c0_i32_0 : i32, i32
  }
  func.func @transform_14(%arg0: i32) -> (i32, i32) {
    %c0_i32 = arith.constant 0 : i32
    %c0_i32_0 = arith.constant 0 : i32
    %c0_i32_1 = arith.constant 0 : i32
    return %c0_i32, %c0_i32_0 : i32, i32
  }
  func.func @transform_15(%arg0: i32) -> (i32, i32) {
    %c0_i32 = arith.constant 0 : i32
    %c0_i32_0 = arith.constant 0 : i32
    %c0_i32_1 = arith.constant 0 : i32
    return %c0_i32, %c0_i32_0 : i32, i32
  }
  func.func @transform_16(%arg0: i32) -> (i32, i32) {
    %c0_i32 = arith.constant 0 : i32
    %c0_i32_0 = arith.constant 0 : i32
    %c0_i32_1 = arith.constant 0 : i32
    return %c0_i32, %c0_i32_0 : i32, i32
  }
  func.func @transform_17(%arg0: i32) -> (i32, i32) {
    %c0_i32 = arith.constant 0 : i32
    %c0_i32_0 = arith.constant 0 : i32
    %c0_i32_1 = arith.constant 0 : i32
    return %c0_i32, %c0_i32_0 : i32, i32
  }
  func.func @transform_18(%arg0: i32) -> (i32, i32) {
    %c0_i32 = arith.constant 0 : i32
    %c0_i32_0 = arith.constant 0 : i32
    %c0_i32_1 = arith.constant 0 : i32
    return %c0_i32, %c0_i32_0 : i32, i32
  }
  func.func @transform_19(%arg0: i32) -> (i32, i32) {
    %c0_i32 = arith.constant 0 : i32
    %c0_i32_0 = arith.constant 0 : i32
    %c0_i32_1 = arith.constant 0 : i32
    return %c0_i32, %c0_i32_0 : i32, i32
  }
  func.func @transform_20(%arg0: i32) -> (i32, i32) {
    %c0_i32 = arith.constant 0 : i32
    %c0_i32_0 = arith.constant 0 : i32
    %c0_i32_1 = arith.constant 0 : i32
    return %c0_i32, %c0_i32_0 : i32, i32
  }
  func.func @transform_21(%arg0: i32) -> (i32, i32) {
    %c0_i32 = arith.constant 0 : i32
    %c0_i32_0 = arith.constant 0 : i32
    %c0_i32_1 = arith.constant 0 : i32
    return %c0_i32, %c0_i32_0 : i32, i32
  }
  func.func @transform_22(%arg0: i32) -> (i32, i32) {
    %c0_i32 = arith.constant 0 : i32
    %c0_i32_0 = arith.constant 0 : i32
    %c0_i32_1 = arith.constant 0 : i32
    return %c0_i32, %c0_i32_0 : i32, i32
  }
  func.func @transform_23(%arg0: i32) -> (i32, i32) {
    %c0_i32 = arith.constant 0 : i32
    %c0_i32_0 = arith.constant 0 : i32
    %c0_i32_1 = arith.constant 0 : i32
    return %c0_i32, %c0_i32_0 : i32, i32
  }
  func.func @transform_24(%arg0: i32) -> (i32, i32) {
    %c0_i32 = arith.constant 0 : i32
    %c0_i32_0 = arith.constant 0 : i32
    %c0_i32_1 = arith.constant 0 : i32
    return %c0_i32, %c0_i32_0 : i32, i32
  }
  func.func @transform_25(%arg0: i32) -> (i32, i32) {
    %c0_i32 = arith.constant 0 : i32
    %c0_i32_0 = arith.constant 0 : i32
    %c0_i32_1 = arith.constant 0 : i32
    return %c0_i32, %c0_i32_0 : i32, i32
  }
}

</mosaic_0001>

<bundles_post_ra>
// kernel: tpu_custom_call.1
= control target key start
LH: loop header
LB: loop body
LE: loop exit
PB: predicated region body
PF: predicated region fallthrough
CT: control target
= control target key end

     0   :  { %s16389_s0 = inlined_call_operand.vmem [shape: f32[256,1], index: 0, kind: input, shape index: {}]   ;;  %s16390_s1 = inlined_call_operand.vmem [shape: f32[256,1], index: 1, kind: input, shape index: {}]   ;;  %s16391_s2 = inlined_call_operand.hbm [shape: f32[7,128], index: 2, kind: input, shape index: {}]   ;;  %s16392_s3 = inlined_call_operand.hbm [shape: f32[72,128], index: 3, kind: input, shape index: {}]   ;;  %s16393_s4 = inlined_call_operand.hbm [shape: f32[72,128], index: 4, kind: input, shape index: {}]   ;;  %s16394_s5 = inlined_call_operand.vmem [shape: f32[896,128], index: 5, kind: input, shape index: {}]   ;;  %s16395_s6 = inlined_call_operand.hbm [shape: f32[40,64], index: 6, kind: input, shape index: {}]   ;;  %s16396_s7 = inlined_call_operand.hbm [shape: f32[40,64], index: 7, kind: input, shape index: {}]   ;;  %s16397_s8 = inlined_call_operand.hbm [shape: f32[896,128], index: 8, kind: input, shape index: {}]   ;;  %s16398_s9 = inlined_call_operand.hbm [shape: f32[24,32], index: 9, kind: input, shape index: {}]   ;;  %s16399_s10 = inlined_call_operand.hbm [shape: f32[24,32], index: 10, kind: input, shape index: {}]   ;;  %s16400_s11 = inlined_call_operand.hbm [shape: f32[896,128], index: 11, kind: input, shape index: {}]   ;;  %s16401_s12 = inlined_call_operand.vmem [shape: f32[16,15], index: 12, kind: input, shape index: {}]   ;;  %s16402_s13 = inlined_call_operand.hbm [shape: f32[16,15], index: 13, kind: input, shape index: {}]   ;;  %s16403_s14 = inlined_call_operand.hbm [shape: f32[896,128], index: 14, kind: input, shape index: {}]   ;;  %s16404_s15 = inlined_call_operand.vmem [shape: f32[8,7], index: 15, kind: input, shape index: {}]   ;;  %s16405_s16 = inlined_call_operand.vmem [shape: f32[8,7], index: 16, kind: input, shape index: {}]   ;;  %s16406_s17 = inlined_call_operand.hbm [shape: f32[896,128], index: 17, kind: input, shape index: {}]   ;;  %s16407_s18 = inlined_call_operand.vmem [shape: f32[8,4], index: 18, kind: input, shape index: {}]   ;;  %s16408_s19 = inlined_call_operand.vmem [shape: f32[8,4], index: 19, kind: input, shape index: {}]   ;;  %s16409_s20 = inlined_call_operand.hbm [shape: f32[896,256], index: 20, kind: input, shape index: {}]   ;;  %s16410_s21 = inlined_call_operand.vmem [shape: f32[256,100], index: 21, kind: input, shape index: {}]   ;;  %s16411_s22 = inlined_call_operand.vmem [shape: f32[1,100], index: 22, kind: input, shape index: {}]   ;;  %s16412_s23 = inlined_call_operand.vmem [shape: f32[100,4], index: 23, kind: input, shape index: {}]   ;;  %s16413_s24 = inlined_call_operand.vmem [shape: f32[1,4], index: 24, kind: input, shape index: {}]   ;;  %s16414_s25 = inlined_call_operand.hbm [shape: f32[2,4], index: 25, kind: output, shape index: {}]  }
   0x1   :  { %16495 = sst [smem:[#allocation70_spill]] %s16389_s0 }
   0x2   :  { %16496 = sst [smem:[#allocation71_spill]] %s16390_s1 }
   0x3   :  { %16497 = sst [smem:[#allocation72_spill]] %s16391_s2 }
   0x4   :  { %16498 = sst [smem:[#allocation73_spill]] %s16392_s3 }
   0x5   :  { %16499 = sst [smem:[#allocation74_spill]] %s16393_s4 }
   0x6   :  { %16500 = sst [smem:[#allocation75_spill]] %s16394_s5 }
   0x7   :  { %16501 = sst [smem:[#allocation76_spill]] %s16395_s6 }
   0x8   :  { %16502 = sst [smem:[#allocation77_spill]] %s16396_s7 }
   0x9   :  { %16503 = sst [smem:[#allocation78_spill]] %s16397_s8 }
   0xa   :  { %16504 = sst [smem:[#allocation79_spill]] %s16398_s9 }
   0xb   :  { %30 = vsyncpa [#allocation3], 0 }
   0xc   :  { %31 = vsyncpa [#allocation6], 0 }
   0xd   :  { %32 = vsyncpa [#allocation9], 0 }
   0xe   :  { %33 = vsyncpa [#allocation12], 0 }
   0xf   :  { %34 = vsyncpa [#allocation15], 0 }
  0x10   :  { %35 = vsyncpa [#allocation18], 0 }
  0x11   :  { %36 = vsyncpa [#allocation21], 0 }
  0x12   :  { %37 = vsyncpa [#allocation4], 0  ;;  %s11425_s29 = smov [#allocation5]  }
  0x13   :  { %s57_s2 = sshll.u32 %s11425_s29, 4  ;;  %s58_s2 = int_to_ptr.vmem [resolvable:$true] %s57_s2 }
  0x14   :  { %s11137_s6 = scalar_lea.vmem %s58_s2, 1152  ;;  %p11142_p1 = scmp.lt.s32.totalorder %s58_s2, %s58_s2 }
  0x15   :  { %p11138_p0 = scmp.ne.s32.totalorder %s58_s2, %s11137_s6  ;;  %p11143_p2 = scmp.lt.s32.totalorder %s11137_s6, %s11137_s6 }
  0x17   :  { %p11144_p3 = por %p11143_p2, %p11142_p1 }
  0x19   :  { %p11145_p4 = pnand %p11144_p3, %p11138_p0 }
  0x1b   :  { %11148 = shalt.err (!%p11145_p4)
}
  0x1c   :  { %s11426_s30 = smov 128   ;;  %s11427_s7 = smov 8  }
  0x1d   :  { %s16505_s1 = sld [smem:[#allocation73_spill]]  ;;  %s11428_s8 = smov [#allocation8]  }
  0x1e   :  { %s83_s27 = sshll.u32 %s11428_s8, 4  ;;  %s11429_s4 = smov [#allocation11]   ;;  %s84_s27 = int_to_ptr.vmem [resolvable:$true] %s83_s27 }
  0x1f   :  { %s107_s28 = sshll.u32 %s11429_s4, 4  ;;  %s11157_s9 = scalar_lea.vmem %s84_s27, 640  ;;  %s108_s28 = int_to_ptr.vmem [resolvable:$true] %s107_s28 }
  0x20   :  { %p11158_p5 = scmp.ne.s32.totalorder %s84_s27, %s11157_s9  ;;  %p11162_p6 = scmp.lt.s32.totalorder %s84_s27, %s84_s27 }
  0x21   :  { %p11163_p7 = scmp.lt.s32.totalorder %s11157_s9, %s11157_s9 }
  0x23   :  { %63 = dma.hbm_to_vmem [thread:$0]  %s16505_s1, 1152, %s58_s2, [#allocation6], %s11426_s30, %s11426_s30, %s11427_s7  }
  0x24   :  { %p11164_p8 = por %p11163_p7, %p11162_p6 }
  0x26   :  { %p11165_p9 = pnand %p11164_p8, %p11158_p5 }
  0x28   :  { %11168 = shalt.err (!%p11165_p9)
}
  0x29   :  { %s16506_s29 = sld [smem:[#allocation76_spill]]  ;;  %s11177_s2 = scalar_lea.vmem %s108_s28, 14336 }
  0x2a   :  { %p11178_p10 = scmp.ne.s32.totalorder %s108_s28, %s11177_s2  ;;  %p11182_p11 = scmp.lt.s32.totalorder %s108_s28, %s108_s28 }
  0x2b   :  { %p11183_p12 = scmp.lt.s32.totalorder %s11177_s2, %s11177_s2 }
  0x2d   :  { %p11184_p13 = por %p11183_p12, %p11182_p11 }
  0x2f   :  { %89 = dma.hbm_to_vmem [thread:$0]  %s16506_s29, 640, %s84_s27, [#allocation9], %s11426_s30, %s11426_s30, %s11427_s7  }
  0x30   :  { %p11185_p0 = pnand %p11184_p13, %p11178_p10 }
  0x32   :  { %11188 = shalt.err (!%p11185_p0)
}
  0x33   :  { %s16507_s26 = sld [smem:[#allocation78_spill]]  ;;  %s11430_s1 = smov [#allocation14]  }
  0x34   :  { %s131_s8 = sshll.u32 %s11430_s1, 4  ;;  %s11431_s4 = smov [#allocation17]   ;;  %s132_s8 = int_to_ptr.vmem [resolvable:$true] %s131_s8 }
  0x35   :  { %s157_s27 = sshll.u32 %s11431_s4, 4  ;;  %s11197_s9 = scalar_lea.vmem %s132_s8, 384  ;;  %s158_s27 = int_to_ptr.vmem [resolvable:$true] %s157_s27 }
  0x36   :  { %p11198_p1 = scmp.ne.s32.totalorder %s132_s8, %s11197_s9  ;;  %p11202_p2 = scmp.lt.s32.totalorder %s132_s8, %s132_s8 }
  0x37   :  { %p11203_p3 = scmp.lt.s32.totalorder %s11197_s9, %s11197_s9 }
  0x39   :  { %113 = dma.hbm_to_vmem [thread:$0]  %s16507_s26, 14336, %s108_s28, [#allocation12], %s11426_s30, %s11426_s30, %s11427_s7  }
  0x3a   :  { %p11204_p4 = por %p11203_p3, %p11202_p2 }
  0x3c   :  { %p11205_p5 = pnand %p11204_p4, %p11198_p1 }
  0x3e   :  { %11208 = shalt.err (!%p11205_p5)
}
  0x3f   :  { %137 = dma.hbm_to_vmem [thread:$0]  %s16399_s10, 384, %s132_s8, [#allocation15], %s11426_s30, %s11426_s30, %s11427_s7  }
  0x40   :  { %s11217_s28 = scalar_lea.vmem %s158_s27, 256  ;;  %p11222_p7 = scmp.lt.s32.totalorder %s158_s27, %s158_s27 }
  0x41   :  { %p11218_p6 = scmp.ne.s32.totalorder %s158_s27, %s11217_s28  ;;  %p11223_p8 = scmp.lt.s32.totalorder %s11217_s28, %s11217_s28 }
  0x43   :  { %p11224_p9 = por %p11223_p8, %p11222_p7 }
  0x45   :  { %p11225_p10 = pnand %p11224_p9, %p11218_p6 }
  0x47   :  { %11228 = shalt.err (!%p11225_p10)
}
  0x48   :  { %163 = dma.hbm_to_vmem [thread:$0]  %s16402_s13, 256, %s158_s27, [#allocation18], %s11426_s30, %s11426_s30, %s11427_s7  }
  0x49   :  { %s11432_s6 = smov [#allocation20]   ;;  %s11433_s26 = smov [#allocation2]  }
  0x4a   :  { %s185_s3 = sshll.u32 %s11432_s6, 4  ;;  %s48_s10 = sshll.u32 %s11433_s26, 4  ;;  %s186_s3 = int_to_ptr.vmem [resolvable:$true] %s185_s3  ;;  %s49_s10 = int_to_ptr.vmem [resolvable:$true] %s48_s10 }
  0x4b   :  { %s11237_s1 = scalar_lea.vmem %s186_s3, 14336  ;;  %p11242_p12 = scmp.lt.s32.totalorder %s186_s3, %s186_s3 }
  0x4c   :  { %p11238_p11 = scmp.ne.s32.totalorder %s186_s3, %s11237_s1  ;;  %p11243_p13 = scmp.lt.s32.totalorder %s11237_s1, %s11237_s1 }
  0x4e   :  { %p11244_p0 = por %p11243_p13, %p11242_p12 }
  0x50   :  { %p11245_p1 = pnand %p11244_p0, %p11238_p11 }
  0x52   :  { %11248 = shalt.err (!%p11245_p1)
}
  0x53   :  { %191 = dma.hbm_to_vmem [thread:$0]  %s16406_s17, 14336, %s186_s3, [#allocation21], %s11426_s30, %s11426_s30, %s11427_s7  }
  0x54   :  { %s11257_s13 = scalar_lea.vmem %s49_s10, 128  ;;  %p11262_p3 = scmp.lt.s32.totalorder %s49_s10, %s49_s10 }
  0x55   :  { %p11258_p2 = scmp.ne.s32.totalorder %s49_s10, %s11257_s13  ;;  %p11263_p4 = scmp.lt.s32.totalorder %s11257_s13, %s11257_s13 }
  0x57   :  { %p11264_p5 = por %p11263_p4, %p11262_p3 }
  0x59   :  { %p11265_p6 = pnand %p11264_p5, %p11258_p2 }
  0x5b   :  { %11268 = shalt.err (!%p11265_p6)
}
  0x5c   :  { %s16508_s5 = sld [smem:[#allocation72_spill]]  ;;  %s11434_s0 = smov [#allocation7]  }
  0x5d   :  { %s69_s28 = sshll.u32 %s11434_s0, 4  ;;  %s11435_s29 = smov [#allocation10]   ;;  %s70_s28 = int_to_ptr.vmem [resolvable:$true] %s69_s28 }
  0x5e   :  { %s95_s2 = sshll.u32 %s11435_s29, 4  ;;  %s11277_s6 = scalar_lea.vmem %s70_s28, 1152  ;;  %s96_s2 = int_to_ptr.vmem [resolvable:$true] %s95_s2 }
  0x5f   :  { %p11278_p7 = scmp.ne.s32.totalorder %s70_s28, %s11277_s6  ;;  %p11282_p8 = scmp.lt.s32.totalorder %s70_s28, %s70_s28 }
  0x60   :  { %p11283_p9 = scmp.lt.s32.totalorder %s11277_s6, %s11277_s6 }
  0x62   :  { %51 = dma.hbm_to_vmem [thread:$0]  %s16508_s5, 128, %s49_s10, [#allocation3]  }
  0x63   :  { %p11284_p10 = por %p11283_p9, %p11282_p8 }
  0x65   :  { %p11285_p11 = pnand %p11284_p10, %p11278_p7 }
  0x67   :  { %11288 = shalt.err (!%p11285_p11)
}
  0x68   :  { %s16509_s26 = sld [smem:[#allocation74_spill]]  ;;  %s11297_s10 = scalar_lea.vmem %s96_s2, 640 }
  0x69   :  { %p11298_p12 = scmp.ne.s32.totalorder %s96_s2, %s11297_s10  ;;  %p11302_p13 = scmp.lt.s32.totalorder %s96_s2, %s96_s2 }
  0x6a   :  { %p11303_p0 = scmp.lt.s32.totalorder %s11297_s10, %s11297_s10 }
  0x6c   :  { %p11304_p1 = por %p11303_p0, %p11302_p13 }
  0x6e   :  { %75 = dma.hbm_to_vmem [thread:$0]  %s16509_s26, 1152, %s70_s28, [#allocation6], %s11426_s30, %s11426_s30, %s11427_s7  }
  0x6f   :  { %p11305_p2 = pnand %p11304_p1, %p11298_p12 }
  0x71   :  { %11308 = shalt.err (!%p11305_p2)
}
  0x72   :  { %s16510_s4 = sld [smem:[#allocation77_spill]]  ;;  %s11436_s13 = smov [#allocation13]  }
  0x73   :  { %s119_s27 = sshll.u32 %s11436_s13, 4  ;;  %s11437_s9 = smov [#allocation16]   ;;  %s120_s27 = int_to_ptr.vmem [resolvable:$true] %s119_s27 }
  0x74   :  { %s143_s5 = sshll.u32 %s11437_s9, 4  ;;  %s11317_s0 = scalar_lea.vmem %s120_s27, 384  ;;  %s144_s5 = int_to_ptr.vmem [resolvable:$true] %s143_s5 }
  0x75   :  { %p11318_p3 = scmp.ne.s32.totalorder %s120_s27, %s11317_s0  ;;  %p11322_p4 = scmp.lt.s32.totalorder %s120_s27, %s120_s27 }
  0x76   :  { %p11323_p5 = scmp.lt.s32.totalorder %s11317_s0, %s11317_s0 }
  0x78   :  { %101 = dma.hbm_to_vmem [thread:$0]  %s16510_s4, 640, %s96_s2, [#allocation9], %s11426_s30, %s11426_s30, %s11427_s7  }
  0x79   :  { %p11324_p6 = por %p11323_p5, %p11322_p4 }
  0x7b   :  { %p11325_p7 = pnand %p11324_p6, %p11318_p3 }
  0x7d   :  { %11328 = shalt.err (!%p11325_p7)
}
  0x7e   :  { %s16511_s6 = sld [smem:[#allocation79_spill]]  ;;  %s11337_s2 = scalar_lea.vmem %s144_s5, 14336 }
  0x7f   :  { %p11338_p8 = scmp.ne.s32.totalorder %s144_s5, %s11337_s2  ;;  %p11342_p9 = scmp.lt.s32.totalorder %s144_s5, %s144_s5 }
  0x80   :  { %p11343_p10 = scmp.lt.s32.totalorder %s11337_s2, %s11337_s2 }
  0x82   :  { %p11344_p11 = por %p11343_p10, %p11342_p9 }
  0x84   :  { %125 = dma.hbm_to_vmem [thread:$0]  %s16511_s6, 384, %s120_s27, [#allocation12], %s11426_s30, %s11426_s30, %s11427_s7  }
  0x85   :  { %p11345_p12 = pnand %p11344_p11, %p11338_p8 }
  0x87   :  { %11348 = shalt.err (!%p11345_p12)
}
  0x88   :  { %149 = dma.hbm_to_vmem [thread:$0]  %s16400_s11, 14336, %s144_s5, [#allocation15], %s11426_s30, %s11426_s30, %s11427_s7  }
  0x89   :  { %s11438_s26 = smov [#allocation19]   ;;  %s11439_s1 = smov [#allocation22]  }
  0x8a   :  { %s169_s10 = sshll.u32 %s11438_s26, 4  ;;  %s201_s8 = sshll.u32 %s11439_s1, 4  ;;  %s170_s10 = int_to_ptr.vmem [resolvable:$true] %s169_s10  ;;  %s202_s8 = int_to_ptr.vmem [resolvable:$true] %s201_s8 }
  0x8b   :  { %s11357_s4 = scalar_lea.vmem %s170_s10, 14336  ;;  %p11362_p0 = scmp.lt.s32.totalorder %s170_s10, %s170_s10 }
  0x8c   :  { %p11358_p13 = scmp.ne.s32.totalorder %s170_s10, %s11357_s4  ;;  %p11363_p1 = scmp.lt.s32.totalorder %s11357_s4, %s11357_s4 }
  0x8e   :  { %p11364_p2 = por %p11363_p1, %p11362_p0 }
  0x90   :  { %p11365_p3 = pnand %p11364_p2, %p11358_p13 }
  0x92   :  { %11368 = shalt.err (!%p11365_p3)
}
  0x93   :  { %175 = dma.hbm_to_vmem [thread:$0]  %s16403_s14, 14336, %s170_s10, [#allocation18], %s11426_s30, %s11426_s30, %s11427_s7  }
  0x94   :  { %s11377_s11 = scalar_lea.vmem %s202_s8, 28672  ;;  %p11382_p5 = scmp.lt.s32.totalorder %s202_s8, %s202_s8 }
  0x95   :  { %p11378_p4 = scmp.ne.s32.totalorder %s202_s8, %s11377_s11  ;;  %p11383_p6 = scmp.lt.s32.totalorder %s11377_s11, %s11377_s11 }
  0x97   :  { %p11384_p7 = por %p11383_p6, %p11382_p5 }
  0x99   :  { %p11385_p8 = pnand %p11384_p7, %p11378_p4 }
  0x9b   :  { %11388 = shalt.err (!%p11385_p8)
}
  0x9c   :  { %s11440_s9 = smov 256   ;;  %s11441_s5 = smov 16  }
  0x9d   :  { %207 = dma.hbm_to_vmem [thread:$0]  %s16409_s20, 28672, %s202_s8, [#allocation21], %s11440_s9, %s11440_s9, %s11441_s5  }
  0x9e   :  { %11409 = dma.done.wait [#allocation3], 128  }
  0x9f   :  { %11410 = vsyncadd [#allocation3], 4294967168 }
  0xa0   :  { %11411 = dma.done.wait [#allocation6], 2304  }
  0xa1   :  { %11412 = vsyncadd [#allocation6], 4294964992 }
  0xa2   :  { %11413 = dma.done.wait [#allocation9], 1280  }
  0xa3   :  { %11414 = vsyncadd [#allocation9], 4294966016 }
  0xa4   :  { %11415 = dma.done.wait [#allocation12], 14720  }
  0xa5   :  { %11416 = vsyncadd [#allocation12], 4294952576 }
  0xa6   :  { %11417 = dma.done.wait [#allocation15], 14720  }
  0xa7   :  { %11418 = vsyncadd [#allocation15], 4294952576 }
  0xa8   :  { %11419 = dma.done.wait [#allocation18], 14592  }
  0xa9   :  { %11420 = vsyncadd [#allocation18], 4294952704 }
  0xaa   :  { %11421 = dma.done.wait [#allocation21], 43008  }
  0xab   :  { %11422 = vsyncadd [#allocation21], 4294924288  ;;  %vm319_vm0 = vcmask 7168   ;;  %s16512_s7 = sld [smem:[#allocation70_spill]]  ;;  %vm827_vm1 = vcmask 1041408   ;;  %vm879_vm2 = vcmask 1040384  }
  0xac   :  { %s16513_s14 = sld [smem:[#allocation71_spill]]  ;;  %vm1579_vm3 = vcmask 1044480   ;;  %vm1372_vm4 = vcmask 1045504   ;;  %vm1160_vm5 = vcmask 1046528   ;;  %vm11444_vm6 = vmmov 0  }
  0xad   :  { %s16783_s0 = sld [smem:[#allocation75_spill]] }
  0xb1   :  { %v11651_v0 = vld [vmem:[%s16512_s7] sm:$0xff]  ;;  %v11656_v1 = vld [vmem:[%s16512_s7 + $0x8] sm:$0xff]  ;;  %v11661_v2 = vld [vmem:[%s16512_s7 + $0x10] sm:$0xff] }
  0xb2   :  { %v11666_v3 = vld [vmem:[%s16512_s7 + $0x18] sm:$0xff]  ;;  %v320_v4 = vsel %vm319_vm0, %v11651_v0, 0.0  ;;  %v321_v5 = vsel %vm319_vm0, %v11656_v1, 0.0  ;;  %v323_v6 = vsel %vm319_vm0, %v11661_v2, 0.0  ;;  %v11677_v7 = vld [vmem:[%s16512_s7 + $0x20] sm:$0xff]  ;;  %v11684_v10 = vld [vmem:[%s16512_s7 + $0x28] sm:$0xff] }
  0xb3   :  { %v322_v8 = vadd.f32 %v321_v5, %v320_v4  ;;  %v325_v9 = vsel %vm319_vm0, %v11666_v3, 0.0  ;;  %v327_v12 = vsel %vm319_vm0, %v11677_v7, 0.0  ;;  %v11691_v13 = vld [vmem:[%s16512_s7 + $0x30] sm:$0xff]  ;;  %v329_v15 = vsel %vm319_vm0, %v11684_v10, 0.0  ;;  %v11698_v16 = vld [vmem:[%s16512_s7 + $0x38] sm:$0xff]  ;;  %v11705_v19 = vld [vmem:[%s16512_s7 + $0x40] sm:$0xff] }
  0xb4   :  { %v331_v18 = vsel %vm319_vm0, %v11691_v13, 0.0  ;;  %v11710_v21 = vld [vmem:[%s16513_s14] sm:$0xff]  ;;  %v333_v22 = vsel %vm319_vm0, %v11698_v16, 0.0  ;;  %v11717_v23 = vld [vmem:[%s16513_s14 + $0x8] sm:$0xff]  ;;  %v11722_v24 = vld [vmem:[%s16513_s14 + $0x10] sm:$0xff]  ;;  %v335_v31 = vsel %vm319_vm0, %v11705_v19, 0.0 }
  0xb5   :  { %v324_v11 = vadd.f32 %v323_v6, %v322_v8  ;;  %v11727_v25 = vld [vmem:[%s16513_s14 + $0x18] sm:$0xff]  ;;  %v393_v26 = vsel %vm319_vm0, %v11710_v21, 0.0  ;;  %v11734_v27 = vld [vmem:[%s16512_s7 + $0x48] sm:$0xff]  ;;  %v394_v29 = vsel %vm319_vm0, %v11717_v23, 0.0  ;;  %v396_v30 = vsel %vm319_vm0, %v11722_v24, 0.0  ;;  %v11745_v32 = vld [vmem:[%s16513_s14 + $0x20] sm:$0xff] }
  0xb6   :  { %v395_v33 = vadd.f32 %v394_v29, %v393_v26  ;;  %v11750_v34 = vld [vmem:[%s16512_s7 + $0x50] sm:$0xff]  ;;  %v398_v36 = vsel %vm319_vm0, %v11727_v25, 0.0  ;;  %v337_v37 = vsel %vm319_vm0, %v11734_v27, 0.0  ;;  %v11759_v38 = vld [vmem:[%s16513_s14 + $0x28] sm:$0xff]  ;;  %v11764_v40 = vld [vmem:[%s16512_s7 + $0x58] sm:$0xff]  ;;  %v400_v42 = vsel %vm319_vm0, %v11745_v32, 0.0 }
  0xb7   :  { %v326_v14 = vadd.f32 %v325_v9, %v324_v11  ;;  %v339_v43 = vsel %vm319_vm0, %v11750_v34, 0.0  ;;  %v11773_v44 = vld [vmem:[%s16513_s14 + $0x30] sm:$0xff]  ;;  %v11778_v46 = vld [vmem:[%s16512_s7 + $0x60] sm:$0xff]  ;;  %v402_v48 = vsel %vm319_vm0, %v11759_v38, 0.0  ;;  %v341_v49 = vsel %vm319_vm0, %v11764_v40, 0.0  ;;  %v11787_v50 = vld [vmem:[%s16513_s14 + $0x38] sm:$0xff] }
  0xb8   :  { %v397_v39 = vadd.f32 %v396_v30, %v395_v33  ;;  %v11792_v52 = vld [vmem:[%s16512_s7 + $0x68] sm:$0xff]  ;;  %v404_v54 = vsel %vm319_vm0, %v11773_v44, 0.0  ;;  %v343_v55 = vsel %vm319_vm0, %v11778_v46, 0.0  ;;  %v11801_v56 = vld [vmem:[%s16513_s14 + $0x40] sm:$0xff]  ;;  %v11806_v58 = vld [vmem:[%s16512_s7 + $0x70] sm:$0xff]  ;;  %v406_v60 = vsel %vm319_vm0, %v11787_v50, 0.0 }
  0xb9   :  { %v328_v17 = vadd.f32 %v327_v12, %v326_v14  ;;  %v345_v61 = vsel %vm319_vm0, %v11792_v52, 0.0  ;;  %v11815_v62 = vld [vmem:[%s16513_s14 + $0x48] sm:$0xff]  ;;  %v11820_v4 = vld [vmem:[%s16512_s7 + $0x78] sm:$0xff]  ;;  %v408_v6 = vsel %vm319_vm0, %v11801_v56, 0.0  ;;  %v347_v8 = vsel %vm319_vm0, %v11806_v58, 0.0  ;;  %v11829_v9 = vld [vmem:[%s16513_s14 + $0x50] sm:$0xff] }
  0xba   :  { %v399_v45 = vadd.f32 %v398_v36, %v397_v39  ;;  %v11834_v12 = vld [vmem:[%s16512_s7 + $0x80] sm:$0xff]  ;;  %v11862_v33 = vld [vmem:[%s16512_s7 + $0x90] sm:$0xff]  ;;  %v11871_v39 = vld [vmem:[%s16513_s14 + $0x68] sm:$0xff] }
  0xbb   :  { %v330_v20 = vadd.f32 %v329_v15, %v328_v17  ;;  %v410_v15 = vsel %vm319_vm0, %v11815_v62, 0.0  ;;  %v349_v17 = vsel %vm319_vm0, %v11820_v4, 0.0  ;;  %v351_v29 = vsel %vm319_vm0, %v11834_v12, 0.0  ;;  %v11857_v30 = vld [vmem:[%s16513_s14 + $0x60] sm:$0xff] }
  0xbc   :  { %v401_v51 = vadd.f32 %v400_v42, %v399_v45  ;;  %v11876_v42 = vld [vmem:[%s16512_s7 + $0x98] sm:$0xff]  ;;  %v416_v45 = vsel %vm319_vm0, %v11857_v30, 0.0 }
  0xbd   :  { %v332_v28 = vadd.f32 %v331_v18, %v330_v20  ;;  %v11843_v18 = vld [vmem:[%s16513_s14 + $0x58] sm:$0xff] }
  0xbe   :  { %v403_v57 = vadd.f32 %v402_v48, %v401_v51  ;;  %v414_v36 = vsel %vm319_vm0, %v11843_v18, 0.0  ;;  %v11885_v48 = vld [vmem:[%s16513_s14 + $0x70] sm:$0xff]  ;;  %v11890_v51 = vld [vmem:[%s16512_s7 + $0xa0] sm:$0xff] }
  0xbf   :  { %v334_v35 = vadd.f32 %v333_v22, %v332_v28  ;;  %v11848_v22 = vld [vmem:[%s16512_s7 + $0x88] sm:$0xff]  ;;  %v412_v28 = vsel %vm319_vm0, %v11829_v9, 0.0 }
  0xc0   :  { %v405_v63 = vadd.f32 %v404_v54, %v403_v57  ;;  %v418_v54 = vsel %vm319_vm0, %v11871_v39, 0.0  ;;  %v11899_v57 = vld [vmem:[%s16513_s14 + $0x78] sm:$0xff] }
  0xc1   :  { %v336_v41 = vadd.f32 %v335_v31, %v334_v35 }
  0xc2   :  { %v407_v11 = vadd.f32 %v406_v60, %v405_v63  ;;  %v11904_v60 = vld [vmem:[%s16512_s7 + $0xa8] sm:$0xff]  ;;  %v420_v63 = vsel %vm319_vm0, %v11885_v48, 0.0 }
  0xc3   :  { %v338_v47 = vadd.f32 %v337_v37, %v336_v41  ;;  %v353_v37 = vsel %vm319_vm0, %v11848_v22, 0.0 }
  0xc4   :  { %v409_v20 = vadd.f32 %v408_v6, %v407_v11  ;;  %v11913_v6 = vld [vmem:[%s16513_s14 + $0x80] sm:$0xff]  ;;  %v11918_v11 = vld [vmem:[%s16512_s7 + $0xb0] sm:$0xff] }
  0xc5   :  { %v340_v53 = vadd.f32 %v339_v43, %v338_v47  ;;  %v355_v47 = vsel %vm319_vm0, %v11862_v33, 0.0 }
  0xc6   :  { %v411_v31 = vadd.f32 %v410_v15, %v409_v20  ;;  %v422_v15 = vsel %vm319_vm0, %v11899_v57, 0.0  ;;  %v11927_v20 = vld [vmem:[%s16513_s14 + $0x88] sm:$0xff] }
  0xc7   :  { %v342_v59 = vadd.f32 %v341_v49, %v340_v53  ;;  %16514 = vst [vmem:[#allocation32_spill] sm:$0xff] %v11927_v20 }
  0xc8   :  { %v413_v41 = vadd.f32 %v412_v28, %v411_v31  ;;  %v11932_v28 = vld [vmem:[%s16512_s7 + $0xb8] sm:$0xff]  ;;  %v424_v31 = vsel %vm319_vm0, %v11913_v6, 0.0 }
  0xc9   :  { %v344_v5 = vadd.f32 %v343_v55, %v342_v59  ;;  %v357_v55 = vsel %vm319_vm0, %v11876_v42, 0.0 }
  0xca   :  { %v415_v49 = vadd.f32 %v414_v36, %v413_v41  ;;  %v11941_v36 = vld [vmem:[%s16513_s14 + $0x90] sm:$0xff]  ;;  %v11946_v41 = vld [vmem:[%s16512_s7 + $0xc0] sm:$0xff] }
  0xcb   :  { %v346_v14 = vadd.f32 %v345_v61, %v344_v5  ;;  %v359_v5 = vsel %vm319_vm0, %v11890_v51, 0.0  ;;  %16515 = vst [vmem:[#allocation33_spill] sm:$0xff] %v11941_v36 }
  0xcc   :  { %v417_v59 = vadd.f32 %v416_v45, %v415_v49  ;;  %v426_v45 = vsel %vm319_vm0, %v11927_v20, 0.0  ;;  %v11955_v49 = vld [vmem:[%s16513_s14 + $0x98] sm:$0xff] }
  0xcd   :  { %v348_v26 = vadd.f32 %v347_v8, %v346_v14  ;;  %16516 = vst [vmem:[#allocation34_spill] sm:$0xff] %v11955_v49 }
  0xce   :  { %v419_v8 = vadd.f32 %v418_v54, %v417_v59  ;;  %v11960_v54 = vld [vmem:[%s16512_s7 + $0xc8] sm:$0xff]  ;;  %v428_v59 = vsel %vm319_vm0, %v11941_v36, 0.0 }
  0xcf   :  { %v350_v35 = vadd.f32 %v349_v17, %v348_v26  ;;  %v361_v17 = vsel %vm319_vm0, %v11904_v60, 0.0 }
  0xd0   :  { %v421_v26 = vadd.f32 %v420_v63, %v419_v8  ;;  %v11969_v63 = vld [vmem:[%s16513_s14 + $0xa0] sm:$0xff]  ;;  %v11974_v8 = vld [vmem:[%s16512_s7 + $0xd0] sm:$0xff] }
  0xd1   :  { %v352_v43 = vadd.f32 %v351_v29, %v350_v35  ;;  %v363_v35 = vsel %vm319_vm0, %v11918_v11, 0.0  ;;  %16517 = vst [vmem:[#allocation35_spill] sm:$0xff] %v11969_v63 }
  0xd3   :  { %v354_v53 = vadd.f32 %v353_v37, %v352_v43  ;;  %v423_v37 = vadd.f32 %v422_v15, %v421_v26  ;;  %v430_v15 = vsel %vm319_vm0, %v11955_v49, 0.0  ;;  %v11983_v26 = vld [vmem:[%s16513_s14 + $0xa8] sm:$0xff] }
  0xd4   :  { %16518 = vst [vmem:[#allocation36_spill] sm:$0xff] %v11983_v26 }
  0xd5   :  { %v356_v61 = vadd.f32 %v355_v47, %v354_v53  ;;  %v365_v47 = vsel %vm319_vm0, %v11932_v28, 0.0  ;;  %v425_v53 = vadd.f32 %v424_v31, %v423_v37  ;;  %v11988_v31 = vld [vmem:[%s16512_s7 + $0xd8] sm:$0xff]  ;;  %v432_v37 = vsel %vm319_vm0, %v11969_v63, 0.0 }
  0xd6   :  { %16519 = vst [vmem:[#allocation37_spill] sm:$0xff] %v11988_v31 }
  0xd7   :  { %v358_v14 = vadd.f32 %v357_v55, %v356_v61  ;;  %v367_v61 = vsel %vm319_vm0, %v11946_v41, 0.0 }
  0xd9   :  { %v360_v29 = vadd.f32 %v359_v5, %v358_v14  ;;  %v427_v5 = vadd.f32 %v426_v45, %v425_v53  ;;  %v11997_v45 = vld [vmem:[%s16513_s14 + $0xb0] sm:$0xff]  ;;  %v12002_v53 = vld [vmem:[%s16512_s7 + $0xe0] sm:$0xff] }
  0xda   :  { %16520 = vst [vmem:[#allocation38_spill] sm:$0xff] %v11997_v45  ;;  %16521 = vst [vmem:[#allocation39_spill] sm:$0xff] %v12002_v53 }
  0xdb   :  { %v362_v43 = vadd.f32 %v361_v17, %v360_v29  ;;  %v369_v17 = vsel %vm319_vm0, %v11960_v54, 0.0  ;;  %v429_v29 = vadd.f32 %v428_v59, %v427_v5  ;;  %v434_v59 = vsel %vm319_vm0, %v11983_v26, 0.0  ;;  %v12011_v5 = vld [vmem:[%s16513_s14 + $0xb8] sm:$0xff]  ;;  %v12025_v26 = vld [vmem:[%s16513_s14 + $0xc0] sm:$0xff] }
  0xdc   :  { %16522 = vst [vmem:[#allocation40_spill] sm:$0xff] %v12011_v5  ;;  %16524 = vst [vmem:[#allocation42_spill] sm:$0xff] %v12025_v26 }
  0xdd   :  { %v364_v55 = vadd.f32 %v363_v35, %v362_v43  ;;  %v371_v43 = vsel %vm319_vm0, %v11974_v8, 0.0 }
  0xdf   :  { %v366_v14 = vadd.f32 %v365_v47, %v364_v55  ;;  %v431_v47 = vadd.f32 %v430_v15, %v429_v29  ;;  %v12016_v15 = vld [vmem:[%s16512_s7 + $0xe8] sm:$0xff] }
  0xe0   :  { %16523 = vst [vmem:[#allocation41_spill] sm:$0xff] %v12016_v15 }
  0xe1   :  { %v368_v35 = vadd.f32 %v367_v61, %v366_v14  ;;  %v373_v61 = vsel %vm319_vm0, %v11988_v31, 0.0  ;;  %v433_v14 = vadd.f32 %v432_v37, %v431_v47  ;;  %v12030_v37 = vld [vmem:[%s16512_s7 + $0xf0] sm:$0xff] }
  0xe2   :  { %16525 = vst [vmem:[#allocation43_spill] sm:$0xff] %v12030_v37 }
  0xe3   :  { %v370_v55 = vadd.f32 %v369_v17, %v368_v35  ;;  %v436_v17 = vsel %vm319_vm0, %v11997_v45, 0.0  ;;  %v375_v35 = vsel %vm319_vm0, %v12002_v53, 0.0  ;;  %v435_v63 = vadd.f32 %v434_v59, %v433_v14  ;;  %v12039_v45 = vld [vmem:[%s16513_s14 + $0xc8] sm:$0xff]  ;;  %v12044_v59 = vld [vmem:[%s16512_s7 + $0xf8] sm:$0xff] }
  0xe4   :  { %16526 = vst [vmem:[#allocation44_spill] sm:$0xff] %v12039_v45  ;;  %16527 = vst [vmem:[#allocation45_spill] sm:$0xff] %v12044_v59 }
  0xe5   :  { %v372_v29 = vadd.f32 %v371_v43, %v370_v55  ;;  %v438_v43 = vsel %vm319_vm0, %v12011_v5, 0.0  ;;  %v377_v55 = vsel %vm319_vm0, %v12016_v15, 0.0  ;;  %v437_v49 = vadd.f32 %v436_v17, %v435_v63  ;;  %v12053_v5 = vld [vmem:[%s16513_s14 + $0xd0] sm:$0xff] }
  0xe6   :  { %16528 = vst [vmem:[#allocation46_spill] sm:$0xff] %v12053_v5  ;;  %v442_v63 = vsel %vm319_vm0, %v12039_v45, 0.0  ;;  %v381_v17 = vsel %vm319_vm0, %v12044_v59, 0.0  ;;  %v12076_v45 = vld [vmem:[%s16513_s14 + $0xe8] sm:$0xff] }
  0xe7   :  { %v374_v47 = vadd.f32 %v373_v61, %v372_v29  ;;  %v440_v61 = vsel %vm319_vm0, %v12025_v26, 0.0  ;;  %v379_v29 = vsel %vm319_vm0, %v12030_v37, 0.0  ;;  %v439_v15 = vadd.f32 %v438_v43, %v437_v49  ;;  %v12069_v49 = vld [vmem:[%s16513_s14 + $0xe0] sm:$0xff]  ;;  %16531 = vst [vmem:[#allocation49_spill] sm:$0xff] %v12076_v45 }
  0xe8   :  { %v444_v37 = vsel %vm319_vm0, %v12053_v5, 0.0  ;;  %16530 = vst [vmem:[#allocation48_spill] sm:$0xff] %v12069_v49 }
  0xe9   :  { %v376_v14 = vadd.f32 %v375_v35, %v374_v47  ;;  %v12062_v35 = vld [vmem:[%s16513_s14 + $0xd8] sm:$0xff]  ;;  %v441_v47 = vadd.f32 %v440_v61, %v439_v15  ;;  %v12083_v61 = vld [vmem:[%s16513_s14 + $0xf0] sm:$0xff] }
  0xea   :  { %16529 = vst [vmem:[#allocation47_spill] sm:$0xff] %v12062_v35  ;;  %16532 = vst [vmem:[#allocation50_spill] sm:$0xff] %v12083_v61 }
  0xeb   :  { %v378_v53 = vadd.f32 %v377_v55, %v376_v14  ;;  %v443_v43 = vadd.f32 %v442_v63, %v441_v47  ;;  %v446_v14 = vsel %vm319_vm0, %v12062_v35, 0.0  ;;  %v12090_v63 = vld [vmem:[%s16513_s14 + $0xf8] sm:$0xff] }
  0xed   :  { %v380_v26 = vadd.f32 %v379_v29, %v378_v53  ;;  %v445_v15 = vadd.f32 %v444_v37, %v443_v43  ;;  %v448_v53 = vsel %vm319_vm0, %v12069_v49, 0.0  ;;  %v452_v37 = vsel %vm319_vm0, %v12083_v61, 0.0 }
  0xee   :  { %v454_v43 = vsel %vm319_vm0, %v12090_v63, 0.0 }
  0xef   :  { %v382_v55 = vadd.f32 %v381_v17, %v380_v26  ;;  %v447_v29 = vadd.f32 %v446_v14, %v445_v15  ;;  %v450_v26 = vsel %vm319_vm0, %v12076_v45, 0.0 }
  0xf1   :  { %383 = vadd.xlane.f32.xlu0 %v382_v55  ;;  %v449_v17 = vadd.f32 %v448_v53, %v447_v29 }
  0xf3   :  { %v451_v47 = vadd.f32 %v450_v26, %v449_v17 }
  0xf5   :  { %v453_v55 = vadd.f32 %v452_v37, %v451_v47 }
  0xf7   :  { %v455_v49 = vadd.f32 %v454_v43, %v453_v55 }
  0xf9   :  { %456 = vadd.xlane.f32.xlu0 %v455_v49 }
 0x17a   :  { %v384_v14 = vpop.xlane.xlu0 %383 }
 0x17b   :  { %v385_v15 = vrot.slane %v384_v14, 4 }
 0x17d   :  { %v386_v35 = vadd.f32 %v385_v15, %v384_v14 }
 0x17f   :  { %v387_v45 = vrot.slane %v386_v35, 2 }
 0x181   :  { %v388_v5 = vadd.f32 %v387_v45, %v386_v35 }
 0x182   :  { %v457_v36 = vpop.xlane.xlu0 %456 }
 0x183   :  { %v389_v59 = vrot.slane %v388_v5, 1  ;;  %v458_v20 = vrot.slane %v457_v36, 4 }
 0x185   :  { %v390_v31 = vadd.f32 %v389_v59, %v388_v5  ;;  %v459_v53 = vadd.f32 %v458_v20, %v457_v36 }
 0x187   :  { %11080 = vpush %v390_v31  ;;  %v460_v29 = vrot.slane %v459_v53, 2 }
 0x189   :  { %v461_v61 = vadd.f32 %v460_v29, %v459_v53 }
 0x18b   :  { %v462_v26 = vrot.slane %v461_v61, 1 }
 0x18d   :  { %v463_v17 = vadd.f32 %v462_v26, %v461_v61 }
 0x18f   :  { %11082 = vpush %v463_v17 }
 0x1b8   :  { %s11081_s14 = spop %11080 }
 0x1b9   :  { %v392_v49 = vstv %s11081_s14 }
 0x1c0   :  { %s11083_s13 = spop %11082 }
 0x1c1   :  { %v465_v37 = vstv %s11083_s13 }
 0x1c2   :  { %v466_v47 = vadd.f32 %v465_v37, %v392_v49 }
 0x1c4   :  { %v12096_v43 = vmul.f32 0.001953125, %v466_v47 }
 0x1c6   :  { %v12100_v45 = vsub.f32 %v11651_v0, %v12096_v43  ;;  %v12104_v31 = vsub.f32 %v11656_v1, %v12096_v43  ;;  %v12108_v20 = vsub.f32 %v11661_v2, %v12096_v43  ;;  %v12112_v36 = vsub.f32 %v11666_v3, %v12096_v43 }
 0x1c7   :  { %v12120_v0 = vsub.f32 %v11677_v7, %v12096_v43  ;;  %v12126_v2 = vsub.f32 %v11684_v10, %v12096_v43  ;;  %v12134_v14 = vsub.f32 %v11691_v13, %v12096_v43  ;;  %v12141_v10 = vsub.f32 %v11698_v16, %v12096_v43 }
 0x1c8   :  { %v532_v5 = vmul.f32 %v12100_v45, %v12100_v45  ;;  %v533_v59 = vmul.f32 %v12104_v31, %v12104_v31  ;;  %v534_v1 = vmul.f32 %v12108_v20, %v12108_v20  ;;  %v535_v3 = vmul.f32 %v12112_v36, %v12112_v36 }
 0x1c9   :  { %v536_v7 = vmul.f32 %v12120_v0, %v12120_v0  ;;  %v537_v29 = vmul.f32 %v12126_v2, %v12126_v2  ;;  %v12148_v13 = vsub.f32 %v11705_v19, %v12096_v43  ;;  %v538_v37 = vmul.f32 %v12134_v14, %v12134_v14 }
 0x1ca   :  { %v564_v35 = vsel %vm319_vm0, %v532_v5, 0.0  ;;  %v565_v61 = vsel %vm319_vm0, %v533_v59, 0.0  ;;  %v567_v15 = vsel %vm319_vm0, %v534_v1, 0.0  ;;  %v569_v26 = vsel %vm319_vm0, %v535_v3, 0.0 }
 0x1cb   :  { %v566_v55 = vadd.f32 %v565_v61, %v564_v35  ;;  %v571_v49 = vsel %vm319_vm0, %v536_v7, 0.0  ;;  %v12155_v16 = vsub.f32 %v11734_v27, %v12096_v43  ;;  %v539_v5 = vmul.f32 %v12141_v10, %v12141_v10 }
 0x1cc   :  { %v573_v59 = vsel %vm319_vm0, %v537_v29, 0.0  ;;  %v12162_v1 = vsub.f32 %v11750_v34, %v12096_v43  ;;  %v12166_v3 = vsub.f32 %v11710_v21, %v12096_v43  ;;  %v12170_v35 = vsub.f32 %v11717_v23, %v12096_v43 }
 0x1cd   :  { %v568_v53 = vadd.f32 %v567_v15, %v566_v55  ;;  %v540_v27 = vmul.f32 %v12148_v13, %v12148_v13  ;;  %v575_v61 = vsel %vm319_vm0, %v538_v37, 0.0  ;;  %v12177_v7 = vsub.f32 %v11764_v40, %v12096_v43 }
 0x1ce   :  { %v12181_v34 = vsub.f32 %v11722_v24, %v12096_v43  ;;  %v541_v21 = vmul.f32 %v12155_v16, %v12155_v16  ;;  %v577_v23 = vsel %vm319_vm0, %v539_v5, 0.0  ;;  %v12188_v15 = vsub.f32 %v11778_v46, %v12096_v43 }
 0x1cf   :  { %v570_v17 = vadd.f32 %v569_v26, %v568_v53  ;;  %v12192_v53 = vsub.f32 %v11727_v25, %v12096_v43  ;;  %v542_v40 = vmul.f32 %v12162_v1, %v12162_v1  ;;  %v579_v24 = vsel %vm319_vm0, %v540_v27, 0.0 }
 0x1d0   :  { %v637_v26 = vmul.f32 %v12166_v3, %v12166_v3  ;;  %v12203_v46 = vsub.f32 %v11792_v52, %v12096_v43  ;;  %v12207_v25 = vsub.f32 %v11745_v32, %v12096_v43  ;;  %v639_v5 = vmul.f32 %v12181_v34, %v12181_v34 }
 0x1d1   :  { %v572_v47 = vadd.f32 %v571_v49, %v570_v17  ;;  %v638_v17 = vmul.f32 %v12170_v35, %v12170_v35  ;;  %v543_v49 = vmul.f32 %v12177_v7, %v12177_v7  ;;  %v12220_v52 = vsub.f32 %v11759_v38, %v12096_v43 }
 0x1d2   :  { %v544_v32 = vmul.f32 %v12188_v15, %v12188_v15  ;;  %v583_v27 = vsel %vm319_vm0, %v542_v40, 0.0  ;;  %v12235_v38 = vsub.f32 %v11773_v44, %v12096_v43  ;;  %v545_v40 = vmul.f32 %v12203_v46, %v12203_v46 }
 0x1d3   :  { %v574_v19 = vadd.f32 %v573_v59, %v572_v47  ;;  %v581_v47 = vsel %vm319_vm0, %v541_v21, 0.0  ;;  %v12216_v59 = vsub.f32 %v11806_v58, %v12096_v43  ;;  %v670_v21 = vsel %vm319_vm0, %v638_v17, 0.0 }
 0x1d4   :  { %v12231_v58 = vsub.f32 %v11820_v4, %v12096_v43  ;;  %v672_v17 = vsel %vm319_vm0, %v639_v5, 0.0  ;;  %v12245_v4 = vsub.f32 %v11834_v12, %v12096_v43  ;;  %v12249_v44 = vsub.f32 %v11787_v50, %v12096_v43 }
 0x1d5   :  { %v576_v55 = vadd.f32 %v575_v61, %v574_v19  ;;  %v640_v61 = vmul.f32 %v12192_v53, %v12192_v53  ;;  %v12259_v12 = vsub.f32 %v11848_v22, %v12096_v43  ;;  %v12263_v50 = vsub.f32 %v11801_v56, %v12096_v43 }
 0x1d6   :  { %v12273_v22 = vsub.f32 %v11862_v33, %v12096_v43  ;;  %v12277_v56 = vsub.f32 %v11815_v62, %v12096_v43  ;;  %v12287_v33 = vsub.f32 %v11876_v42, %v12096_v43  ;;  %v12291_v62 = vsub.f32 %v11829_v9, %v12096_v43 }
 0x1d7   :  { %v578_v29 = vadd.f32 %v577_v23, %v576_v55  ;;  %v669_v55 = vsel %vm319_vm0, %v637_v26, 0.0  ;;  %v641_v26 = vmul.f32 %v12207_v25, %v12207_v25  ;;  %v674_v5 = vsel %vm319_vm0, %v640_v61, 0.0  ;;  %16533 = vst [vmem:[#allocation51_spill] sm:$0xff] %v12259_v12 }
 0x1d8   :  { %16534 = vst [vmem:[#allocation52_spill] sm:$0xff] %v12273_v22  ;;  %16535 = vst [vmem:[#allocation53_spill] sm:$0xff] %v12287_v33  ;;  %v12301_v42 = vsub.f32 %v11890_v51, %v12096_v43  ;;  %v12305_v9 = vsub.f32 %v11843_v18, %v12096_v43  ;;  %v12315_v51 = vsub.f32 %v11904_v60, %v12096_v43 }
 0x1d9   :  { %v580_v37 = vadd.f32 %v579_v24, %v578_v29  ;;  %v671_v29 = vadd.f32 %v670_v21, %v669_v55  ;;  %v585_v24 = vsel %vm319_vm0, %v543_v49, 0.0  ;;  %v587_v49 = vsel %vm319_vm0, %v544_v32, 0.0 }
 0x1da   :  { %v589_v32 = vsel %vm319_vm0, %v545_v40, 0.0  ;;  %v676_v61 = vsel %vm319_vm0, %v641_v26, 0.0  ;;  %16536 = vst [vmem:[#allocation54_spill] sm:$0xff] %v12301_v42  ;;  %16537 = vst [vmem:[#allocation55_spill] sm:$0xff] %v12315_v51  ;;  %v12319_v18 = vsub.f32 %v11857_v30, %v12096_v43  ;;  %v12329_v60 = vsub.f32 %v11918_v11, %v12096_v43 }
 0x1db   :  { %v582_v19 = vadd.f32 %v581_v47, %v580_v37  ;;  %v673_v47 = vadd.f32 %v672_v17, %v671_v29  ;;  %v643_v29 = vmul.f32 %v12235_v38, %v12235_v38  ;;  %v12333_v30 = vsub.f32 %v11871_v39, %v12096_v43 }
 0x1dc   :  { %16538 = vst [vmem:[#allocation56_spill] sm:$0xff] %v12329_v60  ;;  %v12343_v11 = vsub.f32 %v11932_v28, %v12096_v43  ;;  %v12347_v39 = vsub.f32 %v11885_v48, %v12096_v43  ;;  %v12357_v28 = vsub.f32 %v11946_v41, %v12096_v43  ;;  %v12361_v48 = vsub.f32 %v11899_v57, %v12096_v43 }
 0x1dd   :  { %v584_v23 = vadd.f32 %v583_v27, %v582_v19  ;;  %v546_v19 = vmul.f32 %v12216_v59, %v12216_v59  ;;  %v642_v27 = vmul.f32 %v12220_v52, %v12220_v52  ;;  %v675_v21 = vadd.f32 %v674_v5, %v673_v47 }
 0x1de   :  { %v644_v47 = vmul.f32 %v12249_v44, %v12249_v44  ;;  %16539 = vst [vmem:[#allocation57_spill] sm:$0xff] %v12343_v11  ;;  %16540 = vst [vmem:[#allocation58_spill] sm:$0xff] %v12357_v28  ;;  %v12371_v41 = vsub.f32 %v11960_v54, %v12096_v43  ;;  %v12375_v57 = vsub.f32 %v11913_v6, %v12096_v43 }
 0x1df   :  { %v586_v37 = vadd.f32 %v585_v24, %v584_v23  ;;  %v547_v23 = vmul.f32 %v12231_v58, %v12231_v58  ;;  %v677_v17 = vadd.f32 %v676_v61, %v675_v21  ;;  %v591_v40 = vsel %vm319_vm0, %v546_v19, 0.0 }
 0x1e0   :  { %v678_v26 = vsel %vm319_vm0, %v642_v27, 0.0  ;;  %v645_v21 = vmul.f32 %v12263_v50, %v12263_v50  ;;  %v680_v27 = vsel %vm319_vm0, %v643_v29, 0.0  ;;  %v682_v29 = vsel %vm319_vm0, %v644_v47, 0.0  ;;  %16541 = vst [vmem:[#allocation59_spill] sm:$0xff] %v12371_v41 }
 0x1e1   :  { %v588_v55 = vadd.f32 %v587_v49, %v586_v37  ;;  %v548_v37 = vmul.f32 %v12245_v4, %v12245_v4  ;;  %v679_v5 = vadd.f32 %v678_v26, %v677_v17  ;;  %v593_v19 = vsel %vm319_vm0, %v547_v23, 0.0 }
 0x1e2   :  { %v646_v17 = vmul.f32 %v12277_v56, %v12277_v56  ;;  %v684_v47 = vsel %vm319_vm0, %v645_v21, 0.0  ;;  %v12385_v54 = vsub.f32 %v11974_v8, %v12096_v43 }
 0x1e3   :  { %v590_v24 = vadd.f32 %v589_v32, %v588_v55  ;;  %v549_v55 = vmul.f32 %v12259_v12, %v12259_v12  ;;  %v681_v61 = vadd.f32 %v680_v27, %v679_v5  ;;  %v595_v23 = vsel %vm319_vm0, %v548_v37, 0.0 }
 0x1e4   :  { %v647_v5 = vmul.f32 %v12291_v62, %v12291_v62  ;;  %v686_v21 = vsel %vm319_vm0, %v646_v17, 0.0  ;;  %16542 = vst [vmem:[#allocation60_spill] sm:$0xff] %v12385_v54 }
 0x1e5   :  { %v592_v49 = vadd.f32 %v591_v40, %v590_v24  ;;  %v550_v24 = vmul.f32 %v12273_v22, %v12273_v22  ;;  %v683_v26 = vadd.f32 %v682_v29, %v681_v61  ;;  %v597_v37 = vsel %vm319_vm0, %v549_v55, 0.0 }
 0x1e6   :  { %v648_v61 = vmul.f32 %v12305_v9, %v12305_v9  ;;  %v688_v17 = vsel %vm319_vm0, %v647_v5, 0.0 }
 0x1e7   :  { %v594_v32 = vadd.f32 %v593_v19, %v592_v49  ;;  %v551_v49 = vmul.f32 %v12287_v33, %v12287_v33  ;;  %v685_v27 = vadd.f32 %v684_v47, %v683_v26  ;;  %v599_v55 = vsel %vm319_vm0, %v550_v24, 0.0  ;;  %v16558_v33 = vld [vmem:[#allocation38_spill] sm:$0xff] }
 0x1e8   :  { %v649_v26 = vmul.f32 %v12319_v18, %v12319_v18  ;;  %v690_v5 = vsel %vm319_vm0, %v648_v61, 0.0 }
 0x1e9   :  { %v596_v40 = vadd.f32 %v595_v23, %v594_v32  ;;  %v552_v32 = vmul.f32 %v12301_v42, %v12301_v42  ;;  %v687_v29 = vadd.f32 %v686_v21, %v685_v27  ;;  %v601_v24 = vsel %vm319_vm0, %v551_v49, 0.0  ;;  %v16555_v42 = vld [vmem:[#allocation36_spill] sm:$0xff] }
 0x1ea   :  { %v650_v27 = vmul.f32 %v12333_v30, %v12333_v30  ;;  %v692_v61 = vsel %vm319_vm0, %v649_v26, 0.0 }
 0x1eb   :  { %v598_v19 = vadd.f32 %v597_v37, %v596_v40  ;;  %v553_v40 = vmul.f32 %v12315_v51, %v12315_v51  ;;  %v689_v47 = vadd.f32 %v688_v17, %v687_v29  ;;  %v603_v49 = vsel %vm319_vm0, %v552_v32, 0.0  ;;  %v16552_v51 = vld [vmem:[#allocation35_spill] sm:$0xff] }
 0x1ec   :  { %v651_v29 = vmul.f32 %v12347_v39, %v12347_v39  ;;  %v694_v26 = vsel %vm319_vm0, %v650_v27, 0.0 }
 0x1ed   :  { %v600_v23 = vadd.f32 %v599_v55, %v598_v19  ;;  %v554_v19 = vmul.f32 %v12329_v60, %v12329_v60  ;;  %v691_v21 = vadd.f32 %v690_v5, %v689_v47  ;;  %v605_v32 = vsel %vm319_vm0, %v553_v40, 0.0  ;;  %v16544_v5 = vld [vmem:[#allocation37_spill] sm:$0xff]  ;;  %v16549_v60 = vld [vmem:[#allocation34_spill] sm:$0xff] }
 0x1ee   :  { %v556_v47 = vmul.f32 %v12357_v28, %v12357_v28  ;;  %v12399_v8 = vsub.f32 %v16544_v5, %v12096_v43  ;;  %v696_v27 = vsel %vm319_vm0, %v651_v29, 0.0  ;;  %v16547_v28 = vld [vmem:[#allocation39_spill] sm:$0xff] }
 0x1ef   :  { %v602_v37 = vadd.f32 %v601_v24, %v600_v23  ;;  %v555_v23 = vmul.f32 %v12343_v11, %v12343_v11  ;;  %v16543_v24 = vld [vmem:[#allocation32_spill] sm:$0xff]  ;;  %v607_v40 = vsel %vm319_vm0, %v554_v19, 0.0  ;;  %v16546_v11 = vld [vmem:[#allocation33_spill] sm:$0xff]  ;;  %v12413_v5 = vsub.f32 %v16547_v28, %v12096_v43 }
 0x1f0   :  { %v12389_v6 = vsub.f32 %v16543_v24, %v12096_v43  ;;  %16545 = vst [vmem:[#allocation32_spill] sm:$0xff] %v12399_v8  ;;  %v12403_v24 = vsub.f32 %v16546_v11, %v12096_v43  ;;  %v12417_v11 = vsub.f32 %v16549_v60, %v12096_v43  ;;  %v12431_v60 = vsub.f32 %v16552_v51, %v12096_v43 }
 0x1f1   :  { %v604_v55 = vadd.f32 %v603_v49, %v602_v37  ;;  %v693_v37 = vadd.f32 %v692_v61, %v691_v21  ;;  %v652_v49 = vmul.f32 %v12361_v48, %v12361_v48  ;;  %v609_v19 = vsel %vm319_vm0, %v555_v23, 0.0  ;;  %16548 = vst [vmem:[#allocation37_spill] sm:$0xff] %v12413_v5 }
 0x1f2   :  { %v653_v61 = vmul.f32 %v12375_v57, %v12375_v57  ;;  %v611_v23 = vsel %vm319_vm0, %v556_v47, 0.0  ;;  %v12445_v51 = vsub.f32 %v16555_v42, %v12096_v43  ;;  %v12459_v42 = vsub.f32 %v16558_v33, %v12096_v43 }
 0x1f3   :  { %v606_v17 = vadd.f32 %v605_v32, %v604_v55  ;;  %v695_v21 = vadd.f32 %v694_v26, %v693_v37  ;;  %v557_v32 = vmul.f32 %v12371_v41, %v12371_v41  ;;  %v654_v26 = vmul.f32 %v12389_v6, %v12389_v6  ;;  %v16550_v41 = vld [vmem:[#allocation41_spill] sm:$0xff] }
 0x1f4   :  { %v698_v29 = vsel %vm319_vm0, %v652_v49, 0.0  ;;  %v12427_v28 = vsub.f32 %v16550_v41, %v12096_v43  ;;  %v700_v49 = vsel %vm319_vm0, %v653_v61, 0.0 }
 0x1f5   :  { %v608_v55 = vadd.f32 %v607_v40, %v606_v17  ;;  %v697_v37 = vadd.f32 %v696_v27, %v695_v21  ;;  %v558_v40 = vmul.f32 %v12385_v54, %v12385_v54  ;;  %v613_v47 = vsel %vm319_vm0, %v557_v32, 0.0  ;;  %v16553_v54 = vld [vmem:[#allocation43_spill] sm:$0xff] }
 0x1f6   :  { %16551 = vst [vmem:[#allocation33_spill] sm:$0xff] %v12427_v28  ;;  %v655_v27 = vmul.f32 %v12403_v24, %v12403_v24  ;;  %v12441_v41 = vsub.f32 %v16553_v54, %v12096_v43  ;;  %v702_v61 = vsel %vm319_vm0, %v654_v26, 0.0 }
 0x1f7   :  { %v610_v17 = vadd.f32 %v609_v19, %v608_v55  ;;  %v699_v21 = vadd.f32 %v698_v29, %v697_v37  ;;  %v559_v19 = vmul.f32 %v12399_v8, %v12399_v8  ;;  %v615_v32 = vsel %vm319_vm0, %v558_v40, 0.0  ;;  %v16556_v8 = vld [vmem:[#allocation45_spill] sm:$0xff] }
 0x1f8   :  { %16554 = vst [vmem:[#allocation39_spill] sm:$0xff] %v12441_v41  ;;  %v656_v29 = vmul.f32 %v12417_v11, %v12417_v11  ;;  %v12455_v54 = vsub.f32 %v16556_v8, %v12096_v43  ;;  %v704_v26 = vsel %vm319_vm0, %v655_v27, 0.0  ;;  %v562_v33 = vmul.f32 %v12441_v41, %v12441_v41 }
 0x1f9   :  { %v612_v55 = vadd.f32 %v611_v23, %v610_v17  ;;  %v701_v37 = vadd.f32 %v700_v49, %v699_v21  ;;  %v560_v23 = vmul.f32 %v12413_v5, %v12413_v5  ;;  %v617_v40 = vsel %vm319_vm0, %v559_v19, 0.0  ;;  %v16559_v5 = vld [vmem:[#allocation40_spill] sm:$0xff] }
 0x1fa   :  { %16557 = vst [vmem:[#allocation34_spill] sm:$0xff] %v12455_v54  ;;  %v657_v49 = vmul.f32 %v12431_v60, %v12431_v60  ;;  %v12469_v8 = vsub.f32 %v16559_v5, %v12096_v43  ;;  %v706_v19 = vsel %vm319_vm0, %v656_v29, 0.0  ;;  %v563_v5 = vmul.f32 %v12455_v54, %v12455_v54  ;;  %v16561_v29 = vld [vmem:[#allocation44_spill] sm:$0xff] }
 0x1fb   :  { %v614_v17 = vadd.f32 %v613_v47, %v612_v55  ;;  %v703_v21 = vadd.f32 %v702_v61, %v701_v37  ;;  %v561_v47 = vmul.f32 %v12427_v28, %v12427_v28  ;;  %v658_v37 = vmul.f32 %v12445_v51, %v12445_v51 }
 0x1fc   :  { %v12489_v41 = vsub.f32 %v16561_v29, %v12096_v43 }
 0x1fd   :  { %v616_v55 = vadd.f32 %v615_v32, %v614_v17  ;;  %v705_v12 = vadd.f32 %v704_v26, %v703_v21  ;;  %v619_v17 = vsel %vm319_vm0, %v560_v23, 0.0  ;;  %v16560_v32 = vld [vmem:[#allocation42_spill] sm:$0xff]  ;;  %v659_v21 = vmul.f32 %v12459_v42, %v12459_v42 }
 0x1fe   :  { %v12479_v61 = vsub.f32 %v16560_v32, %v12096_v43  ;;  %v708_v23 = vsel %vm319_vm0, %v657_v49, 0.0  ;;  %v623_v32 = vsel %vm319_vm0, %v562_v33, 0.0  ;;  %v625_v49 = vsel %vm319_vm0, %v563_v5, 0.0  ;;  %v16564_v5 = vld [vmem:[#allocation48_spill] sm:$0xff] }
 0x1ff   :  { %v618_v22 = vadd.f32 %v617_v40, %v616_v55  ;;  %v707_v28 = vadd.f32 %v706_v19, %v705_v12  ;;  %v621_v55 = vsel %vm319_vm0, %v561_v47, 0.0  ;;  %v660_v12 = vmul.f32 %v12469_v8, %v12469_v8  ;;  %v16562_v19 = vld [vmem:[#allocation46_spill] sm:$0xff] }
 0x200   :  { %v12497_v54 = vsub.f32 %v16562_v19, %v12096_v43 }
 0x201   :  { %v620_v27 = vadd.f32 %v619_v17, %v618_v22  ;;  %v709_v26 = vadd.f32 %v708_v23, %v707_v28  ;;  %v710_v22 = vsel %vm319_vm0, %v658_v37, 0.0  ;;  %v661_v28 = vmul.f32 %v12479_v61, %v12479_v61  ;;  %v16563_v23 = vld [vmem:[#allocation47_spill] sm:$0xff] }
 0x202   :  { %v12505_v29 = vsub.f32 %v16563_v23, %v12096_v43  ;;  %v662_v37 = vmul.f32 %v12489_v41, %v12489_v41 }
 0x203   :  { %v622_v40 = vadd.f32 %v621_v55, %v620_v27  ;;  %v711_v47 = vadd.f32 %v710_v22, %v709_v26  ;;  %v712_v27 = vsel %vm319_vm0, %v659_v21, 0.0  ;;  %v663_v21 = vmul.f32 %v12497_v54, %v12497_v54 }
 0x204   :  { %v716_v22 = vsel %vm319_vm0, %v661_v28, 0.0 }
 0x205   :  { %v624_v17 = vadd.f32 %v623_v32, %v622_v40  ;;  %v713_v33 = vadd.f32 %v712_v27, %v711_v47  ;;  %v714_v40 = vsel %vm319_vm0, %v660_v12, 0.0  ;;  %v12512_v32 = vsub.f32 %v16564_v5, %v12096_v43  ;;  %v16565_v47 = vld [vmem:[#allocation49_spill] sm:$0xff] }
 0x206   :  { %v12519_v19 = vsub.f32 %v16565_v47, %v12096_v43  ;;  %v718_v12 = vsel %vm319_vm0, %v662_v37, 0.0  ;;  %v720_v28 = vsel %vm319_vm0, %v663_v21, 0.0 }
 0x207   :  { %v626_v55 = vadd.f32 %v625_v49, %v624_v17  ;;  %v715_v26 = vadd.f32 %v714_v40, %v713_v33  ;;  %v664_v49 = vmul.f32 %v12505_v29, %v12505_v29  ;;  %v665_v23 = vmul.f32 %v12512_v32, %v12512_v32 }
 0x208   :  { %16566 = vst [vmem:[#allocation41_spill] sm:$0xff] %v12519_v19  ;;  %v666_v5 = vmul.f32 %v12519_v19, %v12519_v19 }
 0x209   :  { %627 = vadd.xlane.f32.xlu1 %v626_v55  ;;  %v717_v17 = vadd.f32 %v716_v22, %v715_v26  ;;  %v16567_v55 = vld [vmem:[#allocation50_spill] sm:$0xff]  ;;  %v12533_v26 = vsub.f32 %v12090_v63, %v12096_v43  ;;  %v722_v37 = vsel %vm319_vm0, %v664_v49, 0.0  ;;  %v724_v47 = vsel %vm319_vm0, %v665_v23, 0.0 }
 0x20a   :  { %v12526_v33 = vsub.f32 %v16567_v55, %v12096_v43  ;;  %v11442_v49 = vmov 0  }
 0x20b   :  { %v719_v27 = vadd.f32 %v718_v12, %v717_v17  ;;  %16569 = vst [vmem:[#allocation43_spill] sm:$0xff] %v12533_v26  ;;  %v668_v21 = vmul.f32 %v12533_v26, %v12533_v26  ;;  %11110 = vset.pattern.permute.xlu1 %v11442_v49  ;;  %11109 = vset.pattern.permute.xlu0 %v11442_v49 }
 0x20c   :  { %16568 = vst [vmem:[#allocation35_spill] sm:$0xff] %v12526_v33  ;;  %v667_v17 = vmul.f32 %v12526_v33, %v12526_v33 }
 0x20d   :  { %v721_v40 = vadd.f32 %v720_v28, %v719_v27  ;;  %v726_v27 = vsel %vm319_vm0, %v666_v5, 0.0  ;;  %v730_v28 = vsel %vm319_vm0, %v668_v21, 0.0 }
 0x20e   :  { %v728_v63 = vsel %vm319_vm0, %v667_v17, 0.0 }
 0x20f   :  { %v723_v22 = vadd.f32 %v722_v37, %v721_v40 }
 0x211   :  { %v725_v12 = vadd.f32 %v724_v47, %v723_v22 }
 0x213   :  { %v727_v55 = vadd.f32 %v726_v27, %v725_v12 }
 0x215   :  { %v729_v43 = vadd.f32 %v728_v63, %v727_v55 }
 0x217   :  { %v731_v19 = vadd.f32 %v730_v28, %v729_v43 }
 0x219   :  { %732 = vadd.xlane.f32.xlu1 %v731_v19 }
 0x292   :  { %v628_v40 = vpop.xlane.xlu1 %627 }
 0x293   :  { %v629_v37 = vrot.slane %v628_v40, 4 }
 0x295   :  { %v630_v23 = vadd.f32 %v629_v37, %v628_v40 }
 0x297   :  { %v631_v22 = vrot.slane %v630_v23, 2 }
 0x299   :  { %v632_v47 = vadd.f32 %v631_v22, %v630_v23 }
 0x29b   :  { %v633_v33 = vrot.slane %v632_v47, 1 }
 0x29d   :  { %v634_v26 = vadd.f32 %v633_v33, %v632_v47 }
 0x29f   :  { %11084 = vpush %v634_v26 }
 0x2a2   :  { %v733_v5 = vpop.xlane.xlu1 %732 }
 0x2a3   :  { %v734_v12 = vrot.slane %v733_v5, 4 }
 0x2a5   :  { %v735_v27 = vadd.f32 %v734_v12, %v733_v5 }
 0x2a7   :  { %v736_v17 = vrot.slane %v735_v27, 2 }
 0x2a9   :  { %v737_v55 = vadd.f32 %v736_v17, %v735_v27 }
 0x2ab   :  { %v738_v63 = vrot.slane %v737_v55, 1 }
 0x2ad   :  { %v739_v21 = vadd.f32 %v738_v63, %v737_v55 }
 0x2af   :  { %11086 = vpush %v739_v21 }
 0x2d0   :  { %s11085_s27 = spop %11084 }
 0x2d1   :  { %v636_v19 = vstv %s11085_s27 }
 0x2e0   :  { %s11087_s11 = spop %11086 }
 0x2e1   :  { %v741_v43 = vstv %s11087_s11 }
 0x2e2   :  { %v742_v28 = vadd.f32 %v741_v43, %v636_v19 }
 0x2e4   :  { %v743_v49 = vmul.f32 0.001953125, %v742_v28 }
 0x2e6   :  { %v744_v40 = vadd.f32 1e-05, %v743_v49 }
 0x2e8   :  { %11111 = vrsqrt.f32 %v744_v40 }
 0x2f5   :  { %v12546_v37 = vpop.eup %11111 }
 0x2f6   :  { %v778_v33 = vmul.f32 %v12546_v37, %v12166_v3  ;;  %v779_v26 = vmul.f32 %v12546_v37, %v12170_v35  ;;  %v782_v23 = vmul.f32 %v12546_v37, %v12207_v25  ;;  %v783_v22 = vmul.f32 %v12546_v37, %v12220_v52 }
 0x2f7   :  { %v780_v47 = vmul.f32 %v12546_v37, %v12181_v34  ;;  %v784_v17 = vmul.f32 %v12546_v37, %v12235_v38  ;;  %v746_v3 = vmul.f32 %v12546_v37, %v12100_v45  ;;  %v785_v38 = vmul.f32 %v12546_v37, %v12249_v44 }
 0x2f8   :  { %v828_v5 = vrot.slane %v778_v33, 6  ;;  %v829_v12 = vrot.slane %v779_v26, 6  ;;  %v835_v27 = vrot.slane %v782_v23, 6  ;;  %v837_v25 = vrot.slane %v783_v22, 6 }
 0x2f9   :  { %v831_v63 = vrot.slane %v780_v47, 6  ;;  %v839_v52 = vrot.slane %v784_v17, 6  ;;  %v880_v34 = vrot.slane %v746_v3, 7  ;;  %v747_v45 = vmul.f32 %v12546_v37, %v12104_v31 }
 0x2fa   :  { %v861_v35 = vsel %vm827_vm1, 0.0, %v828_v5  ;;  %v830_v55 = vsel %vm827_vm1, %v828_v5, %v829_v12  ;;  %v838_v21 = vsel %vm827_vm1, %v835_v27, %v837_v25  ;;  %v841_v49 = vrot.slane %v785_v38, 6 }
 0x2fb   :  { %917 = vperm.xlu0 %11109, %v861_v35   ;;  %921 = vperm.xlu1 %11110, %v830_v55   ;;  %v832_v19 = vsel %vm827_vm1, %v829_v12, %v831_v63  ;;  %v840_v43 = vsel %vm827_vm1, %v837_v25, %v839_v52  ;;  %v913_v28 = vsel %vm879_vm2, 0.0, %v880_v34  ;;  %v881_v40 = vrot.slane %v747_v45, 7 }
 0x2fc   :  { %v786_v33 = vmul.f32 %v12546_v37, %v12263_v50  ;;  %v781_v26 = vmul.f32 %v12546_v37, %v12192_v53  ;;  %v787_v44 = vmul.f32 %v12546_v37, %v12277_v56  ;;  %v748_v31 = vmul.f32 %v12546_v37, %v12108_v20 }
 0x2fd   :  { %v842_v23 = vsel %vm827_vm1, %v839_v52, %v841_v49  ;;  %v882_v22 = vsel %vm879_vm2, %v880_v34, %v881_v40  ;;  %v788_v50 = vmul.f32 %v12546_v37, %v12291_v62  ;;  %v789_v3 = vmul.f32 %v12546_v37, %v12305_v9 }
 0x2fe   :  { %v843_v47 = vrot.slane %v786_v33, 6  ;;  %v833_v5 = vrot.slane %v781_v26, 6  ;;  %v845_v17 = vrot.slane %v787_v44, 6  ;;  %v883_v56 = vrot.slane %v748_v31, 7 }
 0x2ff   :  { %937 = vperm.xlu0 %11109, %v838_v21   ;;  %925 = vperm.xlu1 %11110, %v832_v19   ;;  %v847_v20 = vrot.slane %v788_v50, 6  ;;  %v749_v25 = vmul.f32 %v12546_v37, %v12112_v36  ;;  %v790_v21 = vmul.f32 %v12546_v37, %v12319_v18  ;;  %v750_v9 = vmul.f32 %v12546_v37, %v12120_v0 }
 0x300   :  { %v844_v53 = vsel %vm827_vm1, %v841_v49, %v843_v47  ;;  %v834_v12 = vsel %vm827_vm1, %v831_v63, %v833_v5  ;;  %v846_v35 = vsel %vm827_vm1, %v843_v47, %v845_v17  ;;  %v884_v55 = vsel %vm879_vm2, %v881_v40, %v883_v56 }
 0x301   :  { %v848_v62 = vsel %vm827_vm1, %v845_v17, %v847_v20  ;;  %v849_v63 = vrot.slane %v789_v3, 6  ;;  %v836_v52 = vsel %vm827_vm1, %v833_v5, %v835_v27  ;;  %v885_v34 = vrot.slane %v749_v25, 7 }
 0x302   :  { %v791_v36 = vmul.f32 %v12546_v37, %v12333_v30  ;;  %v851_v45 = vrot.slane %v790_v21, 6  ;;  %v751_v27 = vmul.f32 %v12546_v37, %v12126_v2  ;;  %v792_v18 = vmul.f32 %v12546_v37, %v12347_v39 }
 0x303   :  { %941 = vperm.xlu0 %11109, %v840_v43   ;;  %1018 = vperm.xlu1 %11110, %v913_v28   ;;  %v850_v19 = vsel %vm827_vm1, %v847_v20, %v849_v63  ;;  %v886_v38 = vsel %vm879_vm2, %v883_v56, %v885_v34  ;;  %v887_v43 = vrot.slane %v750_v9, 7  ;;  %v752_v0 = vmul.f32 %v12546_v37, %v12134_v14 }
 0x304   :  { %v852_v28 = vsel %vm827_vm1, %v849_v63, %v851_v45  ;;  %v853_v30 = vrot.slane %v791_v36, 6  ;;  %v889_v40 = vrot.slane %v751_v27, 7  ;;  %v855_v33 = vrot.slane %v792_v18, 6 }
 0x305   :  { %v888_v49 = vsel %vm879_vm2, %v885_v34, %v887_v43  ;;  %v891_v26 = vrot.slane %v752_v0, 7  ;;  %v12612_v2 = vmul.f32 %v12546_v37, %v12361_v48  ;;  %v753_v14 = vmul.f32 %v12546_v37, %v12141_v10 }
 0x306   :  { %v854_v44 = vsel %vm827_vm1, %v851_v45, %v853_v30  ;;  %v890_v39 = vsel %vm879_vm2, %v887_v43, %v889_v40  ;;  %v856_v31 = vsel %vm827_vm1, %v853_v30, %v855_v33  ;;  %v760_v48 = vmul.f32 %v12546_v37, %v12216_v59 }
 0x307   :  { %945 = vperm.xlu0 %11109, %v842_v23   ;;  %1022 = vperm.xlu1 %11110, %v882_v22   ;;  %v892_v23 = vsel %vm879_vm2, %v889_v40, %v891_v26  ;;  %v857_v22 = vrot.slane %v12612_v2, 6  ;;  %v893_v47 = vrot.slane %v753_v14, 7  ;;  %v761_v5 = vmul.f32 %v12546_v37, %v12231_v58 }
 0x308   :  { %v754_v50 = vmul.f32 %v12546_v37, %v12148_v13  ;;  %v907_v17 = vrot.slane %v760_v48, 7  ;;  %v794_v58 = vmul.f32 %v12546_v37, %v12375_v57  ;;  %v795_v13 = vmul.f32 %v12546_v37, %v12389_v6  ;;  %v16570_v48 = vld [vmem:[#allocation51_spill] sm:$0xff] }
 0x309   :  { %v858_v10 = vsel %vm827_vm1, %v855_v33, %v857_v22  ;;  %v909_v56 = vrot.slane %v761_v5, 7  ;;  %v759_v27 = vmul.f32 %v12546_v37, %v12203_v46  ;;  %v800_v46 = vmul.f32 %v12546_v37, %v12459_v42 }
 0x30a   :  { %v895_v59 = vrot.slane %v754_v50, 7  ;;  %v1662_v25 = vrot.slane %v795_v13, 6  ;;  %v802_v42 = vmul.f32 %v12546_v37, %v12479_v61  ;;  %v763_v5 = vmul.f32 %v12546_v37, %v16570_v48  ;;  %v16583_v48 = vld [vmem:[#allocation59_spill] sm:$0xff] }
 0x30b   :  { %949 = vperm.xlu0 %11109, %v844_v53   ;;  %929 = vperm.xlu1 %11110, %v834_v12   ;;  %v755_v53 = vmul.f32 %v12546_v37, %v12155_v16  ;;  %v894_v12 = vsel %vm879_vm2, %v891_v26, %v893_v47  ;;  %v910_v20 = vsel %vm879_vm2, %v907_v17, %v909_v56  ;;  %v914_v57 = vsel %vm879_vm2, %v909_v56, 0.0  ;;  %v16572_v56 = vld [vmem:[#allocation53_spill] sm:$0xff] }
 0x30c   :  { %v896_v3 = vsel %vm879_vm2, %v893_v47, %v895_v59  ;;  %v756_v16 = vmul.f32 %v12546_v37, %v12162_v1  ;;  %v905_v0 = vrot.slane %v759_v27, 7  ;;  %v1672_v26 = vrot.slane %v800_v46, 6  ;;  %v16578_v27 = vld [vmem:[#allocation43_spill] sm:$0xff] }
 0x30d   :  { %v1676_v47 = vrot.slane %v802_v42, 6 }
 0x30e   :  { %v899_v6 = vrot.slane %v756_v16, 7  ;;  %v908_v33 = vsel %vm879_vm2, %v905_v0, %v907_v17  ;;  %v805_v17 = vmul.f32 %v12546_v37, %v12505_v29  ;;  %v806_v29 = vmul.f32 %v12546_v37, %v12512_v32  ;;  %v16576_v32 = vld [vmem:[#allocation35_spill] sm:$0xff] }
 0x30f   :  { %953 = vperm.xlu0 %11109, %v846_v35   ;;  %1026 = vperm.xlu1 %11110, %v884_v55   ;;  %v897_v35 = vrot.slane %v755_v53, 7  ;;  %v1661_v55 = vrot.slane %v794_v58, 6  ;;  %v1713_v53 = vrot.slane %v763_v5, 7  ;;  %v771_v5 = vmul.f32 %v12546_v37, %v16583_v48 }
 0x311   :  { %v898_v63 = vsel %vm879_vm2, %v895_v59, %v897_v35  ;;  %v1663_v34 = vsel %vm827_vm1, %v1661_v55, %v1662_v25  ;;  %v900_v21 = vsel %vm879_vm2, %v897_v35, %v899_v6  ;;  %v765_v59 = vmul.f32 %v12546_v37, %v16572_v56 }
 0x313   :  { %957 = vperm.xlu0 %11109, %v848_v62   ;;  %933 = vperm.xlu1 %11110, %v836_v52   ;;  %v796_v62 = vmul.f32 %v12546_v37, %v12403_v24  ;;  %v757_v52 = vmul.f32 %v12546_v37, %v12177_v7  ;;  %v758_v24 = vmul.f32 %v12546_v37, %v12188_v15  ;;  %v1717_v35 = vrot.slane %v765_v59, 7 }
 0x314   :  { %v798_v7 = vmul.f32 %v12546_v37, %v12431_v60 }
 0x315   :  { %v1664_v1 = vrot.slane %v796_v62, 6  ;;  %v901_v9 = vrot.slane %v757_v52, 7  ;;  %v903_v43 = vrot.slane %v758_v24, 7  ;;  %v16577_v24 = vld [vmem:[#allocation56_spill] sm:$0xff] }
 0x317   :  { %961 = vperm.xlu0 %11109, %v850_v19   ;;  %1030 = vperm.xlu1 %11110, %v886_v38   ;;  %v797_v19 = vmul.f32 %v12546_v37, %v12417_v11  ;;  %v1665_v36 = vsel %vm827_vm1, %v1662_v25, %v1664_v1  ;;  %v902_v38 = vsel %vm879_vm2, %v899_v6, %v901_v9  ;;  %v1668_v11 = vrot.slane %v798_v7, 6  ;;  %v16573_v25 = vld [vmem:[#allocation54_spill] sm:$0xff] }
 0x318   :  { %v904_v15 = vsel %vm879_vm2, %v901_v9, %v903_v43  ;;  %v766_v62 = vmul.f32 %v12546_v37, %v16573_v25  ;;  %v1684_v6 = vrot.slane %v806_v29, 6 }
 0x319   :  { %v1666_v45 = vrot.slane %v797_v19, 6  ;;  %v808_v19 = vmul.f32 %v12546_v37, %v16576_v32 }
 0x31a   :  { %v1719_v52 = vrot.slane %v766_v62, 7  ;;  %v16586_v62 = vld [vmem:[#allocation37_spill] sm:$0xff] }
 0x31b   :  { %965 = vperm.xlu0 %11109, %v852_v28   ;;  %1034 = vperm.xlu1 %11110, %v888_v49   ;;  %v1667_v18 = vsel %vm827_vm1, %v1664_v1, %v1666_v45  ;;  %v799_v28 = vmul.f32 %v12546_v37, %v12445_v51  ;;  %v1669_v60 = vsel %vm827_vm1, %v1666_v45, %v1668_v11 }
 0x31c   :  { %v906_v49 = vsel %vm879_vm2, %v903_v43, %v905_v0  ;;  %v801_v51 = vmul.f32 %v12546_v37, %v12469_v8  ;;  %v803_v8 = vmul.f32 %v12546_v37, %v12489_v41 }
 0x31d   :  { %v1670_v30 = vrot.slane %v799_v28, 6 }
 0x31e   :  { %v1674_v14 = vrot.slane %v801_v51, 6  ;;  %v1678_v61 = vrot.slane %v803_v8, 6 }
 0x31f   :  { %969 = vperm.xlu0 %11109, %v854_v44   ;;  %1038 = vperm.xlu1 %11110, %v890_v39   ;;  %v1671_v40 = vsel %vm827_vm1, %v1668_v11, %v1670_v30  ;;  %v862_v44 = vsel %vm827_vm1, %v857_v22, 0.0  ;;  %v1673_v39 = vsel %vm827_vm1, %v1670_v30, %v1672_v26  ;;  %v12717_v11 = vmul.f32 %v12546_v37, %v16578_v27  ;;  %v16580_v30 = vld [vmem:[#allocation34_spill] sm:$0xff] }
 0x320   :  { %v1675_v2 = vsel %vm827_vm1, %v1672_v26, %v1674_v14  ;;  %v1677_v50 = vsel %vm827_vm1, %v1674_v14, %v1676_v47  ;;  %v1679_v58 = vsel %vm827_vm1, %v1676_v47, %v1678_v61  ;;  %v777_v46 = vmul.f32 %v12546_v37, %v16580_v30  ;;  %v16582_v14 = vld [vmem:[#allocation58_spill] sm:$0xff] }
 0x321   :  { %v770_v42 = vmul.f32 %v12546_v37, %v16582_v14 }
 0x323   :  { %973 = vperm.xlu0 %11109, %v856_v31   ;;  %1042 = vperm.xlu1 %11110, %v892_v23   ;;  %v762_v31 = vmul.f32 %v12546_v37, %v12245_v4  ;;  %v1694_v23 = vsel %vm827_vm1, 0.0, %v1661_v55  ;;  %v804_v4 = vmul.f32 %v12546_v37, %v12497_v54 }
 0x325   :  { %v1712_v22 = vrot.slane %v762_v31, 7  ;;  %v1680_v13 = vrot.slane %v804_v4, 6  ;;  %v980_v31 = vlaneseq }
 0x327   :  { %977 = vperm.xlu0 %11109, %v858_v10   ;;  %1046 = vperm.xlu1 %11110, %v894_v12   ;;  %v1745_v10 = vsel %vm879_vm2, 0.0, %v1712_v22  ;;  %v16571_v12 = vld [vmem:[#allocation52_spill] sm:$0xff]  ;;  %v1714_v54 = vsel %vm879_vm2, %v1712_v22, %v1713_v53  ;;  %v1681_v16 = vsel %vm827_vm1, %v1678_v61, %v1680_v13  ;;  %v1727_v22 = vrot.slane %v770_v42, 7 }
 0x328   :  { %v764_v41 = vmul.f32 %v12546_v37, %v16571_v12  ;;  %v981_v61 = vshrl.u32 %v980_v31, 7 }
 0x32a   :  { %v1233_v32 = vsub.s32 3, %v981_v61 }
 0x32b   :  { %1078 = vperm.xlu0 %11109, %v910_v20   ;;  %1050 = vperm.xlu1 %11110, %v896_v3   ;;  %v1715_v20 = vrot.slane %v764_v41, 7  ;;  %v1682_v3 = vrot.slane %v805_v17, 6  ;;  %v1543_v41 = vsub.s32 6, %v981_v61  ;;  %v810_v17 = vld [vmem:[#allocation2] sm:$0x7f] }
 0x32d   :  { %v1716_v55 = vsel %vm879_vm2, %v1713_v53, %v1715_v20  ;;  %v1685_v7 = vsel %vm827_vm1, %v1682_v3, %v1684_v6  ;;  %v16584_v53 = vld [vmem:[#allocation60_spill] sm:$0xff] }
 0x32e   :  { %v772_v12 = vmul.f32 %v12546_v37, %v16584_v53 }
 0x32f   :  { %1228 = vperm.xlu0 %11109, %v914_v57   ;;  %1054 = vperm.xlu1 %11110, %v898_v63   ;;  %v1683_v57 = vsel %vm827_vm1, %v1680_v13, %v1682_v3  ;;  %v1718_v63 = vsel %vm879_vm2, %v1715_v20, %v1717_v35  ;;  %v1124_v20 = vsub.s32 2, %v981_v61  ;;  %v1336_v3 = vsub.s32 4, %v981_v61 }
 0x333   :  { %1753 = vperm.xlu0 %11109, %v1663_v34   ;;  %1058 = vperm.xlu1 %11110, %v900_v21   ;;  %v16574_v34 = vld [vmem:[#allocation41_spill] sm:$0xff]  ;;  %v16575_v21 = vld [vmem:[#allocation55_spill] sm:$0xff] }
 0x334   :  { %v807_v1 = vmul.f32 %v12546_v37, %v16574_v34  ;;  %v767_v9 = vmul.f32 %v12546_v37, %v16575_v21  ;;  %v1083_v21 = vsub.s32 1, %v981_v61 }
 0x336   :  { %v1686_v45 = vrot.slane %v807_v1, 6  ;;  %v1721_v43 = vrot.slane %v767_v9, 7 }
 0x337   :  { %1757 = vperm.xlu0 %11109, %v1665_v36   ;;  %1062 = vperm.xlu1 %11110, %v902_v38   ;;  %v768_v36 = vmul.f32 %v12546_v37, %v16577_v24  ;;  %v1720_v38 = vsel %vm879_vm2, %v1717_v35, %v1719_v52  ;;  %v12751_v35 = vrot.slane %v810_v17, %v1543_v41 }
 0x338   :  { %v1687_v0 = vsel %vm827_vm1, %v1684_v6, %v1686_v45  ;;  %v1722_v28 = vsel %vm879_vm2, %v1719_v52, %v1721_v43  ;;  %v12758_v6 = vrot.slane %v810_v17, %v1124_v20  ;;  %v12760_v52 = vrot.slane %v810_v17, %v1336_v3 }
 0x33b   :  { %1761 = vperm.xlu0 %11109, %v1667_v18   ;;  %1066 = vperm.xlu1 %11110, %v904_v15   ;;  %v16579_v18 = vld [vmem:[#allocation57_spill] sm:$0xff] }
 0x33c   :  { %v769_v15 = vmul.f32 %v12546_v37, %v16579_v18 }
 0x33f   :  { %1765 = vperm.xlu0 %11109, %v1669_v60   ;;  %1070 = vperm.xlu1 %11110, %v906_v49   ;;  %v1688_v60 = vrot.slane %v808_v19, 6  ;;  %v1723_v49 = vrot.slane %v768_v36, 7  ;;  %v16587_v19 = vld [vmem:[#allocation33_spill] sm:$0xff] }
 0x340   :  { %v775_v24 = vmul.f32 %v12546_v37, %v16587_v19 }
 0x341   :  { %v1689_v51 = vsel %vm827_vm1, %v1686_v45, %v1688_v60 }
 0x343   :  { %1769 = vperm.xlu0 %11109, %v1671_v40   ;;  %1074 = vperm.xlu1 %11110, %v908_v33   ;;  %v1690_v40 = vrot.slane %v12717_v11, 6  ;;  %v16581_v33 = vld [vmem:[#allocation39_spill] sm:$0xff] }
 0x344   :  { %v12728_v26 = vmul.f32 %v12546_v37, %v16581_v33  ;;  %v1737_v33 = vrot.slane %v775_v24, 7 }
 0x346   :  { %v1739_v8 = vrot.slane %v12728_v26, 7 }
 0x347   :  { %1773 = vperm.xlu0 %11109, %v1673_v39   ;;  %1119 = vperm.xlu1 %11110, %v862_v44   ;;  %v1724_v44 = vsel %vm879_vm2, %v1721_v43, %v1723_v49  ;;  %v1725_v39 = vrot.slane %v769_v15, 7  ;;  %v1440_v43 = vsub.s32 5, %v981_v61 }
 0x349   :  { %v1726_v47 = vsel %vm879_vm2, %v1723_v49, %v1725_v39  ;;  %v12806_v14 = vrot.slane %v810_v17, %v1440_v43 }
 0x34b   :  { %1777 = vperm.xlu0 %11109, %v1675_v2   ;;  %1749 = vperm.xlu1 %11110, %v1694_v23   ;;  %v1741_v23 = vrot.slane %v777_v46, 7  ;;  %v1691_v2 = vsel %vm827_vm1, %v1688_v60, %v1690_v40  ;;  %v12784_v60 = vrot.slane %v810_v17, %v1083_v21  ;;  %v12794_v46 = vrot.slane %v810_v17, %v1233_v32 }
 0x34c   :  { %v1740_v32 = vsel %vm879_vm2, %v1737_v33, %v1739_v8 }
 0x34d   :  { %v1742_v4 = vsel %vm879_vm2, %v1739_v8, %v1741_v23  ;;  %v1746_v56 = vsel %vm879_vm2, %v1741_v23, 0.0 }
 0x34f   :  { %1781 = vperm.xlu0 %11109, %v1677_v50   ;;  %1846 = vperm.xlu1 %11110, %v1745_v10   ;;  %v1728_v50 = vsel %vm879_vm2, %v1725_v39, %v1727_v22  ;;  %v1729_v10 = vrot.slane %v771_v5, 7 }
 0x351   :  { %v1730_v59 = vsel %vm879_vm2, %v1727_v22, %v1729_v10 }
 0x353   :  { %1785 = vperm.xlu0 %11109, %v1679_v58   ;;  %1850 = vperm.xlu1 %11110, %v1714_v54   ;;  %v1731_v58 = vrot.slane %v772_v12, 7  ;;  %v16585_v54 = vld [vmem:[#allocation32_spill] sm:$0xff] }
 0x354   :  { %v773_v13 = vmul.f32 %v12546_v37, %v16585_v54 }
 0x355   :  { %v1732_v29 = vsel %vm879_vm2, %v1729_v10, %v1731_v58 }
 0x356   :  { %v1733_v25 = vrot.slane %v773_v13, 7 }
 0x357   :  { %1789 = vperm.xlu0 %11109, %v1681_v16   ;;  %1854 = vperm.xlu1 %11110, %v1716_v55  }
 0x358   :  { %v1734_v45 = vsel %vm879_vm2, %v1731_v58, %v1733_v25 }
 0x35b   :  { %1793 = vperm.xlu0 %11109, %v1683_v57   ;;  %1858 = vperm.xlu1 %11110, %v1718_v63   ;;  %v774_v57 = vmul.f32 %v12546_v37, %v16586_v62  ;;  %v982_v63 = vsub.s32 0, %v981_v61 }
 0x35d   :  { %v1735_v27 = vrot.slane %v774_v57, 7  ;;  %v12772_v18 = vrot.slane %v810_v17, %v982_v63 }
 0x35f   :  { %1797 = vperm.xlu0 %11109, %v1685_v7   ;;  %1862 = vperm.xlu1 %11110, %v1720_v38   ;;  %v1736_v31 = vsel %vm879_vm2, %v1733_v25, %v1735_v27  ;;  %v1738_v53 = vsel %vm879_vm2, %v1735_v27, %v1737_v33 }
 0x363   :  { %1801 = vperm.xlu0 %11109, %v1687_v0   ;;  %1866 = vperm.xlu1 %11110, %v1722_v28  }
 0x367   :  { %1805 = vperm.xlu0 %11109, %v1689_v51   ;;  %1870 = vperm.xlu1 %11110, %v1724_v44  }
 0x36b   :  { %1809 = vperm.xlu0 %11109, %v1691_v2   ;;  %1874 = vperm.xlu1 %11110, %v1726_v47  }
 0x36f   :  { %1906 = vperm.xlu0 %11109, %v1742_v4   ;;  %1878 = vperm.xlu1 %11110, %v1728_v50  }
 0x373   :  { %2047 = vperm.xlu0 %11109, %v1746_v56   ;;  %1882 = vperm.xlu1 %11110, %v1730_v59  }
 0x376   :  { %v918_v16 = vpop.permute.xlu0 %917  ;;  %v12753_v55 = vpop.permute.xlu1 %921 }
 0x377   :  { %v1545_v34 = vmul.f32 %v12751_v35, %v918_v16  ;;  %1886 = vperm.xlu1 %11110, %v1732_v29   ;;  %v1546_v1 = vmul.f32 %v12751_v35, %v12753_v55  ;;  %v1126_v15 = vmul.f32 %v12758_v6, %v918_v16  ;;  %v1127_v0 = vmul.f32 %v12758_v6, %v12753_v55 }
 0x378   :  { %v12779_v28 = vmul.f32 %v12760_v52, %v12753_v55  ;;  %v984_v48 = vmul.f32 %v12772_v18, %v918_v16  ;;  %v1338_v54 = vmul.f32 %v12760_v52, %v918_v16  ;;  %v985_v16 = vmul.f32 %v12772_v18, %v12753_v55 }
 0x379   :  { %v1580_v9 = vrot.slane %v1545_v34, 3  ;;  %v1581_v36 = vrot.slane %v1546_v1, 3  ;;  %v1161_v23 = vrot.slane %v1126_v15, 1  ;;  %v1162_v2 = vrot.slane %v1127_v0, 1 }
 0x37a   :  { %v12767_v7 = vpop.permute.xlu0 %937  ;;  %v12769_v38 = vpop.permute.xlu1 %925  ;;  %v1374_v47 = vrot.slane %v12779_v28, 2  ;;  %v1373_v19 = vrot.slane %v1338_v54, 2 }
 0x37b   :  { %1890 = vperm.xlu1 %11110, %v1734_v45   ;;  %v12782_v37 = vsel %vm1579_vm3, %v1580_v9, %v1581_v36  ;;  %v12788_v49 = vmul.f32 %v12758_v6, %v12769_v38  ;;  %v12792_v30 = vmul.f32 %v12760_v52, %v12769_v38  ;;  %v12798_v51 = vmul.f32 %v12751_v35, %v12767_v7 }
 0x37c   :  { %v12802_v44 = vmul.f32 %v12751_v35, %v12769_v38  ;;  %v1163_v13 = vsel %vm1160_vm5, %v1161_v23, %v1162_v2  ;;  %v1375_v33 = vsel %vm1372_vm4, %v1373_v19, %v1374_v47 }
 0x37d   :  { %v1376_v22 = vrot.slane %v12792_v30, 2  ;;  %v1164_v50 = vrot.slane %v12788_v49, 1  ;;  %v1589_v12 = vrot.slane %v12798_v51, 3  ;;  %v1695_v30 = vsel %vm827_vm1, %v1690_v40, 0.0 }
 0x37e   :  { %v12804_v39 = vpop.permute.xlu0 %941  ;;  %v1019_v42 = vpop.permute.xlu1 %1018  ;;  %v1583_v5 = vrot.slane %v12802_v44, 3 }
 0x37f   :  { %1894 = vperm.xlu1 %11110, %v1736_v31   ;;  %v1551_v61 = vmul.f32 %v12751_v35, %v12804_v39  ;;  %v1085_v4 = vmul.f32 %v12784_v60, %v1019_v42  ;;  %v12818_v10 = vsel %vm1372_vm4, %v1374_v47, %v1376_v22  ;;  %v1235_v20 = vmul.f32 %v12794_v46, %v1019_v42 }
 0x380   :  { %v12823_v41 = vsel %vm1579_vm3, %v1581_v36, %v1583_v5  ;;  %v1442_v25 = vmul.f32 %v12806_v14, %v1019_v42  ;;  %v1165_v57 = vsel %vm1160_vm5, %v1162_v2, %v1164_v50 }
 0x381   :  { %v1591_v17 = vrot.slane %v1551_v61, 3  ;;  %v1101_v56 = vadd.f32 %v1085_v4, %v984_v48  ;;  %v1269_v24 = vrot.slane %v1235_v20, 1  ;;  %v986_v4 = vmul.f32 %v12772_v18, %v12769_v38 }
 0x382   :  { %v12825_v59 = vpop.permute.xlu0 %945  ;;  %v1023_v58 = vpop.permute.xlu1 %1022  ;;  %v1476_v55 = vrot.slane %v1442_v25, 2 }
 0x383   :  { %1898 = vperm.xlu1 %11110, %v1738_v53   ;;  %v12833_v3 = vsel %vm1579_vm3, %v1589_v12, %v1591_v17  ;;  %v1210_v29 = vadd.f32 %v1163_v13, %v1101_v56  ;;  %v12838_v62 = vmul.f32 %v12751_v35, %v12825_v59  ;;  %v1086_v63 = vmul.f32 %v12784_v60, %v1023_v58 }
 0x384   :  { %v1236_v34 = vmul.f32 %v12794_v46, %v1023_v58  ;;  %v1443_v21 = vmul.f32 %v12806_v14, %v1023_v58 }
 0x385   :  { %v1593_v1 = vrot.slane %v12838_v62, 3  ;;  %v1102_v36 = vadd.f32 %v1086_v63, %v985_v16 }
 0x386   :  { %v930_v9 = vpop.permute.xlu1 %929  ;;  %v1270_v45 = vrot.slane %v1236_v34, 1  ;;  %v1477_v27 = vrot.slane %v1443_v21, 2  ;;  %v12856_v28 = vpop.permute.xlu0 %949 }
 0x387   :  { %1902 = vperm.xlu1 %11110, %v1740_v32   ;;  %v12853_v43 = vsel %vm1579_vm3, %v1591_v17, %v1593_v1  ;;  %v1211_v15 = vadd.f32 %v1165_v57, %v1102_v36  ;;  %v1129_v44 = vmul.f32 %v12758_v6, %v930_v9  ;;  %v1341_v42 = vmul.f32 %v12760_v52, %v930_v9 }
 0x388   :  { %v1271_v0 = vsel %vm1160_vm5, %v1269_v24, %v1270_v45  ;;  %v1478_v8 = vsel %vm1372_vm4, %v1476_v55, %v1477_v27  ;;  %v1548_v31 = vmul.f32 %v12751_v35, %v930_v9 }
 0x389   :  { %v1318_v26 = vadd.f32 %v1271_v0, %v1210_v29  ;;  %v1166_v2 = vrot.slane %v1129_v44, 1  ;;  %v1378_v48 = vrot.slane %v1341_v42, 2 }
 0x38a   :  { %v1027_v49 = vpop.permute.xlu1 %1026  ;;  %v1585_v61 = vrot.slane %v1548_v31, 3  ;;  %v12872_v17 = vpop.permute.xlu0 %953 }
 0x38b   :  { %1943 = vperm.xlu1 %11110, %v1695_v30   ;;  %v1422_v23 = vadd.f32 %v1375_v33, %v1318_v26  ;;  %v1379_v40 = vsel %vm1372_vm4, %v1376_v22, %v1378_v48  ;;  %v1167_v56 = vsel %vm1160_vm5, %v1164_v50, %v1166_v2  ;;  %v1087_v58 = vmul.f32 %v12784_v60, %v1027_v49 }
 0x38c   :  { %v12870_v47 = vsel %vm1579_vm3, %v1583_v5, %v1585_v61  ;;  %v1237_v13 = vmul.f32 %v12794_v46, %v1027_v49  ;;  %v1444_v38 = vmul.f32 %v12806_v14, %v1027_v49  ;;  %v1343_v22 = vmul.f32 %v12760_v52, %v12767_v7 }
 0x38d   :  { %v1525_v53 = vadd.f32 %v1478_v8, %v1422_v23  ;;  %v1103_v20 = vadd.f32 %v1087_v58, %v986_v4  ;;  %v987_v49 = vmul.f32 %v12772_v18, %v930_v9 }
 0x38e   :  { %v934_v11 = vpop.permute.xlu1 %933  ;;  %v1272_v29 = vrot.slane %v1237_v13, 1  ;;  %v1479_v16 = vrot.slane %v1444_v38, 2  ;;  %v12888_v34 = vpop.permute.xlu0 %957  ;;  %v1382_v36 = vrot.slane %v1343_v22, 2 }
 0x38f   :  { %v12877_v54 = vadd.f32 %v12782_v37, %v1525_v53  ;;  %v1212_v5 = vadd.f32 %v1167_v56, %v1103_v20  ;;  %v12885_v50 = vmul.f32 %v12758_v6, %v934_v11  ;;  %v1342_v21 = vmul.f32 %v12760_v52, %v934_v11 }
 0x390   :  { %v1273_v57 = vsel %vm1160_vm5, %v1270_v45, %v1272_v29  ;;  %v1480_v37 = vsel %vm1372_vm4, %v1477_v27, %v1479_v16  ;;  %v1549_v19 = vmul.f32 %v12751_v35, %v934_v11 }
 0x391   :  { %16588 = vst [vmem:[#allocation36_spill] sm:$0xff] %v12877_v54  ;;  %v1319_v63 = vadd.f32 %v1273_v57, %v1211_v15  ;;  %v1168_v32 = vrot.slane %v12885_v50, 1  ;;  %v1380_v0 = vrot.slane %v1342_v21, 2  ;;  %v989_v50 = vmul.f32 %v12772_v18, %v12767_v7 }
 0x392   :  { %v1031_v25 = vpop.permute.xlu1 %1030  ;;  %v1587_v45 = vrot.slane %v1549_v19, 3  ;;  %v12911_v42 = vpop.permute.xlu0 %961 }
 0x393   :  { %v1423_v55 = vadd.f32 %v12818_v10, %v1319_v63  ;;  %v1169_v26 = vsel %vm1160_vm5, %v1166_v2, %v1168_v32  ;;  %v1381_v15 = vsel %vm1372_vm4, %v1378_v48, %v1380_v0  ;;  %v12897_v27 = vsel %vm1372_vm4, %v1380_v0, %v1382_v36 }
 0x394   :  { %v12901_v30 = vsel %vm1579_vm3, %v1585_v61, %v1587_v45  ;;  %v12906_v33 = vsel %vm1579_vm3, %v1587_v45, %v1589_v12  ;;  %v1088_v31 = vmul.f32 %v12784_v60, %v1031_v25  ;;  %v1238_v23 = vmul.f32 %v12794_v46, %v1031_v25 }
 0x395   :  { %v1526_v8 = vadd.f32 %v1480_v37, %v1423_v55  ;;  %v1445_v9 = vmul.f32 %v12806_v14, %v1031_v25  ;;  %v1344_v2 = vmul.f32 %v12760_v52, %v12804_v39  ;;  %v1131_v12 = vmul.f32 %v12758_v6, %v12767_v7 }
 0x396   :  { %v1035_v24 = vpop.permute.xlu1 %1034  ;;  %v1104_v48 = vadd.f32 %v1088_v31, %v987_v49  ;;  %v1274_v51 = vrot.slane %v1238_v23, 1  ;;  %v12930_v22 = vpop.permute.xlu0 %965  ;;  %v988_v63 = vmul.f32 %v12772_v18, %v934_v11  ;;  %v1345_v55 = vmul.f32 %v12760_v52, %v12825_v59 }
 0x397   :  { %v12909_v44 = vadd.f32 %v12823_v41, %v1526_v8  ;;  %v1481_v61 = vrot.slane %v1445_v9, 2  ;;  %v12924_v41 = vmul.f32 %v12758_v6, %v12804_v39  ;;  %v1089_v20 = vmul.f32 %v12784_v60, %v1035_v24 }
 0x398   :  { %v1213_v53 = vadd.f32 %v1169_v26, %v1104_v48  ;;  %v1275_v56 = vsel %vm1160_vm5, %v1272_v29, %v1274_v51  ;;  %v1239_v38 = vmul.f32 %v12794_v46, %v1035_v24  ;;  %v1384_v25 = vrot.slane %v1344_v2, 2 }
 0x399   :  { %16589 = vst [vmem:[#allocation45_spill] sm:$0xff] %v12909_v44  ;;  %v1482_v58 = vsel %vm1372_vm4, %v1479_v16, %v1481_v61  ;;  %v1320_v13 = vadd.f32 %v1275_v56, %v1212_v5  ;;  %v1446_v57 = vmul.f32 %v12806_v14, %v1035_v24  ;;  %v1170_v16 = vrot.slane %v1131_v12, 1 }
 0x39a   :  { %v1039_v10 = vpop.permute.xlu1 %1038  ;;  %v1276_v21 = vrot.slane %v1239_v38, 1  ;;  %v12940_v5 = vmul.f32 %v12772_v18, %v12804_v39  ;;  %v16456_v19 = vrot.slane %v12924_v41, 1  ;;  %v1105_v0 = vadd.f32 %v1089_v20, %v988_v63  ;;  %v12969_v48 = vpop.permute.xlu0 %969 }
 0x39b   :  { %v1424_v37 = vadd.f32 %v1379_v40, %v1320_v13  ;;  %v1483_v45 = vrot.slane %v1446_v57, 2  ;;  %v12947_v11 = vsel %vm1372_vm4, %v1382_v36, %v1384_v25  ;;  %v12951_v40 = vmul.f32 %v12772_v18, %v12825_v59 }
 0x39c   :  { %v1277_v7 = vsel %vm1160_vm5, %v1274_v51, %v1276_v21  ;;  %v1240_v39 = vmul.f32 %v12794_v46, %v1039_v10  ;;  %v12956_v8 = vmul.f32 %v12758_v6, %v12825_v59  ;;  %v1346_v49 = vmul.f32 %v12760_v52, %v12856_v28 }
 0x39d   :  { %v1527_v24 = vadd.f32 %v1482_v58, %v1424_v37  ;;  %v1321_v26 = vadd.f32 %v1277_v7, %v1213_v53  ;;  %v12964_v36 = vmul.f32 %v12806_v14, %v1039_v10  ;;  %v1171_v9 = vsel %vm1160_vm5, %v1168_v32, %v1170_v16 }
 0x39e   :  { %v12920_v4 = vpop.permute.xlu1 %1042  ;;  %v1090_v51 = vmul.f32 %v12784_v60, %v1039_v10  ;;  %v1278_v59 = vrot.slane %v1240_v39, 1  ;;  %v1386_v12 = vrot.slane %v1345_v55, 2  ;;  %v12974_v53 = vmul.f32 %v12758_v6, %v12856_v28 }
 0x39f   :  { %v12961_v31 = vadd.f32 %v12870_v47, %v1527_v24  ;;  %v1425_v2 = vadd.f32 %v1381_v15, %v1321_v26  ;;  %v1214_v47 = vadd.f32 %v1171_v9, %v1105_v0  ;;  %v1484_v56 = vsel %vm1372_vm4, %v1481_v61, %v1483_v45 }
 0x3a0   :  { %v1553_v58 = vmul.f32 %v12751_v35, %v12856_v28  ;;  %v1279_v32 = vsel %vm1160_vm5, %v1276_v21, %v1278_v59  ;;  %v1485_v15 = vrot.slane %v12964_v36, 2  ;;  %v12984_v10 = vmul.f32 %v12772_v18, %v12856_v28 }
 0x3a1   :  { %16590 = vst [vmem:[#allocation38_spill] sm:$0xff] %v12961_v31  ;;  %v1528_v13 = vadd.f32 %v1484_v56, %v1425_v2  ;;  %v1173_v38 = vsel %vm1160_vm5, %v1170_v16, %v16456_v19  ;;  %v1322_v57 = vadd.f32 %v1279_v32, %v1214_v47  ;;  %v1388_v63 = vrot.slane %v1346_v49, 2 }
 0x3a2   :  { %v12936_v29 = vpop.permute.xlu1 %1046  ;;  %v1347_v37 = vmul.f32 %v12760_v52, %v12872_v17  ;;  %v1106_v55 = vadd.f32 %v1090_v51, %v989_v50  ;;  %v12997_v24 = vsel %vm1372_vm4, %v1384_v25, %v1386_v12  ;;  %v13002_v0 = vmul.f32 %v12794_v46, %v12920_v4  ;;  %v13012_v25 = vpop.permute.xlu0 %973 }
 0x3a3   :  { %v12994_v21 = vadd.f32 %v12901_v30, %v1528_v13  ;;  %v1426_v28 = vadd.f32 %v12897_v27, %v1322_v57  ;;  %v13006_v16 = vmul.f32 %v12806_v14, %v12920_v4  ;;  %v1595_v26 = vrot.slane %v1553_v58, 3 }
 0x3a4   :  { %v1554_v30 = vmul.f32 %v12751_v35, %v12872_v17  ;;  %v1486_v50 = vsel %vm1372_vm4, %v1483_v45, %v1485_v15  ;;  %v13016_v27 = vmul.f32 %v12758_v6, %v12872_v17  ;;  %v1348_v39 = vmul.f32 %v12760_v52, %v12888_v34 }
 0x3a5   :  { %16591 = vst [vmem:[#allocation40_spill] sm:$0xff] %v12994_v21  ;;  %v1529_v49 = vadd.f32 %v1486_v50, %v1426_v28  ;;  %v16455_v36 = vrot.slane %v13002_v0, 1  ;;  %v13024_v2 = vsel %vm1372_vm4, %v1386_v12, %v1388_v63  ;;  %v13028_v45 = vmul.f32 %v12772_v18, %v12872_v17 }
 0x3a6   :  { %v12966_v23 = vpop.permute.xlu1 %1050  ;;  %v1390_v51 = vrot.slane %v1347_v37, 2  ;;  %v1215_v47 = vadd.f32 %v1173_v38, %v1106_v55  ;;  %v1555_v56 = vmul.f32 %v12751_v35, %v12888_v34  ;;  %v16457_v32 = vrot.slane %v13006_v16, 2 }
 0x3a7   :  { %v13033_v58 = vadd.f32 %v12906_v33, %v1529_v49  ;;  %v1281_v13 = vsel %vm1160_vm5, %v1278_v59, %v16455_v36  ;;  %v13042_v12 = vsel %vm1579_vm3, %v1593_v1, %v1595_v26  ;;  %v1597_v17 = vrot.slane %v1554_v30, 3  ;;  %v13065_v49 = vpop.permute.xlu0 %977 }
 0x3a8   :  { %v1349_v38 = vmul.f32 %v12760_v52, %v12911_v42  ;;  %v1323_v57 = vadd.f32 %v1281_v13, %v1215_v47  ;;  %v13049_v33 = vmul.f32 %v12758_v6, %v12888_v34  ;;  %v1392_v55 = vrot.slane %v1348_v39, 2 }
 0x3a9   :  { %16592 = vst [vmem:[#allocation42_spill] sm:$0xff] %v13033_v58  ;;  %v1556_v59 = vmul.f32 %v12751_v35, %v12911_v42  ;;  %v13056_v62 = vsel %vm1372_vm4, %v1388_v63, %v1390_v51  ;;  %v13060_v1 = vmul.f32 %v12772_v18, %v12888_v34  ;;  %v1350_v30 = vmul.f32 %v12760_v52, %v12930_v22 }
 0x3aa   :  { %v12989_v61 = vpop.permute.xlu1 %1054  ;;  %v1427_v50 = vadd.f32 %v12947_v11, %v1323_v57  ;;  %v1599_v39 = vrot.slane %v1555_v56, 3  ;;  %v13069_v47 = vmul.f32 %v12758_v6, %v12911_v42  ;;  %v1557_v63 = vmul.f32 %v12751_v35, %v12930_v22 }
 0x3ab   :  { %v1488_v34 = vsel %vm1372_vm4, %v1485_v15, %v16457_v32  ;;  %v13077_v13 = vsel %vm1579_vm3, %v1595_v26, %v1597_v17  ;;  %v1394_v37 = vrot.slane %v1349_v38, 2  ;;  %v1351_v11 = vmul.f32 %v12760_v52, %v12969_v48 }
 0x3ac   :  { %v1530_v57 = vadd.f32 %v1488_v34, %v1427_v50  ;;  %v13083_v7 = vsel %vm1372_vm4, %v1390_v51, %v1392_v55  ;;  %v1601_v36 = vrot.slane %v1556_v59, 3  ;;  %v13087_v19 = vmul.f32 %v12758_v6, %v12930_v22 }
 0x3ad   :  { %v13091_v15 = vmul.f32 %v12772_v18, %v12911_v42  ;;  %v1396_v26 = vrot.slane %v1350_v30, 2  ;;  %v1242_v50 = vmul.f32 %v12794_v46, %v12936_v29  ;;  %v13099_v34 = vsel %vm1579_vm3, %v1597_v17, %v1599_v39 }
 0x3ae   :  { %v13021_v9 = vpop.permute.xlu1 %1058  ;;  %v13094_v38 = vadd.f32 %v12833_v3, %v1530_v57  ;;  %16595 = vst [vmem:[#allocation47_spill] sm:$0xff] %v13099_v34  ;;  %v1603_v59 = vrot.slane %v1557_v63, 3  ;;  %v1091_v56 = vmul.f32 %v12784_v60, %v12920_v4  ;;  %v13107_v42 = vsel %vm1372_vm4, %v1392_v55, %v1394_v37  ;;  %v1079_v57 = vpop.permute.xlu0 %1078 }
 0x3af   :  { %16593 = vst [vmem:[#allocation44_spill] sm:$0xff] %v13091_v15  ;;  %16596 = vst [vmem:[#allocation48_spill] sm:$0xff] %v13107_v42  ;;  %v13111_v3 = vmul.f32 %v12758_v6, %v12969_v48  ;;  %v1398_v30 = vrot.slane %v1351_v11, 2  ;;  %v1558_v17 = vmul.f32 %v12751_v35, %v12969_v48  ;;  %v2446_v63 = vadd.f32 %v12909_v44, %v12877_v54 }
 0x3b0   :  { %16594 = vst [vmem:[#allocation46_spill] sm:$0xff] %v13094_v38  ;;  %v13118_v51 = vsel %vm1579_vm3, %v1599_v39, %v1601_v36  ;;  %v13122_v4 = vmul.f32 %v12772_v18, %v12930_v22  ;;  %v13126_v20 = vsel %vm1372_vm4, %v1394_v37, %v1396_v26  ;;  %v13130_v11 = vmul.f32 %v12772_v18, %v12969_v48 }
 0x3b1   :  { %16597 = vst [vmem:[#allocation49_spill] sm:$0xff] %v13111_v3  ;;  %16598 = vst [vmem:[#allocation50_spill] sm:$0xff] %v13118_v51  ;;  %v13134_v42 = vmul.f32 %v12760_v52, %v13012_v25  ;;  %v1282_v44 = vrot.slane %v1242_v50, 1  ;;  %v13137_v39 = vsel %vm1579_vm3, %v1601_v36, %v1603_v59  ;;  %v13141_v22 = vmul.f32 %v12751_v35, %v13012_v25 }
 0x3b2   :  { %v13053_v28 = vpop.permute.xlu1 %1062  ;;  %16599 = vst [vmem:[#allocation51_spill] sm:$0xff] %v13122_v4  ;;  %16600 = vst [vmem:[#allocation52_spill] sm:$0xff] %v13126_v20  ;;  %v1107_v55 = vadd.f32 %v1091_v56, %v12940_v5  ;;  %v1243_v37 = vmul.f32 %v12794_v46, %v12966_v23  ;;  %v13148_v54 = vsel %vm1372_vm4, %v1396_v26, %v1398_v30  ;;  %v1605_v51 = vrot.slane %v1558_v17, 3 }
 0x3b3   :  { %16601 = vst [vmem:[#allocation53_spill] sm:$0xff] %v13130_v11  ;;  %16602 = vst [vmem:[#allocation54_spill] sm:$0xff] %v13137_v39  ;;  %v1092_v50 = vmul.f32 %v12784_v60, %v12936_v29  ;;  %v2447_v36 = vadd.f32 %v2446_v63, %v12961_v31  ;;  %v13155_v39 = vmul.f32 %v12772_v18, %v13012_v25  ;;  %v1400_v17 = vrot.slane %v13134_v42, 2 }
 0x3b4   :  { %16603 = vst [vmem:[#allocation41_spill] sm:$0xff] %v13148_v54  ;;  %v13159_v5 = vmul.f32 %v12758_v6, %v13012_v25  ;;  %v13163_v56 = vmul.f32 %v12794_v46, %v12989_v61  ;;  %v16605_v48 = vrot.slane %v12956_v8, 1  ;;  %v16606_v63 = vrot.slane %v12924_v41, 1 }
 0x3b5   :  { %16604 = vst [vmem:[#allocation55_spill] sm:$0xff] %v13155_v39  ;;  %v16607_v54 = vrot.slane %v13002_v0, 1  ;;  %v1093_v25 = vmul.f32 %v12784_v60, %v12966_v23  ;;  %v1229_v39 = vpop.permute.xlu0 %1228  ;;  %v1607_v11 = vrot.slane %v13141_v22, 3  ;;  %v13181_v42 = vmul.f32 %v12758_v6, %v13065_v49 }
 0x3b6   :  { %v13104_v32 = vpop.permute.xlu1 %1066  ;;  %v1175_v31 = vsel %vm1160_vm5, %v16606_v63, %v16605_v48  ;;  %v1284_v34 = vrot.slane %v1243_v37, 1  ;;  %v13185_v41 = vmul.f32 %v12760_v52, %v13065_v49  ;;  %v13189_v0 = vmul.f32 %v12751_v35, %v13065_v49 }
 0x3b7   :  { %v1283_v20 = vsel %vm1160_vm5, %v16607_v54, %v1282_v44  ;;  %v1216_v3 = vadd.f32 %v1175_v31, %v1107_v55  ;;  %v1108_v54 = vadd.f32 %v1092_v50, %v12951_v40  ;;  %v1449_v48 = vmul.f32 %v12806_v14, %v12936_v29 }
 0x3b8   :  { %v13195_v31 = vsel %vm1579_vm3, %v1603_v59, %v1605_v51  ;;  %v1286_v37 = vrot.slane %v13163_v56, 1  ;;  %v2448_v63 = vadd.f32 %v2447_v36, %v12994_v21  ;;  %v13201_v4 = vsel %vm1372_vm4, %v1398_v30, %v1400_v17 }
 0x3b9   :  { %v1324_v22 = vadd.f32 %v1283_v20, %v1216_v3  ;;  %v999_v15 = vmul.f32 %v12772_v18, %v13065_v49  ;;  %v1109_v40 = vadd.f32 %v1093_v25, %v12984_v10  ;;  %v13207_v29 = vsel %vm1579_vm3, %v1605_v51, %v1607_v11  ;;  %v1754_v51 = vpop.permute.xlu0 %1753 }
 0x3ba   :  { %v13165_v26 = vpop.permute.xlu1 %1070  ;;  %16608 = vst [vmem:[#allocation35_spill] sm:$0xff] %v13207_v29  ;;  %v16609_v50 = vrot.slane %v12974_v53, 1  ;;  %v16610_v20 = vrot.slane %v12956_v8, 1  ;;  %v1285_v36 = vsel %vm1160_vm5, %v1282_v44, %v1284_v34  ;;  %v1489_v25 = vrot.slane %v1449_v48, 2 }
 0x3bb   :  { %v1428_v55 = vadd.f32 %v12997_v24, %v1324_v22  ;;  %v16611_v59 = vrot.slane %v13016_v27, 1  ;;  %v1450_v44 = vmul.f32 %v12806_v14, %v12966_v23  ;;  %v13235_v24 = vmul.f32 %v12794_v46, %v1079_v57 }
 0x3bc   :  { %v1177_v3 = vsel %vm1160_vm5, %v16610_v20, %v16609_v50  ;;  %v16612_v21 = vmov %v16609_v50  ;;  %v1287_v50 = vsel %vm1160_vm5, %v1284_v34, %v1286_v37  ;;  %v1100_v20 = vmul.f32 %v12784_v60, %v1079_v57 }
 0x3bd   :  { %v1217_v10 = vadd.f32 %v1177_v3, %v1108_v54  ;;  %v1179_v8 = vsel %vm1160_vm5, %v16612_v21, %v16611_v59  ;;  %v13232_v54 = vmul.f32 %v12794_v46, %v13021_v9  ;;  %v13238_v53 = vmul.f32 %v12806_v14, %v1079_v57 }
 0x3be   :  { %v13216_v30 = vpop.permute.xlu1 %1074  ;;  %v1218_v56 = vadd.f32 %v1179_v8, %v1109_v40  ;;  %v1094_v21 = vmul.f32 %v12784_v60, %v12989_v61  ;;  %v13244_v23 = vmul.f32 %v12806_v14, %v12989_v61  ;;  %v16613_v34 = vrot.slane %v13006_v16, 2 }
 0x3bf   :  { %v1325_v49 = vadd.f32 %v1285_v36, %v1217_v10  ;;  %v1251_v22 = vmul.f32 %v12794_v46, %v1229_v39  ;;  %v1458_v40 = vmul.f32 %v12806_v14, %v1229_v39  ;;  %v2449_v3 = vadd.f32 %v2448_v63, %v13033_v58  ;;  %v16638_v58 = vld [vmem:[#allocation47_spill] sm:$0xff] }
 0x3c0   :  { %v1490_v48 = vsel %vm1372_vm4, %v16613_v34, %v1489_v25  ;;  %v1326_v59 = vadd.f32 %v1287_v50, %v1218_v56  ;;  %v16614_v57 = vrot.slane %v13185_v41, 2  ;;  %v1491_v8 = vrot.slane %v1450_v44, 2  ;;  %v1758_v56 = vpop.permute.xlu0 %1757 }
 0x3c1   :  { %v1531_v10 = vadd.f32 %v1490_v48, %v1428_v55  ;;  %v16615_v16 = vrot.slane %v13189_v0, 3  ;;  %v13264_v29 = vadd.f32 %v1100_v20, %v999_v15  ;;  %v1429_v39 = vadd.f32 %v13024_v2, %v1325_v49 }
 0x3c2   :  { %v13255_v36 = vsel %vm1372_vm4, %v1400_v17, %v16614_v57  ;;  %v13257_v61 = vpop.permute.xlu1 %1119  ;;  %v1288_v63 = vrot.slane %v13232_v54, 1  ;;  %v16465_v50 = vrot.slane %v13235_v24, 1  ;;  %v16464_v17 = vrot.slane %v13238_v53, 2 }
 0x3c3   :  { %v13262_v34 = vsel %vm1579_vm3, %v1607_v11, %v16615_v16  ;;  %v1110_v55 = vadd.f32 %v1094_v21, %v13028_v45  ;;  %v1493_v44 = vrot.slane %v13244_v23, 2  ;;  %v2450_v48 = vadd.f32 %v2449_v3, %v13094_v38 }
 0x3c4   :  { %v1300_v57 = vrot.slane %v1251_v22, 1  ;;  %v1507_v11 = vrot.slane %v1458_v40, 2  ;;  %v1430_v15 = vadd.f32 %v13056_v62, %v1326_v59  ;;  %v13275_v20 = vadd.f32 %v12853_v43, %v1531_v10 }
 0x3c5   :  { %v1492_v2 = vsel %vm1372_vm4, %v1489_v25, %v1491_v8  ;;  %v16617_v49 = vrot.slane %v13049_v33, 1  ;;  %v16618_v54 = vrot.slane %v13016_v27, 1  ;;  %v13284_v45 = vmul.f32 %v1754_v51, %v12758_v6 }
 0x3c6   :  { %16616 = vst [vmem:[#allocation56_spill] sm:$0xff] %v13275_v20  ;;  %v1532_v21 = vadd.f32 %v1492_v2, %v1429_v39  ;;  %v13287_v23 = vmul.f32 %v1754_v51, %v12760_v52  ;;  %v1289_v62 = vsel %vm1160_vm5, %v1286_v37, %v1288_v63  ;;  %v1246_v43 = vmul.f32 %v12794_v46, %v13053_v28  ;;  %v13299_v59 = vpop.permute.xlu1 %1749  ;;  %v1762_v39 = vpop.permute.xlu0 %1761 }
 0x3c7   :  { %v1181_v16 = vsel %vm1160_vm5, %v16618_v54, %v16617_v49  ;;  %v1494_v25 = vsel %vm1372_vm4, %v1491_v8, %v1493_v44  ;;  %v1095_v27 = vmul.f32 %v12784_v60, %v13021_v9  ;;  %v13297_v40 = vmul.f32 %v12806_v14, %v13021_v9 }
 0x3c8   :  { %v1219_v22 = vadd.f32 %v1181_v16, %v1110_v55  ;;  %v13304_v3 = vsel %vm1160_vm5, %v16465_v50, %v1300_v57  ;;  %v13309_v37 = vsel %vm1372_vm4, %v16464_v17, %v1507_v11  ;;  %v1533_v10 = vadd.f32 %v1494_v25, %v1430_v15 }
 0x3c9   :  { %16619 = vst [vmem:[#allocation43_spill] sm:$0xff] %v13309_v37  ;;  %v13312_v8 = vmul.f32 %v1754_v51, %v12751_v35  ;;  %v2451_v9 = vadd.f32 %v2450_v48, %v13275_v20  ;;  %v13316_v55 = vmul.f32 %v1754_v51, %v12772_v18  ;;  %v13319_v49 = vmul.f32 %v1758_v56, %v12760_v52  ;;  %v16640_v37 = vld [vmem:[#allocation48_spill] sm:$0xff] }
 0x3ca   :  { %v1327_v2 = vadd.f32 %v1289_v62, %v1219_v22  ;;  %v13322_v57 = vadd.f32 %v13042_v12, %v1532_v21  ;;  %v13326_v15 = vmul.f32 %v1758_v56, %v12751_v35  ;;  %v1290_v54 = vrot.slane %v1246_v43, 1 }
 0x3cb   :  { %16620 = vst [vmem:[#allocation57_spill] sm:$0xff] %v13316_v55  ;;  %v1111_v48 = vadd.f32 %v1095_v27, %v13060_v1  ;;  %v1495_v51 = vrot.slane %v13297_v40, 2  ;;  %v13332_v62 = vmul.f32 %v1758_v56, %v12758_v6  ;;  %v13335_v22 = vadd.f32 %v13077_v13, %v1533_v10  ;;  %v13352_v10 = vpop.permute.xlu1 %1846 }
 0x3cc   :  { %16621 = vst [vmem:[#allocation34_spill] sm:$0xff] %v13322_v57  ;;  %v16624_v21 = vrot.slane %v13069_v47, 1  ;;  %v16625_v25 = vrot.slane %v13049_v33, 1  ;;  %v1247_v11 = vmul.f32 %v12794_v46, %v13104_v32  ;;  %v1431_v1 = vadd.f32 %v13083_v7, %v1327_v2  ;;  %v1766_v7 = vpop.permute.xlu0 %1765 }
 0x3cd   :  { %16622 = vst [vmem:[#allocation39_spill] sm:$0xff] %v13332_v62  ;;  %16623 = vst [vmem:[#allocation58_spill] sm:$0xff] %v13335_v22  ;;  %v13347_v27 = vmul.f32 %v1758_v56, %v12772_v18  ;;  %v2186_v40 = vrot.slane %v13319_v49, 2  ;;  %v1096_v13 = vmul.f32 %v12784_v60, %v13053_v28  ;;  %v2452_v17 = vadd.f32 %v2451_v9, %v13322_v57  ;;  %v16631_v49 = vld [vmem:[#allocation44_spill] sm:$0xff] }
 0x3ce   :  { %v1183_v43 = vsel %vm1160_vm5, %v16625_v25, %v16624_v21  ;;  %v1291_v21 = vsel %vm1160_vm5, %v1288_v63, %v1290_v54  ;;  %v1453_v25 = vmul.f32 %v12806_v14, %v13053_v28  ;;  %v1496_v56 = vsel %vm1372_vm4, %v1493_v44, %v1495_v51 }
 0x3cf   :  { %16626 = vst [vmem:[#allocation59_spill] sm:$0xff] %v13347_v27  ;;  %v1220_v2 = vadd.f32 %v1183_v43, %v1111_v48  ;;  %v1248_v50 = vmul.f32 %v12794_v46, %v13165_v26  ;;  %v2453_v12 = vadd.f32 %v2452_v17, %v13335_v22  ;;  %v16627_v9 = vrot.slane %v13087_v19, 1 }
 0x3d0   :  { %v16628_v33 = vrot.slane %v13069_v47, 1  ;;  %v1097_v28 = vmul.f32 %v12784_v60, %v13104_v32  ;;  %v1292_v16 = vrot.slane %v1247_v11, 1  ;;  %v1534_v48 = vadd.f32 %v1496_v56, %v1431_v1  ;;  %v13398_v56 = vpop.permute.xlu1 %1850  ;;  %v1770_v38 = vpop.permute.xlu0 %1769 }
 0x3d1   :  { %v16629_v44 = vrot.slane %v13287_v23, 2  ;;  %v1112_v57 = vadd.f32 %v1096_v13, %v16631_v49  ;;  %v1328_v20 = vadd.f32 %v1291_v21, %v1220_v2  ;;  %v16632_v17 = vrot.slane %v13326_v15, 3 }
 0x3d2   :  { %v1185_v63 = vsel %vm1160_vm5, %v16628_v33, %v16627_v9  ;;  %v16633_v22 = vrot.slane %v13312_v8, 3  ;;  %v1497_v33 = vrot.slane %v1453_v25, 2  ;;  %v13385_v9 = vmul.f32 %v1762_v39, %v12758_v6 }
 0x3d3   :  { %v13374_v43 = vsel %vm1372_vm4, %v16629_v44, %v2186_v40  ;;  %v13388_v11 = vmul.f32 %v1762_v39, %v12760_v52  ;;  %v13391_v1 = vmul.f32 %v1762_v39, %v12772_v18  ;;  %v13394_v13 = vmul.f32 %v1762_v39, %v12751_v35 }
 0x3d4   :  { %16630 = vst [vmem:[#allocation60_spill] sm:$0xff] %v13374_v43  ;;  %v13382_v47 = vsel %vm1579_vm3, %v16633_v22, %v16632_v17  ;;  %16635 = vst [vmem:[#allocation37_spill] sm:$0xff] %v13385_v9  ;;  %v1294_v21 = vrot.slane %v1248_v50, 1  ;;  %v1249_v2 = vmul.f32 %v12794_v46, %v13216_v30  ;;  %v16637_v22 = vld [vmem:[#allocation51_spill] sm:$0xff]  ;;  %v1293_v49 = vsel %vm1160_vm5, %v1290_v54, %v1292_v16  ;;  %v16644_v54 = vld [vmem:[#allocation53_spill] sm:$0xff] }
 0x3d5   :  { %16634 = vst [vmem:[#allocation32_spill] sm:$0xff] %v13382_v47  ;;  %16636 = vst [vmem:[#allocation33_spill] sm:$0xff] %v13391_v1  ;;  %v1113_v25 = vadd.f32 %v1097_v28, %v16637_v22  ;;  %v1454_v44 = vmul.f32 %v12806_v14, %v13104_v32  ;;  %v1098_v17 = vmul.f32 %v12784_v60, %v13165_v26  ;;  %v2188_v22 = vrot.slane %v13388_v11, 2  ;;  %v16641_v32 = vld [vmem:[#allocation49_spill] sm:$0xff] }
 0x3d6   :  { %v13407_v39 = vadd.f32 %v16638_v58, %v1534_v48  ;;  %v1221_v50 = vadd.f32 %v1185_v63, %v1112_v57  ;;  %v1432_v47 = vadd.f32 %v16640_v37, %v1328_v20  ;;  %v1099_v1 = vmul.f32 %v12784_v60, %v13216_v30 }
 0x3d7   :  { %v1498_v28 = vsel %vm1372_vm4, %v1495_v51, %v1497_v33  ;;  %v16642_v43 = vrot.slane %v16641_v32, 1  ;;  %v16643_v27 = vrot.slane %v13087_v19, 1  ;;  %v2386_v58 = vrot.slane %v13394_v13, 3  ;;  %v13430_v13 = vpop.permute.xlu1 %1854 }
 0x3d8   :  { %16639 = vst [vmem:[#allocation44_spill] sm:$0xff] %v13407_v39  ;;  %v1329_v57 = vadd.f32 %v1293_v49, %v1221_v50  ;;  %v1295_v20 = vsel %vm1160_vm5, %v1292_v16, %v1294_v21  ;;  %v1296_v37 = vrot.slane %v1249_v2, 1  ;;  %v1499_v48 = vrot.slane %v1454_v44, 2  ;;  %v1774_v49 = vpop.permute.xlu0 %1773  ;;  %v16646_v44 = vld [vmem:[#allocation52_spill] sm:$0xff] }
 0x3d9   :  { %v1187_v62 = vsel %vm1160_vm5, %v16643_v27, %v16642_v43  ;;  %v13423_v51 = vmul.f32 %v1766_v7, %v12772_v18  ;;  %v1114_v9 = vadd.f32 %v1098_v17, %v16644_v54  ;;  %v2454_v11 = vadd.f32 %v2453_v12, %v13407_v39  ;;  %v16645_v27 = vld [vmem:[#allocation55_spill] sm:$0xff] }
 0x3da   :  { %v1222_v63 = vadd.f32 %v1187_v62, %v1113_v25  ;;  %v1535_v55 = vadd.f32 %v1498_v28, %v1432_v47  ;;  %v1455_v19 = vmul.f32 %v12806_v14, %v13165_v26  ;;  %v1115_v43 = vadd.f32 %v1099_v1, %v16645_v27 }
 0x3db   :  { %v13433_v16 = vsel %vm1372_vm4, %v2186_v40, %v2188_v22  ;;  %v13436_v62 = vmul.f32 %v1766_v7, %v12758_v6  ;;  %v2153_v2 = vmul.f32 %v1766_v7, %v12760_v52  ;;  %v1433_v12 = vadd.f32 %v16646_v44, %v1329_v57  ;;  %v16651_v57 = vld [vmem:[#allocation50_spill] sm:$0xff] }
 0x3dc   :  { %v1330_v25 = vadd.f32 %v1295_v20, %v1222_v63  ;;  %v2351_v47 = vmul.f32 %v1766_v7, %v12751_v35  ;;  %v16647_v26 = vrot.slane %v13159_v5, 1  ;;  %v16648_v1 = vrot.slane %v16641_v32, 1 }
 0x3dd   :  { %v1297_v40 = vsel %vm1160_vm5, %v1294_v21, %v1296_v37  ;;  %v1500_v50 = vsel %vm1372_vm4, %v1497_v33, %v1499_v48  ;;  %v16649_v54 = vrot.slane %v13181_v42, 1  ;;  %v1142_v7 = vmul.f32 %v12758_v6, %v13257_v61  ;;  %v16653_v33 = vld [vmem:[#allocation41_spill] sm:$0xff] }
 0x3de   :  { %v1189_v17 = vsel %vm1160_vm5, %v16648_v1, %v16647_v26  ;;  %v16650_v20 = vmov %v16647_v26  ;;  %v13456_v27 = vadd.f32 %v16651_v57, %v1535_v55  ;;  %v1501_v32 = vrot.slane %v1455_v19, 2 }
 0x3df   :  { %v1223_v28 = vadd.f32 %v1189_v17, %v1114_v9  ;;  %v1191_v63 = vsel %vm1160_vm5, %v16650_v20, %v16649_v54  ;;  %v1456_v21 = vmul.f32 %v12806_v14, %v13216_v30  ;;  %v2190_v26 = vrot.slane %v2153_v2, 2 }
 0x3e0   :  { %16652 = vst [vmem:[#allocation51_spill] sm:$0xff] %v13456_v27  ;;  %v1224_v44 = vadd.f32 %v1191_v63, %v1115_v43  ;;  %v1434_v9 = vadd.f32 %v16653_v33, %v1330_v25  ;;  %v16654_v1 = vrot.slane %v13235_v24, 1  ;;  %v16655_v54 = vrot.slane %v13326_v15, 3  ;;  %v13470_v63 = vpop.permute.xlu1 %1858  ;;  %v1778_v25 = vpop.permute.xlu0 %1777 }
 0x3e1   :  { %v1331_v17 = vadd.f32 %v1297_v40, %v1223_v28  ;;  %v1536_v55 = vadd.f32 %v1500_v50, %v1433_v12  ;;  %v2388_v43 = vrot.slane %v2351_v47, 3  ;;  %v13473_v30 = vmul.f32 %v1770_v38, %v12772_v18 }
 0x3e2   :  { %v1299_v5 = vsel %vm1160_vm5, %v1296_v37, %v16654_v1  ;;  %v13467_v20 = vsel %vm1579_vm3, %v16655_v54, %v2386_v58  ;;  %v2154_v2 = vmul.f32 %v1770_v38, %v12760_v52  ;;  %v2352_v24 = vmul.f32 %v1770_v38, %v12751_v35  ;;  %v16656_v1 = vld [vmem:[#allocation54_spill] sm:$0xff] }
 0x3e3   :  { %v1192_v37 = vrot.slane %v1142_v7, 1  ;;  %v2455_v15 = vadd.f32 %v2454_v11, %v13456_v27  ;;  %v1502_v40 = vsel %vm1372_vm4, %v1499_v48, %v1501_v32  ;;  %v1332_v28 = vadd.f32 %v1299_v5, %v1224_v44 }
 0x3e4   :  { %v1503_v12 = vrot.slane %v1456_v21, 2  ;;  %v13480_v50 = vsel %vm1372_vm4, %v2188_v22, %v2190_v26  ;;  %v1537_v47 = vadd.f32 %v1502_v40, %v1434_v9  ;;  %v13483_v57 = vmul.f32 %v1770_v38, %v12758_v6 }
 0x3e5   :  { %v1435_v33 = vadd.f32 %v13201_v4, %v1331_v17  ;;  %v13487_v54 = vadd.f32 %v16656_v1, %v1536_v55  ;;  %v13490_v7 = vsel %vm1579_vm3, %v2386_v58, %v2388_v43  ;;  %v2155_v11 = vmul.f32 %v1774_v49, %v12760_v52  ;;  %v13508_v55 = vpop.permute.xlu1 %1862 }
 0x3e6   :  { %v13494_v48 = vmul.f32 %v1774_v49, %v12751_v35  ;;  %v2192_v44 = vrot.slane %v2154_v2, 2  ;;  %v2390_v22 = vrot.slane %v2352_v24, 3  ;;  %v16658_v21 = vrot.slane %v13181_v42, 1 }
 0x3e7   :  { %16657 = vst [vmem:[#allocation47_spill] sm:$0xff] %v13487_v54  ;;  %v1354_v4 = vmul.f32 %v12760_v52, %v13257_v61  ;;  %v1436_v9 = vadd.f32 %v13255_v36, %v1332_v28  ;;  %v1504_v5 = vsel %vm1372_vm4, %v1501_v32, %v1503_v12  ;;  %v13504_v58 = vmul.f32 %v1774_v49, %v12758_v6  ;;  %v1782_v36 = vpop.permute.xlu0 %1781 }
 0x3e8   :  { %v1193_v38 = vsel %vm1160_vm5, %v16658_v21, %v1192_v37  ;;  %v1561_v17 = vmul.f32 %v12751_v35, %v13257_v61  ;;  %v13511_v2 = vadd.f32 %v13195_v31, %v1537_v47  ;;  %v1538_v24 = vadd.f32 %v1504_v5, %v1435_v33 }
 0x3e9   :  { %v13515_v37 = vmul.f32 %v1774_v49, %v12772_v18  ;;  %v2456_v32 = vadd.f32 %v2455_v15, %v13487_v54  ;;  %v2194_v40 = vrot.slane %v2155_v11, 2  ;;  %v2392_v28 = vrot.slane %v13494_v48, 3 }
 0x3ea   :  { %16659 = vst [vmem:[#allocation48_spill] sm:$0xff] %v13511_v2  ;;  %v1225_v1 = vadd.f32 %v1193_v38, %v13264_v29  ;;  %v13521_v61 = vsel %vm1372_vm4, %v2190_v26, %v2192_v44  ;;  %v13524_v31 = vsel %vm1579_vm3, %v2388_v43, %v2390_v22  ;;  %v16660_v47 = vrot.slane %v13238_v53, 2  ;;  %v16661_v29 = vld [vmem:[#allocation35_spill] sm:$0xff] }
 0x3eb   :  { %v1404_v49 = vrot.slane %v1354_v4, 2  ;;  %v1611_v15 = vrot.slane %v1561_v17, 3  ;;  %v2156_v11 = vmul.f32 %v1778_v25, %v12760_v52  ;;  %v2457_v48 = vadd.f32 %v2456_v32, %v13511_v2  ;;  %v13548_v17 = vpop.permute.xlu1 %1866 }
 0x3ec   :  { %v1506_v33 = vsel %vm1372_vm4, %v1503_v12, %v16660_v47  ;;  %v13533_v38 = vadd.f32 %v16661_v29, %v1538_v24  ;;  %v13536_v26 = vmul.f32 %v1778_v25, %v12758_v6  ;;  %v2354_v43 = vmul.f32 %v1778_v25, %v12751_v35 }
 0x3ed   :  { %v1539_v21 = vadd.f32 %v1506_v33, %v1436_v9  ;;  %v13540_v53 = vsel %vm1372_vm4, %v2192_v44, %v2194_v40  ;;  %v13543_v12 = vsel %vm1579_vm3, %v2390_v22, %v2392_v28  ;;  %v1333_v4 = vadd.f32 %v13304_v3, %v1225_v1  ;;  %v1786_v33 = vpop.permute.xlu0 %1785 }
 0x3ee   :  { %16662 = vst [vmem:[#allocation49_spill] sm:$0xff] %v13533_v38  ;;  %16663 = vst [vmem:[#allocation53_spill] sm:$0xff] %v13543_v12  ;;  %v1946_v9 = vmul.f32 %v13299_v59, %v12758_v6  ;;  %v16664_v24 = vrot.slane %v13185_v41, 2  ;;  %v13554_v47 = vmul.f32 %v1778_v25, %v12772_v18  ;;  %v2149_v44 = vmul.f32 %v13299_v59, %v12760_v52 }
 0x3ef   :  { %v2347_v22 = vmul.f32 %v13299_v59, %v12751_v35  ;;  %v13561_v3 = vadd.f32 %v13262_v34, %v1539_v21  ;;  %v16666_v1 = vrot.slane %v13189_v0, 3  ;;  %v2196_v41 = vrot.slane %v2156_v11, 2 }
 0x3f0   :  { %v1405_v32 = vsel %vm1372_vm4, %v16664_v24, %v1404_v49  ;;  %v2157_v49 = vmul.f32 %v1782_v36, %v12760_v52  ;;  %v13570_v25 = vadd.f32 %v2457_v48, %v13533_v38  ;;  %v2394_v5 = vrot.slane %v2354_v43, 3  ;;  %v13593_v24 = vpop.permute.xlu1 %1870 }
 0x3f1   :  { %16665 = vst [vmem:[#allocation55_spill] sm:$0xff] %v13561_v3  ;;  %v13566_v29 = vsel %vm1579_vm3, %v16666_v1, %v1611_v15  ;;  %v2355_v42 = vmul.f32 %v1782_v36, %v12751_v35  ;;  %v13574_v19 = vadd.f32 %v1405_v32, %v1333_v4  ;;  %v1980_v34 = vrot.slane %v1946_v9, 1 }
 0x3f2   :  { %16667 = vst [vmem:[#allocation52_spill] sm:$0xff] %v13566_v29  ;;  %16668 = vst [vmem:[#allocation50_spill] sm:$0xff] %v13570_v25  ;;  %v13577_v21 = vmul.f32 %v1782_v36, %v12758_v6  ;;  %v2051_v0 = vmul.f32 %v13398_v56, %v12794_v46  ;;  %v1812_v15 = vmul.f32 %v13299_v59, %v12772_v18  ;;  %v2183_v11 = vrot.slane %v2149_v44, 2 }
 0x3f3   :  { %16669 = vst [vmem:[#allocation41_spill] sm:$0xff] %v13574_v19  ;;  %v2381_v48 = vrot.slane %v2347_v22, 3  ;;  %v1909_v1 = vmul.f32 %v13352_v10, %v12784_v60  ;;  %v13586_v43 = vsel %vm1372_vm4, %v2194_v40, %v2196_v41  ;;  %v13589_v4 = vmul.f32 %v1782_v36, %v12772_v18  ;;  %v1790_v22 = vpop.permute.xlu0 %1789 }
 0x3f4   :  { %v2198_v9 = vrot.slane %v2157_v49, 2  ;;  %v2050_v32 = vmul.f32 %v13352_v10, %v12794_v46  ;;  %v13596_v38 = vsel %vm1579_vm3, %v2392_v28, %v2394_v5  ;;  %v2396_v59 = vrot.slane %v2355_v42, 3 }
 0x3f5   :  { %16670 = vst [vmem:[#allocation54_spill] sm:$0xff] %v13596_v38  ;;  %v2158_v44 = vmul.f32 %v1786_v33, %v12760_v52  ;;  %v2052_v40 = vmul.f32 %v13430_v13, %v12794_v46  ;;  %v16671_v36 = vrot.slane %v13284_v45, 1  ;;  %v1910_v54 = vmul.f32 %v13398_v56, %v12784_v60 }
 0x3f6   :  { %v2085_v27 = vrot.slane %v2051_v0, 1  ;;  %v16672_v28 = vrot.slane %v13287_v23, 2  ;;  %v16673_v39 = vrot.slane %v13312_v8, 3  ;;  %v1925_v3 = vadd.f32 %v1909_v1, %v1812_v15 }
 0x3f7   :  { %v1982_v49 = vsel %vm1160_vm5, %v1980_v34, %v16671_v36  ;;  %v2356_v2 = vmul.f32 %v1786_v33, %v12751_v35  ;;  %v13617_v29 = vsel %vm1372_vm4, %v2196_v41, %v2198_v9  ;;  %v2084_v34 = vrot.slane %v2050_v32, 1  ;;  %v13637_v32 = vpop.permute.xlu1 %1874 }
 0x3f8   :  { %v2185_v42 = vsel %vm1372_vm4, %v2183_v11, %v16672_v28  ;;  %v13613_v25 = vsel %vm1579_vm3, %v2381_v48, %v16673_v39  ;;  %16674 = vst [vmem:[#allocation35_spill] sm:$0xff] %v13617_v29  ;;  %v2248_v36 = vmul.f32 %v13352_v10, %v12806_v14  ;;  %v13622_v0 = vmul.f32 %v1786_v33, %v12772_v18  ;;  %v16678_v11 = vld [vmem:[#allocation57_spill] sm:$0xff] }
 0x3f9   :  { %v13625_v23 = vsel %vm1579_vm3, %v2394_v5, %v2396_v59  ;;  %v13628_v8 = vmul.f32 %v1786_v33, %v12758_v6  ;;  %v2200_v39 = vrot.slane %v2158_v44, 2  ;;  %v2087_v15 = vrot.slane %v2052_v40, 1  ;;  %v1794_v33 = vpop.permute.xlu0 %1793  ;;  %v16680_v40 = vld [vmem:[#allocation39_spill] sm:$0xff] }
 0x3fa   :  { %16675 = vst [vmem:[#allocation61_spill] sm:$0xff] %v13622_v0  ;;  %16676 = vst [vmem:[#allocation62_spill] sm:$0xff] %v13625_v23  ;;  %v1926_v48 = vadd.f32 %v1910_v54, %v16678_v11  ;;  %v2086_v41 = vsel %vm1160_vm5, %v2084_v34, %v2085_v27  ;;  %v2249_v1 = vmul.f32 %v13398_v56, %v12806_v14  ;;  %v2398_v5 = vrot.slane %v2356_v2, 3 }
 0x3fb   :  { %16677 = vst [vmem:[#allocation63_spill] sm:$0xff] %v13628_v8  ;;  %v13635_v10 = vmul.f32 %v1790_v22, %v12760_v52  ;;  %v2029_v28 = vadd.f32 %v1982_v49, %v1925_v3  ;;  %v13640_v23 = vmul.f32 %v1790_v22, %v12758_v6  ;;  %v13644_v44 = vmul.f32 %v13470_v63, %v12794_v46  ;;  %v16686_v3 = vld [vmem:[#allocation37_spill] sm:$0xff] }
 0x3fc   :  { %v2282_v54 = vrot.slane %v2248_v36, 2  ;;  %v16681_v34 = vrot.slane %v16680_v40, 1  ;;  %v16682_v56 = vrot.slane %v13284_v45, 1  ;;  %v2357_v19 = vmul.f32 %v1790_v22, %v12751_v35 }
 0x3fd   :  { %16679 = vst [vmem:[#allocation57_spill] sm:$0xff] %v13640_v23  ;;  %v1911_v2 = vmul.f32 %v13430_v13, %v12784_v60  ;;  %v2133_v49 = vadd.f32 %v2086_v41, %v2029_v28  ;;  %v13656_v38 = vmul.f32 %v1790_v22, %v12772_v18  ;;  %v2088_v12 = vsel %vm1160_vm5, %v2085_v27, %v2087_v15 }
 0x3fe   :  { %v1984_v11 = vsel %vm1160_vm5, %v16682_v56, %v16681_v34  ;;  %v13660_v36 = vsel %vm1372_vm4, %v2198_v9, %v2200_v39  ;;  %v2283_v45 = vrot.slane %v2249_v1, 2  ;;  %v2202_v34 = vrot.slane %v13635_v10, 2  ;;  %v16689_v1 = vld [vmem:[#allocation59_spill] sm:$0xff] }
 0x3ff   :  { %16683 = vst [vmem:[#allocation39_spill] sm:$0xff] %v13656_v38  ;;  %16684 = vst [vmem:[#allocation64_spill] sm:$0xff] %v13660_v36  ;;  %v2030_v0 = vadd.f32 %v1984_v11, %v1926_v48  ;;  %v13664_v56 = vsel %vm1579_vm3, %v2396_v59, %v2398_v5  ;;  %v2250_v41 = vmul.f32 %v13430_v13, %v12806_v14  ;;  %v2089_v22 = vrot.slane %v13644_v44, 1  ;;  %v13676_v36 = vpop.permute.xlu1 %1878 }
 0x400   :  { %16685 = vst [vmem:[#allocation65_spill] sm:$0xff] %v13664_v56  ;;  %v2400_v28 = vrot.slane %v2357_v19, 3  ;;  %v16687_v27 = vrot.slane %v16686_v3, 1  ;;  %v16688_v9 = vrot.slane %v16680_v40, 1  ;;  %v1927_v11 = vadd.f32 %v1911_v2, %v16689_v1  ;;  %v1798_v19 = vpop.permute.xlu0 %1797 }
 0x401   :  { %v2134_v10 = vadd.f32 %v2088_v12, %v2030_v0  ;;  %v2232_v59 = vadd.f32 %v2185_v42, %v2133_v49  ;;  %v13679_v29 = vmul.f32 %v1794_v33, %v12758_v6  ;;  %v2160_v13 = vmul.f32 %v1794_v33, %v12760_v52 }
 0x402   :  { %v1986_v48 = vsel %vm1160_vm5, %v16688_v9, %v16687_v27  ;;  %v2358_v44 = vmul.f32 %v1794_v33, %v12751_v35  ;;  %v2284_v56 = vsel %vm1372_vm4, %v2282_v54, %v2283_v45  ;;  %v13685_v40 = vsel %vm1372_vm4, %v2200_v39, %v2202_v34  ;;  %v16692_v9 = vld [vmem:[#allocation60_spill] sm:$0xff] }
 0x403   :  { %16690 = vst [vmem:[#allocation37_spill] sm:$0xff] %v13685_v40  ;;  %v13688_v27 = vmul.f32 %v1794_v33, %v12772_v18  ;;  %v2054_v12 = vmul.f32 %v13508_v55, %v12794_v46  ;;  %v2285_v42 = vrot.slane %v2250_v41, 2  ;;  %v1912_v0 = vmul.f32 %v13470_v63, %v12784_v60 }
 0x404   :  { %v2090_v2 = vsel %vm1160_vm5, %v2087_v15, %v2089_v22  ;;  %v2251_v49 = vmul.f32 %v13470_v63, %v12806_v14  ;;  %v13698_v54 = vsel %vm1579_vm3, %v2398_v5, %v2400_v28  ;;  %v2031_v39 = vadd.f32 %v1986_v48, %v1927_v11  ;;  %v13713_v11 = vpop.permute.xlu1 %1882 }
 0x405   :  { %16691 = vst [vmem:[#allocation59_spill] sm:$0xff] %v13688_v27  ;;  %v2233_v1 = vadd.f32 %v16692_v9, %v2134_v10  ;;  %v13702_v33 = vmul.f32 %v1798_v19, %v12760_v52  ;;  %v2331_v40 = vadd.f32 %v2284_v56, %v2232_v59  ;;  %v2204_v27 = vrot.slane %v2160_v13, 2  ;;  %v16696_v56 = vld [vmem:[#allocation33_spill] sm:$0xff] }
 0x406   :  { %v2402_v38 = vrot.slane %v2358_v44, 3  ;;  %v16693_v23 = vrot.slane %v13436_v62, 1  ;;  %v16694_v15 = vrot.slane %v16686_v3, 1  ;;  %v2135_v8 = vadd.f32 %v2090_v2, %v2031_v39  ;;  %v1802_v44 = vpop.permute.xlu0 %1801 }
 0x407   :  { %v13711_v5 = vmul.f32 %v1798_v19, %v12751_v35  ;;  %v2091_v48 = vrot.slane %v2054_v12, 1  ;;  %v2286_v10 = vsel %vm1372_vm4, %v2283_v45, %v2285_v42  ;;  %v1928_v59 = vadd.f32 %v1912_v0, %v16696_v56  ;;  %v16700_v56 = vld [vmem:[#allocation32_spill] sm:$0xff] }
 0x408   :  { %v1988_v63 = vsel %vm1160_vm5, %v16694_v15, %v16693_v23  ;;  %v2287_v9 = vrot.slane %v2251_v49, 2  ;;  %v13718_v13 = vmul.f32 %v1798_v19, %v12758_v6  ;;  %v2332_v41 = vadd.f32 %v2286_v10, %v2233_v1 }
 0x409   :  { %16695 = vst [vmem:[#allocation60_spill] sm:$0xff] %v13711_v5  ;;  %v2206_v3 = vrot.slane %v13702_v33, 2  ;;  %v1913_v23 = vmul.f32 %v13508_v55, %v12784_v60  ;;  %v2055_v12 = vmul.f32 %v13548_v17, %v12794_v46  ;;  %v13726_v2 = vadd.f32 %v13613_v25, %v2331_v40 }
 0x40a   :  { %v13729_v45 = vsel %vm1372_vm4, %v2202_v34, %v2204_v27  ;;  %v13732_v0 = vsel %vm1579_vm3, %v2400_v28, %v2402_v38  ;;  %v13736_v49 = vmul.f32 %v13508_v55, %v12806_v14  ;;  %v2234_v39 = vadd.f32 %v13433_v16, %v2135_v8  ;;  %v1806_v33 = vpop.permute.xlu0 %1805 }
 0x40b   :  { %16697 = vst [vmem:[#allocation33_spill] sm:$0xff] %v13732_v0  ;;  %v13740_v1 = vmul.f32 %v1798_v19, %v12772_v18  ;;  %v2092_v25 = vsel %vm1160_vm5, %v2089_v22, %v2091_v48  ;;  %v2032_v40 = vadd.f32 %v1988_v63, %v1928_v59  ;;  %v2288_v34 = vsel %vm1372_vm4, %v2285_v42, %v2287_v9  ;;  %v13758_v63 = vpop.permute.xlu1 %1886 }
 0x40c   :  { %v16698_v28 = vrot.slane %v13483_v57, 1  ;;  %v16699_v10 = vrot.slane %v13436_v62, 1  ;;  %v13752_v16 = vadd.f32 %v16700_v56, %v2332_v41  ;;  %v13755_v8 = vsel %vm1372_vm4, %v2204_v27, %v2206_v3 }
 0x40d   :  { %v1929_v19 = vadd.f32 %v1913_v23, %v13423_v51  ;;  %v2093_v22 = vrot.slane %v2055_v12, 1  ;;  %v2136_v42 = vadd.f32 %v2092_v25, %v2032_v40  ;;  %v2289_v59 = vrot.slane %v13736_v49, 2 }
 0x40e   :  { %v1990_v55 = vsel %vm1160_vm5, %v16699_v10, %v16698_v28  ;;  %v2162_v15 = vmul.f32 %v1802_v44, %v12760_v52  ;;  %v2056_v62 = vmul.f32 %v13593_v24, %v12794_v46  ;;  %v2333_v28 = vadd.f32 %v2288_v34, %v2234_v39 }
 0x40f   :  { %v16701_v41 = vrot.slane %v13711_v5, 3  ;;  %v13770_v51 = vmul.f32 %v1802_v44, %v12758_v6  ;;  %v1914_v23 = vmul.f32 %v13548_v17, %v12784_v60  ;;  %v13775_v12 = vmul.f32 %v1802_v44, %v12772_v18 }
 0x410   :  { %v13778_v49 = vmul.f32 %v1802_v44, %v12751_v35  ;;  %v16704_v25 = vrot.slane %v13504_v58, 1  ;;  %v16705_v39 = vrot.slane %v13483_v57, 1  ;;  %v2033_v34 = vadd.f32 %v1990_v55, %v1929_v19 }
 0x411   :  { %v13767_v27 = vsel %vm1579_vm3, %v2402_v38, %v16701_v41  ;;  %v2057_v38 = vmul.f32 %v13637_v32, %v12794_v46  ;;  %v2094_v10 = vsel %vm1160_vm5, %v2091_v48, %v2093_v22  ;;  %v2253_v56 = vmul.f32 %v13548_v17, %v12806_v14  ;;  %v13802_v17 = vpop.permute.xlu1 %1890 }
 0x412   :  { %16702 = vst [vmem:[#allocation32_spill] sm:$0xff] %v13767_v27  ;;  %16703 = vst [vmem:[#allocation66_spill] sm:$0xff] %v13778_v49  ;;  %v1992_v40 = vsel %vm1160_vm5, %v16705_v39, %v16704_v25  ;;  %v1915_v41 = vmul.f32 %v13593_v24, %v12784_v60  ;;  %v2235_v44 = vadd.f32 %v13480_v50, %v2136_v42  ;;  %v2208_v27 = vrot.slane %v2162_v15, 2 }
 0x413   :  { %v2290_v5 = vsel %vm1372_vm4, %v2287_v9, %v2289_v59  ;;  %v2095_v57 = vrot.slane %v2056_v62, 1  ;;  %v13795_v25 = vadd.f32 %v13467_v20, %v2333_v28  ;;  %v1930_v55 = vadd.f32 %v1914_v23, %v13473_v30  ;;  %v13808_v9 = vpop.permute.xlu0 %1809 }
 0x414   :  { %v13800_v48 = vmul.f32 %v1806_v33, %v12758_v6  ;;  %v2137_v0 = vadd.f32 %v2094_v10, %v2033_v34  ;;  %v13806_v50 = vmul.f32 %v1806_v33, %v12760_v52  ;;  %16706 = vst [vmem:[#allocation67_spill] sm:$0xff] %v13808_v9  ;;  %v2097_v15 = vrot.slane %v2057_v38, 1 }
 0x415   :  { %v2291_v20 = vrot.slane %v2253_v56, 2  ;;  %v13811_v42 = vmul.f32 %v1806_v33, %v12772_v18  ;;  %v1931_v30 = vadd.f32 %v1915_v41, %v13515_v37  ;;  %v13816_v62 = vmul.f32 %v13676_v36, %v12794_v46  ;;  %v13840_v49 = vpop.permute.xlu1 %1894 }
 0x416   :  { %v2334_v28 = vadd.f32 %v2290_v5, %v2235_v44  ;;  %v13819_v23 = vsel %vm1372_vm4, %v2206_v3, %v2208_v27  ;;  %v2096_v34 = vsel %vm1160_vm5, %v2093_v22, %v2095_v57  ;;  %v1916_v10 = vmul.f32 %v13637_v32, %v12784_v60 }
 0x417   :  { %v2034_v38 = vadd.f32 %v1992_v40, %v1930_v55  ;;  %v13826_v19 = vmul.f32 %v1806_v33, %v12751_v35  ;;  %v2254_v37 = vmul.f32 %v13593_v24, %v12806_v14  ;;  %v2236_v41 = vadd.f32 %v13521_v61, %v2137_v0 }
 0x418   :  { %v16488_v5 = vrot.slane %v13806_v50, 2  ;;  %v16708_v3 = vrot.slane %v13536_v26, 1  ;;  %v16709_v22 = vrot.slane %v13504_v58, 1  ;;  %v2098_v40 = vsel %vm1160_vm5, %v2095_v57, %v2097_v15  ;;  %v1907_v57 = vpop.permute.xlu0 %1906 }
 0x419   :  { %16707 = vst [vmem:[#allocation68_spill] sm:$0xff] %v13826_v19  ;;  %v2292_v55 = vsel %vm1372_vm4, %v2289_v59, %v2291_v20  ;;  %v2138_v33 = vadd.f32 %v2096_v34, %v2034_v38  ;;  %v2099_v39 = vrot.slane %v13816_v62, 1  ;;  %v13843_v61 = vadd.f32 %v13490_v7, %v2334_v28  ;;  %v16724_v19 = vld [vmem:[#allocation39_spill] sm:$0xff] }
 0x41a   :  { %v1994_v44 = vsel %vm1160_vm5, %v16709_v22, %v16708_v3  ;;  %v13847_v24 = vmul.f32 %v13808_v9, %v12758_v6  ;;  %v1932_v58 = vadd.f32 %v1916_v10, %v13554_v47  ;;  %v2255_v0 = vmul.f32 %v13637_v32, %v12806_v14 }
 0x41b   :  { %v2035_v56 = vadd.f32 %v1994_v44, %v1931_v30  ;;  %v2293_v30 = vrot.slane %v2254_v37, 2  ;;  %v13855_v62 = vmul.f32 %v13808_v9, %v12760_v52  ;;  %v2335_v7 = vadd.f32 %v2292_v55, %v2236_v41 }
 0x41c   :  { %v13860_v28 = vsel %vm1372_vm4, %v2208_v27, %v16488_v5  ;;  %v1827_v47 = vmul.f32 %v13808_v9, %v12772_v18  ;;  %v2059_v32 = vmul.f32 %v13713_v11, %v12794_v46  ;;  %v2237_v10 = vadd.f32 %v13540_v53, %v2138_v33  ;;  %v13882_v33 = vpop.permute.xlu1 %1898  ;;  %v16737_v9 = vld [vmem:[#allocation59_spill] sm:$0xff] }
 0x41d   :  { %v2139_v34 = vadd.f32 %v2098_v40, %v2035_v56  ;;  %v16710_v38 = vrot.slane %v13577_v21, 1  ;;  %v16711_v37 = vmov %v16708_v3  ;;  %v1917_v41 = vmul.f32 %v13676_v36, %v12784_v60 }
 0x41e   :  { %v2100_v27 = vsel %vm1160_vm5, %v2097_v15, %v2099_v39  ;;  %v2295_v18 = vrot.slane %v2255_v0, 2  ;;  %v1924_v44 = vmul.f32 %v1907_v57, %v12784_v60  ;;  %v2294_v40 = vsel %vm1372_vm4, %v2291_v20, %v2293_v30 }
 0x41f   :  { %v1996_v56 = vsel %vm1160_vm5, %v16711_v37, %v16710_v38  ;;  %v2238_v55 = vadd.f32 %v13586_v43, %v2139_v34  ;;  %v2256_v26 = vmul.f32 %v13676_v36, %v12806_v14  ;;  %v13885_v38 = vadd.f32 %v13524_v31, %v2335_v7  ;;  %v2048_v37 = vpop.permute.xlu0 %2047  ;;  %v16713_v7 = vld [vmem:[#allocation63_spill] sm:$0xff] }
 0x420   :  { %v2036_v22 = vadd.f32 %v1996_v56, %v1932_v58  ;;  %v1918_v58 = vmul.f32 %v13713_v11, %v12784_v60  ;;  %v2101_v0 = vrot.slane %v2059_v32, 1  ;;  %v2336_v56 = vadd.f32 %v2294_v40, %v2237_v10 }
 0x421   :  { %v13890_v20 = vmul.f32 %v1907_v57, %v12794_v46  ;;  %v1933_v43 = vadd.f32 %v1917_v41, %v13589_v4  ;;  %v2060_v36 = vmul.f32 %v13758_v63, %v12794_v46  ;;  %v2296_v34 = vsel %vm1372_vm4, %v2293_v30, %v2295_v18  ;;  %v16716_v30 = vld [vmem:[#allocation35_spill] sm:$0xff] }
 0x422   :  { %v2140_v15 = vadd.f32 %v2100_v27, %v2036_v22  ;;  %v13896_v59 = vadd.f32 %v1924_v44, %v1827_v47  ;;  %v13899_v31 = vmul.f32 %v1907_v57, %v12806_v14  ;;  %v16714_v27 = vrot.slane %v16713_v7, 1  ;;  %v16717_v44 = vld [vmem:[#allocation61_spill] sm:$0xff] }
 0x423   :  { %v16715_v32 = vrot.slane %v13577_v21, 1  ;;  %v2337_v22 = vadd.f32 %v2296_v34, %v2238_v55  ;;  %v2297_v40 = vrot.slane %v2256_v26, 2  ;;  %v13907_v4 = vmul.f32 %v2048_v37, %v12794_v46  ;;  %v16718_v21 = vld [vmem:[#allocation53_spill] sm:$0xff] }
 0x424   :  { %16712 = vst [vmem:[#allocation69_spill] sm:$0xff] %v13899_v31  ;;  %v2257_v41 = vmul.f32 %v13713_v11, %v12806_v14  ;;  %v2239_v47 = vadd.f32 %v16716_v30, %v2140_v15  ;;  %v1934_v5 = vadd.f32 %v1918_v58, %v16717_v44  ;;  %v2102_v57 = vsel %vm1160_vm5, %v2099_v39, %v2101_v0  ;;  %v16720_v15 = vld [vmem:[#allocation57_spill] sm:$0xff]  ;;  %v16723_v44 = vld [vmem:[#allocation54_spill] sm:$0xff] }
 0x425   :  { %v1998_v10 = vsel %vm1160_vm5, %v16715_v32, %v16714_v27  ;;  %v1919_v53 = vmul.f32 %v13758_v63, %v12784_v60  ;;  %v13917_v3 = vadd.f32 %v16718_v21, %v2336_v56  ;;  %v2103_v34 = vrot.slane %v2060_v36, 1  ;;  %v13920_v27 = vpop.permute.xlu1 %1902 }
 0x426   :  { %v2037_v26 = vadd.f32 %v1998_v10, %v1933_v43  ;;  %v13923_v11 = vmul.f32 %v2048_v37, %v12806_v14  ;;  %v16721_v32 = vrot.slane %v16720_v15, 1  ;;  %v16722_v58 = vrot.slane %v16713_v7, 1 }
 0x427   :  { %v13932_v30 = vmul.f32 %v13758_v63, %v12806_v14  ;;  %v2061_v56 = vmul.f32 %v13802_v17, %v12794_v46  ;;  %v2298_v43 = vsel %vm1372_vm4, %v2295_v18, %v2297_v40  ;;  %v2299_v37 = vrot.slane %v2257_v41, 2  ;;  %v16728_v41 = vld [vmem:[#allocation43_spill] sm:$0xff] }
 0x428   :  { %16719 = vst [vmem:[#allocation63_spill] sm:$0xff] %v13923_v11  ;;  %v2000_v39 = vsel %vm1160_vm5, %v16722_v58, %v16721_v32  ;;  %v2141_v10 = vadd.f32 %v2102_v57, %v2037_v26  ;;  %v13939_v21 = vadd.f32 %v16723_v44, %v2337_v22  ;;  %v2338_v55 = vadd.f32 %v2298_v43, %v2239_v47  ;;  %v16727_v57 = vld [vmem:[#allocation41_spill] sm:$0xff]  ;;  %v16732_v44 = vld [vmem:[#allocation52_spill] sm:$0xff]  ;;  %v16736_v22 = vld [vmem:[#allocation62_spill] sm:$0xff] }
 0x429   :  { %v2038_v7 = vadd.f32 %v2000_v39, %v1934_v5  ;;  %v1935_v32 = vadd.f32 %v1919_v53, %v16724_v19  ;;  %v16725_v58 = vrot.slane %v13679_v29, 1  ;;  %v16726_v63 = vrot.slane %v16720_v15, 1  ;;  %v16731_v39 = vld [vmem:[#allocation64_spill] sm:$0xff]  ;;  %v13967_v36 = vpop.permute.xlu1 %1943 }
 0x42a   :  { %v2104_v31 = vsel %vm1160_vm5, %v2101_v0, %v2103_v34  ;;  %v1920_v18 = vmul.f32 %v13802_v17, %v12784_v60  ;;  %v1540_v26 = vadd.f32 %v16728_v41, %v16727_v57  ;;  %v16729_v5 = vrot.slane %v13718_v13, 1  ;;  %v16735_v57 = vld [vmem:[#allocation50_spill] sm:$0xff] }
 0x42b   :  { %v2002_v11 = vsel %vm1160_vm5, %v16726_v63, %v16725_v58  ;;  %v16730_v19 = vmov %v16725_v58  ;;  %v2105_v47 = vrot.slane %v2061_v56, 1  ;;  %v2062_v15 = vmul.f32 %v13840_v49, %v12794_v46  ;;  %v16734_v63 = vld [vmem:[#allocation55_spill] sm:$0xff] }
 0x42c   :  { %v2004_v53 = vsel %vm1160_vm5, %v16730_v19, %v16729_v5  ;;  %v2240_v0 = vadd.f32 %v16731_v39, %v2141_v10  ;;  %v2300_v43 = vsel %vm1372_vm4, %v2297_v40, %v2299_v37  ;;  %v13963_v58 = vadd.f32 %v16732_v44, %v1540_v26 }
 0x42d   :  { %v2459_v41 = vadd.f32 %v16735_v57, %v16734_v63  ;;  %v13970_v29 = vadd.f32 %v16736_v22, %v2338_v55  ;;  %v2039_v5 = vadd.f32 %v2002_v11, %v1935_v32  ;;  %v2142_v56 = vadd.f32 %v2104_v31, %v2038_v7 }
 0x42e   :  { %16733 = vst [vmem:[#allocation35_spill] sm:$0xff] %v13963_v58  ;;  %v2063_v19 = vmul.f32 %v13882_v33, %v12794_v46  ;;  %v1936_v10 = vadd.f32 %v1920_v18, %v16737_v9  ;;  %v13977_v40 = vmul.f32 %v13802_v17, %v12806_v14  ;;  %v1921_v26 = vmul.f32 %v13840_v49, %v12784_v60  ;;  %v16738_v18 = vld [vmem:[#allocation37_spill] sm:$0xff] }
 0x42f   :  { %v2460_v39 = vadd.f32 %v2459_v41, %v13963_v58  ;;  %v2106_v44 = vsel %vm1160_vm5, %v2103_v34, %v2105_v47  ;;  %v2107_v55 = vrot.slane %v2062_v15, 1  ;;  %v2064_v31 = vmul.f32 %v13920_v27, %v12794_v46 }
 0x430   :  { %v1962_v11 = vmul.f32 %v13967_v36, %v12758_v6  ;;  %v1922_v9 = vmul.f32 %v13882_v33, %v12784_v60  ;;  %v1923_v17 = vmul.f32 %v13920_v27, %v12784_v60  ;;  %v2339_v32 = vadd.f32 %v2300_v43, %v2240_v0 }
 0x431   :  { %v2461_v7 = vadd.f32 %v2460_v39, %v13726_v2  ;;  %v2241_v22 = vadd.f32 %v16738_v18, %v2142_v56  ;;  %v16739_v34 = vrot.slane %v13932_v30, 2  ;;  %v2109_v57 = vrot.slane %v2063_v19, 1 }
 0x432   :  { %v16493_v46 = vmov 0.0   ;;  %v2040_v6 = vadd.f32 %v2004_v53, %v1936_v10  ;;  %v2143_v41 = vadd.f32 %v2106_v44, %v2039_v5  ;;  %v1937_v58 = vadd.f32 %v1921_v26, %v13740_v1 }
 0x433   :  { %v2302_v15 = vsel %vm1372_vm4, %v2299_v37, %v16739_v34  ;;  %10347 = vmatprep.subr.mxu0 %v16493_v46  ;;  %10406 = vmatprep.subr.mxu1 %v16493_v46  ;;  %v2462_v60 = vadd.f32 %v2461_v7, %v13752_v16  ;;  %v16740_v0 = vrot.slane %v13770_v51, 1  ;;  %v16741_v43 = vrot.slane %v13718_v13, 1 }
 0x434   :  { %v2108_v37 = vsel %vm1160_vm5, %v2105_v47, %v2107_v55  ;;  %v2111_v19 = vrot.slane %v2064_v31, 1  ;;  %v2011_v39 = vrot.slane %v1962_v11, 1  ;;  %v2303_v18 = vrot.slane %v13977_v40, 2  ;;  %10379 = vmatprep.mubr.msk.f32.mxu0 %vm11444_vm6, %v16493_v46  ;;  %10438 = vmatprep.mubr.msk.f32.mxu1 %vm11444_vm6, %v16493_v46 }
 0x435   :  { %v2006_v56 = vsel %vm1160_vm5, %v16741_v43, %v16740_v0  ;;  %v1938_v34 = vadd.f32 %v1922_v9, %v13775_v12  ;;  %v1939_v53 = vadd.f32 %v1923_v17, %v13811_v42  ;;  %v2463_v1 = vadd.f32 %v2462_v60, %v13795_v25 }
 0x436   :  { %v2340_v5 = vadd.f32 %v2302_v15, %v2241_v22  ;;  %v2260_v10 = vmul.f32 %v13840_v49, %v12806_v14  ;;  %v16742_v13 = vrot.slane %v13800_v48, 1  ;;  %v16743_v26 = vmov %v16740_v0 }
 0x437   :  { %v2110_v44 = vsel %vm1160_vm5, %v2107_v55, %v2109_v57  ;;  %v2242_v40 = vadd.f32 %v13729_v45, %v2143_v41  ;;  %v2041_v31 = vadd.f32 %v2006_v56, %v1937_v58  ;;  %v2144_v12 = vadd.f32 %v2108_v37, %v2040_v6 }
 0x438   :  { %v2008_v47 = vsel %vm1160_vm5, %v16743_v26, %v16742_v13  ;;  %v2464_v42 = vadd.f32 %v2463_v1, %v13843_v61  ;;  %v2261_v11 = vmul.f32 %v13882_v33, %v12806_v14  ;;  %v16744_v9 = vrot.slane %v13847_v24, 1 }
 0x439   :  { %v16745_v49 = vmov %v16742_v13  ;;  %v2112_v51 = vsel %vm1160_vm5, %v2109_v57, %v2111_v19  ;;  %v2042_v45 = vadd.f32 %v2008_v47, %v1938_v34  ;;  %v2145_v58 = vadd.f32 %v2110_v44, %v2041_v31  ;;  %v16754_v31 = vld [vmem:[#allocation67_spill] sm:$0xff] }
 0x43a   :  { %v2010_v17 = vsel %vm1160_vm5, %v16745_v49, %v16744_v9  ;;  %v16746_v7 = vmov %v16744_v9  ;;  %v2465_v15 = vadd.f32 %v2464_v42, %v13885_v38  ;;  %v2305_v6 = vrot.slane %v2260_v10, 2  ;;  %v16756_v42 = vld [vmem:[#allocation33_spill] sm:$0xff] }
 0x43b   :  { %v2012_v55 = vsel %vm1160_vm5, %v16746_v7, %v2011_v39  ;;  %v2043_v22 = vadd.f32 %v2010_v17, %v1939_v53  ;;  %v16747_v33 = vrot.slane %v13890_v20, 1  ;;  %v2262_v48 = vmul.f32 %v13920_v27, %v12806_v14  ;;  %v16757_v17 = vld [vmem:[#allocation63_spill] sm:$0xff] }
 0x43c   :  { %v2165_v57 = vmul.f32 %v13967_v36, %v12760_v52  ;;  %v2243_v24 = vadd.f32 %v13755_v8, %v2144_v12  ;;  %v2146_v60 = vadd.f32 %v2112_v51, %v2042_v45  ;;  %v2466_v0 = vadd.f32 %v2465_v15, %v13917_v3 }
 0x43d   :  { %v2114_v41 = vsel %vm1160_vm5, %v2111_v19, %v16747_v33  ;;  %v2044_v43 = vadd.f32 %v2012_v55, %v13896_v59  ;;  %v16748_v56 = vrot.slane %v13907_v4, 1  ;;  %v16749_v37 = vmov %v16747_v33  ;;  %v16750_v19 = vld [vmem:[#allocation65_spill] sm:$0xff] }
 0x43e   :  { %v14048_v34 = vadd.f32 %v16750_v19, %v2339_v32  ;;  %v16751_v14 = vrot.slane %v13932_v30, 2  ;;  %v2307_v27 = vrot.slane %v2261_v11, 2  ;;  %v2244_v53 = vadd.f32 %v13819_v23, %v2145_v58  ;;  %v16759_v58 = vld [vmem:[#allocation32_spill] sm:$0xff] }
 0x43f   :  { %v2116_v39 = vsel %vm1160_vm5, %v16749_v37, %v16748_v56  ;;  %v2147_v1 = vadd.f32 %v2114_v41, %v2043_v22  ;;  %v2467_v59 = vadd.f32 %v2466_v0, %v13939_v21  ;;  %v14056_v4 = vadd.f32 %v13698_v54, %v2340_v5  ;;  %v16755_v5 = vld [vmem:[#allocation69_spill] sm:$0xff]  ;;  %v16760_v41 = vld [vmem:[#allocation66_spill] sm:$0xff] }
 0x440   :  { %v2304_v52 = vsel %vm1372_vm4, %v16751_v14, %v2303_v18  ;;  %v2306_v20 = vsel %vm1372_vm4, %v2303_v18, %v2305_v6  ;;  %v2309_v10 = vrot.slane %v2262_v48, 2  ;;  %v2214_v13 = vrot.slane %v2165_v57, 2  ;;  %v16762_v57 = vld [vmem:[#allocation60_spill] sm:$0xff] }
 0x441   :  { %v2341_v8 = vadd.f32 %v2304_v52, %v2242_v40  ;;  %v2342_v32 = vadd.f32 %v2306_v20, %v2243_v24  ;;  %v2245_v26 = vadd.f32 %v13860_v28, %v2146_v60  ;;  %v2468_v30 = vadd.f32 %v2467_v59, %v13970_v29 }
 0x442   :  { %v2148_v47 = vadd.f32 %v2116_v39, %v2044_v43  ;;  %v16752_v44 = vrot.slane %v13855_v62, 2  ;;  %v16753_v23 = vrot.slane %v13806_v50, 2  ;;  %v2362_v54 = vmul.f32 %v16754_v31, %v12751_v35 }
 0x443   :  { %v2311_v12 = vrot.slane %v16755_v5, 2  ;;  %v2308_v18 = vsel %vm1372_vm4, %v2305_v6, %v2307_v27  ;;  %v14071_v11 = vadd.f32 %v16756_v42, %v2341_v8  ;;  %v2469_v49 = vadd.f32 %v2468_v30, %v14048_v34 }
 0x444   :  { %v2213_v40 = vsel %vm1372_vm4, %v16753_v23, %v16752_v44  ;;  %v2343_v28 = vadd.f32 %v2308_v18, %v2244_v53  ;;  %v2313_v51 = vrot.slane %v16757_v17, 2  ;;  %v2310_v50 = vsel %vm1372_vm4, %v2307_v27, %v2309_v10  ;;  %v16768_v18 = vld [vmem:[#allocation36_spill] sm:$0xff] }
 0x445   :  { %v2246_v9 = vadd.f32 %v2213_v40, %v2147_v1  ;;  %v16758_v7 = vmov %v16752_v44  ;;  %v2363_v45 = vmul.f32 %v13967_v36, %v12751_v35  ;;  %v14082_v22 = vadd.f32 %v16759_v58, %v2342_v32  ;;  %v16764_v36 = vld [vmem:[#allocation68_spill] sm:$0xff] }
 0x446   :  { %v2215_v55 = vsel %vm1372_vm4, %v16758_v7, %v2214_v13  ;;  %v2344_v15 = vadd.f32 %v2310_v50, %v2245_v26  ;;  %v2470_v6 = vadd.f32 %v2469_v49, %v14056_v4  ;;  %v16761_v48 = vrot.slane %v16760_v41, 3  ;;  %v16770_v49 = vld [vmem:[#allocation38_spill] sm:$0xff]  ;;  %v16771_v7 = vld [vmem:[#allocation40_spill] sm:$0xff] }
 0x447   :  { %v2247_v33 = vadd.f32 %v2215_v55, %v2148_v47  ;;  %v16763_v24 = vrot.slane %v16762_v57, 3  ;;  %v2410_v0 = vrot.slane %v2362_v54, 3  ;;  %v2312_v62 = vsel %vm1372_vm4, %v2309_v10, %v2311_v12 }
 0x448   :  { %v2345_v56 = vadd.f32 %v2312_v62, %v2246_v9  ;;  %v2471_v35 = vadd.f32 %v2470_v6, %v14071_v11  ;;  %v16765_v37 = vrot.slane %v16764_v36, 3  ;;  %v16766_v39 = vmov %v16761_v48 }
 0x449   :  { %v2407_v60 = vsel %vm1579_vm3, %v16763_v24, %v16761_v48  ;;  %v2314_v14 = vsel %vm1372_vm4, %v2311_v12, %v2313_v51  ;;  %v2412_v52 = vrot.slane %v2363_v45, 3  ;;  %v16772_v45 = vld [vmem:[#allocation42_spill] sm:$0xff]  ;;  %v16774_v24 = vld [vmem:[#allocation56_spill] sm:$0xff] }
 0x44a   :  { %v14091_v43 = vadd.f32 %v2407_v60, %v2343_v28  ;;  %v2409_v19 = vsel %vm1579_vm3, %v16766_v39, %v16765_v37  ;;  %v2472_v8 = vadd.f32 %v2471_v35, %v14082_v22  ;;  %v2346_v53 = vadd.f32 %v2314_v14, %v2247_v33  ;;  %v16769_v28 = vld [vmem:[#allocation45_spill] sm:$0xff]  ;;  %v16773_v33 = vld [vmem:[#allocation46_spill] sm:$0xff] }
 0x44b   :  { %v14100_v27 = vadd.f32 %v2409_v19, %v2344_v15  ;;  %v16767_v1 = vmov %v16765_v37  ;;  %v2413_v13 = vsel %vm1579_vm3, %v2410_v0, %v2412_v52  ;;  %v16776_v39 = vld [vmem:[#allocation58_spill] sm:$0xff] }
 0x44c   :  { %v2411_v59 = vsel %vm1579_vm3, %v16767_v1, %v2410_v0  ;;  %v2473_v10 = vadd.f32 %v2472_v8, %v14091_v43  ;;  %v14111_v26 = vadd.f32 %v2413_v13, %v2346_v53  ;;  %v16777_v8 = vld [vmem:[#allocation44_spill] sm:$0xff] }
 0x44d   :  { %v14106_v20 = vadd.f32 %v2411_v59, %v2345_v56  ;;  %v16775_v56 = vld [vmem:[#allocation34_spill] sm:$0xff] }
 0x44e   :  { %v2474_v32 = vadd.f32 %v2473_v10, %v14100_v27  ;;  %v16778_v10 = vld [vmem:[#allocation51_spill] sm:$0xff] }
 0x450   :  { %v2475_v30 = vadd.f32 %v2474_v32, %v14106_v20 }
 0x452   :  { %v2476_v47 = vadd.f32 %v2475_v30, %v14111_v26 }
 0x454   :  { %v2477_v44 = vrot.slane %v2476_v47, 4 }
 0x456   :  { %v2478_v23 = vadd.f32 %v2477_v44, %v2476_v47  ;;  %v16779_v47 = vld [vmem:[#allocation47_spill] sm:$0xff] }
 0x458   :  { %v2479_v40 = vrot.slane %v2478_v23, 2 }
 0x45a   :  { %v2480_v31 = vadd.f32 %v2479_v40, %v2478_v23 }
 0x45c   :  { %v2481_v54 = vrot.slane %v2480_v31, 1 }
 0x45e   :  { %v2482_v5 = vadd.f32 %v2481_v54, %v2480_v31  ;;  %v16780_v31 = vld [vmem:[#allocation48_spill] sm:$0xff] }
 0x460   :  { %v14115_v12 = vmul.f32 0.00390625, %v2482_v5 }
 0x462   :  { %v14119_v42 = vsub.f32 %v16768_v18, %v14115_v12  ;;  %v14123_v9 = vsub.f32 %v16769_v28, %v14115_v12  ;;  %v14127_v17 = vsub.f32 %v16770_v49, %v14115_v12  ;;  %v14135_v55 = vsub.f32 %v16771_v7, %v14115_v12  ;;  %v16781_v28 = vld [vmem:[#allocation49_spill] sm:$0xff] }
 0x463   :  { %v14139_v58 = vsub.f32 %v16772_v45, %v14115_v12  ;;  %v14145_v41 = vsub.f32 %v16773_v33, %v14115_v12  ;;  %v14155_v60 = vsub.f32 %v16774_v24, %v14115_v12  ;;  %v14161_v35 = vsub.f32 %v16775_v56, %v14115_v12  ;;  %v16782_v33 = vld [vmem:[#allocation35_spill] sm:$0xff] }
 0x464   :  { %v2516_v51 = vmul.f32 %v14119_v42, %v14119_v42  ;;  %v2517_v50 = vmul.f32 %v14123_v9, %v14123_v9  ;;  %v2518_v15 = vmul.f32 %v14127_v17, %v14127_v17  ;;  %v2519_v48 = vmul.f32 %v14135_v55, %v14135_v55 }
 0x465   :  { %v2520_v0 = vmul.f32 %v14139_v58, %v14139_v58  ;;  %v2521_v36 = vmul.f32 %v14145_v41, %v14145_v41  ;;  %v14167_v19 = vsub.f32 %v16776_v39, %v14115_v12  ;;  %v2522_v14 = vmul.f32 %v14155_v60, %v14155_v60 }
 0x466   :  { %v2548_v6 = vadd.f32 %v2517_v50, %v2516_v51  ;;  %v14173_v53 = vsub.f32 %v16777_v8, %v14115_v12  ;;  %v2523_v1 = vmul.f32 %v14161_v35, %v14161_v35  ;;  %v14179_v13 = vsub.f32 %v16778_v10, %v14115_v12 }
 0x467   :  { %v2524_v32 = vmul.f32 %v14167_v19, %v14167_v19  ;;  %v14185_v44 = vsub.f32 %v16779_v47, %v14115_v12  ;;  %v14191_v54 = vsub.f32 %v16780_v31, %v14115_v12  ;;  %v14197_v49 = vsub.f32 %v16781_v28, %v14115_v12 }
 0x468   :  { %v2549_v57 = vadd.f32 %v2548_v6, %v2518_v15  ;;  %v2525_v23 = vmul.f32 %v14173_v53, %v14173_v53  ;;  %v2526_v5 = vmul.f32 %v14179_v13, %v14179_v13  ;;  %v14203_v7 = vsub.f32 %v16734_v63, %v14115_v12 }
 0x469   :  { %v2527_v51 = vmul.f32 %v14185_v44, %v14185_v44  ;;  %v2528_v45 = vmul.f32 %v14191_v54, %v14191_v54  ;;  %v2529_v6 = vmul.f32 %v14197_v49, %v14197_v49  ;;  %v14215_v24 = vsub.f32 %v13726_v2, %v14115_v12 }
 0x46a   :  { %v2550_v62 = vadd.f32 %v2549_v57, %v2519_v48  ;;  %v14211_v48 = vsub.f32 %v16782_v33, %v14115_v12  ;;  %v2530_v63 = vmul.f32 %v14203_v7, %v14203_v7  ;;  %v14239_v8 = vsub.f32 %v13885_v38, %v14115_v12 }
 0x46b   :  { %v2532_v2 = vmul.f32 %v14215_v24, %v14215_v24  ;;  %v14257_v47 = vsub.f32 %v13970_v29, %v14115_v12  ;;  %v14275_v28 = vsub.f32 %v14071_v11, %v14115_v12  ;;  %v14293_v33 = vsub.f32 %v14100_v27, %v14115_v12 }
 0x46c   :  { %v2551_v37 = vadd.f32 %v2550_v62, %v2520_v0  ;;  %v14221_v62 = vsub.f32 %v13752_v16, %v14115_v12  ;;  %v2531_v56 = vmul.f32 %v14211_v48, %v14211_v48  ;;  %v2536_v38 = vmul.f32 %v14239_v8, %v14239_v8 }
 0x46d   :  { %v2539_v29 = vmul.f32 %v14257_v47, %v14257_v47  ;;  %v2542_v11 = vmul.f32 %v14275_v28, %v14275_v28  ;;  %v2545_v27 = vmul.f32 %v14293_v33, %v14293_v33 }
 0x46e   :  { %v2552_v52 = vadd.f32 %v2551_v37, %v2521_v36  ;;  %v14227_v37 = vsub.f32 %v13795_v25, %v14115_v12  ;;  %v2533_v16 = vmul.f32 %v14221_v62, %v14221_v62 }
 0x470   :  { %v2553_v59 = vadd.f32 %v2552_v52, %v2522_v14  ;;  %v14233_v14 = vsub.f32 %v13843_v61, %v14115_v12  ;;  %v2534_v25 = vmul.f32 %v14227_v37, %v14227_v37 }
 0x472   :  { %v2554_v30 = vadd.f32 %v2553_v59, %v2523_v1  ;;  %v14245_v59 = vsub.f32 %v13917_v3, %v14115_v12  ;;  %v2535_v61 = vmul.f32 %v14233_v14, %v14233_v14 }
 0x474   :  { %v2555_v40 = vadd.f32 %v2554_v30, %v2524_v32  ;;  %v14251_v32 = vsub.f32 %v13939_v21, %v14115_v12  ;;  %v2537_v3 = vmul.f32 %v14245_v59, %v14245_v59 }
 0x476   :  { %v2556_v18 = vadd.f32 %v2555_v40, %v2525_v23  ;;  %v14263_v40 = vsub.f32 %v14048_v34, %v14115_v12  ;;  %v2538_v21 = vmul.f32 %v14251_v32, %v14251_v32 }
 0x478   :  { %v2557_v50 = vadd.f32 %v2556_v18, %v2526_v5  ;;  %v14269_v5 = vsub.f32 %v14056_v4, %v14115_v12  ;;  %v2540_v34 = vmul.f32 %v14263_v40, %v14263_v40 }
 0x47a   :  { %v2558_v15 = vadd.f32 %v2557_v50, %v2527_v51  ;;  %v14281_v50 = vsub.f32 %v14082_v22, %v14115_v12  ;;  %v2541_v4 = vmul.f32 %v14269_v5, %v14269_v5 }
 0x47c   :  { %v2559_v57 = vadd.f32 %v2558_v15, %v2528_v45  ;;  %v14287_v15 = vsub.f32 %v14091_v43, %v14115_v12  ;;  %v2543_v22 = vmul.f32 %v14281_v50, %v14281_v50 }
 0x47e   :  { %v2560_v0 = vadd.f32 %v2559_v57, %v2529_v6  ;;  %v2544_v43 = vmul.f32 %v14287_v15, %v14287_v15 }
 0x480   :  { %v2561_v36 = vadd.f32 %v2560_v0, %v2530_v63  ;;  %v14299_v63 = vsub.f32 %v14106_v20, %v14115_v12 }
 0x482   :  { %v2562_v39 = vadd.f32 %v2561_v36, %v2531_v56  ;;  %v14305_v56 = vsub.f32 %v14111_v26, %v14115_v12 }
 0x484   :  { %v2563_v52 = vadd.f32 %v2562_v39, %v2532_v2  ;;  %v2546_v2 = vmul.f32 %v14299_v63, %v14299_v63  ;;  %v2547_v20 = vmul.f32 %v14305_v56, %v14305_v56 }
 0x486   :  { %v2564_v1 = vadd.f32 %v2563_v52, %v2533_v16 }
 0x488   :  { %v2565_v10 = vadd.f32 %v2564_v1, %v2534_v25 }
 0x48a   :  { %v2566_v30 = vadd.f32 %v2565_v10, %v2535_v61 }
 0x48c   :  { %v2567_v23 = vadd.f32 %v2566_v30, %v2536_v38 }
 0x48e   :  { %v2568_v31 = vadd.f32 %v2567_v23, %v2537_v3 }
 0x490   :  { %v2569_v18 = vadd.f32 %v2568_v31, %v2538_v21 }
 0x492   :  { %v2570_v51 = vadd.f32 %v2569_v18, %v2539_v29 }
 0x494   :  { %v2571_v45 = vadd.f32 %v2570_v51, %v2540_v34 }
 0x496   :  { %v2572_v6 = vadd.f32 %v2571_v45, %v2541_v4 }
 0x498   :  { %v2573_v57 = vadd.f32 %v2572_v6, %v2542_v11 }
 0x49a   :  { %v2574_v0 = vadd.f32 %v2573_v57, %v2543_v22 }
 0x49c   :  { %v2575_v36 = vadd.f32 %v2574_v0, %v2544_v43 }
 0x49e   :  { %v2576_v39 = vadd.f32 %v2575_v36, %v2545_v27 }
 0x4a0   :  { %v2577_v16 = vadd.f32 %v2576_v39, %v2546_v2 }
 0x4a2   :  { %v2578_v52 = vadd.f32 %v2577_v16, %v2547_v20 }
 0x4a4   :  { %v2579_v25 = vrot.slane %v2578_v52, 4 }
 0x4a6   :  { %v2580_v1 = vadd.f32 %v2579_v25, %v2578_v52 }
 0x4a8   :  { %v2581_v61 = vrot.slane %v2580_v1, 2 }
 0x4aa   :  { %v2582_v10 = vadd.f32 %v2581_v61, %v2580_v1 }
 0x4ac   :  { %v2583_v38 = vrot.slane %v2582_v10, 1 }
 0x4ae   :  { %v2584_v26 = vadd.f32 %v2583_v38, %v2582_v10 }
 0x4b0   :  { %v2585_v12 = vmul.f32 0.00390625, %v2584_v26 }
 0x4b2   :  { %v2586_v30 = vadd.f32 1e-05, %v2585_v12 }
 0x4b4   :  { %11113 = vrsqrt.f32 %v2586_v30 }
 0x4c1   :  { %v14313_v3 = vpop.eup %11113 }
 0x4c2   :  { %v2603_v23 = vmul.f32 %v14313_v3, %v14211_v48  ;;  %v2602_v21 = vmul.f32 %v14313_v3, %v14203_v7  ;;  %v2601_v31 = vmul.f32 %v14313_v3, %v14197_v49  ;;  %v2600_v34 = vmul.f32 %v14313_v3, %v14191_v54 }
 0x4c3   :  { %v2599_v45 = vmul.f32 %v14313_v3, %v14185_v44  ;;  %v2598_v48 = vmul.f32 %v14313_v3, %v14179_v13  ;;  %v2597_v11 = vmul.f32 %v14313_v3, %v14173_v53  ;;  %v2596_v22 = vmul.f32 %v14313_v3, %v14167_v19 }
 0x4c4   :  { %vm2635_vm7 = vcmp.gt.f32.partialorder %v2603_v23, 0.0  ;;  %v2667_v29 = vmul.f32 0.1, %v2603_v23  ;;  %v2666_v18 = vmul.f32 0.1, %v2602_v21  ;;  %vm2634_vm8 = vcmp.gt.f32.partialorder %v2602_v21, 0.0 }
 0x4c5   :  { %v2665_v4 = vmul.f32 0.1, %v2601_v31  ;;  %vm2633_vm9 = vcmp.gt.f32.partialorder %v2601_v31, 0.0  ;;  %v2664_v7 = vmul.f32 0.1, %v2600_v34  ;;  %vm2632_vm10 = vcmp.gt.f32.partialorder %v2600_v34, 0.0 }
 0x4c6   :  { %v2699_v51 = vsel %vm2635_vm7, %v2603_v23, %v2667_v29  ;;  %v2698_v49 = vsel %vm2634_vm8, %v2602_v21, %v2666_v18  ;;  %v2663_v54 = vmul.f32 0.1, %v2599_v45  ;;  %vm2631_vm11 = vcmp.gt.f32.partialorder %v2599_v45, 0.0  ;;  %v14381_v29 = vld [vmem:[#allocation7] sm:$0xff] }
 0x4c7   :  { %10348 = vmatpush3.msra.mxu0 %v2699_v51  ;;  %10407 = vmatpush3.msra.mxu1 %v2699_v51  ;;  %v2697_v44 = vsel %vm2633_vm9, %v2601_v31, %v2665_v4  ;;  %v2696_v13 = vsel %vm2632_vm10, %v2600_v34, %v2664_v7  ;;  %v2662_v6 = vmul.f32 0.1, %v2598_v48  ;;  %vm2630_vm12 = vcmp.gt.f32.partialorder %v2598_v48, 0.0 }
 0x4c8   :  { %10349 = vmatprep.subr.mxu0 %v16493_v46  ;;  %10408 = vmatprep.subr.mxu1 %v16493_v46  ;;  %v2695_v53 = vsel %vm2631_vm11, %v2599_v45, %v2663_v54  ;;  %v2661_v57 = vmul.f32 0.1, %v2597_v11  ;;  %v2595_v43 = vmul.f32 %v14313_v3, %v14161_v35  ;;  %vm2629_vm13 = vcmp.gt.f32.partialorder %v2597_v11, 0.0 }
 0x4c9   :  { %10350 = vmatpush3.msra.mxu0 %v2698_v49  ;;  %10409 = vmatpush3.msra.mxu1 %v2698_v49  ;;  %v2694_v19 = vsel %vm2630_vm12, %v2598_v48, %v2662_v6  ;;  %v2660_v0 = vmul.f32 0.1, %v2596_v22  ;;  %v2594_v27 = vmul.f32 %v14313_v3, %v14155_v60  ;;  %vm2628_vm14 = vcmp.gt.f32.partialorder %v2596_v22, 0.0  ;;  %v14397_v49 = vld [vmem:[#allocation7 + $0x8] sm:$0xff] }
 0x4ca   :  { %10351 = vmatprep.subr.mxu0 %v16493_v46  ;;  %10410 = vmatprep.subr.mxu1 %v16493_v46  ;;  %v2693_v35 = vsel %vm2629_vm13, %v2597_v11, %v2661_v57  ;;  %v2659_v36 = vmul.f32 0.1, %v2595_v43  ;;  %v2593_v2 = vmul.f32 %v14313_v3, %v14145_v41  ;;  %vm2627_vm15 = vcmp.gt.f32.partialorder %v2595_v43, 0.0 }
 0x4cb   :  { %10352 = vmatpush3.msra.mxu0 %v2697_v44  ;;  %10411 = vmatpush3.msra.mxu1 %v2697_v44  ;;  %v2692_v60 = vsel %vm2628_vm14, %v2596_v22, %v2660_v0  ;;  %v2658_v39 = vmul.f32 0.1, %v2594_v27  ;;  %v2592_v20 = vmul.f32 %v14313_v3, %v14139_v58  ;;  %vm2626_vm0 = vcmp.gt.f32.partialorder %v2594_v27, 0.0 }
 0x4cc   :  { %10353 = vmatprep.subr.mxu0 %v16493_v46  ;;  %10412 = vmatprep.subr.mxu1 %v16493_v46  ;;  %v2691_v41 = vsel %vm2627_vm15, %v2595_v43, %v2659_v36  ;;  %v2657_v16 = vmul.f32 0.1, %v2593_v2  ;;  %v2591_v52 = vmul.f32 %v14313_v3, %v14135_v55  ;;  %vm2625_vm7 = vcmp.gt.f32.partialorder %v2593_v2, 0.0 }
 0x4cd   :  { %10354 = vmatpush3.msra.mxu0 %v2696_v13  ;;  %10413 = vmatpush3.msra.mxu1 %v2696_v13  ;;  %v2690_v58 = vsel %vm2626_vm0, %v2594_v27, %v2658_v39  ;;  %v2656_v25 = vmul.f32 0.1, %v2592_v20  ;;  %v2590_v1 = vmul.f32 %v14313_v3, %v14127_v17  ;;  %vm2624_vm8 = vcmp.gt.f32.partialorder %v2592_v20, 0.0  ;;  %v14415_v13 = vld [vmem:[#allocation7 + $0x10] sm:$0xff] }
 0x4ce   :  { %10355 = vmatprep.subr.mxu0 %v16493_v46  ;;  %10414 = vmatprep.subr.mxu1 %v16493_v46  ;;  %v2689_v55 = vsel %vm2625_vm7, %v2593_v2, %v2657_v16  ;;  %v2655_v61 = vmul.f32 0.1, %v2591_v52  ;;  %v2589_v10 = vmul.f32 %v14313_v3, %v14123_v9  ;;  %vm2623_vm9 = vcmp.gt.f32.partialorder %v2591_v52, 0.0 }
 0x4cf   :  { %10356 = vmatpush3.msra.mxu0 %v2695_v53  ;;  %10415 = vmatpush3.msra.mxu1 %v2695_v53  ;;  %v2688_v17 = vsel %vm2624_vm8, %v2592_v20, %v2656_v25  ;;  %v2654_v38 = vmul.f32 0.1, %v2590_v1  ;;  %v2588_v26 = vmul.f32 %v14313_v3, %v14119_v42  ;;  %vm2622_vm10 = vcmp.gt.f32.partialorder %v2590_v1, 0.0 }
 0x4d0   :  { %10357 = vmatprep.subr.mxu0 %v16493_v46  ;;  %10416 = vmatprep.subr.mxu1 %v16493_v46  ;;  %v2687_v9 = vsel %vm2623_vm9, %v2591_v52, %v2655_v61  ;;  %v2653_v12 = vmul.f32 0.1, %v2589_v10  ;;  %vm2621_vm11 = vcmp.gt.f32.partialorder %v2589_v10, 0.0  ;;  %v2619_v30 = vmul.f32 %v14313_v3, %v14305_v56  ;;  %v14379_v56 = vld [vmem:[#allocation5] sm:$0xff] }
 0x4d1   :  { %10358 = vmatpush3.msra.mxu0 %v2694_v19  ;;  %10417 = vmatpush3.msra.mxu1 %v2694_v19  ;;  %v2686_v42 = vsel %vm2622_vm10, %v2590_v1, %v2654_v38  ;;  %v2652_v23 = vmul.f32 0.1, %v2588_v26  ;;  %vm2620_vm12 = vcmp.gt.f32.partialorder %v2588_v26, 0.0  ;;  %v2618_v31 = vmul.f32 %v14313_v3, %v14299_v63  ;;  %v14433_v19 = vld [vmem:[#allocation7 + $0x18] sm:$0xff] }
 0x4d2   :  { %10359 = vmatprep.subr.mxu0 %v16493_v46  ;;  %10418 = vmatprep.subr.mxu1 %v16493_v46  ;;  %v2685_v21 = vsel %vm2621_vm11, %v2589_v10, %v2653_v12  ;;  %v2683_v18 = vmul.f32 0.1, %v2619_v30  ;;  %vm2651_vm13 = vcmp.gt.f32.partialorder %v2619_v30, 0.0  ;;  %v2617_v51 = vmul.f32 %v14313_v3, %v14293_v33  ;;  %v14395_v33 = vld [vmem:[#allocation5 + $0x8] sm:$0xff] }
 0x4d3   :  { %10360 = vmatpush3.msra.mxu0 %v2693_v35  ;;  %10419 = vmatpush3.msra.mxu1 %v2693_v35  ;;  %v2684_v34 = vsel %vm2620_vm12, %v2588_v26, %v2652_v23  ;;  %v2682_v63 = vmul.f32 0.1, %v2618_v31  ;;  %vm2650_vm14 = vcmp.gt.f32.partialorder %v2618_v31, 0.0  ;;  %v2616_v45 = vmul.f32 %v14313_v3, %v14287_v15 }
 0x4d4   :  { %10361 = vmatprep.subr.mxu0 %v16493_v46  ;;  %10420 = vmatprep.subr.mxu1 %v16493_v46  ;;  %v2715_v4 = vsel %vm2651_vm13, %v2619_v30, %v2683_v18  ;;  %v2681_v7 = vmul.f32 0.1, %v2617_v51  ;;  %vm2649_vm15 = vcmp.gt.f32.partialorder %v2617_v51, 0.0  ;;  %v2615_v15 = vmul.f32 %v14313_v3, %v14281_v50  ;;  %v14413_v50 = vld [vmem:[#allocation5 + $0x10] sm:$0xff]  ;;  %v14519_v18 = vld [vmem:[#allocation7 + $0x40] sm:$0xff] }
 0x4d5   :  { %10362 = vmatpush3.msra.mxu0 %v2692_v60  ;;  %10421 = vmatpush3.msra.mxu1 %v2692_v60  ;;  %v2714_v48 = vsel %vm2650_vm14, %v2618_v31, %v2682_v63  ;;  %v2680_v44 = vmul.f32 0.1, %v2616_v45  ;;  %vm2648_vm0 = vcmp.gt.f32.partialorder %v2616_v45, 0.0  ;;  %v2614_v11 = vmul.f32 %v14313_v3, %v14275_v28  ;;  %v14451_v60 = vld [vmem:[#allocation7 + $0x20] sm:$0xff]  ;;  %v14517_v31 = vld [vmem:[#allocation5 + $0x40] sm:$0xff]  ;;  %v2797_v63 = vld [vmem:[%s16783_s0 + $0x1f8] sm:$0xff] }
 0x4d6   :  { %10363 = vmatprep.subr.mxu0 %v16493_v46  ;;  %10422 = vmatprep.subr.mxu1 %v16493_v46  ;;  %v2713_v54 = vsel %vm2649_vm15, %v2617_v51, %v2681_v7  ;;  %v2679_v6 = vmul.f32 0.1, %v2615_v15  ;;  %vm2647_vm7 = vcmp.gt.f32.partialorder %v2615_v15, 0.0  ;;  %v2613_v28 = vmul.f32 %v14313_v3, %v14269_v5  ;;  %v14431_v5 = vld [vmem:[#allocation5 + $0x18] sm:$0xff]  ;;  %v2765_v51 = vld [vmem:[%s16783_s0 + $0xf8] sm:$0xff]  ;;  %v2764_v7 = vld [vmem:[%s16783_s0 + $0xf0] sm:$0xff] }
 0x4d7   :  { %10364 = vmatpush3.msra.mxu0 %v2691_v41  ;;  %10423 = vmatpush3.msra.mxu1 %v2691_v41  ;;  %v2712_v22 = vsel %vm2648_vm0, %v2616_v45, %v2680_v44  ;;  %v2678_v53 = vmul.f32 0.1, %v2614_v11  ;;  %vm2646_vm8 = vcmp.gt.f32.partialorder %v2614_v11, 0.0  ;;  %v2612_v43 = vmul.f32 %v14313_v3, %v14263_v40  ;;  %v2781_v45 = vld [vmem:[%s16783_s0 + $0x178] sm:$0xff]  ;;  %v2795_v44 = vld [vmem:[%s16783_s0 + $0x1e8] sm:$0xff] }
 0x4d8   :  { %10365 = vmatprep.subr.mxu0 %v16493_v46  ;;  %10424 = vmatprep.subr.mxu1 %v16493_v46  ;;  %v2711_v57 = vsel %vm2647_vm7, %v2615_v15, %v2679_v6  ;;  %v2677_v0 = vmul.f32 0.1, %v2613_v28  ;;  %vm2645_vm9 = vcmp.gt.f32.partialorder %v2613_v28, 0.0  ;;  %v2611_v40 = vmul.f32 %v14313_v3, %v14257_v47  ;;  %v14449_v47 = vld [vmem:[#allocation5 + $0x20] sm:$0xff]  ;;  %v2761_v6 = vld [vmem:[%s16783_s0 + $0xd8] sm:$0xff] }
 0x4d9   :  { %10366 = vmatpush3.msra.mxu0 %v2690_v58  ;;  %10425 = vmatpush3.msra.mxu1 %v2690_v58  ;;  %v2710_v27 = vsel %vm2646_vm8, %v2614_v11, %v2678_v53  ;;  %v2676_v35 = vmul.f32 0.1, %v2612_v43  ;;  %vm2644_vm10 = vcmp.gt.f32.partialorder %v2612_v43, 0.0  ;;  %v2610_v2 = vmul.f32 %v14313_v3, %v14251_v32  ;;  %v14469_v58 = vld [vmem:[#allocation7 + $0x28] sm:$0xff]  ;;  %v2763_v15 = vld [vmem:[%s16783_s0 + $0xe8] sm:$0xff]  ;;  %v2794_v11 = vld [vmem:[%s16783_s0 + $0x1e0] sm:$0xff] }
 0x4da   :  { %10367 = vmatprep.subr.mxu0 %v16493_v46  ;;  %10426 = vmatprep.subr.mxu1 %v16493_v46  ;;  %v2709_v36 = vsel %vm2645_vm9, %v2613_v28, %v2677_v0  ;;  %v2675_v39 = vmul.f32 0.1, %v2611_v40  ;;  %vm2643_vm11 = vcmp.gt.f32.partialorder %v2611_v40, 0.0  ;;  %v2609_v32 = vmul.f32 %v14313_v3, %v14245_v59  ;;  %v14467_v59 = vld [vmem:[#allocation5 + $0x28] sm:$0xff]  ;;  %v2745_v28 = vld [vmem:[%s16783_s0 + $0x58] sm:$0xff]  ;;  %v2759_v0 = vld [vmem:[%s16783_s0 + $0xc8] sm:$0xff] }
 0x4db   :  { %10368 = vmatpush3.msra.mxu0 %v2689_v55  ;;  %10427 = vmatpush3.msra.mxu1 %v2689_v55  ;;  %v2708_v20 = vsel %vm2644_vm10, %v2612_v43, %v2676_v35  ;;  %v2674_v41 = vmul.f32 0.1, %v2610_v2  ;;  %vm2642_vm12 = vcmp.gt.f32.partialorder %v2610_v2, 0.0  ;;  %v2608_v52 = vmul.f32 %v14313_v3, %v14239_v8  ;;  %v2777_v53 = vld [vmem:[%s16783_s0 + $0x158] sm:$0xff]  ;;  %v2792_v43 = vld [vmem:[%s16783_s0 + $0x1d0] sm:$0xff]  ;;  %v2775_v35 = vld [vmem:[%s16783_s0 + $0x148] sm:$0xff] }
 0x4dc   :  { %10369 = vmatprep.subr.mxu0 %v16493_v46  ;;  %10428 = vmatprep.subr.mxu1 %v16493_v46  ;;  %v2707_v16 = vsel %vm2643_vm11, %v2611_v40, %v2675_v39  ;;  %v2673_v25 = vmul.f32 0.1, %v2609_v32  ;;  %vm2641_vm13 = vcmp.gt.f32.partialorder %v2609_v32, 0.0  ;;  %v2607_v8 = vmul.f32 %v14313_v3, %v14233_v14  ;;  %v14485_v14 = vld [vmem:[#allocation5 + $0x30] sm:$0xff]  ;;  %v2743_v40 = vld [vmem:[%s16783_s0 + $0x48] sm:$0xff] }
 0x4dd   :  { %10370 = vmatpush3.msra.mxu0 %v2688_v17  ;;  %10429 = vmatpush3.msra.mxu1 %v2688_v17  ;;  %v2706_v1 = vsel %vm2642_vm12, %v2610_v2, %v2674_v41  ;;  %v2672_v55 = vmul.f32 0.1, %v2608_v52  ;;  %vm2640_vm14 = vcmp.gt.f32.partialorder %v2608_v52, 0.0  ;;  %v2606_v10 = vmul.f32 %v14313_v3, %v14227_v37  ;;  %v14487_v17 = vld [vmem:[#allocation7 + $0x30] sm:$0xff]  ;;  %v2757_v39 = vld [vmem:[%s16783_s0 + $0xb8] sm:$0xff] }
 0x4de   :  { %10371 = vmatprep.subr.mxu0 %v16493_v46  ;;  %10430 = vmatprep.subr.mxu1 %v16493_v46  ;;  %v2705_v61 = vsel %vm2641_vm13, %v2609_v32, %v2673_v25  ;;  %v2671_v38 = vmul.f32 0.1, %v2607_v8  ;;  %vm2639_vm15 = vcmp.gt.f32.partialorder %v2607_v8, 0.0  ;;  %v2605_v37 = vmul.f32 %v14313_v3, %v14221_v62  ;;  %v14503_v62 = vld [vmem:[#allocation5 + $0x38] sm:$0xff]  ;;  %v2741_v32 = vld [vmem:[%s16783_s0 + $0x38] sm:$0xff]  ;;  %v2755_v25 = vld [vmem:[%s16783_s0 + $0xa8] sm:$0xff] }
 0x4df   :  { %10372 = vmatpush3.msra.mxu0 %v2687_v9  ;;  %10431 = vmatpush3.msra.mxu1 %v2687_v9  ;;  %v2704_v26 = vsel %vm2640_vm14, %v2608_v52, %v2672_v55  ;;  %v2670_v9 = vmul.f32 0.1, %v2606_v10  ;;  %vm2638_vm0 = vcmp.gt.f32.partialorder %v2606_v10, 0.0  ;;  %v2604_v30 = vmul.f32 %v14313_v3, %v14215_v24  ;;  %v2790_v2 = vld [vmem:[%s16783_s0 + $0x1c0] sm:$0xff]  ;;  %v2773_v41 = vld [vmem:[%s16783_s0 + $0x138] sm:$0xff]  ;;  %v2788_v52 = vld [vmem:[%s16783_s0 + $0x1b0] sm:$0xff] }
 0x4e0   :  { %10373 = vmatprep.subr.mxu0 %v16493_v46  ;;  %10432 = vmatprep.subr.mxu1 %v16493_v46  ;;  %v2703_v12 = vsel %vm2639_vm15, %v2607_v8, %v2671_v38  ;;  %v2669_v23 = vmul.f32 0.1, %v2605_v37  ;;  %vm2637_vm7 = vcmp.gt.f32.partialorder %v2605_v37, 0.0  ;;  %v2739_v8 = vld [vmem:[%s16783_s0 + $0x28] sm:$0xff]  ;;  %v2753_v38 = vld [vmem:[%s16783_s0 + $0x98] sm:$0xff] }
 0x4e1   :  { %10374 = vmatpush3.msra.mxu0 %v2686_v42  ;;  %10433 = vmatpush3.msra.mxu1 %v2686_v42  ;;  %v14505_v42 = vld [vmem:[#allocation7 + $0x38] sm:$0xff]  ;;  %v2668_v24 = vmul.f32 0.1, %v2604_v30  ;;  %vm2636_vm8 = vcmp.gt.f32.partialorder %v2604_v30, 0.0 }
 0x4e2   :  { %10375 = vmatprep.subr.mxu0 %v16493_v46  ;;  %10434 = vmatprep.subr.mxu1 %v16493_v46  ;;  %v2701_v3 = vsel %vm2637_vm7, %v2605_v37, %v2669_v23  ;;  %v2771_v55 = vld [vmem:[%s16783_s0 + $0x128] sm:$0xff]  ;;  %v2737_v37 = vld [vmem:[%s16783_s0 + $0x18] sm:$0xff] }
 0x4e3   :  { %10376 = vmatpush3.msra.mxu0 %v2685_v21  ;;  %10435 = vmatpush3.msra.mxu1 %v2685_v21  ;;  %v2702_v21 = vsel %vm2638_vm0, %v2606_v10, %v2670_v9  ;;  %v2786_v10 = vld [vmem:[%s16783_s0 + $0x1a0] sm:$0xff]  ;;  %v2769_v9 = vld [vmem:[%s16783_s0 + $0x118] sm:$0xff]  ;;  %v2751_v23 = vld [vmem:[%s16783_s0 + $0x88] sm:$0xff] }
 0x4e4   :  { %10377 = vmatprep.subr.mxu0 %v16493_v46  ;;  %10436 = vmatprep.subr.mxu1 %v16493_v46 }
 0x4e5   :  { %10378 = vmatpush3.msra.mxu0 %v2684_v34  ;;  %10437 = vmatpush3.msra.mxu1 %v2684_v34  ;;  %v2700_v34 = vsel %vm2636_vm8, %v2604_v30, %v2668_v24  ;;  %v2784_v30 = vld [vmem:[%s16783_s0 + $0x190] sm:$0xff]  ;;  %v2735_v24 = vld [vmem:[%s16783_s0 + $0x8] sm:$0xff] }
 0x4e6   :  { %10380 = vmatmul.mubr.f32.vlgmr.msra.gmra.mxu0 %v14379_v56  ;;  %10439 = vmatmul.mubr.f32.vlgmr.msra.gmra.mxu1 %v14381_v29 }
 0x4e7   :  { %10465 = vmatprep.subr.mxu0 %v16493_v46  ;;  %10524 = vmatprep.subr.mxu1 %v16493_v46 }
 0x4e8   :  { %10466 = vmatpush3.msra.mxu0 %v2715_v4  ;;  %10525 = vmatpush3.msra.mxu1 %v2715_v4  ;;  %v2749_v4 = vld [vmem:[%s16783_s0 + $0x78] sm:$0xff] }
 0x4e9   :  { %10467 = vmatprep.subr.mxu0 %v16493_v46  ;;  %10526 = vmatprep.subr.mxu1 %v16493_v46 }
 0x4ea   :  { %10382 = vmatprep.mubr.msk.f32.mxu0 %vm11444_vm6, %v16493_v46  ;;  %10441 = vmatprep.mubr.msk.f32.mxu1 %vm11444_vm6, %v16493_v46 }
 0x4eb   :  { %10468 = vmatpush3.msra.mxu0 %v2714_v48  ;;  %10527 = vmatpush3.msra.mxu1 %v2714_v48  ;;  %v2796_v48 = vld [vmem:[%s16783_s0 + $0x1f0] sm:$0xff] }
 0x4ec   :  { %10383 = vmatmul.mubr.f32.gmra.mxu0 %v14395_v33  ;;  %10442 = vmatmul.mubr.f32.gmra.mxu1 %v14397_v49 }
 0x4ed   :  { %10469 = vmatprep.subr.mxu0 %v16493_v46  ;;  %10528 = vmatprep.subr.mxu1 %v16493_v46 }
 0x4ee   :  { %10470 = vmatpush3.msra.mxu0 %v2713_v54  ;;  %10529 = vmatpush3.msra.mxu1 %v2713_v54  ;;  %v2762_v54 = vld [vmem:[%s16783_s0 + $0xe0] sm:$0xff] }
 0x4ef   :  { %10471 = vmatprep.subr.mxu0 %v16493_v46  ;;  %10530 = vmatprep.subr.mxu1 %v16493_v46 }
 0x4f0   :  { %10385 = vmatprep.mubr.msk.f32.mxu0 %vm11444_vm6, %v16493_v46  ;;  %10444 = vmatprep.mubr.msk.f32.mxu1 %vm11444_vm6, %v16493_v46 }
 0x4f1   :  { %10472 = vmatpush3.msra.mxu0 %v2712_v22  ;;  %10531 = vmatpush3.msra.mxu1 %v2712_v22  ;;  %v2793_v22 = vld [vmem:[%s16783_s0 + $0x1d8] sm:$0xff] }
 0x4f2   :  { %10386 = vmatmul.mubr.f32.gmra.mxu0 %v14413_v50  ;;  %10445 = vmatmul.mubr.f32.gmra.mxu1 %v14415_v13 }
 0x4f3   :  { %10473 = vmatprep.subr.mxu0 %v16493_v46  ;;  %10532 = vmatprep.subr.mxu1 %v16493_v46 }
 0x4f4   :  { %10474 = vmatpush3.msra.mxu0 %v2711_v57  ;;  %10533 = vmatpush3.msra.mxu1 %v2711_v57  ;;  %v2760_v57 = vld [vmem:[%s16783_s0 + $0xd0] sm:$0xff] }
 0x4f5   :  { %10475 = vmatprep.subr.mxu0 %v16493_v46  ;;  %10534 = vmatprep.subr.mxu1 %v16493_v46 }
 0x4f6   :  { %10388 = vmatprep.mubr.msk.f32.mxu0 %vm11444_vm6, %v16493_v46  ;;  %10447 = vmatprep.mubr.msk.f32.mxu1 %vm11444_vm6, %v16493_v46 }
 0x4f7   :  { %10476 = vmatpush3.msra.mxu0 %v2710_v27  ;;  %10535 = vmatpush3.msra.mxu1 %v2710_v27  ;;  %v2791_v27 = vld [vmem:[%s16783_s0 + $0x1c8] sm:$0xff] }
 0x4f8   :  { %10389 = vmatmul.mubr.f32.gmra.mxu0 %v14431_v5  ;;  %10448 = vmatmul.mubr.f32.gmra.mxu1 %v14433_v19 }
 0x4f9   :  { %10477 = vmatprep.subr.mxu0 %v16493_v46  ;;  %10536 = vmatprep.subr.mxu1 %v16493_v46 }
 0x4fa   :  { %10478 = vmatpush3.msra.mxu0 %v2709_v36  ;;  %10537 = vmatpush3.msra.mxu1 %v2709_v36  ;;  %v2758_v36 = vld [vmem:[%s16783_s0 + $0xc0] sm:$0xff] }
 0x4fb   :  { %10479 = vmatprep.subr.mxu0 %v16493_v46  ;;  %10538 = vmatprep.subr.mxu1 %v16493_v46 }
 0x4fc   :  { %10391 = vmatprep.mubr.msk.f32.mxu0 %vm11444_vm6, %v16493_v46  ;;  %10450 = vmatprep.mubr.msk.f32.mxu1 %vm11444_vm6, %v16493_v46 }
 0x4fd   :  { %10480 = vmatpush3.msra.mxu0 %v2708_v20  ;;  %10539 = vmatpush3.msra.mxu1 %v2708_v20  ;;  %v2789_v20 = vld [vmem:[%s16783_s0 + $0x1b8] sm:$0xff] }
 0x4fe   :  { %10392 = vmatmul.mubr.f32.gmra.mxu0 %v14449_v47  ;;  %10451 = vmatmul.mubr.f32.gmra.mxu1 %v14451_v60 }
 0x4ff   :  { %10481 = vmatprep.subr.mxu0 %v16493_v46  ;;  %10540 = vmatprep.subr.mxu1 %v16493_v46 }
 0x500   :  { %10482 = vmatpush3.msra.mxu0 %v2707_v16  ;;  %10541 = vmatpush3.msra.mxu1 %v2707_v16  ;;  %v2756_v16 = vld [vmem:[%s16783_s0 + $0xb0] sm:$0xff] }
 0x501   :  { %10483 = vmatprep.subr.mxu0 %v16493_v46  ;;  %10542 = vmatprep.subr.mxu1 %v16493_v46 }
 0x502   :  { %10394 = vmatprep.mubr.msk.f32.mxu0 %vm11444_vm6, %v16493_v46  ;;  %10453 = vmatprep.mubr.msk.f32.mxu1 %vm11444_vm6, %v16493_v46 }
 0x503   :  { %10484 = vmatpush3.msra.mxu0 %v2706_v1  ;;  %10543 = vmatpush3.msra.mxu1 %v2706_v1  ;;  %v2787_v1 = vld [vmem:[%s16783_s0 + $0x1a8] sm:$0xff] }
 0x504   :  { %10395 = vmatmul.mubr.f32.gmra.mxu0 %v14467_v59  ;;  %10454 = vmatmul.mubr.f32.gmra.mxu1 %v14469_v58 }
 0x505   :  { %10485 = vmatprep.subr.mxu0 %v16493_v46  ;;  %10544 = vmatprep.subr.mxu1 %v16493_v46 }
 0x506   :  { %10486 = vmatpush3.msra.mxu0 %v2705_v61  ;;  %10545 = vmatpush3.msra.mxu1 %v2705_v61  ;;  %v2754_v61 = vld [vmem:[%s16783_s0 + $0xa0] sm:$0xff] }
 0x507   :  { %10487 = vmatprep.subr.mxu0 %v16493_v46  ;;  %10546 = vmatprep.subr.mxu1 %v16493_v46 }
 0x508   :  { %10397 = vmatprep.mubr.msk.f32.mxu0 %vm11444_vm6, %v16493_v46  ;;  %10456 = vmatprep.mubr.msk.f32.mxu1 %vm11444_vm6, %v16493_v46 }
 0x509   :  { %10488 = vmatpush3.msra.mxu0 %v2704_v26  ;;  %10547 = vmatpush3.msra.mxu1 %v2704_v26  ;;  %v2785_v26 = vld [vmem:[%s16783_s0 + $0x198] sm:$0xff] }
 0x50a   :  { %10398 = vmatmul.mubr.f32.gmra.mxu0 %v14485_v14  ;;  %10457 = vmatmul.mubr.f32.gmra.mxu1 %v14487_v17 }
 0x50b   :  { %10489 = vmatprep.subr.mxu0 %v16493_v46  ;;  %10548 = vmatprep.subr.mxu1 %v16493_v46 }
 0x50c   :  { %10490 = vmatpush3.msra.mxu0 %v2703_v12  ;;  %10549 = vmatpush3.msra.mxu1 %v2703_v12  ;;  %v2752_v12 = vld [vmem:[%s16783_s0 + $0x90] sm:$0xff] }
 0x50d   :  { %10491 = vmatprep.subr.mxu0 %v16493_v46  ;;  %10550 = vmatprep.subr.mxu1 %v16493_v46 }
 0x50e   :  { %10400 = vmatprep.mubr.msk.f32.mxu0 %vm11444_vm6, %v16493_v46  ;;  %10459 = vmatprep.mubr.msk.f32.mxu1 %vm11444_vm6, %v16493_v46 }
 0x50f   :  { %10492 = vmatpush3.msra.mxu0 %v2702_v21  ;;  %10551 = vmatpush3.msra.mxu1 %v2702_v21  ;;  %v2783_v21 = vld [vmem:[%s16783_s0 + $0x188] sm:$0xff] }
 0x510   :  { %10401 = vmatmul.mubr.f32.gmra.mxu0 %v14503_v62  ;;  %10460 = vmatmul.mubr.f32.gmra.mxu1 %v14505_v42 }
 0x511   :  { %10493 = vmatprep.subr.mxu0 %v16493_v46  ;;  %10552 = vmatprep.subr.mxu1 %v16493_v46 }
 0x512   :  { %10494 = vmatpush3.msra.mxu0 %v2701_v3  ;;  %10553 = vmatpush3.msra.mxu1 %v2701_v3  ;;  %v2767_v3 = vld [vmem:[%s16783_s0 + $0x108] sm:$0xff] }
 0x513   :  { %10495 = vmatprep.subr.mxu0 %v16493_v46  ;;  %10554 = vmatprep.subr.mxu1 %v16493_v46 }
 0x514   :  { %10403 = vmatprep.mubr.msk.f32.mxu0 %vm11444_vm6, %v16493_v46  ;;  %10462 = vmatprep.mubr.msk.f32.mxu1 %vm11444_vm6, %v16493_v46 }
 0x515   :  { %10496 = vmatpush3.msra.mxu0 %v2700_v34  ;;  %10555 = vmatpush3.msra.mxu1 %v2700_v34  ;;  %v2734_v34 = vld [vmem:[%s16783_s0] sm:$0xff] }
 0x516   :  { %10404 = vmatmul.mubr.f32.gmra.mxu0 %v14517_v31  ;;  %10463 = vmatmul.mubr.f32.gmra.mxu1 %v14519_v18 }
 0x517   :  { %10497 = vmatprep.mubr.msk.f32.mxu0 %vm11444_vm6, %v16493_v46  ;;  %10556 = vmatprep.mubr.msk.f32.mxu1 %vm11444_vm6, %v16493_v46 }
 0x518   :  { %9316 = vmatprep.subr.mxu0 %v2765_v51  ;;  %9396 = vmatprep.subr.mxu1 %v2797_v63  ;;  %v2766_v51 = vld [vmem:[%s16783_s0 + $0x100] sm:$0xff]  ;;  %v2829_v63 = vld [vmem:[%s16783_s0 + $0x2f8] sm:$0xff] }
 0x51a   :  { %10498 = vmatmul.mubr.f32.vlgmr.msra.gmra.mxu0 %v14379_v56  ;;  %10557 = vmatmul.mubr.f32.vlgmr.msra.gmra.mxu1 %v14381_v29  ;;  %v2748_v56 = vld [vmem:[%s16783_s0 + $0x70] sm:$0xff] }
 0x51b   :  { %10500 = vmatprep.mubr.msk.f32.mxu0 %vm11444_vm6, %v16493_v46  ;;  %10559 = vmatprep.mubr.msk.f32.mxu1 %vm11444_vm6, %v16493_v46  ;;  %v2780_v29 = vld [vmem:[%s16783_s0 + $0x170] sm:$0xff] }
 0x51c   :  { %9317 = vmatpush3.msra.mxu0 %v2749_v4  ;;  %9397 = vmatpush3.msra.mxu1 %v2781_v45  ;;  %v2845_v4 = vld [vmem:[%s16783_s0 + $0x378] sm:$0xff] }
 0x51d   :  { %9318 = vmatprep.subr.mxu0 %v2764_v7  ;;  %9398 = vmatprep.subr.mxu1 %v2796_v48  ;;  %v2813_v48 = vld [vmem:[%s16783_s0 + $0x278] sm:$0xff] }
 0x51e   :  { %10501 = vmatmul.mubr.f32.gmra.mxu0 %v14395_v33  ;;  %10560 = vmatmul.mubr.f32.gmra.mxu1 %v14397_v49  ;;  %v2747_v33 = vld [vmem:[%s16783_s0 + $0x68] sm:$0xff] }
 0x51f   :  { %10503 = vmatprep.mubr.msk.f32.mxu0 %vm11444_vm6, %v16493_v46  ;;  %10562 = vmatprep.mubr.msk.f32.mxu1 %vm11444_vm6, %v16493_v46  ;;  %v2779_v49 = vld [vmem:[%s16783_s0 + $0x168] sm:$0xff] }
 0x520   :  { %9319 = vmatpush3.msra.mxu0 %v2748_v56  ;;  %9399 = vmatpush3.msra.mxu1 %v2780_v29  ;;  %v2828_v56 = vld [vmem:[%s16783_s0 + $0x2f0] sm:$0xff] }
 0x521   :  { %9320 = vmatprep.subr.mxu0 %v2763_v15  ;;  %9400 = vmatprep.subr.mxu1 %v2795_v44  ;;  %v2812_v44 = vld [vmem:[%s16783_s0 + $0x270] sm:$0xff] }
 0x522   :  { %10504 = vmatmul.mubr.f32.gmra.mxu0 %v14413_v50  ;;  %10563 = vmatmul.mubr.f32.gmra.mxu1 %v14415_v13  ;;  %v2746_v50 = vld [vmem:[%s16783_s0 + $0x60] sm:$0xff] }
 0x523   :  { %10506 = vmatprep.mubr.msk.f32.mxu0 %vm11444_vm6, %v16493_v46  ;;  %10565 = vmatprep.mubr.msk.f32.mxu1 %vm11444_vm6, %v16493_v46  ;;  %v2778_v13 = vld [vmem:[%s16783_s0 + $0x160] sm:$0xff] }
 0x524   :  { %9321 = vmatpush3.msra.mxu0 %v2747_v33  ;;  %9401 = vmatpush3.msra.mxu1 %v2779_v49  ;;  %v2827_v33 = vld [vmem:[%s16783_s0 + $0x2e8] sm:$0xff] }
 0x525   :  { %9322 = vmatprep.subr.mxu0 %v2762_v54  ;;  %9402 = vmatprep.subr.mxu1 %v2794_v11  ;;  %v2811_v49 = vld [vmem:[%s16783_s0 + $0x268] sm:$0xff]  ;;  %v2826_v54 = vld [vmem:[%s16783_s0 + $0x2e0] sm:$0xff] }
 0x526   :  { %10507 = vmatmul.mubr.f32.gmra.mxu0 %v14431_v5  ;;  %10566 = vmatmul.mubr.f32.gmra.mxu1 %v14433_v19  ;;  %v2744_v5 = vld [vmem:[%s16783_s0 + $0x50] sm:$0xff] }
 0x527   :  { %10509 = vmatprep.mubr.msk.f32.mxu0 %vm11444_vm6, %v16493_v46  ;;  %10568 = vmatprep.mubr.msk.f32.mxu1 %vm11444_vm6, %v16493_v46  ;;  %v2776_v19 = vld [vmem:[%s16783_s0 + $0x150] sm:$0xff] }
 0x528   :  { %9323 = vmatpush3.msra.mxu0 %v2746_v50  ;;  %9403 = vmatpush3.msra.mxu1 %v2778_v13 }
 0x529   :  { %9324 = vmatprep.subr.mxu0 %v2761_v6  ;;  %9404 = vmatprep.subr.mxu1 %v2793_v22 }
 0x52a   :  { %10510 = vmatmul.mubr.f32.gmra.mxu0 %v14449_v47  ;;  %10569 = vmatmul.mubr.f32.gmra.mxu1 %v14451_v60  ;;  %v2742_v47 = vld [vmem:[%s16783_s0 + $0x40] sm:$0xff] }
 0x52b   :  { %10512 = vmatprep.mubr.msk.f32.mxu0 %vm11444_vm6, %v16493_v46  ;;  %10571 = vmatprep.mubr.msk.f32.mxu1 %vm11444_vm6, %v16493_v46  ;;  %v2774_v60 = vld [vmem:[%s16783_s0 + $0x140] sm:$0xff] }
 0x52c   :  { %9325 = vmatpush3.msra.mxu0 %v2745_v28  ;;  %9405 = vmatpush3.msra.mxu1 %v2777_v53  ;;  %v2810_v53 = vld [vmem:[%s16783_s0 + $0x260] sm:$0xff] }
 0x52d   :  { %9326 = vmatprep.subr.mxu0 %v2760_v57  ;;  %9406 = vmatprep.subr.mxu1 %v2792_v43 }
 0x52e   :  { %10513 = vmatmul.mubr.f32.gmra.mxu0 %v14467_v59  ;;  %10572 = vmatmul.mubr.f32.gmra.mxu1 %v14469_v58  ;;  %v2740_v59 = vld [vmem:[%s16783_s0 + $0x30] sm:$0xff] }
 0x52f   :  { %10515 = vmatprep.mubr.msk.f32.mxu0 %vm11444_vm6, %v16493_v46  ;;  %10574 = vmatprep.mubr.msk.f32.mxu1 %vm11444_vm6, %v16493_v46  ;;  %v2772_v58 = vld [vmem:[%s16783_s0 + $0x130] sm:$0xff] }
 0x530   :  { %9327 = vmatpush3.msra.mxu0 %v2744_v5  ;;  %9407 = vmatpush3.msra.mxu1 %v2776_v19 }
 0x531   :  { %9328 = vmatprep.subr.mxu0 %v2759_v0  ;;  %9408 = vmatprep.subr.mxu1 %v2791_v27  ;;  %v2825_v0 = vld [vmem:[%s16783_s0 + $0x2d8] sm:$0xff] }
 0x532   :  { %10516 = vmatmul.mubr.f32.gmra.mxu0 %v14485_v14  ;;  %10575 = vmatmul.mubr.f32.gmra.mxu1 %v14487_v17  ;;  %v2738_v14 = vld [vmem:[%s16783_s0 + $0x20] sm:$0xff] }
 0x533   :  { %10518 = vmatprep.mubr.msk.f32.mxu0 %vm11444_vm6, %v16493_v46  ;;  %10577 = vmatprep.mubr.msk.f32.mxu1 %vm11444_vm6, %v16493_v46  ;;  %v2770_v17 = vld [vmem:[%s16783_s0 + $0x120] sm:$0xff] }
 0x534   :  { %9329 = vmatpush3.msra.mxu0 %v2743_v40  ;;  %9409 = vmatpush3.msra.mxu1 %v2775_v35 }
 0x535   :  { %9330 = vmatprep.subr.mxu0 %v2758_v36  ;;  %9410 = vmatprep.subr.mxu1 %v2790_v2  ;;  %v2809_v2 = vld [vmem:[%s16783_s0 + $0x258] sm:$0xff] }
 0x536   :  { %10519 = vmatmul.mubr.f32.gmra.mxu0 %v14503_v62  ;;  %10578 = vmatmul.mubr.f32.gmra.mxu1 %v14505_v42  ;;  %v2736_v62 = vld [vmem:[%s16783_s0 + $0x10] sm:$0xff] }
 0x537   :  { %10521 = vmatprep.mubr.msk.f32.mxu0 %vm11444_vm6, %v16493_v46  ;;  %10580 = vmatprep.mubr.msk.f32.mxu1 %vm11444_vm6, %v16493_v46  ;;  %v2768_v42 = vld [vmem:[%s16783_s0 + $0x110] sm:$0xff] }
 0x538   :  { %9331 = vmatpush3.msra.mxu0 %v2742_v47  ;;  %9411 = vmatpush3.msra.mxu1 %v2774_v60 }
 0x539   :  { %9332 = vmatprep.subr.mxu0 %v2757_v39  ;;  %9412 = vmatprep.subr.mxu1 %v2789_v20  ;;  %v2824_v39 = vld [vmem:[%s16783_s0 + $0x2d0] sm:$0xff] }
 0x53a   :  { %10522 = vmatmul.mubr.f32.gmra.mxu0 %v14517_v31  ;;  %10581 = vmatmul.mubr.f32.gmra.mxu1 %v14519_v18  ;;  %v2750_v31 = vld [vmem:[%s16783_s0 + $0x80] sm:$0xff] }
 0x53b   :  { %9333 = vmatpush3.msra.mxu0 %v2741_v32  ;;  %9413 = vmatpush3.msra.mxu1 %v2773_v41  ;;  %v2782_v18 = vld [vmem:[%s16783_s0 + $0x180] sm:$0xff]  ;;  %v2844_v41 = vld [vmem:[%s16783_s0 + $0x370] sm:$0xff] }
 0x53c   :  { %9334 = vmatprep.subr.mxu0 %v2756_v16  ;;  %9414 = vmatprep.subr.mxu1 %v2788_v52 }
 0x53d   :  { %9335 = vmatpush3.msra.mxu0 %v2740_v59  ;;  %9415 = vmatpush3.msra.mxu1 %v2772_v58  ;;  %v2808_v58 = vld [vmem:[%s16783_s0 + $0x250] sm:$0xff] }
 0x53e   :  { %9336 = vmatprep.subr.mxu0 %v2755_v25  ;;  %9416 = vmatprep.subr.mxu1 %v2787_v1  ;;  %v2843_v25 = vld [vmem:[%s16783_s0 + $0x368] sm:$0xff] }
 0x53f   :  { %9337 = vmatpush3.msra.mxu0 %v2739_v8  ;;  %9417 = vmatpush3.msra.mxu1 %v2771_v55 }
 0x540   :  { %9338 = vmatprep.subr.mxu0 %v2754_v61  ;;  %9418 = vmatprep.subr.mxu1 %v2786_v10  ;;  %v2823_v10 = vld [vmem:[%s16783_s0 + $0x2c8] sm:$0xff] }
 0x541   :  { %9339 = vmatpush3.msra.mxu0 %v2738_v14  ;;  %9419 = vmatpush3.msra.mxu1 %v2770_v17 }
 0x542   :  { %9340 = vmatprep.subr.mxu0 %v2753_v38  ;;  %9420 = vmatprep.subr.mxu1 %v2785_v26  ;;  %v2807_v26 = vld [vmem:[%s16783_s0 + $0x248] sm:$0xff] }
 0x543   :  { %9341 = vmatpush3.msra.mxu0 %v2737_v37  ;;  %9421 = vmatpush3.msra.mxu1 %v2769_v9 }
 0x544   :  { %9342 = vmatprep.subr.mxu0 %v2752_v12  ;;  %9422 = vmatprep.subr.mxu1 %v2784_v30  ;;  %v2822_v12 = vld [vmem:[%s16783_s0 + $0x2c0] sm:$0xff] }
 0x545   :  { %9343 = vmatpush3.msra.mxu0 %v2736_v62  ;;  %9423 = vmatpush3.msra.mxu1 %v2768_v42  ;;  %v2842_v62 = vld [vmem:[%s16783_s0 + $0x360] sm:$0xff] }
 0x546   :  { %9344 = vmatprep.subr.mxu0 %v2751_v23  ;;  %9424 = vmatprep.subr.mxu1 %v2783_v21 }
 0x547   :  { %9345 = vmatpush3.msra.mxu0 %v2735_v24  ;;  %9425 = vmatpush3.msra.mxu1 %v2767_v3  ;;  %v2806_v3 = vld [vmem:[%s16783_s0 + $0x240] sm:$0xff] }
 0x548   :  { %9346 = vmatprep.subr.mxu0 %v2750_v31  ;;  %9426 = vmatprep.subr.mxu1 %v2782_v18  ;;  %v2841_v31 = vld [vmem:[%s16783_s0 + $0x358] sm:$0xff] }
 0x549   :  { %9347 = vmatpush3.msra.mxu0 %v2734_v34  ;;  %9427 = vmatpush3.msra.mxu1 %v2766_v51 }
 0x54a   :  { %9476 = vmatprep.subr.mxu0 %v2829_v63  ;;  %10583 = vmatprep.subr.mxu1 %v2845_v4 }
 0x5a6   :  { %v2912_v45 = vpop.f32.mrf.mxu0  ;;  %v3022_v7 = vpop.f32.mrf.mxu1 }
 0x5a7   :  { %3636 = vmatprep.mubr.f32.mxu0 %v3022_v7  ;;  %v3075_v11 = vrot.slane %v2912_v45, 1  ;;  %v3134_v50 = vrot.slane %v2912_v45, 2  ;;  %v3184_v13 = vrot.slane %v2912_v45, 3  ;;  %v3109_v6 = vrot.slane %v3022_v7, 1 }
 0x5a8   :  { %v10381_v29 = vpop.f32.mrf.mxu0  ;;  %v10440_v15 = vpop.f32.mrf.mxu1  ;;  %3637 = vmatmul.mubr.f32.vlgmr.msra.gmra.mxu0 %v2912_v45  ;;  %v3159_v27 = vrot.slane %v3022_v7, 2 }
 0x5a9   :  { %9477 = vmatpush3.msra.mxu0 %v2813_v48 }
 0x5aa   :  { %9478 = vmatprep.subr.mxu0 %v2828_v56  ;;  %v2805_v56 = vld [vmem:[%s16783_s0 + $0x238] sm:$0xff] }
 0x5ab   :  { %9479 = vmatpush3.msra.mxu0 %v2812_v44  ;;  %v2820_v44 = vld [vmem:[%s16783_s0 + $0x2b0] sm:$0xff] }
 0x5ac   :  { %v2917_v22 = vpop.f32.mrf.mxu0  ;;  %v3027_v28 = vpop.f32.mrf.mxu1  ;;  %9480 = vmatprep.subr.mxu0 %v2827_v33 }
 0x5ad   :  { %v3076_v57 = vrot.slane %v2917_v22, 1  ;;  %v3135_v43 = vrot.slane %v2917_v22, 2  ;;  %v3185_v5 = vrot.slane %v2917_v22, 3  ;;  %v3110_v19 = vrot.slane %v3027_v28, 1  ;;  %3641 = vmatprep.mubr.f32.mxu0 %v3027_v28  ;;  %9481 = vmatpush3.msra.mxu0 %v2811_v49  ;;  %v2840_v49 = vld [vmem:[%s16783_s0 + $0x350] sm:$0xff] }
 0x5ae   :  { %v3160_v40 = vrot.slane %v3027_v28, 2  ;;  %v10384_v35 = vpop.f32.mrf.mxu0  ;;  %v10443_v36 = vpop.f32.mrf.mxu1  ;;  %3642 = vmatmul.mubr.f32.gmra.mxu0 %v2917_v22  ;;  %9482 = vmatprep.subr.mxu0 %v2826_v54  ;;  %v2839_v22 = vld [vmem:[%s16783_s0 + $0x348] sm:$0xff] }
 0x5af   :  { %v3111_v47 = vsel %vm1160_vm5, %v3109_v6, %v3110_v19  ;;  %v3077_v60 = vsel %vm1160_vm5, %v3075_v11, %v3076_v57  ;;  %9483 = vmatpush3.msra.mxu0 %v2810_v53  ;;  %v14812_v20 = vsel %vm1372_vm4, %v3134_v50, %v3135_v43  ;;  %v14815_v32 = vsel %vm1579_vm3, %v3184_v13, %v3185_v5  ;;  %v2804_v6 = vld [vmem:[%s16783_s0 + $0x230] sm:$0xff] }
 0x5b0   :  { %3781 = vmatprep.mubr.f32.mxu1 %v3111_v47  ;;  %9484 = vmatprep.subr.mxu0 %v2825_v0  ;;  %v14821_v16 = vsel %vm1372_vm4, %v3159_v27, %v3160_v40 }
 0x5b1   :  { %3782 = vmatmul.mubr.f32.vlgmr.msra.gmra.mxu1 %v3077_v60  ;;  %9485 = vmatpush3.msra.mxu0 %v2809_v2  ;;  %v2818_v2 = vld [vmem:[%s16783_s0 + $0x2a0] sm:$0xff] }
 0x5b2   :  { %v14823_v52 = vpop.f32.mrf.mxu0  ;;  %v3032_v59 = vpop.f32.mrf.mxu1  ;;  %10584 = vmatpush3.msra.mxu1 %v2845_v4  ;;  %9486 = vmatprep.subr.mxu0 %v2824_v39  ;;  %v2821_v4 = vld [vmem:[%s16783_s0 + $0x2b8] sm:$0xff]  ;;  %v2838_v60 = vld [vmem:[%s16783_s0 + $0x340] sm:$0xff] }
 0x5b3   :  { %v3078_v1 = vrot.slane %v14823_v52, 1  ;;  %v3137_v8 = vrot.slane %v14823_v52, 2  ;;  %v3187_v55 = vrot.slane %v14823_v52, 3  ;;  %v3112_v61 = vrot.slane %v3032_v59, 1  ;;  %3646 = vmatprep.mubr.f32.mxu0 %v3032_v59  ;;  %10585 = vmatprep.subr.mxu1 %v2844_v41 }
 0x5b4   :  { %v3162_v14 = vrot.slane %v3032_v59, 2  ;;  %v10387_v17 = vpop.f32.mrf.mxu0  ;;  %v10446_v38 = vpop.f32.mrf.mxu1  ;;  %3647 = vmatmul.mubr.f32.gmra.mxu0 %v14823_v52  ;;  %10586 = vmatpush3.msra.mxu1 %v2844_v41 }
 0x5b5   :  { %v3113_v37 = vsel %vm1160_vm5, %v3110_v19, %v3112_v61  ;;  %v3079_v9 = vsel %vm1160_vm5, %v3076_v57, %v3078_v1  ;;  %9487 = vmatpush3.msra.mxu0 %v2808_v58  ;;  %10587 = vmatprep.subr.mxu1 %v2843_v25  ;;  %v14847_v30 = vsel %vm1372_vm4, %v3135_v43, %v3137_v8  ;;  %v2802_v58 = vld [vmem:[%s16783_s0 + $0x220] sm:$0xff] }
 0x5b6   :  { %3786 = vmatprep.mubr.f32.mxu1 %v3113_v37  ;;  %9488 = vmatprep.subr.mxu0 %v2823_v10  ;;  %v14853_v42 = vsel %vm1372_vm4, %v3160_v40, %v3162_v14  ;;  %v14856_v23 = vsel %vm1579_vm3, %v3185_v5, %v3187_v55  ;;  %v2819_v5 = vld [vmem:[%s16783_s0 + $0x2a8] sm:$0xff]  ;;  %v2817_v10 = vld [vmem:[%s16783_s0 + $0x298] sm:$0xff] }
 0x5b7   :  { %3787 = vmatmul.mubr.f32.gmra.mxu1 %v3079_v9  ;;  %9489 = vmatpush3.msra.mxu0 %v2807_v26  ;;  %v2803_v40 = vld [vmem:[%s16783_s0 + $0x228] sm:$0xff]  ;;  %v2801_v26 = vld [vmem:[%s16783_s0 + $0x218] sm:$0xff] }
 0x5b8   :  { %v14858_v21 = vpop.f32.mrf.mxu0  ;;  %v3037_v24 = vpop.f32.mrf.mxu1  ;;  %10588 = vmatpush3.msra.mxu1 %v2843_v25  ;;  %9490 = vmatprep.subr.mxu0 %v2822_v12  ;;  %v2837_v25 = vld [vmem:[%s16783_s0 + $0x338] sm:$0xff]  ;;  %v2816_v12 = vld [vmem:[%s16783_s0 + $0x290] sm:$0xff] }
 0x5b9   :  { %v3080_v18 = vrot.slane %v14858_v21, 1  ;;  %v3139_v34 = vrot.slane %v14858_v21, 2  ;;  %v3189_v51 = vrot.slane %v14858_v21, 3  ;;  %v3114_v63 = vrot.slane %v3037_v24, 1  ;;  %3651 = vmatprep.mubr.f32.mxu0 %v3037_v24  ;;  %10589 = vmatprep.subr.mxu1 %v2842_v62 }
 0x5ba   :  { %v3164_v45 = vrot.slane %v3037_v24, 2  ;;  %v10390_v7 = vpop.f32.mrf.mxu0  ;;  %v10449_v48 = vpop.f32.mrf.mxu1  ;;  %3652 = vmatmul.mubr.f32.gmra.mxu0 %v14858_v21  ;;  %10590 = vmatpush3.msra.mxu1 %v2842_v62  ;;  %v2836_v21 = vld [vmem:[%s16783_s0 + $0x330] sm:$0xff] }
 0x5bb   :  { %v3115_v29 = vsel %vm1160_vm5, %v3112_v61, %v3114_v63  ;;  %v3081_v15 = vsel %vm1160_vm5, %v3078_v1, %v3080_v18  ;;  %9491 = vmatpush3.msra.mxu0 %v2806_v3  ;;  %10591 = vmatprep.subr.mxu1 %v2841_v31  ;;  %v14882_v33 = vsel %vm1372_vm4, %v3137_v8, %v3139_v34  ;;  %v2815_v7 = vld [vmem:[%s16783_s0 + $0x288] sm:$0xff] }
 0x5bc   :  { %3791 = vmatprep.mubr.f32.mxu1 %v3115_v29  ;;  %9492 = vmatprep.subr.mxu0 %v2821_v4  ;;  %v14888_v54 = vsel %vm1372_vm4, %v3162_v14, %v3164_v45  ;;  %v14891_v11 = vsel %vm1579_vm3, %v3187_v55, %v3189_v51  ;;  %v2799_v29 = vld [vmem:[%s16783_s0 + $0x208] sm:$0xff] }
 0x5bd   :  { %3792 = vmatmul.mubr.f32.gmra.mxu1 %v3081_v15  ;;  %9493 = vmatpush3.msra.mxu0 %v2805_v56 }
 0x5be   :  { %v14893_v50 = vpop.f32.mrf.mxu0  ;;  %v3042_v13 = vpop.f32.mrf.mxu1  ;;  %10592 = vmatpush3.msra.mxu1 %v2841_v31  ;;  %9494 = vmatprep.subr.mxu0 %v2820_v44 }
 0x5bf   :  { %v3082_v28 = vrot.slane %v14893_v50, 1  ;;  %v3141_v53 = vrot.slane %v14893_v50, 2  ;;  %v3191_v57 = vrot.slane %v14893_v50, 3  ;;  %v3116_v43 = vrot.slane %v3042_v13, 1  ;;  %3656 = vmatprep.mubr.f32.mxu0 %v3042_v13  ;;  %10593 = vmatprep.subr.mxu1 %v2840_v49 }
 0x5c0   :  { %v3166_v19 = vrot.slane %v3042_v13, 2  ;;  %v10393_v0 = vpop.f32.mrf.mxu0  ;;  %v10452_v27 = vpop.f32.mrf.mxu1  ;;  %3657 = vmatmul.mubr.f32.gmra.mxu0 %v14893_v50  ;;  %10594 = vmatpush3.msra.mxu1 %v2840_v49  ;;  %v2814_v49 = vld [vmem:[%s16783_s0 + $0x280] sm:$0xff] }
 0x5c1   :  { %v3117_v35 = vsel %vm1160_vm5, %v3114_v63, %v3116_v43  ;;  %v3083_v36 = vsel %vm1160_vm5, %v3080_v18, %v3082_v28  ;;  %9495 = vmatpush3.msra.mxu0 %v2804_v6  ;;  %10595 = vmatprep.subr.mxu1 %v2839_v22  ;;  %v14917_v47 = vsel %vm1579_vm3, %v3189_v51, %v3191_v57  ;;  %v2835_v51 = vld [vmem:[%s16783_s0 + $0x328] sm:$0xff]  ;;  %v2834_v50 = vld [vmem:[%s16783_s0 + $0x320] sm:$0xff]  ;;  %v2832_v27 = vld [vmem:[%s16783_s0 + $0x310] sm:$0xff] }
 0x5c2   :  { %3796 = vmatprep.mubr.f32.mxu1 %v3117_v35  ;;  %9496 = vmatprep.subr.mxu0 %v2819_v5  ;;  %v14923_v39 = vsel %vm1372_vm4, %v3164_v45, %v3166_v19  ;;  %v14926_v41 = vsel %vm1372_vm4, %v3139_v34, %v3141_v53  ;;  %v2800_v34 = vld [vmem:[%s16783_s0 + $0x210] sm:$0xff] }
 0x5c3   :  { %3797 = vmatmul.mubr.f32.gmra.mxu1 %v3083_v36  ;;  %9497 = vmatpush3.msra.mxu0 %v2803_v40  ;;  %v2831_v36 = vld [vmem:[%s16783_s0 + $0x308] sm:$0xff] }
 0x5c4   :  { %v14928_v52 = vpop.f32.mrf.mxu0  ;;  %v14930_v59 = vpop.f32.mrf.mxu1  ;;  %10596 = vmatpush3.msra.mxu1 %v2839_v22  ;;  %9498 = vmatprep.subr.mxu0 %v2818_v2 }
 0x5c5   :  { %v3084_v1 = vrot.slane %v14928_v52, 1  ;;  %v3143_v8 = vrot.slane %v14928_v52, 2  ;;  %v3193_v55 = vrot.slane %v14928_v52, 3  ;;  %v3118_v61 = vrot.slane %v14930_v59, 1  ;;  %3661 = vmatprep.mubr.f32.mxu0 %v14930_v59  ;;  %10597 = vmatprep.subr.mxu1 %v2838_v60 }
 0x5c6   :  { %v3168_v14 = vrot.slane %v14930_v59, 2  ;;  %v10396_v17 = vpop.f32.mrf.mxu0  ;;  %v10455_v38 = vpop.f32.mrf.mxu1  ;;  %3662 = vmatmul.mubr.f32.gmra.mxu0 %v14928_v52  ;;  %10598 = vmatpush3.msra.mxu1 %v2838_v60 }
 0x5c7   :  { %v3119_v37 = vsel %vm1160_vm5, %v3116_v43, %v3118_v61  ;;  %v3085_v9 = vsel %vm1160_vm5, %v3082_v28, %v3084_v1  ;;  %9499 = vmatpush3.msra.mxu0 %v2802_v58  ;;  %10599 = vmatprep.subr.mxu1 %v2837_v25  ;;  %v14959_v62 = vsel %vm1579_vm3, %v3191_v57, %v3193_v55  ;;  %v2798_v28 = vld [vmem:[%s16783_s0 + $0x200] sm:$0xff] }
 0x5c8   :  { %3801 = vmatprep.mubr.f32.mxu1 %v3119_v37  ;;  %9500 = vmatprep.subr.mxu0 %v2817_v10  ;;  %v14967_v24 = vsel %vm1372_vm4, %v3166_v19, %v3168_v14  ;;  %v14970_v3 = vsel %vm1372_vm4, %v3141_v53, %v3143_v8  ;;  %v2833_v53 = vld [vmem:[%s16783_s0 + $0x318] sm:$0xff] }
 0x5c9   :  { %3802 = vmatmul.mubr.f32.gmra.mxu1 %v3085_v9  ;;  %9501 = vmatpush3.msra.mxu0 %v2801_v26 }
 0x5ca   :  { %v14972_v31 = vpop.f32.mrf.mxu0  ;;  %v14974_v18 = vpop.f32.mrf.mxu1  ;;  %10600 = vmatpush3.msra.mxu1 %v2837_v25  ;;  %9502 = vmatprep.subr.mxu0 %v2816_v12  ;;  %v2830_v25 = vld [vmem:[%s16783_s0 + $0x300] sm:$0xff] }
 0x5cb   :  { %v3086_v63 = vrot.slane %v14972_v31, 1  ;;  %v3145_v4 = vrot.slane %v14972_v31, 2  ;;  %v3120_v45 = vrot.slane %v14974_v18, 1  ;;  %3666 = vmatprep.mubr.f32.mxu0 %v14974_v18  ;;  %10601 = vmatprep.subr.mxu1 %v2836_v21 }
 0x5cc   :  { %v10399_v48 = vpop.f32.mrf.mxu0  ;;  %v10458_v56 = vpop.f32.mrf.mxu1  ;;  %3667 = vmatmul.mubr.f32.gmra.mxu0 %v14972_v31  ;;  %10602 = vmatpush3.msra.mxu1 %v2836_v21 }
 0x5cd   :  { %v3121_v15 = vsel %vm1160_vm5, %v3118_v61, %v3120_v45  ;;  %v3087_v44 = vsel %vm1160_vm5, %v3084_v1, %v3086_v63  ;;  %9503 = vmatpush3.msra.mxu0 %v2800_v34  ;;  %10603 = vmatprep.subr.mxu1 %v2835_v51  ;;  %v15002_v13 = vsel %vm1372_vm4, %v3143_v8, %v3145_v4 }
 0x5ce   :  { %3806 = vmatprep.mubr.f32.mxu1 %v3121_v15  ;;  %9504 = vmatprep.subr.mxu0 %v2815_v7 }
 0x5cf   :  { %3807 = vmatmul.mubr.f32.gmra.mxu1 %v3087_v44  ;;  %9505 = vmatpush3.msra.mxu0 %v2799_v29 }
 0x5d0   :  { %v15004_v6 = vpop.f32.mrf.mxu0  ;;  %v15006_v22 = vpop.f32.mrf.mxu1  ;;  %10604 = vmatpush3.msra.mxu1 %v2835_v51  ;;  %9506 = vmatprep.subr.mxu0 %v2814_v49 }
 0x5d1   :  { %v3088_v57 = vrot.slane %v15004_v6, 1  ;;  %v3147_v43 = vrot.slane %v15004_v6, 2  ;;  %v3122_v5 = vrot.slane %v15006_v22, 1  ;;  %3671 = vmatprep.mubr.f32.mxu0 %v15006_v22  ;;  %10605 = vmatprep.subr.mxu1 %v2834_v50 }
 0x5d2   :  { %v10402_v19 = vpop.f32.mrf.mxu0  ;;  %v10461_v0 = vpop.f32.mrf.mxu1  ;;  %3672 = vmatmul.mubr.f32.gmra.mxu0 %v15004_v6  ;;  %10606 = vmatpush3.msra.mxu1 %v2834_v50 }
 0x5d3   :  { %v3123_v40 = vsel %vm1160_vm5, %v3120_v45, %v3122_v5  ;;  %v3089_v35 = vsel %vm1160_vm5, %v3086_v63, %v3088_v57  ;;  %9507 = vmatpush3.msra.mxu0 %v2798_v28  ;;  %10607 = vmatprep.subr.mxu1 %v2833_v53  ;;  %v15030_v2 = vsel %vm1372_vm4, %v3145_v4, %v3147_v43 }
 0x5d4   :  { %3811 = vmatprep.mubr.f32.mxu1 %v3123_v40  ;;  %10608 = vmatpush3.msra.mxu1 %v2833_v53 }
 0x5d5   :  { %3812 = vmatmul.mubr.f32.gmra.mxu1 %v3089_v35  ;;  %10609 = vmatprep.subr.mxu1 %v2832_v27 }
 0x5d6   :  { %v15032_v60 = vpop.f32.mrf.mxu0  ;;  %v15034_v58 = vpop.f32.mrf.mxu1  ;;  %10610 = vmatpush3.msra.mxu1 %v2832_v27  ;;  %10701 = vmatprep.subr.mxu0 %v16493_v46 }
 0x5d7   :  { %v3090_v1 = vrot.slane %v15032_v60, 1  ;;  %v3124_v8 = vrot.slane %v15034_v58, 1  ;;  %10611 = vmatprep.subr.mxu1 %v2831_v36 }
 0x5d8   :  { %v10405_v61 = vpop.f32.mrf.mxu0  ;;  %v10464_v10 = vpop.f32.mrf.mxu1  ;;  %10612 = vmatpush3.msra.mxu1 %v2831_v36 }
 0x5d9   :  { %v3125_v17 = vsel %vm1160_vm5, %v3122_v5, %v3124_v8  ;;  %v3091_v38 = vsel %vm1160_vm5, %v3088_v57, %v3090_v1  ;;  %10613 = vmatprep.subr.mxu1 %v2830_v25 }
 0x5da   :  { %v15044_v26 = vpop.f32.mrf.mxu0  ;;  %v15046_v37 = vpop.f32.mrf.mxu1  ;;  %3816 = vmatprep.mubr.f32.mxu1 %v3125_v17  ;;  %10614 = vmatpush3.msra.mxu1 %v2830_v25 }
 0x5db   :  { %3676 = vmatprep.mubr.f32.mxu0 %v15046_v37  ;;  %3817 = vmatmul.mubr.f32.gmra.mxu1 %v3091_v38  ;;  %v3438_v51 = vrot.slane %v15044_v26, 1  ;;  %v3472_v63 = vrot.slane %v15046_v37, 1 }
 0x5dc   :  { %v10499_v9 = vpop.f32.mrf.mxu0  ;;  %v10558_v12 = vpop.f32.mrf.mxu1  ;;  %3677 = vmatmul.mubr.f32.gmra.mxu0 %v15044_v26  ;;  %10639 = vmatprep.subr.mxu1 %v16493_v46 }
 0x5de   :  { %v15051_v21 = vpop.f32.mrf.mxu0  ;;  %v15053_v34 = vpop.f32.mrf.mxu1 }
 0x5df   :  { %v3439_v4 = vrot.slane %v15051_v21, 1  ;;  %v3473_v45 = vrot.slane %v15053_v34, 1  ;;  %3681 = vmatprep.mubr.f32.mxu0 %v15053_v34 }
 0x5e0   :  { %v10502_v7 = vpop.f32.mrf.mxu0  ;;  %v10561_v48 = vpop.f32.mrf.mxu1  ;;  %3682 = vmatmul.mubr.f32.gmra.mxu0 %v15051_v21 }
 0x5e1   :  { %v3474_v56 = vsel %vm1160_vm5, %v3472_v63, %v3473_v45  ;;  %v3440_v29 = vsel %vm1160_vm5, %v3438_v51, %v3439_v4 }
 0x5e2   :  { %v15063_v15 = vpop.f32.mrf.mxu0  ;;  %v15065_v44 = vpop.f32.mrf.mxu1  ;;  %3821 = vmatprep.mubr.f32.mxu1 %v3474_v56 }
 0x5e3   :  { %v3441_v49 = vrot.slane %v15063_v15, 1  ;;  %v3475_v50 = vrot.slane %v15065_v44, 1  ;;  %3686 = vmatprep.mubr.f32.mxu0 %v15065_v44  ;;  %3822 = vmatmul.mubr.f32.gmra.mxu1 %v3440_v29 }
 0x5e4   :  { %v10505_v28 = vpop.f32.mrf.mxu0  ;;  %v10564_v53 = vpop.f32.mrf.mxu1  ;;  %3687 = vmatmul.mubr.f32.gmra.mxu0 %v15063_v15 }
 0x5e5   :  { %v3476_v57 = vsel %vm1160_vm5, %v3473_v45, %v3475_v50  ;;  %v3442_v5 = vsel %vm1160_vm5, %v3439_v4, %v3441_v49 }
 0x5e6   :  { %v15073_v19 = vpop.f32.mrf.mxu0  ;;  %v15075_v0 = vpop.f32.mrf.mxu1  ;;  %3826 = vmatprep.mubr.f32.mxu1 %v3476_v57 }
 0x5e7   :  { %v3443_v27 = vrot.slane %v15073_v19, 1  ;;  %v3477_v40 = vrot.slane %v15075_v0, 1  ;;  %3691 = vmatprep.mubr.f32.mxu0 %v15075_v0  ;;  %3827 = vmatmul.mubr.f32.gmra.mxu1 %v3442_v5 }
 0x5e8   :  { %v10508_v35 = vpop.f32.mrf.mxu0  ;;  %v10567_v36 = vpop.f32.mrf.mxu1  ;;  %3692 = vmatmul.mubr.f32.gmra.mxu0 %v15073_v19 }
 0x5e9   :  { %v3478_v25 = vsel %vm1160_vm5, %v3475_v50, %v3477_v40  ;;  %v3444_v1 = vsel %vm1160_vm5, %v3441_v49, %v3443_v27 }
 0x5ea   :  { %v15083_v8 = vpop.f32.mrf.mxu0  ;;  %v15085_v61 = vpop.f32.mrf.mxu1  ;;  %3831 = vmatprep.mubr.f32.mxu1 %v3478_v25 }
 0x5eb   :  { %v3445_v10 = vrot.slane %v15083_v8, 1  ;;  %v3479_v17 = vrot.slane %v15085_v61, 1  ;;  %3696 = vmatprep.mubr.f32.mxu0 %v15085_v61  ;;  %3832 = vmatmul.mubr.f32.gmra.mxu1 %v3444_v1 }
 0x5ec   :  { %v10511_v38 = vpop.f32.mrf.mxu0  ;;  %v10570_v9 = vpop.f32.mrf.mxu1  ;;  %3697 = vmatmul.mubr.f32.gmra.mxu0 %v15083_v8 }
 0x5ed   :  { %v3480_v12 = vsel %vm1160_vm5, %v3477_v40, %v3479_v17  ;;  %v3446_v51 = vsel %vm1160_vm5, %v3443_v27, %v3445_v10 }
 0x5ee   :  { %v15093_v63 = vpop.f32.mrf.mxu0  ;;  %v15095_v4 = vpop.f32.mrf.mxu1  ;;  %3836 = vmatprep.mubr.f32.mxu1 %v3480_v12 }
 0x5ef   :  { %v3447_v45 = vrot.slane %v15093_v63, 1  ;;  %v3481_v7 = vrot.slane %v15095_v4, 1  ;;  %3701 = vmatprep.mubr.f32.mxu0 %v15095_v4  ;;  %3837 = vmatmul.mubr.f32.gmra.mxu1 %v3446_v51 }
 0x5f0   :  { %v10514_v48 = vpop.f32.mrf.mxu0  ;;  %v10573_v56 = vpop.f32.mrf.mxu1  ;;  %3702 = vmatmul.mubr.f32.gmra.mxu0 %v15093_v63 }
 0x5f1   :  { %v3482_v29 = vsel %vm1160_vm5, %v3479_v17, %v3481_v7  ;;  %v3448_v49 = vsel %vm1160_vm5, %v3445_v10, %v3447_v45 }
 0x5f2   :  { %v15103_v50 = vpop.f32.mrf.mxu0  ;;  %v15105_v28 = vpop.f32.mrf.mxu1  ;;  %3841 = vmatprep.mubr.f32.mxu1 %v3482_v29 }
 0x5f3   :  { %v3449_v53 = vrot.slane %v15103_v50, 1  ;;  %v3483_v57 = vrot.slane %v15105_v28, 1  ;;  %3706 = vmatprep.mubr.f32.mxu0 %v15105_v28  ;;  %3842 = vmatmul.mubr.f32.gmra.mxu1 %v3448_v49 }
 0x5f4   :  { %v10517_v5 = vpop.f32.mrf.mxu0  ;;  %v10576_v27 = vpop.f32.mrf.mxu1  ;;  %3707 = vmatmul.mubr.f32.gmra.mxu0 %v15103_v50 }
 0x5f5   :  { %v3484_v40 = vsel %vm1160_vm5, %v3481_v7, %v3483_v57  ;;  %v3450_v35 = vsel %vm1160_vm5, %v3447_v45, %v3449_v53 }
 0x5f6   :  { %v15113_v36 = vpop.f32.mrf.mxu0  ;;  %v15115_v25 = vpop.f32.mrf.mxu1  ;;  %3846 = vmatprep.mubr.f32.mxu1 %v3484_v40  ;;  %v3525_v40 = vrot.slane %v15065_v44, 2  ;;  %v3527_v44 = vrot.slane %v15075_v0, 2  ;;  %v3504_v0 = vrot.slane %v15083_v8, 2 }
 0x5f7   :  { %v3451_v1 = vrot.slane %v15113_v36, 1  ;;  %v3485_v10 = vrot.slane %v15115_v25, 1  ;;  %3711 = vmatprep.mubr.f32.mxu0 %v15115_v25  ;;  %3847 = vmatmul.mubr.f32.gmra.mxu1 %v3450_v35  ;;  %v3560_v27 = vrot.slane %v15113_v36, 3  ;;  %v3497_v35 = vrot.slane %v15044_v26, 2 }
 0x5f8   :  { %v10520_v17 = vpop.f32.mrf.mxu0  ;;  %v10579_v38 = vpop.f32.mrf.mxu1  ;;  %3712 = vmatmul.mubr.f32.gmra.mxu0 %v15113_v36 }
 0x5f9   :  { %3926 = vmatprep.mubr.f32.mxu0 %v14821_v16  ;;  %v3486_v9 = vsel %vm1160_vm5, %v3483_v57, %v3485_v10  ;;  %v3452_v12 = vsel %vm1160_vm5, %v3449_v53, %v3451_v1  ;;  %v3523_v53 = vrot.slane %v15053_v34, 2  ;;  %v3558_v57 = vrot.slane %v15103_v50, 3 }
 0x5fa   :  { %v15124_v51 = vpop.f32.mrf.mxu0  ;;  %v15126_v45 = vpop.f32.mrf.mxu1  ;;  %3851 = vmatprep.mubr.f32.mxu1 %v3486_v9  ;;  %v3502_v38 = vrot.slane %v15073_v19, 2 }
 0x5fb   :  { %v3453_v7 = vrot.slane %v15124_v51, 1  ;;  %v3487_v48 = vrot.slane %v15126_v45, 1  ;;  %3852 = vmatmul.mubr.f32.gmra.mxu1 %v3452_v12  ;;  %v3526_v17 = vsel %vm1372_vm4, %v3523_v53, %v3525_v40  ;;  %v3528_v12 = vsel %vm1372_vm4, %v3525_v40, %v3527_v44 }
 0x5fc   :  { %3927 = vmatmul.mubr.f32.vlgmr.msra.gmra.mxu0 %v14812_v20  ;;  %v10582_v56 = vpop.f32.mrf.mxu1  ;;  %v10523_v29 = vpop.f32.mrf.mxu0  ;;  %v3195_v20 = vrot.slane %v14972_v31, 3  ;;  %v3149_v31 = vrot.slane %v15032_v60, 2 }
 0x5fd   :  { %3931 = vmatprep.mubr.f32.mxu0 %v14853_v42  ;;  %v3488_v16 = vsel %vm1160_vm5, %v3485_v10, %v3487_v48  ;;  %v3454_v49 = vsel %vm1160_vm5, %v3451_v1, %v3453_v7  ;;  %v3197_v42 = vrot.slane %v15004_v6, 3  ;;  %v3500_v10 = vrot.slane %v15063_v15, 2 }
 0x5fe   :  { %3856 = vmatprep.mubr.f32.mxu1 %v3488_v16  ;;  %v3150_v34 = vsel %vm1372_vm4, %v3147_v43, %v3149_v31  ;;  %v3561_v43 = vsel %vm1579_vm3, %v3558_v57, %v3560_v27  ;;  %v3531_v48 = vrot.slane %v15095_v4, 2  ;;  %v3506_v56 = vrot.slane %v15093_v63, 2 }
 0x5ff   :  { %3857 = vmatmul.mubr.f32.gmra.mxu1 %v3454_v49  ;;  %v3503_v7 = vsel %vm1372_vm4, %v3500_v10, %v3502_v38  ;;  %v3533_v29 = vrot.slane %v15105_v28, 2  ;;  %v3535_v4 = vrot.slane %v15115_v25, 2  ;;  %v3537_v28 = vrot.slane %v15126_v45, 2 }
 0x600   :  { %3932 = vmatmul.mubr.f32.gmra.mxu0 %v14847_v30  ;;  %10615 = vmatprep.mubr.f32.mxu1 %v14815_v32  ;;  %v3170_v30 = vrot.slane %v14974_v18, 2  ;;  %v3199_v32 = vrot.slane %v15032_v60, 3  ;;  %v3556_v18 = vrot.slane %v15093_v63, 3  ;;  %v3498_v60 = vrot.slane %v15051_v21, 2 }
 0x601   :  { %3936 = vmatprep.mubr.f32.mxu0 %v14888_v54  ;;  %v3198_v54 = vsel %vm1579_vm3, %v3195_v20, %v3197_v42  ;;  %v3507_v49 = vsel %vm1372_vm4, %v3504_v0, %v3506_v56  ;;  %v3510_v63 = vrot.slane %v15113_v36, 2  ;;  %v3538_v25 = vsel %vm1372_vm4, %v3535_v4, %v3537_v28 }
 0x602   :  { %v3200_v52 = vsel %vm1579_vm3, %v3197_v42, %v3199_v32  ;;  %v3559_v1 = vsel %vm1579_vm3, %v3556_v18, %v3558_v57  ;;  %v3499_v6 = vsel %vm1372_vm4, %v3497_v35, %v3498_v60  ;;  %v3501_v9 = vsel %vm1372_vm4, %v3498_v60, %v3500_v10 }
 0x603   :  { %10616 = vmatmul.mubr.f32.vlgmr.msra.gmra.mxu1 %v14856_v23  ;;  %v3196_v23 = vsel %vm1579_vm3, %v3193_v55, %v3195_v20  ;;  %v3552_v55 = vrot.slane %v15073_v19, 3  ;;  %v3534_v20 = vsel %vm1372_vm4, %v3531_v48, %v3533_v29 }
 0x604   :  { %3937 = vmatmul.mubr.f32.gmra.mxu0 %v14882_v33  ;;  %10618 = vmatprep.mubr.f32.mxu1 %v14891_v11  ;;  %v3548_v33 = vrot.slane %v15051_v21, 3  ;;  %v3172_v11 = vrot.slane %v15006_v22, 2  ;;  %v3562_v21 = vrot.slane %v15124_v51, 3 }
 0x605   :  { %3941 = vmatprep.mubr.f32.mxu0 %v14923_v39  ;;  %v3547_v39 = vrot.slane %v15044_v26, 3 }
 0x606   :  { %v3173_v59 = vsel %vm1372_vm4, %v3170_v30, %v3172_v11  ;;  %v3563_v26 = vsel %vm1579_vm3, %v3560_v27, %v3562_v21 }
 0x607   :  { %10619 = vmatmul.mubr.f32.gmra.mxu1 %v14917_v47  ;;  %v3171_v47 = vsel %vm1372_vm4, %v3168_v14, %v3170_v30  ;;  %v3554_v14 = vrot.slane %v15083_v8, 3  ;;  %v3508_v8 = vrot.slane %v15103_v50, 2  ;;  %v3536_v30 = vsel %vm1372_vm4, %v3533_v29, %v3535_v4 }
 0x608   :  { %3942 = vmatmul.mubr.f32.gmra.mxu0 %v14926_v41  ;;  %10621 = vmatprep.mubr.f32.mxu1 %v14959_v62  ;;  %v3550_v41 = vrot.slane %v15063_v15, 3  ;;  %v3549_v62 = vsel %vm1579_vm3, %v3547_v39, %v3548_v33  ;;  %v3529_v15 = vrot.slane %v15085_v61, 2  ;;  %v3505_v61 = vsel %vm1372_vm4, %v3502_v38, %v3504_v0 }
 0x609   :  { %3946 = vmatprep.mubr.f32.mxu0 %v14967_v24  ;;  %v3174_v24 = vrot.slane %v15034_v58, 2  ;;  %v3522_v58 = vrot.slane %v15046_v37, 2  ;;  %v3555_v5 = vsel %vm1579_vm3, %v3552_v55, %v3554_v14  ;;  %v3509_v42 = vsel %vm1372_vm4, %v3506_v56, %v3508_v8 }
 0x60a   :  { %v3553_v22 = vsel %vm1579_vm3, %v3550_v41, %v3552_v55  ;;  %v3530_v19 = vsel %vm1372_vm4, %v3527_v44, %v3529_v15  ;;  %v3532_v16 = vsel %vm1372_vm4, %v3529_v15, %v3531_v48  ;;  %v3512_v50 = vrot.slane %v15124_v51, 2 }
 0x60b   :  { %10622 = vmatmul.mubr.f32.gmra.mxu1 %v3196_v23  ;;  %v3524_v37 = vsel %vm1372_vm4, %v3522_v58, %v3523_v53  ;;  %v3511_v32 = vsel %vm1372_vm4, %v3508_v8, %v3510_v63 }
 0x60c   :  { %3947 = vmatmul.mubr.f32.gmra.mxu0 %v14970_v3  ;;  %10624 = vmatprep.mubr.f32.mxu1 %v3198_v54  ;;  %v3551_v3 = vsel %vm1579_vm3, %v3548_v33, %v3550_v41  ;;  %v3513_v23 = vsel %vm1372_vm4, %v3510_v63, %v3512_v50 }
 0x60d   :  { %3951 = vmatprep.mubr.f32.mxu0 %v3171_v47 }
 0x60f   :  { %10625 = vmatmul.mubr.f32.gmra.mxu1 %v3200_v52 }
 0x610   :  { %3952 = vmatmul.mubr.f32.gmra.mxu0 %v15002_v13  ;;  %10627 = vmatprep.mubr.f32.mxu1 %v3549_v62  ;;  %v3175_v13 = vsel %vm1372_vm4, %v3172_v11, %v3174_v24 }
 0x611   :  { %3956 = vmatprep.mubr.f32.mxu0 %v3173_v59 }
 0x613   :  { %10628 = vmatmul.mubr.f32.gmra.mxu1 %v3551_v3 }
 0x614   :  { %3957 = vmatmul.mubr.f32.gmra.mxu0 %v15030_v2  ;;  %10630 = vmatprep.mubr.f32.mxu1 %v3553_v22  ;;  %v3557_v2 = vsel %vm1579_vm3, %v3554_v14, %v3556_v18 }
 0x615   :  { %3961 = vmatprep.mubr.f32.mxu0 %v3175_v13 }
 0x617   :  { %10631 = vmatmul.mubr.f32.gmra.mxu1 %v3555_v5 }
 0x618   :  { %3962 = vmatmul.mubr.f32.gmra.mxu0 %v3150_v34  ;;  %10633 = vmatprep.mubr.f32.mxu1 %v3557_v2 }
 0x619   :  { %3966 = vmatprep.mubr.f32.mxu0 %v3524_v37 }
 0x61b   :  { %10634 = vmatmul.mubr.f32.gmra.mxu1 %v3559_v1 }
 0x61c   :  { %3967 = vmatmul.mubr.f32.gmra.mxu0 %v3499_v6  ;;  %10636 = vmatprep.mubr.f32.mxu1 %v3561_v43 }
 0x61d   :  { %3971 = vmatprep.mubr.f32.mxu0 %v3526_v17 }
 0x61f   :  { %10637 = vmatmul.mubr.f32.gmra.mxu1 %v3563_v26 }
 0x620   :  { %3972 = vmatmul.mubr.f32.gmra.mxu0 %v3501_v9  ;;  %10655 = vmatprep.mubr.msk.f32.mxu1 %vm11444_vm6, %v16493_v46 }
 0x621   :  { %3976 = vmatprep.mubr.f32.mxu0 %v3528_v12 }
 0x624   :  { %3977 = vmatmul.mubr.f32.gmra.mxu0 %v3503_v7 }
 0x625   :  { %3981 = vmatprep.mubr.f32.mxu0 %v3530_v19 }
 0x628   :  { %3982 = vmatmul.mubr.f32.gmra.mxu0 %v3505_v61 }
 0x629   :  { %3986 = vmatprep.mubr.f32.mxu0 %v3532_v16 }
 0x62c   :  { %3987 = vmatmul.mubr.f32.gmra.mxu0 %v3507_v49 }
 0x62d   :  { %3991 = vmatprep.mubr.f32.mxu0 %v3534_v20 }
 0x630   :  { %3992 = vmatmul.mubr.f32.gmra.mxu0 %v3509_v42 }
 0x631   :  { %3996 = vmatprep.mubr.f32.mxu0 %v3536_v30 }
 0x634   :  { %3997 = vmatmul.mubr.f32.gmra.mxu0 %v3511_v32 }
 0x635   :  { %4001 = vmatprep.mubr.f32.mxu0 %v3538_v25 }
 0x638   :  { %4002 = vmatmul.mubr.f32.gmra.mxu0 %v3513_v23 }
 0x639   :  { %10717 = vmatprep.mubr.msk.f32.mxu0 %vm11444_vm6, %v16493_v46 }
 0x668   :  { %v15223_v36 = vpop.f32.mrf.mxu0 }
 0x66a   :  { %v15225_v45 = vpop.f32.mrf.mxu0 }
 0x66e   :  { %v15227_v33 = vpop.f32.mrf.mxu0 }
 0x670   :  { %v15229_v54 = vpop.f32.mrf.mxu0 }
 0x671   :  { %v9428_v51 = vpop.f32.mrf.mxu1 }
 0x673   :  { %v9429_v11 = vpop.f32.mrf.mxu1 }
 0x674   :  { %v15231_v47 = vpop.f32.mrf.mxu0  ;;  %v9430_v46 = vadd.f32 %v9429_v11, %v9428_v51 }
 0x676   :  { %v15233_v39 = vpop.f32.mrf.mxu0 }
 0x677   :  { %v9431_v41 = vpop.f32.mrf.mxu1 }
 0x679   :  { %v9432_v52 = vpop.f32.mrf.mxu1 }
 0x67a   :  { %v15235_v55 = vpop.f32.mrf.mxu0 }
 0x67c   :  { %v15237_v62 = vpop.f32.mrf.mxu0 }
 0x67d   :  { %v15239_v24 = vpop.f32.mrf.mxu1 }
 0x67f   :  { %v9435_v59 = vpop.f32.mrf.mxu1 }
 0x680   :  { %v15241_v14 = vpop.f32.mrf.mxu0 }
 0x682   :  { %v15243_v3 = vpop.f32.mrf.mxu0 }
 0x683   :  { %v15245_v31 = vpop.f32.mrf.mxu1 }
 0x685   :  { %v15247_v18 = vpop.f32.mrf.mxu1 }
 0x686   :  { %v15249_v22 = vpop.f32.mrf.mxu0 }
 0x688   :  { %v15253_v13 = vpop.f32.mrf.mxu0 }
 0x689   :  { %v15251_v53 = vpop.f32.mrf.mxu1 }
 0x68b   :  { %v15255_v58 = vpop.f32.mrf.mxu1 }
 0x68c   :  { %v15257_v57 = vpop.f32.mrf.mxu0 }
 0x68e   :  { %v15263_v27 = vpop.f32.mrf.mxu0 }
 0x68f   :  { %v15259_v5 = vpop.f32.mrf.mxu1 }
 0x691   :  { %v15261_v60 = vpop.f32.mrf.mxu1 }
 0x692   :  { %v15267_v2 = vpop.f32.mrf.mxu0 }
 0x694   :  { %v15271_v37 = vpop.f32.mrf.mxu0 }
 0x695   :  { %v15265_v34 = vpop.f32.mrf.mxu1 }
 0x697   :  { %v15269_v40 = vpop.f32.mrf.mxu1 }
 0x69b   :  { %v15275_v21 = vpop.f32.mrf.mxu1 }
 0x69c   :  { %v15273_v35 = vpop.f32.mrf.mxu0 }
 0x69d   :  { %v15281_v6 = vpop.f32.mrf.mxu1 }
 0x69e   :  { %v15277_v1 = vpop.f32.mrf.mxu0 }
 0x6a0   :  { %v15279_v10 = vpop.f32.mrf.mxu0 }
 0x6a2   :  { %v15283_v43 = vpop.f32.mrf.mxu0 }
 0x6a3   :  { %v15285_v44 = vpop.f32.mrf.mxu1 }
 0x6a4   :  { %v15287_v17 = vpop.f32.mrf.mxu0 }
 0x6a5   :  { %v15289_v26 = vpop.f32.mrf.mxu1 }
 0x6a6   :  { %v15291_v38 = vpop.f32.mrf.mxu0 }
 0x6a7   :  { %v15293_v9 = vpop.f32.mrf.mxu1 }
 0x6a8   :  { %v15295_v15 = vpop.f32.mrf.mxu0 }
 0x6a9   :  { %v15297_v12 = vpop.f32.mrf.mxu1 }
 0x6aa   :  { %v15299_v0 = vpop.f32.mrf.mxu0 }
 0x6ab   :  { %v15301_v7 = vpop.f32.mrf.mxu1 }
 0x6ac   :  { %v15303_v48 = vpop.f32.mrf.mxu0 }
 0x6ad   :  { %16784 = vst [vmem:[#allocation61_spill] sm:$0xff] %v15303_v48  ;;  %v15305_v19 = vpop.f32.mrf.mxu1 }
 0x6ae   :  { %v15307_v56 = vpop.f32.mrf.mxu0 }
 0x6af   :  { %16785 = vst [vmem:[#allocation53_spill] sm:$0xff] %v15307_v56  ;;  %v15309_v61 = vpop.f32.mrf.mxu1 }
 0x6b0   :  { %v15311_v29 = vpop.f32.mrf.mxu0 }
 0x6b1   :  { %16786 = vst [vmem:[#allocation57_spill] sm:$0xff] %v15311_v29  ;;  %v15313_v16 = vpop.f32.mrf.mxu1 }
 0x6b2   :  { %v15315_v8 = vpop.f32.mrf.mxu0 }
 0x6b3   :  { %16787 = vst [vmem:[#allocation54_spill] sm:$0xff] %v15315_v8  ;;  %v15317_v49 = vpop.f32.mrf.mxu1 }
 0x6b4   :  { %v15319_v4 = vpop.f32.mrf.mxu0 }
 0x6b5   :  { %16788 = vst [vmem:[#allocation39_spill] sm:$0xff] %v15319_v4  ;;  %v15321_v20 = vpop.f32.mrf.mxu1  ;;  %v9433_v4 = vadd.f32 %v9432_v52, %v9431_v41 }
 0x6b6   :  { %v15323_v63 = vpop.f32.mrf.mxu0 }
 0x6b7   :  { %16789 = vst [vmem:[#allocation41_spill] sm:$0xff] %v15323_v63  ;;  %v15325_v42 = vpop.f32.mrf.mxu1  ;;  %v9350_v63 = vadd.f32 %v15225_v45, %v15223_v36 }
 0x6b8   :  { %16790 = vst [vmem:[#allocation43_spill] sm:$0xff] %v15325_v42  ;;  %v15327_v28 = vpop.f32.mrf.mxu0 }
 0x6b9   :  { %16791 = vst [vmem:[#allocation64_spill] sm:$0xff] %v15327_v28  ;;  %v15329_v30 = vpop.f32.mrf.mxu1  ;;  %v9353_v28 = vadd.f32 %v15229_v54, %v15227_v33 }
 0x6ba   :  { %16792 = vst [vmem:[#allocation52_spill] sm:$0xff] %v15329_v30  ;;  %v15331_v50 = vpop.f32.mrf.mxu0 }
 0x6bb   :  { %16793 = vst [vmem:[#allocation55_spill] sm:$0xff] %v15331_v50  ;;  %v15333_v32 = vpop.f32.mrf.mxu1  ;;  %v3784_v50 = vadd.f32 %v9430_v46, %v9350_v63  ;;  %v3789_v48 = vadd.f32 %v9433_v4, %v9353_v28  ;;  %v9439_v46 = vadd.f32 %v15247_v18, %v15245_v31 }
 0x6bc   :  { %16794 = vst [vmem:[#allocation50_spill] sm:$0xff] %v15333_v32  ;;  %v9508_v25 = vpop.f32.mrf.mxu0 }
 0x6bd   :  { %v15335_v23 = vpop.f32.mrf.mxu1 }
 0x6be   :  { %16795 = vst [vmem:[#allocation62_spill] sm:$0xff] %v15335_v23  ;;  %v9509_v8 = vpop.f32.mrf.mxu0  ;;  %v9436_v23 = vadd.f32 %v9435_v59, %v15239_v24 }
 0x6bf   :  { %v15337_v29 = vpop.f32.mrf.mxu1  ;;  %v9510_v42 = vadd.f32 %v9509_v8, %v9508_v25 }
 0x6c0   :  { %16796 = vst [vmem:[#allocation59_spill] sm:$0xff] %v15337_v29  ;;  %v9511_v56 = vpop.f32.mrf.mxu0  ;;  %v9356_v29 = vadd.f32 %v15233_v39, %v15231_v47 }
 0x6c1   :  { %v15343_v30 = vpop.f32.mrf.mxu1  ;;  %v3929_v52 = vadd.f32 %v9510_v42, %v3784_v50  ;;  %v9362_v50 = vadd.f32 %v15243_v3, %v15241_v14 }
 0x6c2   :  { %v9512_v32 = vpop.f32.mrf.mxu0  ;;  %v3794_v33 = vadd.f32 %v9436_v23, %v9356_v29  ;;  %v9442_v29 = vadd.f32 %v15255_v58, %v15251_v53  ;;  %v9365_v58 = vadd.f32 %v15253_v13, %v15249_v22 }
 0x6c3   :  { %v9513_v51 = vadd.f32 %v9512_v32, %v9511_v56  ;;  %v10617_v11 = vpop.f32.mrf.mxu1  ;;  %v9359_v56 = vadd.f32 %v15237_v62, %v15235_v55 }
 0x6c4   :  { %v9514_v41 = vpop.f32.mrf.mxu0 }
 0x6c5   :  { %v3934_v36 = vadd.f32 %v9513_v51, %v3789_v48  ;;  %v4073_v45 = vpop.f32.mrf.mxu1  ;;  %v3799_v42 = vadd.f32 %v9439_v46, %v9359_v56  ;;  %v3804_v51 = vadd.f32 %v9442_v29, %v9362_v50 }
 0x6c6   :  { %v15348_v8 = vadd.f32 %v4073_v45, %v3929_v52  ;;  %v9515_v25 = vpop.f32.mrf.mxu0 }
 0x6c7   :  { %v15352_v54 = vadd.f32 %v10617_v11, %v3934_v36  ;;  %v9516_v4 = vadd.f32 %v9515_v25, %v9514_v41  ;;  %v10620_v24 = vpop.f32.mrf.mxu1  ;;  %v9445_v11 = vadd.f32 %v15261_v60, %v15259_v5  ;;  %v9368_v60 = vadd.f32 %v15263_v27, %v15257_v57 }
 0x6c8   :  { %v9517_v59 = vpop.f32.mrf.mxu0 }
 0x6c9   :  { %v4152_v47 = vadd.f32 %v15352_v54, %v15348_v8  ;;  %v3939_v39 = vadd.f32 %v9516_v4, %v3794_v33  ;;  %v4083_v48 = vpop.f32.mrf.mxu1  ;;  %v3809_v25 = vadd.f32 %v9445_v11, %v9365_v58  ;;  %v9448_v33 = vadd.f32 %v15269_v40, %v15265_v34 }
 0x6ca   :  { %v9518_v63 = vpop.f32.mrf.mxu0  ;;  %v9371_v40 = vadd.f32 %v15271_v37, %v15267_v2 }
 0x6cb   :  { %v15360_v28 = vadd.f32 %v4083_v48, %v3939_v39  ;;  %v9519_v31 = vadd.f32 %v9518_v63, %v9517_v59  ;;  %v10623_v62 = vpop.f32.mrf.mxu1  ;;  %v3814_v56 = vadd.f32 %v9448_v33, %v9368_v60 }
 0x6cc   :  { %v9520_v18 = vpop.f32.mrf.mxu0 }
 0x6cd   :  { %v4153_v32 = vadd.f32 %v4152_v47, %v15360_v28  ;;  %v3944_v55 = vadd.f32 %v9519_v31, %v3799_v42  ;;  %v4093_v14 = vpop.f32.mrf.mxu1  ;;  %v9451_v47 = vadd.f32 %v15281_v6, %v15275_v21  ;;  %v9454_v31 = vadd.f32 %v15289_v26, %v15285_v44 }
 0x6ce   :  { %v9521_v23 = vpop.f32.mrf.mxu0  ;;  %v9374_v6 = vadd.f32 %v15277_v1, %v15273_v35  ;;  %v9377_v26 = vadd.f32 %v15283_v43, %v15279_v10 }
 0x6cf   :  { %v15367_v41 = vadd.f32 %v10620_v24, %v3944_v55  ;;  %v9522_v52 = vadd.f32 %v9521_v23, %v9520_v18  ;;  %v10626_v22 = vpop.f32.mrf.mxu1  ;;  %v3819_v29 = vadd.f32 %v9451_v47, %v9371_v40  ;;  %v9457_v23 = vadd.f32 %v15297_v12, %v15293_v9 }
 0x6d0   :  { %v9523_v53 = vpop.f32.mrf.mxu0  ;;  %v9380_v12 = vadd.f32 %v15291_v38, %v15287_v17 }
 0x6d1   :  { %v4154_v36 = vadd.f32 %v4153_v32, %v15367_v41  ;;  %v3949_v45 = vadd.f32 %v9522_v52, %v3804_v51  ;;  %v4103_v57 = vpop.f32.mrf.mxu1  ;;  %v3829_v58 = vadd.f32 %v9457_v23, %v9377_v26  ;;  %v16803_v23 = vld [vmem:[#allocation50_spill] sm:$0xff] }
 0x6d2   :  { %v9524_v3 = vpop.f32.mrf.mxu0 }
 0x6d3   :  { %v15374_v46 = vadd.f32 %v4093_v14, %v3949_v45  ;;  %v9525_v4 = vadd.f32 %v9524_v3, %v9523_v53  ;;  %v10629_v2 = vpop.f32.mrf.mxu1 }
 0x6d4   :  { %v9526_v5 = vpop.f32.mrf.mxu0 }
 0x6d5   :  { %v4155_v24 = vadd.f32 %v4154_v36, %v15374_v46  ;;  %v3954_v59 = vadd.f32 %v9525_v4, %v3809_v25  ;;  %v4113_v35 = vpop.f32.mrf.mxu1  ;;  %v9460_v36 = vadd.f32 %v15305_v19, %v15301_v7  ;;  %v9463_v4 = vadd.f32 %v15313_v16, %v15309_v61  ;;  %v16797_v16 = vld [vmem:[#allocation61_spill] sm:$0xff] }
 0x6d6   :  { %v9527_v13 = vpop.f32.mrf.mxu0  ;;  %v9383_v19 = vadd.f32 %v15299_v0, %v15295_v15 }
 0x6d7   :  { %v15381_v39 = vadd.f32 %v10623_v62, %v3954_v59  ;;  %v9528_v48 = vadd.f32 %v9527_v13, %v9526_v5  ;;  %v3824_v62 = vadd.f32 %v9454_v31, %v9374_v6  ;;  %v10632_v10 = vpop.f32.mrf.mxu1  ;;  %v3834_v33 = vadd.f32 %v9460_v36, %v9380_v12 }
 0x6d8   :  { %v9529_v34 = vpop.f32.mrf.mxu0  ;;  %v9466_v13 = vadd.f32 %v15321_v20, %v15317_v49  ;;  %v16801_v49 = vld [vmem:[#allocation57_spill] sm:$0xff]  ;;  %v16802_v20 = vld [vmem:[#allocation54_spill] sm:$0xff] }
 0x6d9   :  { %v4156_v63 = vadd.f32 %v4155_v24, %v15381_v39  ;;  %v3959_v42 = vadd.f32 %v9528_v48, %v3814_v56  ;;  %v4123_v17 = vpop.f32.mrf.mxu1  ;;  %v16798_v48 = vld [vmem:[#allocation53_spill] sm:$0xff]  ;;  %v9389_v6 = vadd.f32 %v16802_v20, %v16801_v49 }
 0x6da   :  { %v9530_v27 = vpop.f32.mrf.mxu0 }
 0x6db   :  { %v15388_v18 = vadd.f32 %v4103_v57, %v3959_v42  ;;  %v9531_v50 = vadd.f32 %v9530_v27, %v9529_v34  ;;  %v9386_v34 = vadd.f32 %v16798_v48, %v16797_v16  ;;  %v10635_v15 = vpop.f32.mrf.mxu1  ;;  %v16799_v57 = vld [vmem:[#allocation43_spill] sm:$0xff]  ;;  %v16800_v27 = vld [vmem:[#allocation52_spill] sm:$0xff] }
 0x6dc   :  { %v9532_v21 = vpop.f32.mrf.mxu0 }
 0x6dd   :  { %v4157_v32 = vadd.f32 %v4156_v63, %v15388_v18  ;;  %v3964_v55 = vadd.f32 %v9531_v50, %v3819_v29  ;;  %v3844_v42 = vadd.f32 %v9466_v13, %v9386_v34  ;;  %v9469_v29 = vadd.f32 %v16800_v27, %v16799_v57 }
 0x6de   :  { %v9533_v37 = vpop.f32.mrf.mxu0 }
 0x6df   :  { %v15395_v51 = vadd.f32 %v10626_v22, %v3964_v55  ;;  %v9534_v11 = vadd.f32 %v9533_v37, %v9532_v21  ;;  %v3839_v22 = vadd.f32 %v9463_v4, %v9383_v19 }
 0x6e0   :  { %v9535_v44 = vpop.f32.mrf.mxu0 }
 0x6e1   :  { %v4158_v52 = vadd.f32 %v4157_v32, %v15395_v51  ;;  %v3969_v53 = vadd.f32 %v9534_v11, %v3824_v62  ;;  %v3849_v62 = vadd.f32 %v9469_v29, %v9389_v6  ;;  %v16804_v11 = vld [vmem:[#allocation62_spill] sm:$0xff] }
 0x6e2   :  { %v9536_v1 = vpop.f32.mrf.mxu0 }
 0x6e3   :  { %v15402_v45 = vadd.f32 %v4113_v35, %v3969_v53  ;;  %v9537_v14 = vadd.f32 %v9536_v1, %v9535_v44  ;;  %v9472_v44 = vadd.f32 %v16804_v11, %v16803_v23  ;;  %v16805_v35 = vld [vmem:[#allocation39_spill] sm:$0xff]  ;;  %v16806_v1 = vld [vmem:[#allocation41_spill] sm:$0xff] }
 0x6e4   :  { %v9538_v9 = vpop.f32.mrf.mxu0 }
 0x6e5   :  { %v4159_v3 = vadd.f32 %v4158_v52, %v15402_v45  ;;  %v3974_v25 = vadd.f32 %v9537_v14, %v3829_v58  ;;  %v9392_v58 = vadd.f32 %v16806_v1, %v16805_v35 }
 0x6e6   :  { %v9539_v43 = vpop.f32.mrf.mxu0 }
 0x6e7   :  { %v15409_v5 = vadd.f32 %v10629_v2, %v3974_v25  ;;  %v9540_v60 = vadd.f32 %v9539_v43, %v9538_v9  ;;  %v4133_v2 = vpop.f32.mrf.mxu1  ;;  %v16807_v25 = vld [vmem:[#allocation59_spill] sm:$0xff] }
 0x6e8   :  { %v9541_v7 = vpop.f32.mrf.mxu0 }
 0x6e9   :  { %v4160_v24 = vadd.f32 %v4159_v3, %v15409_v5  ;;  %v3979_v59 = vadd.f32 %v9540_v60, %v3834_v33  ;;  %v10638_v9 = vpop.f32.mrf.mxu1  ;;  %v3854_v3 = vadd.f32 %v9472_v44, %v9392_v58  ;;  %v16808_v60 = vld [vmem:[#allocation64_spill] sm:$0xff] }
 0x6ea   :  { %v9542_v38 = vpop.f32.mrf.mxu0 }
 0x6eb   :  { %v15416_v56 = vadd.f32 %v4123_v17, %v3979_v59  ;;  %v9543_v47 = vadd.f32 %v9542_v38, %v9541_v7  ;;  %v16809_v7 = vld [vmem:[#allocation55_spill] sm:$0xff]  ;;  %v4143_v17 = vpop.f32.mrf.mxu1 }
 0x6ec   :  { %v9544_v61 = vpop.f32.mrf.mxu0  ;;  %v9395_v19 = vadd.f32 %v16809_v7, %v16808_v60 }
 0x6ed   :  { %v4161_v40 = vadd.f32 %v4160_v24, %v15416_v56  ;;  %v3984_v63 = vadd.f32 %v9543_v47, %v3839_v22 }
 0x6ee   :  { %v9545_v0 = vpop.f32.mrf.mxu0 }
 0x6ef   :  { %v4129_v31 = vadd.f32 %v10632_v10, %v3984_v63  ;;  %v9546_v50 = vadd.f32 %v9545_v0, %v9544_v61  ;;  %v9475_v10 = vadd.f32 %v15343_v30, %v16807_v25 }
 0x6f0   :  { %v9547_v21 = vpop.f32.mrf.mxu0 }
 0x6f1   :  { %v4162_v32 = vadd.f32 %v4161_v40, %v4129_v31  ;;  %v3989_v55 = vadd.f32 %v9546_v50, %v3844_v42  ;;  %v3859_v22 = vadd.f32 %v9475_v10, %v9395_v19 }
 0x6f2   :  { %v9548_v37 = vpop.f32.mrf.mxu0 }
 0x6f3   :  { %v4134_v26 = vadd.f32 %v4133_v2, %v3989_v55  ;;  %v9549_v52 = vadd.f32 %v9548_v37, %v9547_v21 }
 0x6f4   :  { %v9550_v53 = vpop.f32.mrf.mxu0 }
 0x6f5   :  { %v4163_v36 = vadd.f32 %v4162_v32, %v4134_v26  ;;  %v3994_v14 = vadd.f32 %v9549_v52, %v3849_v62 }
 0x6f6   :  { %v9551_v12 = vpop.f32.mrf.mxu0 }
 0x6f7   :  { %v4139_v43 = vadd.f32 %v10635_v15, %v3994_v14  ;;  %v9552_v33 = vadd.f32 %v9551_v12, %v9550_v53 }
 0x6f8   :  { %v9553_v4 = vpop.f32.mrf.mxu0 }
 0x6f9   :  { %v4164_v24 = vadd.f32 %v4163_v36, %v4139_v43  ;;  %v3999_v59 = vadd.f32 %v9552_v33, %v3854_v3 }
 0x6fa   :  { %v9554_v38 = vpop.f32.mrf.mxu0 }
 0x6fb   :  { %v4144_v13 = vadd.f32 %v4143_v17, %v3999_v59  ;;  %v9555_v47 = vadd.f32 %v9554_v38, %v9553_v4 }
 0x6fd   :  { %v4165_v61 = vadd.f32 %v4164_v24, %v4144_v13  ;;  %v4004_v16 = vadd.f32 %v9555_v47, %v3859_v22 }
 0x6ff   :  { %v4149_v48 = vadd.f32 %v10638_v9, %v4004_v16 }
 0x701   :  { %v4166_v34 = vadd.f32 %v4165_v61, %v4149_v48 }
 0x703   :  { %v4167_v40 = vrot.slane %v4166_v34, 4 }
 0x705   :  { %v4168_v63 = vadd.f32 %v4167_v40, %v4166_v34 }
 0x707   :  { %v4169_v30 = vrot.slane %v4168_v63, 2 }
 0x709   :  { %v4170_v15 = vadd.f32 %v4169_v30, %v4168_v63 }
 0x70b   :  { %v4171_v0 = vrot.slane %v4170_v15, 1 }
 0x70d   :  { %v4172_v42 = vadd.f32 %v4171_v0, %v4170_v15 }
 0x70f   :  { %v4173_v57 = vmul.f32 0.0078125, %v4172_v42 }
 0x711   :  { %v4189_v27 = vsub.f32 %v4149_v48, %v4173_v57  ;;  %v15434_v29 = vsub.f32 %v15348_v8, %v4173_v57  ;;  %v15437_v50 = vsub.f32 %v15352_v54, %v4173_v57  ;;  %v15440_v21 = vsub.f32 %v15360_v28, %v4173_v57 }
 0x712   :  { %v15443_v49 = vsub.f32 %v15367_v41, %v4173_v57  ;;  %v4178_v20 = vsub.f32 %v15374_v46, %v4173_v57  ;;  %v4179_v6 = vsub.f32 %v15381_v39, %v4173_v57  ;;  %v4180_v32 = vsub.f32 %v15388_v18, %v4173_v57 }
 0x713   :  { %v4181_v55 = vsub.f32 %v15395_v51, %v4173_v57  ;;  %v15450_v8 = vsub.f32 %v15402_v45, %v4173_v57  ;;  %v15453_v54 = vsub.f32 %v15409_v5, %v4173_v57  ;;  %v15456_v28 = vsub.f32 %v15416_v56, %v4173_v57 }
 0x714   :  { %v15458_v2 = vsub.f32 %v4129_v31, %v4173_v57  ;;  %v4186_v41 = vsub.f32 %v4134_v26, %v4173_v57  ;;  %v4187_v37 = vsub.f32 %v4139_v43, %v4173_v57  ;;  %v4188_v46 = vsub.f32 %v4144_v13, %v4173_v57 }
 0x715   :  { %v4190_v39 = vmul.f32 %v15434_v29, %v15434_v29  ;;  %v4191_v18 = vmul.f32 %v15437_v50, %v15437_v50  ;;  %v4192_v51 = vmul.f32 %v15440_v21, %v15440_v21  ;;  %v4193_v5 = vmul.f32 %v15443_v49, %v15443_v49 }
 0x716   :  { %v4194_v62 = vmul.f32 %v4178_v20, %v4178_v20  ;;  %v4195_v23 = vmul.f32 %v4179_v6, %v4179_v6  ;;  %v4196_v44 = vmul.f32 %v4180_v32, %v4180_v32  ;;  %v4197_v52 = vmul.f32 %v4181_v55, %v4181_v55 }
 0x717   :  { %v4206_v45 = vadd.f32 %v4191_v18, %v4190_v39  ;;  %v4198_v35 = vmul.f32 %v15450_v8, %v15450_v8  ;;  %v4199_v58 = vmul.f32 %v15453_v54, %v15453_v54  ;;  %v4200_v14 = vmul.f32 %v15456_v28, %v15456_v28 }
 0x718   :  { %v4201_v12 = vmul.f32 %v15458_v2, %v15458_v2  ;;  %v4202_v25 = vmul.f32 %v4186_v41, %v4186_v41  ;;  %v4203_v43 = vmul.f32 %v4187_v37, %v4187_v37  ;;  %v4204_v4 = vmul.f32 %v4188_v46, %v4188_v46 }
 0x719   :  { %v4207_v56 = vadd.f32 %v4206_v45, %v4192_v51  ;;  %v4205_v7 = vmul.f32 %v4189_v27, %v4189_v27 }
 0x71b   :  { %v4208_v31 = vadd.f32 %v4207_v56, %v4193_v5 }
 0x71d   :  { %v4209_v11 = vadd.f32 %v4208_v31, %v4194_v62 }
 0x71f   :  { %v4210_v26 = vadd.f32 %v4209_v11, %v4195_v23 }
 0x721   :  { %v4211_v53 = vadd.f32 %v4210_v26, %v4196_v44 }
 0x723   :  { %v4212_v1 = vadd.f32 %v4211_v53, %v4197_v52 }
 0x725   :  { %v4213_v36 = vadd.f32 %v4212_v1, %v4198_v35 }
 0x727   :  { %v4214_v9 = vadd.f32 %v4213_v36, %v4199_v58 }
 0x729   :  { %v4215_v3 = vadd.f32 %v4214_v9, %v4200_v14 }
 0x72b   :  { %v4216_v10 = vadd.f32 %v4215_v3, %v4201_v12 }
 0x72d   :  { %v4217_v33 = vadd.f32 %v4216_v10, %v4202_v25 }
 0x72f   :  { %v4218_v60 = vadd.f32 %v4217_v33, %v4203_v43  ;;  %v4294_v43 = vld [vmem:[#allocation8] sm:$0xff] }
 0x731   :  { %v4219_v19 = vadd.f32 %v4218_v60, %v4204_v4  ;;  %v4295_v4 = vld [vmem:[#allocation8 + $0x8] sm:$0xff]  ;;  %v4296_v60 = vld [vmem:[#allocation8 + $0x10] sm:$0xff] }
 0x733   :  { %v4220_v24 = vadd.f32 %v4219_v19, %v4205_v7  ;;  %v4297_v7 = vld [vmem:[#allocation8 + $0x18] sm:$0xff]  ;;  %v4298_v19 = vld [vmem:[#allocation8 + $0x20] sm:$0xff] }
 0x735   :  { %v4221_v59 = vrot.slane %v4220_v24, 4 }
 0x737   :  { %v4222_v17 = vadd.f32 %v4221_v59, %v4220_v24  ;;  %v4335_v24 = vld [vmem:[#allocation11 + $0xf8] sm:$0xff] }
 0x738   :  { %v4319_v59 = vld [vmem:[#allocation11 + $0x78] sm:$0xff] }
 0x739   :  { %v4223_v38 = vrot.slane %v4222_v17, 2 }
 0x73b   :  { %v4224_v22 = vadd.f32 %v4223_v38, %v4222_v17  ;;  %v4299_v17 = vld [vmem:[#allocation10] sm:$0xff]  ;;  %v4334_v38 = vld [vmem:[#allocation11 + $0xf0] sm:$0xff] }
 0x73d   :  { %v4225_v13 = vrot.slane %v4224_v22, 1 }
 0x73f   :  { %v4226_v47 = vadd.f32 %v4225_v13, %v4224_v22  ;;  %v4318_v22 = vld [vmem:[#allocation11 + $0x70] sm:$0xff]  ;;  %v4333_v13 = vld [vmem:[#allocation11 + $0xe8] sm:$0xff] }
 0x741   :  { %v4227_v61 = vmul.f32 0.0078125, %v4226_v47  ;;  %v4300_v47 = vld [vmem:[#allocation10 + $0x8] sm:$0xff] }
 0x743   :  { %v4228_v16 = vadd.f32 1e-05, %v4227_v61  ;;  %v4317_v61 = vld [vmem:[#allocation11 + $0x68] sm:$0xff] }
 0x745   :  { %11115 = vrsqrt.f32 %v4228_v16  ;;  %v4332_v16 = vld [vmem:[#allocation11 + $0xe0] sm:$0xff] }
 0x752   :  { %v15476_v48 = vpop.eup %11115 }
 0x753   :  { %v4237_v34 = vmul.f32 %v15476_v48, %v4181_v55  ;;  %v4245_v40 = vmul.f32 %v15476_v48, %v4189_v27  ;;  %v4236_v63 = vmul.f32 %v15476_v48, %v4180_v32  ;;  %v4244_v30 = vmul.f32 %v15476_v48, %v4188_v46 }
 0x754   :  { %v4235_v15 = vmul.f32 %v15476_v48, %v4179_v6  ;;  %v4243_v0 = vmul.f32 %v15476_v48, %v4187_v37  ;;  %v4234_v42 = vmul.f32 %v15476_v48, %v4178_v20  ;;  %v4242_v57 = vmul.f32 %v15476_v48, %v4186_v41 }
 0x755   :  { %vm4253_vm9 = vcmp.gt.f32.partialorder %v4237_v34, 0.0  ;;  %v4269_v39 = vmul.f32 0.1, %v4237_v34  ;;  %vm4261_vm10 = vcmp.gt.f32.partialorder %v4245_v40, 0.0  ;;  %v4277_v18 = vmul.f32 0.1, %v4245_v40 }
 0x756   :  { %vm4252_vm11 = vcmp.gt.f32.partialorder %v4236_v63, 0.0  ;;  %v4268_v55 = vmul.f32 0.1, %v4236_v63  ;;  %vm4260_vm12 = vcmp.gt.f32.partialorder %v4244_v30, 0.0  ;;  %v4276_v27 = vmul.f32 0.1, %v4244_v30 }
 0x757   :  { %v15486_v51 = vsel %vm4253_vm9, %v4237_v34, %v4269_v39  ;;  %v15488_v32 = vsel %vm4261_vm10, %v4245_v40, %v4277_v18  ;;  %vm4251_vm13 = vcmp.gt.f32.partialorder %v4235_v15, 0.0  ;;  %v4267_v6 = vmul.f32 0.1, %v4235_v15  ;;  %v4316_v34 = vld [vmem:[#allocation11 + $0x60] sm:$0xff]  ;;  %v4331_v40 = vld [vmem:[#allocation11 + $0xd8] sm:$0xff]  ;;  %v4330_v39 = vld [vmem:[#allocation11 + $0xd0] sm:$0xff] }
 0x758   :  { %10640 = vmatpush3.msra.mxu1 %v15486_v51  ;;  %10702 = vmatpush3.msra.mxu0 %v15488_v32  ;;  %v15492_v20 = vsel %vm4252_vm11, %v4236_v63, %v4268_v55  ;;  %vm4259_vm14 = vcmp.gt.f32.partialorder %v4243_v0, 0.0  ;;  %v4275_v41 = vmul.f32 0.1, %v4243_v0  ;;  %v16810_v37 = vmov 0.0   ;;  %v4302_v63 = vld [vmem:[#allocation10 + $0x18] sm:$0xff] }
 0x759   :  { %10641 = vmatprep.subr.mxu1 %v16810_v37  ;;  %10703 = vmatprep.subr.mxu0 %v16810_v37  ;;  %v15496_v46 = vsel %vm4260_vm12, %v4244_v30, %v4276_v27  ;;  %v15498_v45 = vsel %vm4251_vm13, %v4235_v15, %v4267_v6  ;;  %vm4250_vm15 = vcmp.gt.f32.partialorder %v4234_v42, 0.0  ;;  %v4266_v5 = vmul.f32 0.1, %v4234_v42  ;;  %v4315_v30 = vld [vmem:[#allocation11 + $0x58] sm:$0xff]  ;;  %v4350_v18 = vld [vmem:[#allocation11 + $0x170] sm:$0xff]  ;;  %v4365_v27 = vld [vmem:[#allocation11 + $0x1e8] sm:$0xff] }
 0x75a   :  { %10642 = vmatpush3.msra.mxu1 %v15492_v20  ;;  %10704 = vmatpush3.msra.mxu0 %v15496_v46  ;;  %vm4258_vm0 = vcmp.gt.f32.partialorder %v4242_v57, 0.0  ;;  %v4274_v56 = vmul.f32 0.1, %v4242_v57  ;;  %v4233_v62 = vmul.f32 %v15476_v48, %v15443_v49  ;;  %v4241_v31 = vmul.f32 %v15476_v48, %v15458_v2  ;;  %v4303_v15 = vld [vmem:[#allocation10 + $0x20] sm:$0xff]  ;;  %v4314_v55 = vld [vmem:[#allocation11 + $0x50] sm:$0xff]  ;;  %v4313_v6 = vld [vmem:[#allocation11 + $0x48] sm:$0xff] }
 0x75b   :  { %10643 = vmatprep.subr.mxu1 %v16810_v37  ;;  %10705 = vmatprep.subr.mxu0 %v16810_v37  ;;  %v15509_v23 = vsel %vm4259_vm14, %v4243_v0, %v4275_v41  ;;  %v4232_v11 = vmul.f32 %v15476_v48, %v15440_v21  ;;  %v4240_v44 = vmul.f32 %v15476_v48, %v15456_v28  ;;  %v4367_v0 = vld [vmem:[#allocation11 + $0x1f8] sm:$0xff]  ;;  %v4328_v41 = vld [vmem:[#allocation11 + $0xc0] sm:$0xff] }
 0x75c   :  { %10644 = vmatpush3.msra.mxu1 %v15498_v45  ;;  %10706 = vmatpush3.msra.mxu0 %v15509_v23  ;;  %v15517_v49 = vsel %vm4250_vm15, %v4234_v42, %v4266_v5  ;;  %vm4249_vm7 = vcmp.gt.f32.partialorder %v4233_v62, 0.0  ;;  %v4265_v2 = vmul.f32 0.1, %v4233_v62  ;;  %vm4257_vm8 = vcmp.gt.f32.partialorder %v4241_v31, 0.0  ;;  %v4351_v42 = vld [vmem:[#allocation11 + $0x178] sm:$0xff] }
 0x75d   :  { %10645 = vmatprep.subr.mxu1 %v16810_v37  ;;  %10707 = vmatprep.subr.mxu0 %v16810_v37  ;;  %v15522_v26 = vsel %vm4258_vm0, %v4242_v57, %v4274_v56  ;;  %v4273_v21 = vmul.f32 0.1, %v4241_v31  ;;  %vm4248_vm9 = vcmp.gt.f32.partialorder %v4232_v11, 0.0  ;;  %v4264_v52 = vmul.f32 0.1, %v4232_v11  ;;  %v4366_v57 = vld [vmem:[#allocation11 + $0x1f0] sm:$0xff] }
 0x75e   :  { %10646 = vmatpush3.msra.mxu1 %v15517_v49  ;;  %10708 = vmatpush3.msra.mxu0 %v15522_v26  ;;  %vm4256_vm10 = vcmp.gt.f32.partialorder %v4240_v44, 0.0  ;;  %v4272_v28 = vmul.f32 0.1, %v4240_v44  ;;  %v4231_v53 = vmul.f32 %v15476_v48, %v15437_v50  ;;  %v4239_v35 = vmul.f32 %v15476_v48, %v15453_v54  ;;  %v4363_v5 = vld [vmem:[#allocation11 + $0x1d8] sm:$0xff] }
 0x75f   :  { %10647 = vmatprep.subr.mxu1 %v16810_v37  ;;  %10709 = vmatprep.subr.mxu0 %v16810_v37  ;;  %v4281_v1 = vsel %vm4249_vm7, %v4233_v62, %v4265_v2  ;;  %v15534_v58 = vsel %vm4257_vm8, %v4241_v31, %v4273_v21  ;;  %v4230_v36 = vmul.f32 %v15476_v48, %v15434_v29  ;;  %vm4416_vm15 = vcmask 523264   ;;  %v4327_v56 = vld [vmem:[#allocation11 + $0xb8] sm:$0xff]  ;;  %v4361_v2 = vld [vmem:[#allocation11 + $0x1c8] sm:$0xff] }
 0x760   :  { %10648 = vmatpush3.msra.mxu1 %v4281_v1  ;;  %10710 = vmatpush3.msra.mxu0 %v15534_v58  ;;  %v4280_v14 = vsel %vm4248_vm9, %v4232_v11, %v4264_v52  ;;  %vm4247_vm11 = vcmp.gt.f32.partialorder %v4231_v53, 0.0  ;;  %v4263_v50 = vmul.f32 0.1, %v4231_v53  ;;  %vm4255_vm12 = vcmp.gt.f32.partialorder %v4239_v35, 0.0  ;;  %v4347_v62 = vld [vmem:[#allocation11 + $0x158] sm:$0xff]  ;;  %v4326_v11 = vld [vmem:[#allocation11 + $0xb0] sm:$0xff] }
 0x761   :  { %10649 = vmatprep.subr.mxu1 %v16810_v37  ;;  %10711 = vmatprep.subr.mxu0 %v16810_v37  ;;  %v15542_v54 = vsel %vm4256_vm10, %v4240_v44, %v4272_v28  ;;  %v4271_v9 = vmul.f32 0.1, %v4239_v35  ;;  %v4262_v12 = vmul.f32 0.1, %v4230_v36  ;;  %v4238_v3 = vmul.f32 %v15476_v48, %v15450_v8  ;;  %v4301_v48 = vld [vmem:[#allocation10 + $0x10] sm:$0xff]  ;;  %v4311_v31 = vld [vmem:[#allocation11 + $0x38] sm:$0xff] }
 0x762   :  { %10650 = vmatpush3.msra.mxu1 %v4280_v14  ;;  %10712 = vmatpush3.msra.mxu0 %v15542_v54  ;;  %vm4246_vm13 = vcmp.gt.f32.partialorder %v4230_v36, 0.0  ;;  %v4279_v29 = vsel %vm4247_vm11, %v4231_v53, %v4263_v50  ;;  %v4346_v44 = vld [vmem:[#allocation11 + $0x150] sm:$0xff]  ;;  %v4345_v21 = vld [vmem:[#allocation11 + $0x148] sm:$0xff]  ;;  %v4360_v28 = vld [vmem:[#allocation11 + $0x1c0] sm:$0xff] }
 0x763   :  { %10651 = vmatprep.subr.mxu1 %v16810_v37  ;;  %10713 = vmatprep.subr.mxu0 %v16810_v37  ;;  %v15549_v25 = vsel %vm4255_vm12, %v4239_v35, %v4271_v9  ;;  %vm4254_vm14 = vcmp.gt.f32.partialorder %v4238_v3, 0.0  ;;  %v4270_v10 = vmul.f32 0.1, %v4238_v3  ;;  %v4278_v8 = vsel %vm4246_vm13, %v4230_v36, %v4262_v12  ;;  %v4309_v52 = vld [vmem:[#allocation11 + $0x28] sm:$0xff]  ;;  %v4324_v53 = vld [vmem:[#allocation11 + $0xa0] sm:$0xff]  ;;  %v4323_v36 = vld [vmem:[#allocation11 + $0x98] sm:$0xff] }
 0x764   :  { %10652 = vmatpush3.msra.mxu1 %v4279_v29  ;;  %10714 = vmatpush3.msra.mxu0 %v15549_v25  ;;  %v4344_v35 = vld [vmem:[#allocation11 + $0x140] sm:$0xff]  ;;  %v4307_v50 = vld [vmem:[#allocation11 + $0x18] sm:$0xff]  ;;  %v4322_v9 = vld [vmem:[#allocation11 + $0x90] sm:$0xff] }
 0x765   :  { %10653 = vmatprep.subr.mxu1 %v16810_v37  ;;  %10715 = vmatprep.subr.mxu0 %v16810_v37  ;;  %v15554_v33 = vsel %vm4254_vm14, %v4238_v3, %v4270_v10  ;;  %v4342_v12 = vld [vmem:[#allocation11 + $0x130] sm:$0xff]  ;;  %v4341_v10 = vld [vmem:[#allocation11 + $0x128] sm:$0xff]  ;;  %vm5573_vm14 = vcmask 261120  }
 0x766   :  { %10654 = vmatpush3.msra.mxu1 %v4278_v8  ;;  %10716 = vmatpush3.msra.mxu0 %v15554_v33  ;;  %v4306_v3 = vld [vmem:[#allocation11 + $0x10] sm:$0xff] }
 0x767   :  { %10656 = vmatmul.mubr.msk.f32.vlgmr.msra.gmra.mxu1 %vm4416_vm15, %v4294_v43  ;;  %10670 = vmatprep.subr.mxu1 %v16810_v37 }
 0x768   :  { %10671 = vmatpush3.msra.mxu1 %v15486_v51  ;;  %10658 = vmatprep.mubr.msk.f32.mxu1 %vm11444_vm6, %v16810_v37  ;;  %v4329_v51 = vld [vmem:[#allocation11 + $0xc8] sm:$0xff] }
 0x769   :  { %10672 = vmatprep.subr.mxu1 %v16810_v37  ;;  %10718 = vmatmul.mubr.msk.f32.vlgmr.msra.gmra.mxu0 %vm4416_vm15, %v4294_v43  ;;  %v4305_v43 = vld [vmem:[#allocation11 + $0x8] sm:$0xff] }
 0x76a   :  { %10673 = vmatpush3.msra.mxu1 %v15492_v20  ;;  %10720 = vmatprep.mubr.msk.f32.mxu0 %vm11444_vm6, %v16810_v37  ;;  %v4364_v20 = vld [vmem:[#allocation11 + $0x1e0] sm:$0xff] }
 0x76b   :  { %10659 = vmatmul.mubr.msk.f32.gmra.mxu1 %vm4416_vm15, %v4295_v4  ;;  %10674 = vmatprep.subr.mxu1 %v16810_v37 }
 0x76c   :  { %10675 = vmatpush3.msra.mxu1 %v15498_v45  ;;  %10661 = vmatprep.mubr.msk.f32.mxu1 %vm11444_vm6, %v16810_v37  ;;  %v4312_v45 = vld [vmem:[#allocation11 + $0x40] sm:$0xff] }
 0x76d   :  { %10676 = vmatprep.subr.mxu1 %v16810_v37  ;;  %10721 = vmatmul.mubr.msk.f32.gmra.mxu0 %vm4416_vm15, %v4295_v4  ;;  %v4340_v4 = vld [vmem:[#allocation11 + $0x120] sm:$0xff] }
 0x76e   :  { %10677 = vmatpush3.msra.mxu1 %v15517_v49  ;;  %10723 = vmatprep.mubr.msk.f32.mxu0 %vm11444_vm6, %v16810_v37  ;;  %v4310_v49 = vld [vmem:[#allocation11 + $0x30] sm:$0xff] }
 0x76f   :  { %10662 = vmatmul.mubr.msk.f32.gmra.mxu1 %vm4416_vm15, %v4296_v60  ;;  %10678 = vmatprep.subr.mxu1 %v16810_v37 }
 0x770   :  { %10679 = vmatpush3.msra.mxu1 %v4281_v1  ;;  %10664 = vmatprep.mubr.msk.f32.mxu1 %vm11444_vm6, %v16810_v37  ;;  %v4308_v1 = vld [vmem:[#allocation11 + $0x20] sm:$0xff] }
 0x771   :  { %10680 = vmatprep.subr.mxu1 %v16810_v37  ;;  %10724 = vmatmul.mubr.msk.f32.gmra.mxu0 %vm4416_vm15, %v4296_v60  ;;  %v4304_v60 = vld [vmem:[#allocation11] sm:$0xff] }
 0x772   :  { %10681 = vmatpush3.msra.mxu1 %v4280_v14  ;;  %10726 = vmatprep.mubr.msk.f32.mxu0 %vm11444_vm6, %v16810_v37  ;;  %v4343_v14 = vld [vmem:[#allocation11 + $0x138] sm:$0xff] }
 0x773   :  { %10665 = vmatmul.mubr.msk.f32.gmra.mxu1 %vm4416_vm15, %v4297_v7  ;;  %10682 = vmatprep.subr.mxu1 %v16810_v37 }
 0x774   :  { %10683 = vmatpush3.msra.mxu1 %v4279_v29  ;;  %10667 = vmatprep.mubr.msk.f32.mxu1 %vm11444_vm6, %v16810_v37  ;;  %v4357_v29 = vld [vmem:[#allocation11 + $0x1a8] sm:$0xff] }
 0x775   :  { %10684 = vmatprep.subr.mxu1 %v16810_v37  ;;  %10727 = vmatmul.mubr.msk.f32.gmra.mxu0 %vm4416_vm15, %v4297_v7  ;;  %v4355_v7 = vld [vmem:[#allocation11 + $0x198] sm:$0xff] }
 0x776   :  { %10685 = vmatpush3.msra.mxu1 %v4278_v8  ;;  %10729 = vmatprep.mubr.msk.f32.mxu0 %vm11444_vm6, %v16810_v37  ;;  %v4356_v8 = vld [vmem:[#allocation11 + $0x1a0] sm:$0xff] }
 0x777   :  { %10668 = vmatmul.mubr.msk.f32.gmra.mxu1 %vm4416_vm15, %v4298_v19  ;;  %10732 = vmatprep.subr.mxu1 %v16810_v37 }
 0x778   :  { %10686 = vmatprep.mubr.msk.f32.mxu1 %vm11444_vm6, %v16810_v37  ;;  %9640 = vmatprep.subr.mxu0 %v4335_v24  ;;  %v4354_v24 = vld [vmem:[#allocation11 + $0x190] sm:$0xff] }
 0x779   :  { %10730 = vmatmul.mubr.msk.f32.gmra.mxu0 %vm4416_vm15, %v4298_v19  ;;  %v4339_v19 = vld [vmem:[#allocation11 + $0x118] sm:$0xff] }
 0x77a   :  { %9641 = vmatpush3.msra.mxu0 %v4319_v59  ;;  %v4338_v59 = vld [vmem:[#allocation11 + $0x110] sm:$0xff] }
 0x77b   :  { %10687 = vmatmul.mubr.msk.f32.vlgmr.msra.gmra.mxu1 %vm4416_vm15, %v4299_v17  ;;  %9642 = vmatprep.subr.mxu0 %v4334_v38  ;;  %v4337_v38 = vld [vmem:[#allocation11 + $0x108] sm:$0xff] }
 0x77c   :  { %10733 = vmatpush3.msra.mxu1 %v15488_v32  ;;  %10689 = vmatprep.mubr.msk.f32.mxu1 %vm11444_vm6, %v16810_v37  ;;  %v4349_v32 = vld [vmem:[#allocation11 + $0x168] sm:$0xff] }
 0x77d   :  { %10734 = vmatprep.subr.mxu1 %v16810_v37  ;;  %9643 = vmatpush3.msra.mxu0 %v4318_v22  ;;  %v4399_v22 = vld [vmem:[#allocation11 + $0x2f8] sm:$0xff] }
 0x77e   :  { %10735 = vmatpush3.msra.mxu1 %v15496_v46  ;;  %9644 = vmatprep.subr.mxu0 %v4333_v13  ;;  %v4348_v46 = vld [vmem:[#allocation11 + $0x160] sm:$0xff] }
 0x77f   :  { %10736 = vmatprep.subr.mxu1 %v16810_v37  ;;  %10690 = vmatmul.mubr.msk.f32.gmra.mxu1 %vm4416_vm15, %v4300_v47  ;;  %v4352_v13 = vld [vmem:[#allocation11 + $0x180] sm:$0xff] }
 0x780   :  { %10737 = vmatpush3.msra.mxu1 %v15509_v23  ;;  %10692 = vmatprep.mubr.msk.f32.mxu1 %vm11444_vm6, %v16810_v37  ;;  %v4362_v23 = vld [vmem:[#allocation11 + $0x1d0] sm:$0xff] }
 0x781   :  { %10738 = vmatprep.subr.mxu1 %v16810_v37  ;;  %9645 = vmatpush3.msra.mxu0 %v4317_v61  ;;  %v15641_v61 = vld [vmem:[#allocation11 + $0x378] sm:$0xff] }
 0x782   :  { %10739 = vmatpush3.msra.mxu1 %v15522_v26  ;;  %9646 = vmatprep.subr.mxu0 %v4332_v16  ;;  %v4325_v26 = vld [vmem:[#allocation11 + $0xa8] sm:$0xff] }
 0x783   :  { %10740 = vmatprep.subr.mxu1 %v16810_v37  ;;  %10693 = vmatmul.mubr.msk.f32.gmra.mxu1 %vm4416_vm15, %v4301_v48 }
 0x784   :  { %10741 = vmatpush3.msra.mxu1 %v15534_v58  ;;  %10695 = vmatprep.mubr.msk.f32.mxu1 %vm11444_vm6, %v16810_v37  ;;  %v4359_v58 = vld [vmem:[#allocation11 + $0x1b8] sm:$0xff] }
 0x785   :  { %10742 = vmatprep.subr.mxu1 %v16810_v37  ;;  %9647 = vmatpush3.msra.mxu0 %v4316_v34 }
 0x786   :  { %10743 = vmatpush3.msra.mxu1 %v15542_v54  ;;  %9648 = vmatprep.subr.mxu0 %v4331_v40  ;;  %v4358_v54 = vld [vmem:[#allocation11 + $0x1b0] sm:$0xff] }
 0x787   :  { %10744 = vmatprep.subr.mxu1 %v16810_v37  ;;  %10696 = vmatmul.mubr.msk.f32.gmra.mxu1 %vm4416_vm15, %v4302_v63 }
 0x788   :  { %10745 = vmatpush3.msra.mxu1 %v15549_v25  ;;  %10698 = vmatprep.mubr.msk.f32.mxu1 %vm11444_vm6, %v16810_v37  ;;  %v4321_v25 = vld [vmem:[#allocation11 + $0x88] sm:$0xff] }
 0x789   :  { %10746 = vmatprep.subr.mxu1 %v16810_v37  ;;  %9649 = vmatpush3.msra.mxu0 %v4315_v30 }
 0x78a   :  { %10747 = vmatpush3.msra.mxu1 %v15554_v33  ;;  %9650 = vmatprep.subr.mxu0 %v4330_v39  ;;  %v4320_v33 = vld [vmem:[#allocation11 + $0x80] sm:$0xff] }
 0x78b   :  { %10699 = vmatmul.mubr.msk.f32.gmra.mxu1 %vm4416_vm15, %v4303_v15  ;;  %9696 = vmatprep.subr.mxu1 %v4367_v0 }
 0x78c   :  { %10748 = vmatprep.mubr.msk.f32.mxu1 %vm11444_vm6, %v16810_v37  ;;  %9651 = vmatpush3.msra.mxu0 %v4314_v55 }
 0x78d   :  { %9652 = vmatprep.subr.mxu0 %v4329_v51 }
 0x78e   :  { %9653 = vmatpush3.msra.mxu0 %v4313_v6 }
 0x78f   :  { %10749 = vmatmul.mubr.msk.f32.vlgmr.msra.gmra.mxu1 %vm4416_vm15, %v4299_v17  ;;  %9654 = vmatprep.subr.mxu0 %v4328_v41  ;;  %v4353_v17 = vld [vmem:[#allocation11 + $0x188] sm:$0xff] }
 0x790   :  { %10751 = vmatprep.mubr.msk.f32.mxu1 %vm11444_vm6, %v16810_v37  ;;  %9697 = vmatpush3.msra.mxu1 %v4351_v42 }
 0x791   :  { %9698 = vmatprep.subr.mxu1 %v4366_v57  ;;  %9655 = vmatpush3.msra.mxu0 %v4312_v45 }
 0x792   :  { %9699 = vmatpush3.msra.mxu1 %v4350_v18  ;;  %9656 = vmatprep.subr.mxu0 %v4327_v56 }
 0x793   :  { %10752 = vmatmul.mubr.msk.f32.gmra.mxu1 %vm4416_vm15, %v4300_v47  ;;  %9700 = vmatprep.subr.mxu1 %v4365_v27  ;;  %v4336_v47 = vld [vmem:[#allocation11 + $0x100] sm:$0xff] }
 0x794   :  { %10754 = vmatprep.mubr.msk.f32.mxu1 %vm11444_vm6, %v16810_v37  ;;  %9701 = vmatpush3.msra.mxu1 %v4349_v32 }
 0x795   :  { %9702 = vmatprep.subr.mxu1 %v4364_v20  ;;  %9657 = vmatpush3.msra.mxu0 %v4311_v31 }
 0x796   :  { %9703 = vmatpush3.msra.mxu1 %v4348_v46  ;;  %9658 = vmatprep.subr.mxu0 %v4326_v11 }
 0x797   :  { %10755 = vmatmul.mubr.msk.f32.gmra.mxu1 %vm4416_vm15, %v4301_v48  ;;  %9704 = vmatprep.subr.mxu1 %v4363_v5 }
 0x798   :  { %10757 = vmatprep.mubr.msk.f32.mxu1 %vm11444_vm6, %v16810_v37  ;;  %9705 = vmatpush3.msra.mxu1 %v4347_v62 }
 0x799   :  { %9706 = vmatprep.subr.mxu1 %v4362_v23  ;;  %9659 = vmatpush3.msra.mxu0 %v4310_v49 }
 0x79a   :  { %9707 = vmatpush3.msra.mxu1 %v4346_v44  ;;  %9660 = vmatprep.subr.mxu0 %v4325_v26 }
 0x79b   :  { %10758 = vmatmul.mubr.msk.f32.gmra.mxu1 %vm4416_vm15, %v4302_v63  ;;  %9708 = vmatprep.subr.mxu1 %v4361_v2 }
 0x79c   :  { %10760 = vmatprep.mubr.msk.f32.mxu1 %vm11444_vm6, %v16810_v37  ;;  %9709 = vmatpush3.msra.mxu1 %v4345_v21 }
 0x79d   :  { %9661 = vmatpush3.msra.mxu0 %v4309_v52  ;;  %9710 = vmatprep.subr.mxu1 %v4360_v28 }
 0x79e   :  { %9662 = vmatprep.subr.mxu0 %v4324_v53  ;;  %9711 = vmatpush3.msra.mxu1 %v4344_v35 }
 0x79f   :  { %10761 = vmatmul.mubr.msk.f32.gmra.mxu1 %vm4416_vm15, %v4303_v15  ;;  %9663 = vmatpush3.msra.mxu0 %v4308_v1  ;;  %vm6523_vm15 = vcmask 121856  }
 0x7a0   :  { %9712 = vmatprep.subr.mxu1 %v4359_v58  ;;  %9664 = vmatprep.subr.mxu0 %v4323_v36 }
 0x7a1   :  { %9713 = vmatpush3.msra.mxu1 %v4343_v14  ;;  %9665 = vmatpush3.msra.mxu0 %v4307_v50  ;;  %v4383_v14 = vld [vmem:[#allocation11 + $0x278] sm:$0xff] }
 0x7a2   :  { %9714 = vmatprep.subr.mxu1 %v4358_v54  ;;  %9666 = vmatprep.subr.mxu0 %v4322_v9  ;;  %v4398_v54 = vld [vmem:[#allocation11 + $0x2f0] sm:$0xff] }
 0x7a3   :  { %9715 = vmatpush3.msra.mxu1 %v4342_v12  ;;  %9667 = vmatpush3.msra.mxu0 %v4306_v3  ;;  %v4382_v3 = vld [vmem:[#allocation11 + $0x270] sm:$0xff] }
 0x7a4   :  { %9716 = vmatprep.subr.mxu1 %v4357_v29  ;;  %9668 = vmatprep.subr.mxu0 %v4321_v25  ;;  %v4397_v25 = vld [vmem:[#allocation11 + $0x2e8] sm:$0xff] }
 0x7a5   :  { %9717 = vmatpush3.msra.mxu1 %v4341_v10  ;;  %9669 = vmatpush3.msra.mxu0 %v4305_v43 }
 0x7a6   :  { %9718 = vmatprep.subr.mxu1 %v4356_v8  ;;  %9670 = vmatprep.subr.mxu0 %v4320_v33  ;;  %v4381_v8 = vld [vmem:[#allocation11 + $0x268] sm:$0xff] }
 0x7a7   :  { %9719 = vmatpush3.msra.mxu1 %v4340_v4  ;;  %9671 = vmatpush3.msra.mxu0 %v4304_v60  ;;  %v4396_v60 = vld [vmem:[#allocation11 + $0x2e0] sm:$0xff] }
 0x7a8   :  { %9720 = vmatprep.subr.mxu1 %v4355_v7  ;;  %9752 = vmatprep.subr.mxu0 %v4399_v22  ;;  %v4380_v22 = vld [vmem:[#allocation11 + $0x260] sm:$0xff] }
 0x7a9   :  { %9721 = vmatpush3.msra.mxu1 %v4339_v19 }
 0x7aa   :  { %9722 = vmatprep.subr.mxu1 %v4354_v24 }
 0x7ab   :  { %9723 = vmatpush3.msra.mxu1 %v4338_v59 }
 0x7ac   :  { %9724 = vmatprep.subr.mxu1 %v4353_v17 }
 0x7ad   :  { %9725 = vmatpush3.msra.mxu1 %v4337_v38 }
 0x7ae   :  { %9726 = vmatprep.subr.mxu1 %v4352_v13  ;;  %v4414_v13 = vld [vmem:[#allocation11 + $0x370] sm:$0xff] }
 0x7af   :  { %9727 = vmatpush3.msra.mxu1 %v4336_v47 }
 0x7b0   :  { %10763 = vmatprep.subr.mxu1 %v15641_v61 }
 0x827   :  { %v15644_v16 = vpop.f32.mrf.mxu1 }
 0x828   :  { %v4689_v15 = vrot.slane %v15644_v16, 3  ;;  %v4632_v7 = vrot.slane %v15644_v16, 1 }
 0x829   :  { %v10657_v48 = vpop.f32.mrf.mxu1  ;;  %v15646_v34 = vpop.f32.mrf.mxu0 }
 0x82a   :  { %v4918_v42 = vrot.slane %v15646_v34, 2  ;;  %v4944_v57 = vrot.slane %v15646_v34, 3  ;;  %v4395_v48 = vld [vmem:[#allocation11 + $0x2d8] sm:$0xff] }
 0x82b   :  { %v15648_v40 = vpop.f32.mrf.mxu1  ;;  %v10719_v63 = vpop.f32.mrf.mxu0 }
 0x82c   :  { %v4690_v30 = vrot.slane %v15648_v40, 3  ;;  %v4633_v10 = vrot.slane %v15648_v40, 1 }
 0x82d   :  { %v10660_v0 = vpop.f32.mrf.mxu1  ;;  %v15654_v39 = vpop.f32.mrf.mxu0 }
 0x82e   :  { %v4919_v18 = vrot.slane %v15654_v39, 2  ;;  %v4945_v55 = vrot.slane %v15654_v39, 3  ;;  %v15663_v32 = vsel %vm1579_vm3, %v4689_v15, %v4690_v30  ;;  %v4634_v38 = vsel %vm1160_vm5, %v4632_v7, %v4633_v10 }
 0x82f   :  { %v15658_v27 = vpop.f32.mrf.mxu1  ;;  %v10722_v51 = vpop.f32.mrf.mxu0 }
 0x830   :  { %v15668_v41 = vsel %vm1579_vm3, %v4944_v57, %v4945_v55  ;;  %v15671_v46 = vsel %vm1372_vm4, %v4918_v42, %v4919_v18  ;;  %v4635_v59 = vrot.slane %v15658_v27, 1 }
 0x831   :  { %v10663_v6 = vpop.f32.mrf.mxu1  ;;  %v15665_v20 = vpop.f32.mrf.mxu0 }
 0x832   :  { %v4921_v45 = vrot.slane %v15665_v20, 2  ;;  %v4947_v5 = vrot.slane %v15665_v20, 3  ;;  %v4636_v57 = vsel %vm1160_vm5, %v4633_v10, %v4635_v59  ;;  %v4391_v10 = vld [vmem:[#allocation11 + $0x2b8] sm:$0xff] }
 0x833   :  { %v15675_v56 = vpop.f32.mrf.mxu1  ;;  %v10725_v62 = vpop.f32.mrf.mxu0 }
 0x834   :  { %v15680_v11 = vsel %vm1579_vm3, %v4945_v55, %v4947_v5  ;;  %v15683_v44 = vsel %vm1372_vm4, %v4919_v18, %v4921_v45  ;;  %v4637_v0 = vrot.slane %v15675_v56, 1  ;;  %v4379_v18 = vld [vmem:[#allocation11 + $0x258] sm:$0xff]  ;;  %v4413_v55 = vld [vmem:[#allocation11 + $0x368] sm:$0xff] }
 0x835   :  { %v10666_v31 = vpop.f32.mrf.mxu1  ;;  %v15677_v23 = vpop.f32.mrf.mxu0  ;;  %v4393_v62 = vld [vmem:[#allocation11 + $0x2c8] sm:$0xff] }
 0x836   :  { %v4923_v49 = vrot.slane %v15677_v23, 2  ;;  %v4949_v2 = vrot.slane %v15677_v23, 3 }
 0x837   :  { %v15687_v26 = vpop.f32.mrf.mxu1  ;;  %v10728_v21 = vpop.f32.mrf.mxu0 }
 0x838   :  { %v15692_v53 = vsel %vm1579_vm3, %v4947_v5, %v4949_v2  ;;  %v15695_v35 = vsel %vm1372_vm4, %v4921_v45, %v4923_v49  ;;  %v4378_v45 = vld [vmem:[#allocation11 + $0x250] sm:$0xff]  ;;  %v4412_v21 = vld [vmem:[#allocation11 + $0x360] sm:$0xff] }
 0x839   :  { %v10669_v52 = vpop.f32.mrf.mxu1  ;;  %v15689_v28 = vpop.f32.mrf.mxu0 }
 0x83a   :  { %v4925_v1 = vrot.slane %v15689_v28, 2  ;;  %v4951_v58 = vrot.slane %v15689_v28, 3  ;;  %v4639_v52 = vrot.slane %v15687_v26, 1 }
 0x83b   :  { %v15699_v36 = vpop.f32.mrf.mxu1  ;;  %v10731_v50 = vpop.f32.mrf.mxu0 }
 0x83c   :  { %5021 = vmatprep.mubr.f32.mxu0 %v15699_v36  ;;  %v15703_v9 = vsel %vm1579_vm3, %v4949_v2, %v4951_v58  ;;  %v15707_v29 = vsel %vm1372_vm4, %v4923_v49, %v4925_v1  ;;  %v4650_v33 = vrot.slane %v15699_v36, 1  ;;  %v4638_v49 = vsel %vm1160_vm5, %v4635_v59, %v4637_v0  ;;  %v4377_v2 = vld [vmem:[#allocation11 + $0x248] sm:$0xff]  ;;  %v4392_v58 = vld [vmem:[#allocation11 + $0x2c0] sm:$0xff] }
 0x83d   :  { %v10688_v12 = vpop.f32.mrf.mxu1  ;;  %5022 = vmatmul.mubr.f32.vlgmr.msra.gmra.mxu0 %v15644_v16  ;;  %v4409_v59 = vld [vmem:[#allocation11 + $0x348] sm:$0xff] }
 0x83e   :  { %9753 = vmatpush3.msra.mxu0 %v4383_v14 }
 0x83f   :  { %v15710_v43 = vpop.f32.mrf.mxu1  ;;  %9754 = vmatprep.subr.mxu0 %v4398_v54  ;;  %v4376_v54 = vld [vmem:[#allocation11 + $0x240] sm:$0xff] }
 0x840   :  { %v4651_v4 = vrot.slane %v15710_v43, 1  ;;  %5026 = vmatprep.mubr.f32.mxu0 %v15710_v43  ;;  %9755 = vmatpush3.msra.mxu0 %v4382_v3  ;;  %v4411_v3 = vld [vmem:[#allocation11 + $0x358] sm:$0xff] }
 0x841   :  { %v10691_v19 = vpop.f32.mrf.mxu1  ;;  %5027 = vmatmul.mubr.f32.gmra.mxu0 %v15648_v40  ;;  %9756 = vmatprep.subr.mxu0 %v4397_v25  ;;  %v4640_v25 = vsel %vm1160_vm5, %v4637_v0, %v4639_v52 }
 0x842   :  { %v4652_v24 = vsel %vm1160_vm5, %v4650_v33, %v4651_v4  ;;  %9757 = vmatpush3.msra.mxu0 %v4381_v8  ;;  %v4375_v33 = vld [vmem:[#allocation11 + $0x238] sm:$0xff]  ;;  %v4374_v19 = vld [vmem:[#allocation11 + $0x230] sm:$0xff] }
 0x843   :  { %v15719_v17 = vpop.f32.mrf.mxu1  ;;  %5126 = vmatprep.mubr.f32.mxu1 %v4652_v24  ;;  %9758 = vmatprep.subr.mxu0 %v4396_v60  ;;  %v4390_v60 = vld [vmem:[#allocation11 + $0x2b0] sm:$0xff] }
 0x844   :  { %v4653_v47 = vrot.slane %v15719_v17, 1  ;;  %5031 = vmatprep.mubr.f32.mxu0 %v15719_v17  ;;  %5127 = vmatmul.mubr.f32.vlgmr.msra.gmra.mxu1 %v4634_v38 }
 0x845   :  { %v10694_v63 = vpop.f32.mrf.mxu1  ;;  %5032 = vmatmul.mubr.f32.gmra.mxu0 %v15658_v27  ;;  %10764 = vmatpush3.msra.mxu1 %v15641_v61  ;;  %v4394_v61 = vld [vmem:[#allocation11 + $0x2d0] sm:$0xff] }
 0x846   :  { %v4654_v15 = vsel %vm1160_vm5, %v4651_v4, %v4653_v47  ;;  %9759 = vmatpush3.msra.mxu0 %v4380_v22  ;;  %10765 = vmatprep.subr.mxu1 %v4414_v13  ;;  %v4410_v4 = vld [vmem:[#allocation11 + $0x350] sm:$0xff]  ;;  %v4887_v63 = vrot.slane %v15646_v34, 1 }
 0x847   :  { %v15728_v42 = vpop.f32.mrf.mxu1  ;;  %5131 = vmatprep.mubr.f32.mxu1 %v4654_v15  ;;  %9760 = vmatprep.subr.mxu0 %v4395_v48  ;;  %v4408_v48 = vld [vmem:[#allocation11 + $0x340] sm:$0xff]  ;;  %v4888_v15 = vrot.slane %v15654_v39, 1 }
 0x848   :  { %v4655_v51 = vrot.slane %v15728_v42, 1  ;;  %5036 = vmatprep.mubr.f32.mxu0 %v15728_v42  ;;  %5132 = vmatmul.mubr.f32.gmra.mxu1 %v4636_v57 }
 0x849   :  { %v10697_v6 = vpop.f32.mrf.mxu1  ;;  %5037 = vmatmul.mubr.f32.gmra.mxu0 %v15675_v56  ;;  %10766 = vmatpush3.msra.mxu1 %v4414_v13  ;;  %v4389_v13 = vld [vmem:[#allocation11 + $0x2a8] sm:$0xff] }
 0x84a   :  { %9761 = vmatpush3.msra.mxu0 %v4379_v18  ;;  %v4656_v5 = vsel %vm1160_vm5, %v4653_v47, %v4655_v51  ;;  %10767 = vmatprep.subr.mxu1 %v4413_v55  ;;  %v4373_v47 = vld [vmem:[#allocation11 + $0x228] sm:$0xff]  ;;  %v4388_v18 = vld [vmem:[#allocation11 + $0x2a0] sm:$0xff]  ;;  %v4387_v6 = vld [vmem:[#allocation11 + $0x298] sm:$0xff] }
 0x84b   :  { %v15735_v31 = vpop.f32.mrf.mxu1  ;;  %5136 = vmatprep.mubr.f32.mxu1 %v4656_v5  ;;  %9762 = vmatprep.subr.mxu0 %v4394_v61  ;;  %v4371_v5 = vld [vmem:[#allocation11 + $0x218] sm:$0xff] }
 0x84c   :  { %v4657_v1 = vrot.slane %v15735_v31, 1  ;;  %5137 = vmatmul.mubr.f32.gmra.mxu1 %v4638_v49  ;;  %9763 = vmatpush3.msra.mxu0 %v4378_v45  ;;  %v4890_v49 = vrot.slane %v15665_v20, 1 }
 0x84d   :  { %v10700_v14 = vpop.f32.mrf.mxu1  ;;  %9764 = vmatprep.subr.mxu0 %v4393_v62  ;;  %10768 = vmatpush3.msra.mxu1 %v4413_v55  ;;  %v4406_v62 = vld [vmem:[#allocation11 + $0x330] sm:$0xff] }
 0x84e   :  { %9765 = vmatpush3.msra.mxu0 %v4377_v2  ;;  %10769 = vmatprep.subr.mxu1 %v4412_v21  ;;  %v4658_v50 = vsel %vm1160_vm5, %v4655_v51, %v4657_v1  ;;  %v4372_v51 = vld [vmem:[#allocation11 + $0x220] sm:$0xff] }
 0x84f   :  { %v15741_v12 = vpop.f32.mrf.mxu1  ;;  %5141 = vmatprep.mubr.f32.mxu1 %v4658_v50  ;;  %9766 = vmatprep.subr.mxu0 %v4392_v58  ;;  %v4370_v58 = vld [vmem:[#allocation11 + $0x210] sm:$0xff]  ;;  %v4677_v50 = vrot.slane %v15710_v43, 2  ;;  %v4404_v43 = vld [vmem:[#allocation11 + $0x320] sm:$0xff] }
 0x850   :  { %10770 = vmatpush3.msra.mxu1 %v4412_v21  ;;  %5041 = vmatprep.mubr.f32.mxu0 %v15741_v12  ;;  %v4905_v38 = vrot.slane %v15741_v12, 1  ;;  %v4386_v21 = vld [vmem:[#allocation11 + $0x290] sm:$0xff] }
 0x851   :  { %5142 = vmatmul.mubr.f32.gmra.mxu1 %v4640_v25  ;;  %9767 = vmatpush3.msra.mxu0 %v4376_v54  ;;  %v10750_v8 = vpop.f32.mrf.mxu1  ;;  %v4405_v54 = vld [vmem:[#allocation11 + $0x328] sm:$0xff] }
 0x852   :  { %10771 = vmatprep.subr.mxu1 %v4411_v3  ;;  %5042 = vmatmul.mubr.f32.gmra.mxu0 %v15646_v34  ;;  %v4407_v34 = vld [vmem:[#allocation11 + $0x338] sm:$0xff]  ;;  %v4369_v8 = vld [vmem:[#allocation11 + $0x208] sm:$0xff] }
 0x853   :  { %9768 = vmatprep.subr.mxu0 %v4391_v10  ;;  %10772 = vmatpush3.msra.mxu1 %v4411_v3  ;;  %v15746_v7 = vpop.f32.mrf.mxu1  ;;  %v4385_v3 = vld [vmem:[#allocation11 + $0x288] sm:$0xff]  ;;  %v4676_v10 = vrot.slane %v15699_v36, 2  ;;  %v4384_v36 = vld [vmem:[#allocation11 + $0x280] sm:$0xff] }
 0x854   :  { %9769 = vmatpush3.msra.mxu0 %v4375_v33  ;;  %10773 = vmatprep.subr.mxu1 %v4410_v4  ;;  %v4906_v24 = vrot.slane %v15746_v7, 1  ;;  %v4892_v33 = vrot.slane %v15677_v23, 1 }
 0x855   :  { %9770 = vmatprep.subr.mxu0 %v4390_v60  ;;  %10774 = vmatpush3.msra.mxu1 %v4410_v4  ;;  %v10753_v22 = vpop.f32.mrf.mxu1  ;;  %v4664_v60 = vrot.slane %v15648_v40, 2 }
 0x856   :  { %5046 = vmatprep.mubr.f32.mxu0 %v15746_v7  ;;  %9771 = vmatpush3.msra.mxu0 %v4374_v19  ;;  %v4907_v57 = vsel %vm1160_vm5, %v4905_v38, %v4906_v24  ;;  %v4678_v19 = vsel %vm1372_vm4, %v4676_v10, %v4677_v50  ;;  %v4368_v38 = vld [vmem:[#allocation11 + $0x200] sm:$0xff]  ;;  %v4663_v22 = vrot.slane %v15644_v16, 2 }
 0x857   :  { %10775 = vmatprep.subr.mxu1 %v4409_v59  ;;  %5047 = vmatmul.mubr.f32.gmra.mxu0 %v15654_v39  ;;  %v15754_v0 = vpop.f32.mrf.mxu1  ;;  %v4889_v39 = vsel %vm1160_vm5, %v4887_v63, %v4888_v15  ;;  %v4402_v63 = vld [vmem:[#allocation11 + $0x310] sm:$0xff] }
 0x858   :  { %9772 = vmatprep.subr.mxu0 %v4389_v13  ;;  %10776 = vmatpush3.msra.mxu1 %v4409_v59  ;;  %v4908_v55 = vrot.slane %v15754_v0, 1  ;;  %v4679_v59 = vrot.slane %v15719_v17, 2  ;;  %v4893_v13 = vsel %vm1160_vm5, %v4890_v49, %v4892_v33 }
 0x859   :  { %9773 = vmatpush3.msra.mxu0 %v4373_v47  ;;  %10777 = vmatprep.subr.mxu1 %v4408_v48  ;;  %v10756_v61 = vpop.f32.mrf.mxu1  ;;  %v4894_v47 = vrot.slane %v15689_v28, 1 }
 0x85a   :  { %5146 = vmatprep.mubr.f32.mxu1 %v4907_v57  ;;  %9774 = vmatprep.subr.mxu0 %v4388_v18  ;;  %v4909_v2 = vsel %vm1160_vm5, %v4906_v24, %v4908_v55  ;;  %v4680_v16 = vsel %vm1372_vm4, %v4677_v50, %v4679_v59  ;;  %v4681_v57 = vrot.slane %v15728_v42, 2  ;;  %v4401_v18 = vld [vmem:[#allocation11 + $0x308] sm:$0xff]  ;;  %v4694_v42 = vrot.slane %v15675_v56, 3 }
 0x85b   :  { %10778 = vmatpush3.msra.mxu1 %v4408_v48  ;;  %5051 = vmatprep.mubr.f32.mxu0 %v15754_v0  ;;  %v15760_v45 = vpop.f32.mrf.mxu1  ;;  %v4665_v48 = vsel %vm1372_vm4, %v4663_v22, %v4664_v60  ;;  %v4895_v28 = vsel %vm1160_vm5, %v4892_v33, %v4894_v47 }
 0x85c   :  { %5147 = vmatmul.mubr.f32.gmra.mxu1 %v4889_v39  ;;  %9775 = vmatpush3.msra.mxu0 %v4372_v51  ;;  %v4910_v1 = vrot.slane %v15760_v45, 1  ;;  %v4668_v51 = vrot.slane %v15675_v56, 2  ;;  %v4683_v39 = vrot.slane %v15735_v31, 2  ;;  %v4932_v31 = vrot.slane %v15746_v7, 2 }
 0x85d   :  { %10779 = vmatprep.subr.mxu1 %v4407_v34  ;;  %5052 = vmatmul.mubr.f32.gmra.mxu0 %v15665_v20  ;;  %v10759_v52 = vpop.f32.mrf.mxu1  ;;  %v4891_v20 = vsel %vm1160_vm5, %v4888_v15, %v4890_v49  ;;  %v4666_v15 = vrot.slane %v15658_v27, 2 }
 0x85e   :  { %9776 = vmatprep.subr.mxu0 %v4387_v6  ;;  %10780 = vmatpush3.msra.mxu1 %v4407_v34  ;;  %v4911_v4 = vsel %vm1160_vm5, %v4908_v55, %v4910_v1  ;;  %v4692_v55 = vrot.slane %v15658_v27, 3  ;;  %v4400_v34 = vld [vmem:[#allocation11 + $0x300] sm:$0xff]  ;;  %v4682_v6 = vsel %vm1372_vm4, %v4679_v59, %v4681_v57  ;;  %v4670_v27 = vrot.slane %v15687_v26, 2 }
 0x85f   :  { %9777 = vmatpush3.msra.mxu0 %v4371_v5  ;;  %10781 = vmatprep.subr.mxu1 %v4406_v62  ;;  %v15766_v14 = vpop.f32.mrf.mxu1  ;;  %v4667_v61 = vsel %vm1372_vm4, %v4664_v60, %v4666_v15  ;;  %v4696_v5 = vrot.slane %v15687_v26, 3  ;;  %v4669_v56 = vsel %vm1372_vm4, %v4666_v15, %v4668_v51  ;;  %v4934_v26 = vrot.slane %v15754_v0, 2 }
 0x860   :  { %5151 = vmatprep.mubr.f32.mxu1 %v4909_v2  ;;  %9778 = vmatprep.subr.mxu0 %v4386_v21  ;;  %v4912_v24 = vrot.slane %v15766_v14, 1  ;;  %v4695_v49 = vsel %vm1579_vm3, %v4692_v55, %v4694_v42  ;;  %v4931_v2 = vrot.slane %v15741_v12, 2  ;;  %v4936_v21 = vrot.slane %v15760_v45, 2 }
 0x861   :  { %10782 = vmatpush3.msra.mxu1 %v4406_v62  ;;  %5056 = vmatprep.mubr.f32.mxu0 %v15760_v45  ;;  %v10762_v25 = vpop.f32.mrf.mxu1  ;;  %v4693_v62 = vsel %vm1579_vm3, %v4690_v30, %v4692_v55  ;;  %v4697_v40 = vsel %vm1579_vm3, %v4694_v42, %v4696_v5  ;;  %v4671_v30 = vsel %vm1372_vm4, %v4668_v51, %v4670_v27  ;;  %v4938_v0 = vrot.slane %v15766_v14, 2 }
 0x862   :  { %5152 = vmatmul.mubr.f32.gmra.mxu1 %v4891_v20  ;;  %9779 = vmatpush3.msra.mxu0 %v4370_v58  ;;  %v4913_v17 = vsel %vm1160_vm5, %v4910_v1, %v4912_v24  ;;  %v4933_v7 = vsel %vm1372_vm4, %v4931_v2, %v4932_v31  ;;  %v4935_v12 = vsel %vm1372_vm4, %v4932_v31, %v4934_v26 }
 0x863   :  { %10783 = vmatprep.subr.mxu1 %v4405_v54  ;;  %5057 = vmatmul.mubr.f32.gmra.mxu0 %v15677_v23  ;;  %v4403_v23 = vld [vmem:[#allocation11 + $0x318] sm:$0xff] }
 0x864   :  { %9780 = vmatprep.subr.mxu0 %v4385_v3  ;;  %10784 = vmatpush3.msra.mxu1 %v4405_v54 }
 0x865   :  { %9781 = vmatpush3.msra.mxu0 %v4369_v8  ;;  %5231 = vmatprep.mubr.f32.mxu0 %v4678_v19 }
 0x866   :  { %10785 = vmatprep.subr.mxu1 %v4404_v43  ;;  %5156 = vmatprep.mubr.f32.mxu1 %v4911_v4 }
 0x867   :  { %9782 = vmatprep.subr.mxu0 %v4384_v36  ;;  %10786 = vmatpush3.msra.mxu1 %v4404_v43 }
 0x868   :  { %5157 = vmatmul.mubr.f32.gmra.mxu1 %v4893_v13  ;;  %9783 = vmatpush3.msra.mxu0 %v4368_v38 }
 0x869   :  { %10787 = vmatprep.subr.mxu1 %v4403_v23  ;;  %5232 = vmatmul.mubr.f32.vlgmr.msra.gmra.mxu0 %v4665_v48 }
 0x86a   :  { %10788 = vmatpush3.msra.mxu1 %v4403_v23  ;;  %5236 = vmatprep.mubr.f32.mxu0 %v4680_v16 }
 0x86b   :  { %10789 = vmatprep.subr.mxu1 %v4402_v63  ;;  %5161 = vmatprep.mubr.f32.mxu1 %v4913_v17 }
 0x86c   :  { %10790 = vmatpush3.msra.mxu1 %v4402_v63  ;;  %10807 = vmatprep.subr.mxu0 %v16810_v37 }
 0x86d   :  { %5162 = vmatmul.mubr.f32.gmra.mxu1 %v4895_v28  ;;  %10791 = vmatprep.subr.mxu1 %v4401_v18 }
 0x86e   :  { %5237 = vmatmul.mubr.f32.gmra.mxu0 %v4667_v61  ;;  %10792 = vmatpush3.msra.mxu1 %v4401_v18 }
 0x86f   :  { %10795 = vmatprep.mubr.f32.mxu1 %v15663_v32  ;;  %5241 = vmatprep.mubr.f32.mxu0 %v4682_v6  ;;  %v4684_v32 = vsel %vm1372_vm4, %v4681_v57, %v4683_v39 }
 0x870   :  { %10793 = vmatprep.subr.mxu1 %v4400_v34 }
 0x871   :  { %10794 = vmatpush3.msra.mxu1 %v4400_v34 }
 0x872   :  { %10796 = vmatmul.mubr.f32.vlgmr.msra.gmra.mxu1 %v4693_v62  ;;  %5242 = vmatmul.mubr.f32.gmra.mxu0 %v4669_v56 }
 0x873   :  { %10798 = vmatprep.mubr.f32.mxu1 %v4695_v49  ;;  %5246 = vmatprep.mubr.f32.mxu0 %v4684_v32 }
 0x874   :  { %10841 = vmatprep.subr.mxu1 %v16810_v37 }
 0x876   :  { %10799 = vmatmul.mubr.f32.gmra.mxu1 %v4697_v40  ;;  %5247 = vmatmul.mubr.f32.gmra.mxu0 %v4671_v30 }
 0x877   :  { %10801 = vmatprep.mubr.f32.mxu1 %v15668_v41  ;;  %5251 = vmatprep.mubr.f32.mxu0 %v4933_v7  ;;  %v4937_v41 = vsel %vm1372_vm4, %v4934_v26, %v4936_v21 }
 0x87a   :  { %10802 = vmatmul.mubr.f32.gmra.mxu1 %v15680_v11  ;;  %5252 = vmatmul.mubr.f32.gmra.mxu0 %v15671_v46  ;;  %v4939_v46 = vsel %vm1372_vm4, %v4936_v21, %v4938_v0 }
 0x87b   :  { %10804 = vmatprep.mubr.f32.mxu1 %v15692_v53  ;;  %5256 = vmatprep.mubr.f32.mxu0 %v4935_v12 }
 0x87e   :  { %10805 = vmatmul.mubr.f32.gmra.mxu1 %v15703_v9  ;;  %5257 = vmatmul.mubr.f32.gmra.mxu0 %v15683_v44 }
 0x87f   :  { %5261 = vmatprep.mubr.f32.mxu0 %v4937_v41  ;;  %10849 = vmatprep.mubr.msk.f32.mxu1 %vm11444_vm6, %v16810_v37 }
 0x882   :  { %5262 = vmatmul.mubr.f32.gmra.mxu0 %v15695_v35 }
 0x883   :  { %5266 = vmatprep.mubr.f32.mxu0 %v4939_v46 }
 0x886   :  { %5267 = vmatmul.mubr.f32.gmra.mxu0 %v15707_v29 }
 0x887   :  { %10815 = vmatprep.mubr.msk.f32.mxu0 %vm11444_vm6, %v16810_v37 }
 0x8fd   :  { %v9672_v11 = vpop.f32.mrf.mxu0 }
 0x8ff   :  { %v9673_v53 = vpop.f32.mrf.mxu0 }
 0x900   :  { %v9674_v5 = vadd.f32 %v9673_v53, %v9672_v11 }
 0x901   :  { %v9675_v9 = vpop.f32.mrf.mxu0 }
 0x903   :  { %v9676_v44 = vpop.f32.mrf.mxu0 }
 0x904   :  { %v9728_v45 = vpop.f32.mrf.mxu1  ;;  %v9677_v39 = vadd.f32 %v9676_v44, %v9675_v9 }
 0x905   :  { %v9678_v52 = vpop.f32.mrf.mxu0 }
 0x906   :  { %v9729_v1 = vpop.f32.mrf.mxu1 }
 0x907   :  { %v9679_v58 = vpop.f32.mrf.mxu0  ;;  %v9730_v61 = vadd.f32 %v9729_v1, %v9728_v45 }
 0x908   :  { %v9731_v14 = vpop.f32.mrf.mxu1  ;;  %v9680_v49 = vadd.f32 %v9679_v58, %v9678_v52 }
 0x909   :  { %v9681_v54 = vpop.f32.mrf.mxu0  ;;  %v5129_v30 = vadd.f32 %v9730_v61, %v9674_v5 }
 0x90a   :  { %v9732_v50 = vpop.f32.mrf.mxu1 }
 0x90b   :  { %v9682_v20 = vpop.f32.mrf.mxu0  ;;  %v9733_v51 = vadd.f32 %v9732_v50, %v9731_v14 }
 0x90c   :  { %v9734_v35 = vpop.f32.mrf.mxu1  ;;  %v9683_v26 = vadd.f32 %v9682_v20, %v9681_v54 }
 0x90d   :  { %v5134_v32 = vadd.f32 %v9733_v51, %v9677_v39 }
 0x90e   :  { %v9735_v3 = vpop.f32.mrf.mxu1 }
 0x90f   :  { %v9736_v6 = vadd.f32 %v9735_v3, %v9734_v35 }
 0x911   :  { %v9737_v29 = vpop.f32.mrf.mxu1  ;;  %v5139_v21 = vadd.f32 %v9736_v6, %v9680_v49 }
 0x912   :  { %v9684_v25 = vpop.f32.mrf.mxu0 }
 0x913   :  { %v9738_v43 = vpop.f32.mrf.mxu1 }
 0x914   :  { %v9685_v10 = vpop.f32.mrf.mxu0  ;;  %v9739_v62 = vadd.f32 %v9738_v43, %v9737_v29 }
 0x915   :  { %v9686_v45 = vadd.f32 %v9685_v10, %v9684_v25 }
 0x916   :  { %v5144_v46 = vadd.f32 %v9739_v62, %v9683_v26 }
 0x917   :  { %v9687_v8 = vpop.f32.mrf.mxu0 }
 0x919   :  { %v9688_v33 = vpop.f32.mrf.mxu0 }
 0x91a   :  { %v9689_v50 = vadd.f32 %v9688_v33, %v9687_v8 }
 0x91c   :  { %v9740_v4 = vpop.f32.mrf.mxu1 }
 0x91d   :  { %v9690_v60 = vpop.f32.mrf.mxu0 }
 0x91e   :  { %v9741_v19 = vpop.f32.mrf.mxu1 }
 0x91f   :  { %v9691_v24 = vpop.f32.mrf.mxu0  ;;  %v9742_v12 = vadd.f32 %v9741_v19, %v9740_v4 }
 0x920   :  { %v9692_v25 = vadd.f32 %v9691_v24, %v9690_v60 }
 0x921   :  { %v5149_v58 = vadd.f32 %v9742_v12, %v9686_v45 }
 0x922   :  { %v9743_v36 = vpop.f32.mrf.mxu1 }
 0x923   :  { %v15828_v59 = vpop.f32.mrf.mxu0 }
 0x924   :  { %v9744_v38 = vpop.f32.mrf.mxu1 }
 0x925   :  { %v15830_v22 = vpop.f32.mrf.mxu0  ;;  %v9745_v1 = vadd.f32 %v9744_v38, %v9743_v36 }
 0x927   :  { %v5154_v4 = vadd.f32 %v9745_v1, %v9689_v50 }
 0x928   :  { %v9746_v23 = vpop.f32.mrf.mxu1 }
 0x929   :  { %v9784_v13 = vpop.f32.mrf.mxu0 }
 0x92a   :  { %v9747_v47 = vpop.f32.mrf.mxu1 }
 0x92b   :  { %v9785_v48 = vpop.f32.mrf.mxu0  ;;  %v9748_v54 = vadd.f32 %v9747_v47, %v9746_v23  ;;  %v9695_v23 = vadd.f32 %v15830_v22, %v15828_v59 }
 0x92c   :  { %v9786_v2 = vadd.f32 %v9785_v48, %v9784_v13 }
 0x92d   :  { %v9749_v63 = vpop.f32.mrf.mxu1 }
 0x92e   :  { %v9787_v17 = vpop.f32.mrf.mxu0  ;;  %v5234_v11 = vadd.f32 %v9786_v2, %v5129_v30 }
 0x92f   :  { %v9750_v15 = vpop.f32.mrf.mxu1 }
 0x930   :  { %v9788_v16 = vpop.f32.mrf.mxu0  ;;  %v9751_v33 = vadd.f32 %v9750_v15, %v9749_v63 }
 0x931   :  { %v9789_v27 = vadd.f32 %v9788_v16, %v9787_v17  ;;  %v5159_v16 = vadd.f32 %v9748_v54, %v9692_v25 }
 0x932   :  { %v10797_v57 = vpop.f32.mrf.mxu1  ;;  %v9790_v18 = vpop.f32.mrf.mxu0  ;;  %v5164_v24 = vadd.f32 %v9751_v33, %v9695_v23 }
 0x933   :  { %v5239_v0 = vadd.f32 %v9789_v27, %v5134_v32 }
 0x934   :  { %v5338_v28 = vpop.f32.mrf.mxu1  ;;  %v9791_v55 = vpop.f32.mrf.mxu0 }
 0x935   :  { %v9792_v40 = vadd.f32 %v9791_v55, %v9790_v18  ;;  %v5344_v35 = vadd.f32 %v10797_v57, %v5239_v0  ;;  %v5339_v3 = vadd.f32 %v5338_v28, %v5234_v11 }
 0x936   :  { %v10800_v34 = vpop.f32.mrf.mxu1  ;;  %v9793_v42 = vpop.f32.mrf.mxu0 }
 0x937   :  { %v5244_v53 = vadd.f32 %v9792_v40, %v5139_v21  ;;  %v5377_v17 = vadd.f32 %v5344_v35, %v5339_v3 }
 0x938   :  { %v5348_v56 = vpop.f32.mrf.mxu1  ;;  %v9794_v31 = vpop.f32.mrf.mxu0 }
 0x939   :  { %v9795_v41 = vadd.f32 %v9794_v31, %v9793_v42  ;;  %v5349_v19 = vadd.f32 %v5348_v56, %v5244_v53 }
 0x93a   :  { %v9796_v7 = vpop.f32.mrf.mxu0  ;;  %v10803_v9 = vpop.f32.mrf.mxu1 }
 0x93b   :  { %v5249_v29 = vadd.f32 %v9795_v41, %v5144_v46  ;;  %v5378_v55 = vadd.f32 %v5377_v17, %v5349_v19 }
 0x93c   :  { %v9797_v44 = vpop.f32.mrf.mxu0  ;;  %v5358_v20 = vpop.f32.mrf.mxu1 }
 0x93d   :  { %v9798_v14 = vadd.f32 %v9797_v44, %v9796_v7  ;;  %v5354_v36 = vadd.f32 %v10800_v34, %v5249_v29 }
 0x93e   :  { %v9799_v52 = vpop.f32.mrf.mxu0  ;;  %v10806_v18 = vpop.f32.mrf.mxu1 }
 0x93f   :  { %v5254_v13 = vadd.f32 %v9798_v14, %v5149_v58  ;;  %v5379_v47 = vadd.f32 %v5378_v55, %v5354_v36 }
 0x940   :  { %v9800_v43 = vpop.f32.mrf.mxu0  ;;  %v5368_v39 = vpop.f32.mrf.mxu1 }
 0x941   :  { %v9801_v48 = vadd.f32 %v9800_v43, %v9799_v52  ;;  %v5359_v57 = vadd.f32 %v5358_v20, %v5254_v13 }
 0x942   :  { %v9802_v10 = vpop.f32.mrf.mxu0 }
 0x943   :  { %v5259_v38 = vadd.f32 %v9801_v48, %v5154_v4  ;;  %v5380_v6 = vadd.f32 %v5379_v47, %v5359_v57 }
 0x944   :  { %v9803_v8 = vpop.f32.mrf.mxu0 }
 0x945   :  { %v9804_v28 = vadd.f32 %v9803_v8, %v9802_v10  ;;  %v5364_v61 = vadd.f32 %v10803_v9, %v5259_v38 }
 0x946   :  { %v9805_v51 = vpop.f32.mrf.mxu0 }
 0x947   :  { %v5264_v42 = vadd.f32 %v9804_v28, %v5159_v16  ;;  %v5381_v5 = vadd.f32 %v5380_v6, %v5364_v61 }
 0x948   :  { %v9806_v60 = vpop.f32.mrf.mxu0 }
 0x949   :  { %v5369_v34 = vadd.f32 %v5368_v39, %v5264_v42  ;;  %v9807_v27 = vadd.f32 %v9806_v60, %v9805_v51 }
 0x94b   :  { %v5269_v62 = vadd.f32 %v9807_v27, %v5164_v24  ;;  %v5382_v56 = vadd.f32 %v5381_v5, %v5369_v34 }
 0x94d   :  { %v5374_v63 = vadd.f32 %v10806_v18, %v5269_v62 }
 0x94f   :  { %v5383_v15 = vadd.f32 %v5382_v56, %v5374_v63 }
 0x951   :  { %v5384_v31 = vrot.slane %v5383_v15, 4 }
 0x953   :  { %v5385_v49 = vadd.f32 %v5384_v31, %v5383_v15 }
 0x955   :  { %v5386_v32 = vrot.slane %v5385_v49, 2 }
 0x957   :  { %v5387_v2 = vadd.f32 %v5386_v32, %v5385_v49  ;;  %v5456_v49 = vld [vmem:[#allocation13 + $0x8] sm:$0xff]  ;;  %v5457_v32 = vld [vmem:[#allocation13 + $0x10] sm:$0xff] }
 0x959   :  { %v5388_v40 = vrot.slane %v5387_v2, 1 }
 0x95b   :  { %v5389_v59 = vadd.f32 %v5388_v40, %v5387_v2  ;;  %v5492_v2 = vld [vmem:[#allocation16 + $0xf8] sm:$0xff] }
 0x95c   :  { %v5476_v40 = vld [vmem:[#allocation16 + $0x78] sm:$0xff] }
 0x95d   :  { %v5390_v22 = vmul.f32 0.015625, %v5389_v59  ;;  %v5458_v59 = vld [vmem:[#allocation14] sm:$0xff] }
 0x95f   :  { %v5391_v30 = vsub.f32 %v5339_v3, %v5390_v22  ;;  %v5392_v26 = vsub.f32 %v5344_v35, %v5390_v22  ;;  %v5393_v7 = vsub.f32 %v5349_v19, %v5390_v22  ;;  %v5394_v21 = vsub.f32 %v5354_v36, %v5390_v22 }
 0x960   :  { %v5395_v41 = vsub.f32 %v5359_v57, %v5390_v22  ;;  %v5396_v9 = vsub.f32 %v5364_v61, %v5390_v22  ;;  %v5397_v11 = vsub.f32 %v5369_v34, %v5390_v22  ;;  %v5398_v50 = vsub.f32 %v5374_v63, %v5390_v22  ;;  %v5455_v63 = vld [vmem:[#allocation13] sm:$0xff] }
 0x961   :  { %v5399_v12 = vmul.f32 %v5391_v30, %v5391_v30  ;;  %v5400_v0 = vmul.f32 %v5392_v26, %v5392_v26  ;;  %v5401_v46 = vmul.f32 %v5393_v7, %v5393_v7  ;;  %v5402_v44 = vmul.f32 %v5394_v21, %v5394_v21  ;;  %v5491_v22 = vld [vmem:[#allocation16 + $0xf0] sm:$0xff] }
 0x962   :  { %v5403_v53 = vmul.f32 %v5395_v41, %v5395_v41  ;;  %v5404_v52 = vmul.f32 %v5396_v9, %v5396_v9  ;;  %v5405_v29 = vmul.f32 %v5397_v11, %v5397_v11  ;;  %v5406_v3 = vmul.f32 %v5398_v50, %v5398_v50 }
 0x963   :  { %v5407_v45 = vadd.f32 %v5400_v0, %v5399_v12  ;;  %v5489_v12 = vld [vmem:[#allocation16 + $0xe0] sm:$0xff]  ;;  %v5460_v0 = vld [vmem:[#allocation14 + $0x10] sm:$0xff] }
 0x965   :  { %v5408_v1 = vadd.f32 %v5407_v45, %v5401_v46  ;;  %v5524_v46 = vld [vmem:[#allocation16 + $0x1f8] sm:$0xff] }
 0x966   :  { %v5488_v45 = vld [vmem:[#allocation16 + $0xd8] sm:$0xff] }
 0x967   :  { %v5409_v14 = vadd.f32 %v5408_v1, %v5402_v44  ;;  %v5487_v44 = vld [vmem:[#allocation16 + $0xd0] sm:$0xff]  ;;  %v5508_v1 = vld [vmem:[#allocation16 + $0x178] sm:$0xff] }
 0x969   :  { %v5410_v58 = vadd.f32 %v5409_v14, %v5403_v53  ;;  %v5471_v53 = vld [vmem:[#allocation16 + $0x50] sm:$0xff] }
 0x96a   :  { %v5507_v14 = vld [vmem:[#allocation16 + $0x170] sm:$0xff] }
 0x96b   :  { %v5411_v54 = vadd.f32 %v5410_v58, %v5404_v52  ;;  %v5522_v52 = vld [vmem:[#allocation16 + $0x1e8] sm:$0xff] }
 0x96c   :  { %v5506_v58 = vld [vmem:[#allocation16 + $0x168] sm:$0xff] }
 0x96d   :  { %v5412_v35 = vadd.f32 %v5411_v54, %v5405_v29  ;;  %v5470_v29 = vld [vmem:[#allocation16 + $0x48] sm:$0xff]  ;;  %v5521_v54 = vld [vmem:[#allocation16 + $0x1e0] sm:$0xff] }
 0x96f   :  { %v5413_v20 = vadd.f32 %v5412_v35, %v5406_v3  ;;  %v5485_v3 = vld [vmem:[#allocation16 + $0xc0] sm:$0xff] }
 0x970   :  { %v5505_v35 = vld [vmem:[#allocation16 + $0x160] sm:$0xff] }
 0x971   :  { %v5414_v43 = vrot.slane %v5413_v20, 4 }
 0x973   :  { %v5415_v4 = vadd.f32 %v5414_v43, %v5413_v20  ;;  %v5469_v20 = vld [vmem:[#allocation16 + $0x40] sm:$0xff]  ;;  %v5520_v43 = vld [vmem:[#allocation16 + $0x1d8] sm:$0xff] }
 0x975   :  { %v5416_v19 = vrot.slane %v5415_v4, 2 }
 0x977   :  { %v5417_v13 = vadd.f32 %v5416_v19, %v5415_v4  ;;  %v5484_v4 = vld [vmem:[#allocation16 + $0xb8] sm:$0xff] }
 0x978   :  { %v5504_v19 = vld [vmem:[#allocation16 + $0x158] sm:$0xff] }
 0x979   :  { %v5418_v48 = vrot.slane %v5417_v13, 1 }
 0x97b   :  { %v5419_v25 = vadd.f32 %v5418_v48, %v5417_v13  ;;  %v5468_v13 = vld [vmem:[#allocation16 + $0x38] sm:$0xff]  ;;  %v5519_v48 = vld [vmem:[#allocation16 + $0x1d0] sm:$0xff] }
 0x97d   :  { %v5420_v10 = vmul.f32 0.015625, %v5419_v25  ;;  %v5483_v25 = vld [vmem:[#allocation16 + $0xb0] sm:$0xff] }
 0x97f   :  { %v5421_v17 = vadd.f32 1e-05, %v5420_v10  ;;  %v5503_v10 = vld [vmem:[#allocation16 + $0x150] sm:$0xff] }
 0x981   :  { %11117 = vrsqrt.f32 %v5421_v17  ;;  %v5467_v17 = vld [vmem:[#allocation16 + $0x30] sm:$0xff] }
 0x98e   :  { %v11118_v36 = vpop.eup %11117 }
 0x98f   :  { %v5426_v38 = vmul.f32 %v11118_v36, %v5394_v21  ;;  %v5430_v16 = vmul.f32 %v11118_v36, %v5398_v50  ;;  %v5425_v18 = vmul.f32 %v11118_v36, %v5393_v7  ;;  %v5429_v8 = vmul.f32 %v11118_v36, %v5397_v11  ;;  %v5459_v7 = vld [vmem:[#allocation14 + $0x8] sm:$0xff]  ;;  %v5474_v21 = vld [vmem:[#allocation16 + $0x68] sm:$0xff] }
 0x990   :  { %v5424_v33 = vmul.f32 %v11118_v36, %v5392_v26  ;;  %v5428_v55 = vmul.f32 %v11118_v36, %v5396_v9  ;;  %v5423_v57 = vmul.f32 %v11118_v36, %v5391_v30  ;;  %v5427_v28 = vmul.f32 %v11118_v36, %v5395_v41  ;;  %v5475_v30 = vld [vmem:[#allocation16 + $0x70] sm:$0xff]  ;;  %v5490_v26 = vld [vmem:[#allocation16 + $0xe8] sm:$0xff]  ;;  %v5473_v41 = vld [vmem:[#allocation16 + $0x60] sm:$0xff] }
 0x991   :  { %vm5434_vm0 = vcmp.gt.f32.partialorder %v5426_v38, 0.0  ;;  %v5442_v51 = vmul.f32 0.1, %v5426_v38  ;;  %vm5438_vm7 = vcmp.gt.f32.partialorder %v5430_v16, 0.0  ;;  %v5446_v23 = vmul.f32 0.1, %v5430_v16 }
 0x992   :  { %vm5433_vm8 = vcmp.gt.f32.partialorder %v5425_v18, 0.0  ;;  %v5441_v47 = vmul.f32 0.1, %v5425_v18  ;;  %vm5437_vm9 = vcmp.gt.f32.partialorder %v5429_v8, 0.0  ;;  %v5445_v61 = vmul.f32 0.1, %v5429_v8 }
 0x993   :  { %v5450_v42 = vsel %vm5434_vm0, %v5426_v38, %v5442_v51  ;;  %v5454_v39 = vsel %vm5438_vm7, %v5430_v16, %v5446_v23  ;;  %v5440_v60 = vmul.f32 0.1, %v5424_v33  ;;  %vm5432_vm10 = vcmp.gt.f32.partialorder %v5424_v33, 0.0  ;;  %v5472_v9 = vld [vmem:[#allocation16 + $0x58] sm:$0xff]  ;;  %v5523_v11 = vld [vmem:[#allocation16 + $0x1f0] sm:$0xff]  ;;  %v5486_v50 = vld [vmem:[#allocation16 + $0xc8] sm:$0xff] }
 0x994   :  { %10808 = vmatpush3.msra.mxu0 %v5450_v42  ;;  %10842 = vmatpush3.msra.mxu1 %v5454_v39  ;;  %vm5436_vm11 = vcmp.gt.f32.partialorder %v5428_v55, 0.0  ;;  %v5444_v24 = vmul.f32 0.1, %v5428_v55  ;;  %v5449_v6 = vsel %vm5433_vm8, %v5425_v18, %v5441_v47  ;;  %v5453_v34 = vsel %vm5437_vm9, %v5429_v8, %v5445_v61  ;;  %v5518_v36 = vld [vmem:[#allocation16 + $0x1c8] sm:$0xff]  ;;  %v5517_v8 = vld [vmem:[#allocation16 + $0x1c0] sm:$0xff]  ;;  %v5480_v51 = vld [vmem:[#allocation16 + $0x98] sm:$0xff] }
 0x995   :  { %10809 = vmatprep.subr.mxu0 %v16810_v37  ;;  %10843 = vmatprep.subr.mxu1 %v16810_v37  ;;  %v5439_v27 = vmul.f32 0.1, %v5423_v57  ;;  %vm5431_vm12 = vcmp.gt.f32.partialorder %v5423_v57, 0.0  ;;  %vm5435_vm13 = vcmp.gt.f32.partialorder %v5427_v28, 0.0  ;;  %v5443_v5 = vmul.f32 0.1, %v5427_v28 }
 0x996   :  { %10810 = vmatpush3.msra.mxu0 %v5449_v6  ;;  %10844 = vmatpush3.msra.mxu1 %v5453_v34  ;;  %v5448_v62 = vsel %vm5432_vm10, %v5424_v33, %v5440_v60  ;;  %v5452_v56 = vsel %vm5436_vm11, %v5428_v55, %v5444_v24  ;;  %v5482_v38 = vld [vmem:[#allocation16 + $0xa8] sm:$0xff]  ;;  %v5481_v33 = vld [vmem:[#allocation16 + $0xa0] sm:$0xff]  ;;  %v5500_v23 = vld [vmem:[#allocation16 + $0x138] sm:$0xff] }
 0x997   :  { %10811 = vmatprep.subr.mxu0 %v16810_v37  ;;  %10845 = vmatprep.subr.mxu1 %v16810_v37  ;;  %v5447_v15 = vsel %vm5431_vm12, %v5423_v57, %v5439_v27  ;;  %v5451_v31 = vsel %vm5435_vm13, %v5427_v28, %v5443_v5  ;;  %v5502_v16 = vld [vmem:[#allocation16 + $0x148] sm:$0xff]  ;;  %v5501_v55 = vld [vmem:[#allocation16 + $0x140] sm:$0xff]  ;;  %v5516_v28 = vld [vmem:[#allocation16 + $0x1b8] sm:$0xff]  ;;  %vm8214_vm12 = vcmask 31744   ;;  %vm8893_vm13 = vcmask 1043458  }
 0x998   :  { %10812 = vmatpush3.msra.mxu0 %v5448_v62  ;;  %10846 = vmatpush3.msra.mxu1 %v5452_v56  ;;  %v5466_v18 = vld [vmem:[#allocation16 + $0x28] sm:$0xff]  ;;  %v5465_v57 = vld [vmem:[#allocation16 + $0x20] sm:$0xff]  ;;  %v5464_v47 = vld [vmem:[#allocation16 + $0x18] sm:$0xff] }
 0x999   :  { %10813 = vmatprep.subr.mxu0 %v16810_v37  ;;  %10847 = vmatprep.subr.mxu1 %v16810_v37  ;;  %v5515_v61 = vld [vmem:[#allocation16 + $0x1b0] sm:$0xff]  ;;  %v5514_v24 = vld [vmem:[#allocation16 + $0x1a8] sm:$0xff]  ;;  %v5513_v5 = vld [vmem:[#allocation16 + $0x1a0] sm:$0xff] }
 0x99a   :  { %10814 = vmatpush3.msra.mxu0 %v5447_v15  ;;  %10848 = vmatpush3.msra.mxu1 %v5451_v31  ;;  %v5463_v60 = vld [vmem:[#allocation16 + $0x10] sm:$0xff]  ;;  %v5462_v27 = vld [vmem:[#allocation16 + $0x8] sm:$0xff] }
 0x99b   :  { %10816 = vmatmul.mubr.msk.f32.vlgmr.msra.gmra.mxu0 %vm5573_vm14, %v5455_v63  ;;  %10824 = vmatprep.subr.mxu0 %v16810_v37 }
 0x99c   :  { %10825 = vmatpush3.msra.mxu0 %v5450_v42  ;;  %10818 = vmatprep.mubr.msk.f32.mxu0 %vm11444_vm6, %v16810_v37  ;;  %v5479_v42 = vld [vmem:[#allocation16 + $0x90] sm:$0xff] }
 0x99d   :  { %10826 = vmatprep.subr.mxu0 %v16810_v37  ;;  %10850 = vmatmul.mubr.msk.f32.vlgmr.msra.gmra.mxu1 %vm5573_vm14, %v5455_v63  ;;  %v5461_v63 = vld [vmem:[#allocation16] sm:$0xff] }
 0x99e   :  { %10827 = vmatpush3.msra.mxu0 %v5449_v6  ;;  %10852 = vmatprep.mubr.msk.f32.mxu1 %vm11444_vm6, %v16810_v37  ;;  %v5478_v6 = vld [vmem:[#allocation16 + $0x88] sm:$0xff] }
 0x99f   :  { %10819 = vmatmul.mubr.msk.f32.gmra.mxu0 %vm5573_vm14, %v5456_v49  ;;  %10828 = vmatprep.subr.mxu0 %v16810_v37 }
 0x9a0   :  { %10829 = vmatpush3.msra.mxu0 %v5448_v62  ;;  %10821 = vmatprep.mubr.msk.f32.mxu0 %vm11444_vm6, %v16810_v37  ;;  %v5477_v62 = vld [vmem:[#allocation16 + $0x80] sm:$0xff] }
 0x9a1   :  { %10830 = vmatprep.subr.mxu0 %v16810_v37  ;;  %10853 = vmatmul.mubr.msk.f32.gmra.mxu1 %vm5573_vm14, %v5456_v49  ;;  %v5556_v49 = vld [vmem:[#allocation16 + $0x2f8] sm:$0xff] }
 0x9a2   :  { %10831 = vmatpush3.msra.mxu0 %v5447_v15  ;;  %10855 = vmatprep.mubr.msk.f32.mxu1 %vm11444_vm6, %v16810_v37  ;;  %v5512_v15 = vld [vmem:[#allocation16 + $0x198] sm:$0xff] }
 0x9a3   :  { %10822 = vmatmul.mubr.msk.f32.gmra.mxu0 %vm5573_vm14, %v5457_v32  ;;  %10858 = vmatprep.subr.mxu0 %v16810_v37 }
 0x9a4   :  { %10832 = vmatprep.mubr.msk.f32.mxu0 %vm11444_vm6, %v16810_v37  ;;  %9860 = vmatprep.subr.mxu1 %v5492_v2  ;;  %v5495_v2 = vld [vmem:[#allocation16 + $0x110] sm:$0xff] }
 0x9a5   :  { %10856 = vmatmul.mubr.msk.f32.gmra.mxu1 %vm5573_vm14, %v5457_v32  ;;  %v5511_v32 = vld [vmem:[#allocation16 + $0x190] sm:$0xff] }
 0x9a6   :  { %9861 = vmatpush3.msra.mxu1 %v5476_v40  ;;  %v5510_v40 = vld [vmem:[#allocation16 + $0x188] sm:$0xff] }
 0x9a7   :  { %10833 = vmatmul.mubr.msk.f32.vlgmr.msra.gmra.mxu0 %vm5573_vm14, %v5458_v59  ;;  %9862 = vmatprep.subr.mxu1 %v5491_v22  ;;  %v5509_v22 = vld [vmem:[#allocation16 + $0x180] sm:$0xff] }
 0x9a8   :  { %10859 = vmatpush3.msra.mxu0 %v5454_v39  ;;  %10835 = vmatprep.mubr.msk.f32.mxu0 %vm11444_vm6, %v16810_v37  ;;  %v5499_v39 = vld [vmem:[#allocation16 + $0x130] sm:$0xff] }
 0x9a9   :  { %10860 = vmatprep.subr.mxu0 %v16810_v37  ;;  %9863 = vmatpush3.msra.mxu1 %v5475_v30  ;;  %v5493_v30 = vld [vmem:[#allocation16 + $0x100] sm:$0xff] }
 0x9aa   :  { %10861 = vmatpush3.msra.mxu0 %v5453_v34  ;;  %9864 = vmatprep.subr.mxu1 %v5490_v26  ;;  %v5498_v34 = vld [vmem:[#allocation16 + $0x128] sm:$0xff]  ;;  %v5572_v26 = vld [vmem:[#allocation16 + $0x378] sm:$0xff] }
 0x9ab   :  { %10862 = vmatprep.subr.mxu0 %v16810_v37  ;;  %10836 = vmatmul.mubr.msk.f32.gmra.mxu0 %vm5573_vm14, %v5459_v7 }
 0x9ac   :  { %10863 = vmatpush3.msra.mxu0 %v5452_v56  ;;  %10838 = vmatprep.mubr.msk.f32.mxu0 %vm11444_vm6, %v16810_v37  ;;  %v5497_v56 = vld [vmem:[#allocation16 + $0x120] sm:$0xff] }
 0x9ad   :  { %10864 = vmatprep.subr.mxu0 %v16810_v37  ;;  %9865 = vmatpush3.msra.mxu1 %v5474_v21 }
 0x9ae   :  { %10865 = vmatpush3.msra.mxu0 %v5451_v31  ;;  %9866 = vmatprep.subr.mxu1 %v5489_v12  ;;  %v5496_v31 = vld [vmem:[#allocation16 + $0x118] sm:$0xff] }
 0x9af   :  { %10839 = vmatmul.mubr.msk.f32.gmra.mxu0 %vm5573_vm14, %v5460_v0  ;;  %9867 = vmatpush3.msra.mxu1 %v5473_v41 }
 0x9b0   :  { %10866 = vmatprep.mubr.msk.f32.mxu0 %vm11444_vm6, %v16810_v37  ;;  %9904 = vmatprep.subr.mxu0 %v5524_v46 }
 0x9b1   :  { %9868 = vmatprep.subr.mxu1 %v5488_v45 }
 0x9b2   :  { %9869 = vmatpush3.msra.mxu1 %v5472_v9 }
 0x9b3   :  { %10867 = vmatmul.mubr.msk.f32.vlgmr.msra.gmra.mxu0 %vm5573_vm14, %v5458_v59  ;;  %9870 = vmatprep.subr.mxu1 %v5487_v44  ;;  %v5494_v59 = vld [vmem:[#allocation16 + $0x108] sm:$0xff] }
 0x9b4   :  { %10869 = vmatprep.mubr.msk.f32.mxu0 %vm11444_vm6, %v16810_v37  ;;  %9905 = vmatpush3.msra.mxu0 %v5508_v1 }
 0x9b5   :  { %9906 = vmatprep.subr.mxu0 %v5523_v11  ;;  %9871 = vmatpush3.msra.mxu1 %v5471_v53 }
 0x9b6   :  { %9907 = vmatpush3.msra.mxu0 %v5507_v14  ;;  %9872 = vmatprep.subr.mxu1 %v5486_v50  ;;  %v5540_v14 = vld [vmem:[#allocation16 + $0x278] sm:$0xff] }
 0x9b7   :  { %10870 = vmatmul.mubr.msk.f32.gmra.mxu0 %vm5573_vm14, %v5459_v7  ;;  %9908 = vmatprep.subr.mxu0 %v5522_v52  ;;  %v5555_v52 = vld [vmem:[#allocation16 + $0x2f0] sm:$0xff] }
 0x9b8   :  { %10872 = vmatprep.mubr.msk.f32.mxu0 %vm11444_vm6, %v16810_v37  ;;  %9909 = vmatpush3.msra.mxu0 %v5506_v58 }
 0x9b9   :  { %9873 = vmatpush3.msra.mxu1 %v5470_v29  ;;  %9910 = vmatprep.subr.mxu0 %v5521_v54  ;;  %v5539_v29 = vld [vmem:[#allocation16 + $0x270] sm:$0xff]  ;;  %v5554_v54 = vld [vmem:[#allocation16 + $0x2e8] sm:$0xff] }
 0x9ba   :  { %9874 = vmatprep.subr.mxu1 %v5485_v3  ;;  %9911 = vmatpush3.msra.mxu0 %v5505_v35 }
 0x9bb   :  { %10873 = vmatmul.mubr.msk.f32.gmra.mxu0 %vm5573_vm14, %v5460_v0  ;;  %9875 = vmatpush3.msra.mxu1 %v5469_v20  ;;  %v5538_v20 = vld [vmem:[#allocation16 + $0x268] sm:$0xff] }
 0x9bc   :  { %9912 = vmatprep.subr.mxu0 %v5520_v43  ;;  %9876 = vmatprep.subr.mxu1 %v5484_v4 }
 0x9bd   :  { %9913 = vmatpush3.msra.mxu0 %v5504_v19  ;;  %9877 = vmatpush3.msra.mxu1 %v5468_v13  ;;  %v5553_v19 = vld [vmem:[#allocation16 + $0x2e0] sm:$0xff] }
 0x9be   :  { %9914 = vmatprep.subr.mxu0 %v5519_v48  ;;  %9878 = vmatprep.subr.mxu1 %v5483_v25  ;;  %v5537_v25 = vld [vmem:[#allocation16 + $0x260] sm:$0xff] }
 0x9bf   :  { %9915 = vmatpush3.msra.mxu0 %v5503_v10  ;;  %9879 = vmatpush3.msra.mxu1 %v5467_v17  ;;  %v5552_v17 = vld [vmem:[#allocation16 + $0x2d8] sm:$0xff] }
 0x9c0   :  { %9916 = vmatprep.subr.mxu0 %v5518_v36  ;;  %9880 = vmatprep.subr.mxu1 %v5482_v38 }
 0x9c1   :  { %9917 = vmatpush3.msra.mxu0 %v5502_v16  ;;  %9881 = vmatpush3.msra.mxu1 %v5466_v18  ;;  %v5536_v16 = vld [vmem:[#allocation16 + $0x258] sm:$0xff]  ;;  %v5571_v18 = vld [vmem:[#allocation16 + $0x370] sm:$0xff] }
 0x9c2   :  { %9918 = vmatprep.subr.mxu0 %v5517_v8  ;;  %9882 = vmatprep.subr.mxu1 %v5481_v33  ;;  %v5551_v8 = vld [vmem:[#allocation16 + $0x2d0] sm:$0xff] }
 0x9c3   :  { %9919 = vmatpush3.msra.mxu0 %v5501_v55  ;;  %9883 = vmatpush3.msra.mxu1 %v5465_v57  ;;  %v5535_v55 = vld [vmem:[#allocation16 + $0x250] sm:$0xff]  ;;  %v5570_v57 = vld [vmem:[#allocation16 + $0x368] sm:$0xff] }
 0x9c4   :  { %9920 = vmatprep.subr.mxu0 %v5516_v28  ;;  %9884 = vmatprep.subr.mxu1 %v5480_v51  ;;  %v5550_v28 = vld [vmem:[#allocation16 + $0x2c8] sm:$0xff] }
 0x9c5   :  { %9921 = vmatpush3.msra.mxu0 %v5500_v23  ;;  %9885 = vmatpush3.msra.mxu1 %v5464_v47  ;;  %v5534_v23 = vld [vmem:[#allocation16 + $0x248] sm:$0xff]  ;;  %v5569_v47 = vld [vmem:[#allocation16 + $0x360] sm:$0xff] }
 0x9c6   :  { %9922 = vmatprep.subr.mxu0 %v5515_v61  ;;  %9886 = vmatprep.subr.mxu1 %v5479_v42 }
 0x9c7   :  { %9923 = vmatpush3.msra.mxu0 %v5499_v39  ;;  %9887 = vmatpush3.msra.mxu1 %v5463_v60  ;;  %v5549_v39 = vld [vmem:[#allocation16 + $0x2c0] sm:$0xff] }
 0x9c8   :  { %9924 = vmatprep.subr.mxu0 %v5514_v24  ;;  %9888 = vmatprep.subr.mxu1 %v5478_v6  ;;  %v5533_v24 = vld [vmem:[#allocation16 + $0x240] sm:$0xff] }
 0x9c9   :  { %9925 = vmatpush3.msra.mxu0 %v5498_v34  ;;  %9889 = vmatpush3.msra.mxu1 %v5462_v27  ;;  %v5568_v34 = vld [vmem:[#allocation16 + $0x358] sm:$0xff] }
 0x9ca   :  { %9926 = vmatprep.subr.mxu0 %v5513_v5  ;;  %9890 = vmatprep.subr.mxu1 %v5477_v62  ;;  %v5548_v62 = vld [vmem:[#allocation16 + $0x2b8] sm:$0xff] }
 0x9cb   :  { %9927 = vmatpush3.msra.mxu0 %v5497_v56  ;;  %9891 = vmatpush3.msra.mxu1 %v5461_v63 }
 0x9cc   :  { %9928 = vmatprep.subr.mxu0 %v5512_v15  ;;  %9948 = vmatprep.subr.mxu1 %v5556_v49  ;;  %v5532_v15 = vld [vmem:[#allocation16 + $0x238] sm:$0xff]  ;;  %v5547_v49 = vld [vmem:[#allocation16 + $0x2b0] sm:$0xff] }
 0x9cd   :  { %9929 = vmatpush3.msra.mxu0 %v5496_v31  ;;  %v5567_v31 = vld [vmem:[#allocation16 + $0x350] sm:$0xff] }
 0x9ce   :  { %9930 = vmatprep.subr.mxu0 %v5511_v32 }
 0x9cf   :  { %9931 = vmatpush3.msra.mxu0 %v5495_v2 }
 0x9d0   :  { %9932 = vmatprep.subr.mxu0 %v5510_v40  ;;  %v5531_v40 = vld [vmem:[#allocation16 + $0x230] sm:$0xff] }
 0x9d1   :  { %9933 = vmatpush3.msra.mxu0 %v5494_v59 }
 0x9d2   :  { %9934 = vmatprep.subr.mxu0 %v5509_v22  ;;  %v5566_v22 = vld [vmem:[#allocation16 + $0x348] sm:$0xff] }
 0x9d3   :  { %9935 = vmatpush3.msra.mxu0 %v5493_v30 }
 0x9d4   :  { %10875 = vmatprep.subr.mxu0 %v5572_v26 }
 0xa5b   :  { %v15880_v7 = vpop.f32.mrf.mxu0 }
 0xa5c   :  { %v5754_v13 = vrot.slane %v15880_v7, 1 }
 0xa5d   :  { %v10817_v21 = vpop.f32.mrf.mxu0  ;;  %v15882_v12 = vpop.f32.mrf.mxu1 }
 0xa5e   :  { %v5951_v61 = vrot.slane %v15882_v12, 1  ;;  %v5546_v21 = vld [vmem:[#allocation16 + $0x2a8] sm:$0xff] }
 0xa5f   :  { %v15884_v0 = vpop.f32.mrf.mxu0  ;;  %v10851_v41 = vpop.f32.mrf.mxu1 }
 0xa60   :  { %v5755_v3 = vrot.slane %v15884_v0, 1  ;;  %v6012_v63 = vsel %vm1160_vm5, %v15884_v0, %v5951_v61  ;;  %v5530_v41 = vld [vmem:[#allocation16 + $0x228] sm:$0xff] }
 0xa61   :  { %v10820_v46 = vpop.f32.mrf.mxu0  ;;  %v15886_v45 = vpop.f32.mrf.mxu1 }
 0xa62   :  { %v5756_v38 = vsel %vm1160_vm5, %v5754_v13, %v5755_v3  ;;  %v15917_v27 = vrot.slane %v15886_v45, 1  ;;  %v5565_v46 = vld [vmem:[#allocation16 + $0x340] sm:$0xff]  ;;  %v5563_v13 = vld [vmem:[#allocation16 + $0x330] sm:$0xff] }
 0xa63   :  { %v15888_v9 = vpop.f32.mrf.mxu0  ;;  %v10854_v44 = vpop.f32.mrf.mxu1 }
 0xa64   :  { %v5953_v30 = vsel %vm1160_vm5, %v5951_v61, %v15917_v27  ;;  %v5767_v61 = vrot.slane %v15880_v7, 2 }
 0xa65   :  { %v10823_v1 = vpop.f32.mrf.mxu0  ;;  %v15890_v11 = vpop.f32.mrf.mxu1 }
 0xa66   :  { %v5976_v1 = vrot.slane %v5953_v30, 1 }
 0xa67   :  { %v15892_v53 = vpop.f32.mrf.mxu0  ;;  %v10857_v50 = vpop.f32.mrf.mxu1 }
 0xa68   :  { %6083 = vmatprep.mubr.f32.mxu1 %v15892_v53  ;;  %v5761_v43 = vrot.slane %v15892_v53, 1  ;;  %v5545_v50 = vld [vmem:[#allocation16 + $0x2a0] sm:$0xff] }
 0xa69   :  { %v10834_v58 = vpop.f32.mrf.mxu0  ;;  %6084 = vmatmul.mubr.f32.vlgmr.msra.gmra.mxu1 %v15880_v7 }
 0xa6a   :  { %9949 = vmatpush3.msra.mxu1 %v5540_v14 }
 0xa6b   :  { %9950 = vmatprep.subr.mxu1 %v5555_v52  ;;  %v15897_v35 = vpop.f32.mrf.mxu0  ;;  %v5529_v52 = vld [vmem:[#allocation16 + $0x220] sm:$0xff] }
 0xa6c   :  { %v5762_v4 = vrot.slane %v15897_v35, 1  ;;  %9951 = vmatpush3.msra.mxu1 %v5539_v29  ;;  %v5776_v58 = vrot.slane %v15897_v35, 2  ;;  %v5564_v29 = vld [vmem:[#allocation16 + $0x338] sm:$0xff] }
 0xa6d   :  { %9952 = vmatprep.subr.mxu1 %v5554_v54  ;;  %v10837_v48 = vpop.f32.mrf.mxu0  ;;  %v6014_v54 = vsel %vm1160_vm5, %v5755_v3, %v5976_v1 }
 0xa6e   :  { %9953 = vmatpush3.msra.mxu1 %v5538_v20  ;;  %v5763_v10 = vsel %vm1160_vm5, %v5761_v43, %v5762_v4  ;;  %v5544_v20 = vld [vmem:[#allocation16 + $0x298] sm:$0xff]  ;;  %v5981_v48 = vrot.slane %v15917_v27, 1 }
 0xa6f   :  { %9954 = vmatprep.subr.mxu1 %v5553_v19  ;;  %v15905_v36 = vpop.f32.mrf.mxu0  ;;  %6168 = vmatprep.mubr.f32.mxu0 %v5763_v10  ;;  %v5528_v19 = vld [vmem:[#allocation16 + $0x218] sm:$0xff] }
 0xa70   :  { %9955 = vmatpush3.msra.mxu1 %v5537_v25  ;;  %6169 = vmatmul.mubr.f32.vlgmr.msra.gmra.mxu0 %v5756_v38  ;;  %v5527_v38 = vld [vmem:[#allocation16 + $0x210] sm:$0xff] }
 0xa71   :  { %9956 = vmatprep.subr.mxu1 %v5552_v17  ;;  %10876 = vmatpush3.msra.mxu0 %v5572_v26  ;;  %v10840_v33 = vpop.f32.mrf.mxu0 }
 0xa72   :  { %9957 = vmatpush3.msra.mxu1 %v5536_v16  ;;  %10877 = vmatprep.subr.mxu0 %v5571_v18  ;;  %v5960_v16 = vrot.slane %v15882_v12, 2  ;;  %v5542_v33 = vld [vmem:[#allocation16 + $0x288] sm:$0xff] }
 0xa73   :  { %9958 = vmatprep.subr.mxu1 %v5551_v8  ;;  %10878 = vmatpush3.msra.mxu0 %v5571_v18  ;;  %v15910_v51 = vpop.f32.mrf.mxu0  ;;  %v5961_v18 = vrot.slane %v15886_v45, 2  ;;  %v5562_v8 = vld [vmem:[#allocation16 + $0x328] sm:$0xff] }
 0xa74   :  { %v5956_v42 = vrot.slane %v15910_v51, 1  ;;  %9959 = vmatpush3.msra.mxu1 %v5535_v55  ;;  %10879 = vmatprep.subr.mxu0 %v5570_v57  ;;  %v5966_v25 = vrot.slane %v15910_v51, 2  ;;  %v5768_v51 = vrot.slane %v15884_v0, 2 }
 0xa75   :  { %9960 = vmatprep.subr.mxu1 %v5550_v28  ;;  %10880 = vmatpush3.msra.mxu0 %v5570_v57  ;;  %v10868_v60 = vpop.f32.mrf.mxu0  ;;  %v5982_v57 = vsel %vm1160_vm5, %v5976_v1, %v5981_v48  ;;  %v5526_v28 = vld [vmem:[#allocation16 + $0x208] sm:$0xff] }
 0xa76   :  { %9961 = vmatpush3.msra.mxu1 %v5534_v23  ;;  %10881 = vmatprep.subr.mxu0 %v5569_v47  ;;  %v6013_v6 = vsel %vm1160_vm5, %v15897_v35, %v5956_v42  ;;  %v5972_v60 = vrot.slane %v15886_v45, 3  ;;  %v5974_v45 = vrot.slane %v15890_v11, 3 }
 0xa77   :  { %9962 = vmatprep.subr.mxu1 %v5549_v39  ;;  %10882 = vmatpush3.msra.mxu0 %v5569_v47  ;;  %v15919_v5 = vpop.f32.mrf.mxu0  ;;  %v5561_v47 = vld [vmem:[#allocation16 + $0x320] sm:$0xff]  ;;  %v5971_v39 = vrot.slane %v15882_v12, 3 }
 0xa78   :  { %v15922_v56 = vrot.slane %v15919_v5, 1  ;;  %6088 = vmatprep.mubr.f32.mxu1 %v6013_v6  ;;  %9963 = vmatpush3.msra.mxu1 %v5533_v24  ;;  %v5967_v10 = vrot.slane %v15919_v5, 2  ;;  %v5541_v24 = vld [vmem:[#allocation16 + $0x280] sm:$0xff]  ;;  %v5770_v6 = vrot.slane %v15888_v9, 2  ;;  %v5963_v5 = vrot.slane %v15890_v11, 2 }
 0xa79   :  { %10883 = vmatprep.subr.mxu0 %v5568_v34  ;;  %6089 = vmatmul.mubr.f32.gmra.mxu1 %v6012_v63  ;;  %v10871_v32 = vpop.f32.mrf.mxu0 }
 0xa7a   :  { %9964 = vmatprep.subr.mxu1 %v5548_v62  ;;  %10884 = vmatpush3.msra.mxu0 %v5568_v34  ;;  %v5958_v2 = vsel %vm1160_vm5, %v5956_v42, %v15922_v56  ;;  %v5983_v43 = vrot.slane %v15922_v56, 1  ;;  %v5968_v23 = vsel %vm1372_vm4, %v5966_v25, %v5967_v10  ;;  %v5783_v42 = vrot.slane %v15884_v0, 3  ;;  %v5525_v62 = vld [vmem:[#allocation16 + $0x200] sm:$0xff] }
 0xa7b   :  { %9965 = vmatpush3.msra.mxu1 %v5532_v15  ;;  %10885 = vmatprep.subr.mxu0 %v5567_v31  ;;  %v5977_v59 = vrot.slane %v5958_v2, 1  ;;  %v15930_v26 = vpop.f32.mrf.mxu0  ;;  %v5962_v34 = vsel %vm1372_vm4, %v5960_v16, %v5961_v18  ;;  %v5782_v0 = vrot.slane %v15880_v7, 3  ;;  %v5979_v63 = vrot.slane %v5968_v23, 1 }
 0xa7c   :  { %9966 = vmatprep.subr.mxu1 %v5547_v49  ;;  %10886 = vmatpush3.msra.mxu0 %v5567_v31  ;;  %v5969_v55 = vrot.slane %v15930_v26, 2  ;;  %v5769_v15 = vsel %vm1372_vm4, %v5767_v61, %v5768_v51  ;;  %v5973_v31 = vsel %vm1579_vm3, %v5971_v39, %v5972_v60  ;;  %v5559_v49 = vld [vmem:[#allocation16 + $0x310] sm:$0xff]  ;;  %v5978_v32 = vrot.slane %v5962_v34, 1 }
 0xa7d   :  { %6093 = vmatprep.mubr.f32.mxu1 %v5958_v2  ;;  %9967 = vmatpush3.msra.mxu1 %v5531_v40  ;;  %v10874_v44 = vpop.f32.mrf.mxu0  ;;  %v6015_v14 = vsel %vm1160_vm5, %v5762_v4, %v5977_v59  ;;  %v5775_v4 = vrot.slane %v15892_v53, 2  ;;  %v5543_v53 = vld [vmem:[#allocation16 + $0x290] sm:$0xff]  ;;  %v5984_v17 = vsel %vm1160_vm5, %v5977_v59, %v5983_v43  ;;  %v5784_v7 = vsel %vm1579_vm3, %v5782_v0, %v5783_v42 }
 0xa7e   :  { %10887 = vmatprep.subr.mxu0 %v5566_v22  ;;  %6094 = vmatmul.mubr.f32.gmra.mxu1 %v5953_v30  ;;  %v5970_v12 = vsel %vm1372_vm4, %v5967_v10, %v5969_v55  ;;  %v5964_v11 = vsel %vm1372_vm4, %v5961_v18, %v5963_v5  ;;  %v5771_v59 = vsel %vm1372_vm4, %v5768_v51, %v5770_v6  ;;  %v5558_v30 = vld [vmem:[#allocation16 + $0x308] sm:$0xff]  ;;  %v5980_v26 = vrot.slane %v5973_v31, 1 }
 0xa7f   :  { %9968 = vmatprep.subr.mxu1 %v5546_v21  ;;  %10888 = vmatpush3.msra.mxu0 %v5566_v22  ;;  %v5777_v3 = vsel %vm1372_vm4, %v5775_v4, %v5776_v58  ;;  %v5987_v2 = vrot.slane %v5970_v12, 1  ;;  %v5985_v21 = vrot.slane %v5964_v11, 1 }
 0xa80   :  { %9969 = vmatpush3.msra.mxu1 %v5530_v41  ;;  %10889 = vmatprep.subr.mxu0 %v5565_v46  ;;  %v6016_v41 = vsel %vm1160_vm5, %v5771_v59, %v5978_v32 }
 0xa81   :  { %6173 = vmatprep.mubr.f32.mxu0 %v6015_v14  ;;  %9970 = vmatprep.subr.mxu1 %v5545_v50  ;;  %v5988_v44 = vsel %vm1160_vm5, %v5979_v63, %v5987_v2  ;;  %v5986_v50 = vsel %vm1160_vm5, %v5978_v32, %v5985_v21 }
 0xa82   :  { %10890 = vmatpush3.msra.mxu0 %v5565_v46  ;;  %6098 = vmatprep.mubr.f32.mxu1 %v15922_v56  ;;  %v5560_v56 = vld [vmem:[#allocation16 + $0x318] sm:$0xff]  ;;  %v5557_v46 = vld [vmem:[#allocation16 + $0x300] sm:$0xff] }
 0xa83   :  { %6174 = vmatmul.mubr.f32.gmra.mxu0 %v6014_v54  ;;  %9971 = vmatpush3.msra.mxu1 %v5529_v52 }
 0xa84   :  { %10891 = vmatprep.subr.mxu0 %v5564_v29  ;;  %6099 = vmatmul.mubr.f32.gmra.mxu1 %v15917_v27  ;;  %v5778_v27 = vrot.slane %v15905_v36, 2  ;;  %v5785_v36 = vrot.slane %v15888_v9, 3  ;;  %v5975_v9 = vsel %vm1579_vm3, %v5972_v60, %v5974_v45 }
 0xa85   :  { %9972 = vmatprep.subr.mxu1 %v5544_v20  ;;  %10892 = vmatpush3.msra.mxu0 %v5564_v29  ;;  %v5989_v1 = vrot.slane %v5975_v9, 1  ;;  %v15989_v29 = vld [vmem:[%s16401_s12] sm:$0xff] }
 0xa86   :  { %9973 = vmatpush3.msra.mxu1 %v5528_v19  ;;  %6253 = vmatprep.mubr.f32.mxu1 %v5777_v3  ;;  %v5779_v40 = vsel %vm1372_vm4, %v5776_v58, %v5778_v27  ;;  %v5786_v35 = vsel %vm1579_vm3, %v5783_v42, %v5785_v36  ;;  %v15984_v58 = vld [vmem:[#allocation17] sm:$0xff] }
 0xa87   :  { %10893 = vmatprep.subr.mxu0 %v5563_v13  ;;  %6178 = vmatprep.mubr.f32.mxu0 %v5984_v17  ;;  %v6017_v22 = vsel %vm1160_vm5, %v5779_v40, %v5979_v63  ;;  %v6018_v14 = vsel %vm1160_vm5, %v5786_v35, %v5980_v26  ;;  %v5990_v52 = vsel %vm1160_vm5, %v5980_v26, %v5989_v1 }
 0xa88   :  { %9974 = vmatprep.subr.mxu1 %v5543_v53  ;;  %10894 = vmatpush3.msra.mxu0 %v5563_v13 }
 0xa89   :  { %6179 = vmatmul.mubr.f32.gmra.mxu0 %v5982_v57  ;;  %9975 = vmatpush3.msra.mxu1 %v5527_v38 }
 0xa8a   :  { %10895 = vmatprep.subr.mxu0 %v5562_v8  ;;  %9976 = vmatprep.subr.mxu1 %v5542_v33 }
 0xa8b   :  { %10896 = vmatpush3.msra.mxu0 %v5562_v8  ;;  %9977 = vmatpush3.msra.mxu1 %v5526_v28 }
 0xa8c   :  { %10897 = vmatprep.subr.mxu0 %v5561_v47  ;;  %6183 = vmatprep.mubr.f32.mxu0 %v5983_v43 }
 0xa8d   :  { %9978 = vmatprep.subr.mxu1 %v5541_v24  ;;  %10898 = vmatpush3.msra.mxu0 %v5561_v47 }
 0xa8e   :  { %6184 = vmatmul.mubr.f32.gmra.mxu0 %v5981_v48  ;;  %9979 = vmatpush3.msra.mxu1 %v5525_v62 }
 0xa8f   :  { %10899 = vmatprep.subr.mxu0 %v5560_v56  ;;  %6254 = vmatmul.mubr.f32.vlgmr.msra.gmra.mxu1 %v5769_v15 }
 0xa90   :  { %10900 = vmatpush3.msra.mxu0 %v5560_v56  ;;  %10907 = vmatprep.mubr.f32.mxu0 %v5784_v7 }
 0xa91   :  { %6258 = vmatprep.mubr.f32.mxu1 %v6017_v22  ;;  %10901 = vmatprep.subr.mxu0 %v5559_v49 }
 0xa92   :  { %10902 = vmatpush3.msra.mxu0 %v5559_v49 }
 0xa93   :  { %10903 = vmatprep.subr.mxu0 %v5558_v30  ;;  %6259 = vmatmul.mubr.f32.gmra.mxu1 %v6016_v41 }
 0xa94   :  { %10904 = vmatpush3.msra.mxu0 %v5558_v30  ;;  %6263 = vmatprep.mubr.f32.mxu1 %v5988_v44 }
 0xa95   :  { %10905 = vmatprep.subr.mxu0 %v5557_v46 }
 0xa96   :  { %10906 = vmatpush3.msra.mxu0 %v5557_v46 }
 0xa97   :  { %10908 = vmatmul.mubr.f32.vlgmr.msra.gmra.mxu0 %v6018_v14  ;;  %6264 = vmatmul.mubr.f32.gmra.mxu1 %v5986_v50 }
 0xa98   :  { %10910 = vmatprep.mubr.f32.mxu0 %v5990_v52  ;;  %6268 = vmatprep.mubr.f32.mxu1 %v5987_v2 }
 0xa9b   :  { %10911 = vmatmul.mubr.f32.gmra.mxu0 %v5989_v1  ;;  %6269 = vmatmul.mubr.f32.gmra.mxu1 %v5985_v21 }
 0xa9c   :  { %10924 = vmatprep.mubr.msk.f32.mxu1 %vm6523_vm15, %v15984_v58  ;;  %10917 = vmatprep.mubr.msk.f32.mxu0 %vm6523_vm15, %v15989_v29 }
 0xb29   :  { %v9892_v54 = vpop.f32.mrf.mxu1 }
 0xb2b   :  { %v9893_v20 = vpop.f32.mrf.mxu1 }
 0xb2c   :  { %v9894_v39 = vadd.f32 %v9893_v20, %v9892_v54 }
 0xb30   :  { %v9936_v4 = vpop.f32.mrf.mxu0 }
 0xb32   :  { %v9937_v13 = vpop.f32.mrf.mxu0 }
 0xb33   :  { %v9938_v28 = vadd.f32 %v9937_v13, %v9936_v4 }
 0xb35   :  { %v6171_v5 = vadd.f32 %v9938_v28, %v9894_v39 }
 0xb39   :  { %v9895_v43 = vpop.f32.mrf.mxu1 }
 0xb3b   :  { %v9896_v19 = vpop.f32.mrf.mxu1 }
 0xb3c   :  { %v9897_v51 = vadd.f32 %v9896_v19, %v9895_v43 }
 0xb3e   :  { %v9898_v48 = vpop.f32.mrf.mxu1 }
 0xb40   :  { %v9899_v3 = vpop.f32.mrf.mxu1 }
 0xb41   :  { %v9900_v27 = vadd.f32 %v9899_v3, %v9898_v48 }
 0xb43   :  { %v9939_v25 = vpop.f32.mrf.mxu0 }
 0xb44   :  { %v9901_v53 = vpop.f32.mrf.mxu1 }
 0xb45   :  { %v9940_v10 = vpop.f32.mrf.mxu0 }
 0xb46   :  { %v9902_v38 = vpop.f32.mrf.mxu1  ;;  %v9941_v55 = vadd.f32 %v9940_v10, %v9939_v25 }
 0xb47   :  { %v9903_v7 = vadd.f32 %v9902_v38, %v9901_v53 }
 0xb48   :  { %v6176_v60 = vadd.f32 %v9941_v55, %v9897_v51 }
 0xb49   :  { %v9942_v17 = vpop.f32.mrf.mxu0 }
 0xb4b   :  { %v9943_v16 = vpop.f32.mrf.mxu0 }
 0xb4c   :  { %v9944_v61 = vadd.f32 %v9943_v16, %v9942_v17 }
 0xb4e   :  { %v9945_v8 = vpop.f32.mrf.mxu0  ;;  %v6181_v45 = vadd.f32 %v9944_v61, %v9900_v27 }
 0xb4f   :  { %v9980_v18 = vpop.f32.mrf.mxu1 }
 0xb50   :  { %v9946_v23 = vpop.f32.mrf.mxu0 }
 0xb51   :  { %v9981_v33 = vpop.f32.mrf.mxu1  ;;  %v9947_v56 = vadd.f32 %v9946_v23, %v9945_v8 }
 0xb52   :  { %v9982_v24 = vadd.f32 %v9981_v33, %v9980_v18 }
 0xb53   :  { %v9983_v57 = vpop.f32.mrf.mxu1  ;;  %v6186_v59 = vadd.f32 %v9947_v56, %v9903_v7 }
 0xb54   :  { %v6256_v15 = vadd.f32 %v9982_v24, %v6171_v5 }
 0xb55   :  { %v9984_v47 = vpop.f32.mrf.mxu1 }
 0xb56   :  { %v9985_v42 = vadd.f32 %v9984_v47, %v9983_v57 }
 0xb57   :  { %v10909_v6 = vpop.f32.mrf.mxu0  ;;  %v9986_v34 = vpop.f32.mrf.mxu1 }
 0xb58   :  { %v6261_v62 = vadd.f32 %v9985_v42, %v6176_v60 }
 0xb59   :  { %v6340_v0 = vpop.f32.mrf.mxu0  ;;  %v9987_v12 = vpop.f32.mrf.mxu1 }
 0xb5a   :  { %v9988_v63 = vadd.f32 %v9987_v12, %v9986_v34  ;;  %v6346_v32 = vadd.f32 %v10909_v6, %v6261_v62  ;;  %v6341_v2 = vadd.f32 %v6340_v0, %v6256_v15  ;;  %v6408_v15 = vld [vmem:[%s16401_s12 + $0x8] sm:$0xff] }
 0xb5b   :  { %v10912_v36 = vpop.f32.mrf.mxu0  ;;  %v9989_v31 = vpop.f32.mrf.mxu1 }
 0xb5c   :  { %v6266_v49 = vadd.f32 %v9988_v63, %v6181_v45  ;;  %v6359_v26 = vadd.f32 %v6346_v32, %v6341_v2  ;;  %v6410_v45 = vld [vmem:[#allocation17 + $0x8] sm:$0xff] }
 0xb5d   :  { %v6350_v11 = vpop.f32.mrf.mxu0  ;;  %v9990_v40 = vpop.f32.mrf.mxu1 }
 0xb5e   :  { %v9991_v9 = vadd.f32 %v9990_v40, %v9989_v31  ;;  %v6351_v22 = vadd.f32 %v6350_v11, %v6266_v49  ;;  %v6442_v49 = vld [vmem:[#allocation19 + $0xf8] sm:$0xff]  ;;  %v6441_v40 = vld [vmem:[#allocation19 + $0xf0] sm:$0xff] }
 0xb5f   :  { %v6458_v11 = vld [vmem:[#allocation19 + $0x178] sm:$0xff] }
 0xb60   :  { %v6271_v30 = vadd.f32 %v9991_v9, %v6186_v59  ;;  %v6360_v41 = vadd.f32 %v6359_v26, %v6351_v22  ;;  %v6473_v59 = vld [vmem:[#allocation19 + $0x1f0] sm:$0xff]  ;;  %v6472_v26 = vld [vmem:[#allocation19 + $0x1e8] sm:$0xff] }
 0xb61   :  { %v6425_v9 = vld [vmem:[#allocation19 + $0x70] sm:$0xff] }
 0xb62   :  { %v6356_v21 = vadd.f32 %v10912_v36, %v6271_v30  ;;  %v6440_v30 = vld [vmem:[#allocation19 + $0xe8] sm:$0xff] }
 0xb64   :  { %v6361_v46 = vsel %vm1372_vm4, %v6356_v21, 0.0 }
 0xb65   :  { %v6362_v35 = vadd.f32 %v6361_v46, %v6360_v41  ;;  %v6471_v41 = vld [vmem:[#allocation19 + $0x1e0] sm:$0xff] }
 0xb66   :  { %v6423_v46 = vld [vmem:[#allocation19 + $0x60] sm:$0xff] }
 0xb67   :  { %v6363_v44 = vrot.slane %v6362_v35, 4 }
 0xb69   :  { %v6364_v1 = vadd.f32 %v6363_v44, %v6362_v35  ;;  %v6455_v35 = vld [vmem:[#allocation19 + $0x160] sm:$0xff]  ;;  %v6438_v44 = vld [vmem:[#allocation19 + $0xd8] sm:$0xff] }
 0xb6b   :  { %v6365_v14 = vrot.slane %v6364_v1, 2 }
 0xb6d   :  { %v6366_v50 = vadd.f32 %v6365_v14, %v6364_v1  ;;  %v6470_v1 = vld [vmem:[#allocation19 + $0x1d8] sm:$0xff] }
 0xb6e   :  { %v6422_v14 = vld [vmem:[#allocation19 + $0x58] sm:$0xff] }
 0xb6f   :  { %v6367_v52 = vrot.slane %v6366_v50, 1 }
 0xb71   :  { %v6368_v54 = vadd.f32 %v6367_v52, %v6366_v50  ;;  %v6454_v50 = vld [vmem:[#allocation19 + $0x158] sm:$0xff]  ;;  %v6437_v52 = vld [vmem:[#allocation19 + $0xd0] sm:$0xff] }
 0xb73   :  { %v6369_v20 = vmul.f32 0.033333335, %v6368_v54  ;;  %v6469_v54 = vld [vmem:[#allocation19 + $0x1d0] sm:$0xff] }
 0xb75   :  { %v6370_v43 = vsub.f32 %v6341_v2, %v6369_v20  ;;  %v6371_v4 = vsub.f32 %v6346_v32, %v6369_v20  ;;  %v6372_v19 = vsub.f32 %v6351_v22, %v6369_v20  ;;  %v6373_v13 = vsub.f32 %v6356_v21, %v6369_v20  ;;  %v6474_v32 = vld [vmem:[#allocation19 + $0x1f8] sm:$0xff]  ;;  %v6457_v22 = vld [vmem:[#allocation19 + $0x170] sm:$0xff]  ;;  %v6439_v21 = vld [vmem:[#allocation19 + $0xe0] sm:$0xff] }
 0xb76   :  { %v6426_v2 = vld [vmem:[#allocation19 + $0x78] sm:$0xff]  ;;  %v6421_v20 = vld [vmem:[#allocation19 + $0x50] sm:$0xff] }
 0xb77   :  { %v6374_v48 = vmul.f32 %v6370_v43, %v6370_v43  ;;  %v6375_v25 = vmul.f32 %v6371_v4, %v6371_v4  ;;  %v6377_v10 = vmul.f32 %v6373_v13, %v6373_v13  ;;  %v6376_v3 = vmul.f32 %v6372_v19, %v6372_v19 }
 0xb79   :  { %v6378_v53 = vadd.f32 %v6375_v25, %v6374_v48  ;;  %v6380_v38 = vsel %vm1372_vm4, %v6377_v10, 0.0  ;;  %v6452_v48 = vld [vmem:[#allocation19 + $0x148] sm:$0xff]  ;;  %v6435_v25 = vld [vmem:[#allocation19 + $0xc0] sm:$0xff] }
 0xb7a   :  { %v6467_v10 = vld [vmem:[#allocation19 + $0x1c0] sm:$0xff] }
 0xb7b   :  { %v6379_v17 = vadd.f32 %v6378_v53, %v6376_v3  ;;  %v6419_v3 = vld [vmem:[#allocation19 + $0x40] sm:$0xff] }
 0xb7c   :  { %v6451_v53 = vld [vmem:[#allocation19 + $0x140] sm:$0xff] }
 0xb7d   :  { %v6381_v16 = vadd.f32 %v6380_v38, %v6379_v17  ;;  %v6434_v17 = vld [vmem:[#allocation19 + $0xb8] sm:$0xff] }
 0xb7e   :  { %v6466_v38 = vld [vmem:[#allocation19 + $0x1b8] sm:$0xff] }
 0xb7f   :  { %v6382_v18 = vrot.slane %v6381_v16, 4 }
 0xb81   :  { %v6383_v8 = vadd.f32 %v6382_v18, %v6381_v16  ;;  %v6418_v16 = vld [vmem:[#allocation19 + $0x38] sm:$0xff] }
 0xb82   :  { %v6450_v18 = vld [vmem:[#allocation19 + $0x138] sm:$0xff] }
 0xb83   :  { %v6384_v33 = vrot.slane %v6383_v8, 2 }
 0xb85   :  { %v6385_v55 = vadd.f32 %v6384_v33, %v6383_v8  ;;  %v6433_v8 = vld [vmem:[#allocation19 + $0xb0] sm:$0xff] }
 0xb86   :  { %v6465_v33 = vld [vmem:[#allocation19 + $0x1b0] sm:$0xff] }
 0xb87   :  { %v6386_v57 = vrot.slane %v6385_v55, 1 }
 0xb89   :  { %v6387_v28 = vadd.f32 %v6386_v57, %v6385_v55  ;;  %v6417_v55 = vld [vmem:[#allocation19 + $0x30] sm:$0xff] }
 0xb8a   :  { %v6449_v57 = vld [vmem:[#allocation19 + $0x130] sm:$0xff] }
 0xb8b   :  { %v6388_v51 = vmul.f32 0.033333335, %v6387_v28  ;;  %v6432_v28 = vld [vmem:[#allocation19 + $0xa8] sm:$0xff] }
 0xb8d   :  { %v6389_v23 = vadd.f32 1e-05, %v6388_v51  ;;  %v6416_v51 = vld [vmem:[#allocation19 + $0x28] sm:$0xff] }
 0xb8f   :  { %11119 = vrsqrt.f32 %v6389_v23  ;;  %v6431_v23 = vld [vmem:[#allocation19 + $0xa0] sm:$0xff] }
 0xb9c   :  { %v11120_v47 = vpop.eup %11119 }
 0xb9d   :  { %v6394_v61 = vmul.f32 %v11120_v47, %v6373_v13  ;;  %v6392_v42 = vmul.f32 %v11120_v47, %v6371_v4  ;;  %v6391_v39 = vmul.f32 %v11120_v47, %v6370_v43  ;;  %v6393_v60 = vmul.f32 %v11120_v47, %v6372_v19  ;;  %v6453_v43 = vld [vmem:[#allocation19 + $0x150] sm:$0xff]  ;;  %v6436_v4 = vld [vmem:[#allocation19 + $0xc8] sm:$0xff] }
 0xb9e   :  { %v6468_v19 = vld [vmem:[#allocation19 + $0x1c8] sm:$0xff] }
 0xb9f   :  { %vm6396_vm0 = vcmp.gt.f32.partialorder %v6392_v42, 0.0  ;;  %v6400_v24 = vmul.f32 0.1, %v6392_v42  ;;  %vm6395_vm7 = vcmp.gt.f32.partialorder %v6391_v39, 0.0  ;;  %v6399_v6 = vmul.f32 0.1, %v6391_v39 }
 0xba0   :  { %vm6397_vm8 = vcmp.gt.f32.partialorder %v6393_v60, 0.0  ;;  %vm6398_vm9 = vcmp.gt.f32.partialorder %v6394_v61, 0.0  ;;  %v6401_v34 = vmul.f32 0.1, %v6393_v60  ;;  %v6402_v27 = vmul.f32 0.1, %v6394_v61 }
 0xba1   :  { %v6404_v5 = vsel %vm6396_vm0, %v6392_v42, %v6400_v24  ;;  %v6403_v12 = vsel %vm6395_vm7, %v6391_v39, %v6399_v6  ;;  %v6420_v13 = vld [vmem:[#allocation19 + $0x48] sm:$0xff]  ;;  %v6430_v39 = vld [vmem:[#allocation19 + $0x98] sm:$0xff]  ;;  %v6447_v6 = vld [vmem:[#allocation19 + $0x120] sm:$0xff] }
 0xba2   :  { %10913 = vmatprep.subr.msk.mxu0 %vm1160_vm5, %v6404_v5  ;;  %10920 = vmatprep.subr.msk.mxu1 %vm1160_vm5, %v6404_v5  ;;  %v6405_v62 = vsel %vm6397_vm8, %v6393_v60, %v6401_v34  ;;  %v6406_v0 = vsel %vm6398_vm9, %v6394_v61, %v6402_v27  ;;  %v6711_v36 = vrot.slane %v6404_v5, 7  ;;  %v6464_v47 = vld [vmem:[#allocation19 + $0x1a8] sm:$0xff]  ;;  %v6415_v61 = vld [vmem:[#allocation19 + $0x20] sm:$0xff]  ;;  %v6414_v24 = vld [vmem:[#allocation19 + $0x18] sm:$0xff] }
 0xba3   :  { %10914 = vmatpush3.msk.msra.mxu0 %vm1160_vm5, %v6404_v5  ;;  %10921 = vmatpush3.msk.msra.mxu1 %vm1160_vm5, %v6404_v5  ;;  %v6712_v56 = vrot.slane %v6405_v62, 7  ;;  %v6714_v63 = vrot.slane %v6406_v0, 7  ;;  %v6448_v42 = vld [vmem:[#allocation19 + $0x128] sm:$0xff]  ;;  %v6463_v60 = vld [vmem:[#allocation19 + $0x1a0] sm:$0xff]  ;;  %v6429_v34 = vld [vmem:[#allocation19 + $0x90] sm:$0xff] }
 0xba4   :  { %10915 = vmatprep.subr.mxu0 %v6403_v12  ;;  %10922 = vmatprep.subr.mxu1 %v6403_v12  ;;  %v6462_v27 = vld [vmem:[#allocation19 + $0x198] sm:$0xff]  ;;  %v6413_v5 = vld [vmem:[#allocation19 + $0x10] sm:$0xff]  ;;  %v6428_v0 = vld [vmem:[#allocation19 + $0x88] sm:$0xff] }
 0xba5   :  { %10916 = vmatpush3.msra.mxu0 %v6403_v12  ;;  %10923 = vmatpush3.msra.mxu1 %v6403_v12  ;;  %v6715_v31 = vsel %vm879_vm2, %v6712_v56, %v6714_v63  ;;  %v6713_v7 = vsel %vm879_vm2, %v6711_v36, %v6712_v56  ;;  %v6446_v62 = vld [vmem:[#allocation19 + $0x118] sm:$0xff]  ;;  %v6461_v12 = vld [vmem:[#allocation19 + $0x190] sm:$0xff]  ;;  %v6427_v63 = vld [vmem:[#allocation19 + $0x80] sm:$0xff] }
 0xba6   :  { %10925 = vmatmul.mubr.msk.f32.vlgmr.msra.gmra.mxu1 %vm6523_vm15, %v6410_v45  ;;  %10927 = vmatprep.subr.msk.mxu0 %vm1160_vm5, %v6715_v31  ;;  %v6445_v56 = vld [vmem:[#allocation19 + $0x110] sm:$0xff]  ;;  %v6411_v36 = vld [vmem:[#allocation19] sm:$0xff] }
 0xba7   :  { %10934 = vmatprep.subr.msk.mxu1 %vm1160_vm5, %v6715_v31  ;;  %10918 = vmatmul.mubr.msk.f32.vlgmr.msra.gmra.mxu0 %vm6523_vm15, %v6408_v15 }
 0xba8   :  { %10928 = vmatpush3.msk.msra.mxu0 %vm1160_vm5, %v6715_v31  ;;  %10935 = vmatpush3.msk.msra.mxu1 %vm1160_vm5, %v6715_v31  ;;  %v6444_v31 = vld [vmem:[#allocation19 + $0x108] sm:$0xff] }
 0xba9   :  { %10929 = vmatprep.subr.mxu0 %v6713_v7  ;;  %10936 = vmatprep.subr.mxu1 %v6713_v7 }
 0xbaa   :  { %10930 = vmatpush3.msra.mxu0 %v6713_v7  ;;  %10937 = vmatpush3.msra.mxu1 %v6713_v7  ;;  %v6459_v7 = vld [vmem:[#allocation19 + $0x180] sm:$0xff] }
 0xbab   :  { %10938 = vmatprep.mubr.msk.f32.mxu1 %vm6523_vm15, %v15984_v58  ;;  %10931 = vmatprep.mubr.msk.f32.mxu0 %vm6523_vm15, %v15989_v29  ;;  %v6424_v58 = vld [vmem:[#allocation19 + $0x68] sm:$0xff] }
 0xbac   :  { %10939 = vmatmul.mubr.msk.f32.vlgmr.msra.gmra.mxu1 %vm6523_vm15, %v6410_v45  ;;  %10932 = vmatmul.mubr.msk.f32.vlgmr.msra.gmra.mxu0 %vm6523_vm15, %v6408_v15  ;;  %v6456_v29 = vld [vmem:[#allocation19 + $0x168] sm:$0xff]  ;;  %vm9119_vm15 = vcmask 25600  }
 0xbad   :  { %10028 = vmatprep.subr.mxu0 %v6442_v49  ;;  %10066 = vmatprep.subr.mxu1 %v6474_v32  ;;  %v6412_v45 = vld [vmem:[#allocation19 + $0x8] sm:$0xff]  ;;  %v6506_v49 = vld [vmem:[#allocation19 + $0x2f8] sm:$0xff]  ;;  %v6443_v32 = vld [vmem:[#allocation19 + $0x100] sm:$0xff] }
 0xbae   :  { %10029 = vmatpush3.msra.mxu0 %v6426_v2  ;;  %10067 = vmatpush3.msra.mxu1 %v6458_v11  ;;  %v6460_v15 = vld [vmem:[#allocation19 + $0x188] sm:$0xff]  ;;  %v6522_v2 = vld [vmem:[#allocation19 + $0x378] sm:$0xff] }
 0xbaf   :  { %10030 = vmatprep.subr.mxu0 %v6441_v40  ;;  %10068 = vmatprep.subr.mxu1 %v6473_v59 }
 0xbb0   :  { %10031 = vmatpush3.msra.mxu0 %v6425_v9  ;;  %10069 = vmatpush3.msra.mxu1 %v6457_v22 }
 0xbb1   :  { %10032 = vmatprep.subr.mxu0 %v6440_v30  ;;  %10070 = vmatprep.subr.mxu1 %v6472_v26 }
 0xbb2   :  { %10033 = vmatpush3.msra.mxu0 %v6424_v58  ;;  %10071 = vmatpush3.msra.mxu1 %v6456_v29 }
 0xbb3   :  { %10034 = vmatprep.subr.mxu0 %v6439_v21  ;;  %10072 = vmatprep.subr.mxu1 %v6471_v41 }
 0xbb4   :  { %10035 = vmatpush3.msra.mxu0 %v6423_v46  ;;  %10073 = vmatpush3.msra.mxu1 %v6455_v35 }
 0xbb5   :  { %10036 = vmatprep.subr.mxu0 %v6438_v44  ;;  %10074 = vmatprep.subr.mxu1 %v6470_v1  ;;  %v6490_v44 = vld [vmem:[#allocation19 + $0x278] sm:$0xff] }
 0xbb6   :  { %10037 = vmatpush3.msra.mxu0 %v6422_v14  ;;  %10075 = vmatpush3.msra.mxu1 %v6454_v50 }
 0xbb7   :  { %10038 = vmatprep.subr.mxu0 %v6437_v52  ;;  %10076 = vmatprep.subr.mxu1 %v6469_v54  ;;  %v6505_v52 = vld [vmem:[#allocation19 + $0x2f0] sm:$0xff] }
 0xbb8   :  { %10039 = vmatpush3.msra.mxu0 %v6421_v20  ;;  %10077 = vmatpush3.msra.mxu1 %v6453_v43  ;;  %v6489_v20 = vld [vmem:[#allocation19 + $0x270] sm:$0xff] }
 0xbb9   :  { %10040 = vmatprep.subr.mxu0 %v6436_v4  ;;  %10078 = vmatprep.subr.mxu1 %v6468_v19  ;;  %v6504_v4 = vld [vmem:[#allocation19 + $0x2e8] sm:$0xff]  ;;  %v6521_v19 = vld [vmem:[#allocation19 + $0x370] sm:$0xff] }
 0xbba   :  { %10041 = vmatpush3.msra.mxu0 %v6420_v13  ;;  %10079 = vmatpush3.msra.mxu1 %v6452_v48  ;;  %v6488_v13 = vld [vmem:[#allocation19 + $0x268] sm:$0xff] }
 0xbbb   :  { %10042 = vmatprep.subr.mxu0 %v6435_v25  ;;  %10080 = vmatprep.subr.mxu1 %v6467_v10  ;;  %v6503_v25 = vld [vmem:[#allocation19 + $0x2e0] sm:$0xff]  ;;  %v6520_v10 = vld [vmem:[#allocation19 + $0x368] sm:$0xff] }
 0xbbc   :  { %10043 = vmatpush3.msra.mxu0 %v6419_v3  ;;  %10081 = vmatpush3.msra.mxu1 %v6451_v53  ;;  %v6487_v3 = vld [vmem:[#allocation19 + $0x260] sm:$0xff] }
 0xbbd   :  { %10044 = vmatprep.subr.mxu0 %v6434_v17  ;;  %10082 = vmatprep.subr.mxu1 %v6466_v38 }
 0xbbe   :  { %10045 = vmatpush3.msra.mxu0 %v6418_v16  ;;  %10083 = vmatpush3.msra.mxu1 %v6450_v18  ;;  %v6502_v16 = vld [vmem:[#allocation19 + $0x2d8] sm:$0xff]  ;;  %v6519_v18 = vld [vmem:[#allocation19 + $0x360] sm:$0xff] }
 0xbbf   :  { %10046 = vmatprep.subr.mxu0 %v6433_v8  ;;  %10084 = vmatprep.subr.mxu1 %v6465_v33  ;;  %v6486_v8 = vld [vmem:[#allocation19 + $0x258] sm:$0xff] }
 0xbc0   :  { %10047 = vmatpush3.msra.mxu0 %v6417_v55  ;;  %10085 = vmatpush3.msra.mxu1 %v6449_v57  ;;  %v6501_v55 = vld [vmem:[#allocation19 + $0x2d0] sm:$0xff]  ;;  %v6518_v57 = vld [vmem:[#allocation19 + $0x358] sm:$0xff] }
 0xbc1   :  { %10048 = vmatprep.subr.mxu0 %v6432_v28  ;;  %10086 = vmatprep.subr.mxu1 %v6464_v47  ;;  %v6485_v28 = vld [vmem:[#allocation19 + $0x250] sm:$0xff]  ;;  %v6500_v47 = vld [vmem:[#allocation19 + $0x2c8] sm:$0xff] }
 0xbc2   :  { %10049 = vmatpush3.msra.mxu0 %v6416_v51  ;;  %10087 = vmatpush3.msra.mxu1 %v6448_v42 }
 0xbc3   :  { %10050 = vmatprep.subr.mxu0 %v6431_v23  ;;  %10088 = vmatprep.subr.mxu1 %v6463_v60 }
 0xbc4   :  { %10051 = vmatpush3.msra.mxu0 %v6415_v61  ;;  %10089 = vmatpush3.msra.mxu1 %v6447_v6  ;;  %v6484_v6 = vld [vmem:[#allocation19 + $0x248] sm:$0xff] }
 0xbc5   :  { %10052 = vmatprep.subr.mxu0 %v6430_v39  ;;  %10090 = vmatprep.subr.mxu1 %v6462_v27 }
 0xbc6   :  { %10053 = vmatpush3.msra.mxu0 %v6414_v24  ;;  %10091 = vmatpush3.msra.mxu1 %v6446_v62  ;;  %v6517_v24 = vld [vmem:[#allocation19 + $0x350] sm:$0xff] }
 0xbc7   :  { %10054 = vmatprep.subr.mxu0 %v6429_v34  ;;  %10092 = vmatprep.subr.mxu1 %v6461_v12 }
 0xbc8   :  { %10055 = vmatpush3.msra.mxu0 %v6413_v5  ;;  %10093 = vmatpush3.msra.mxu1 %v6445_v56  ;;  %v6499_v5 = vld [vmem:[#allocation19 + $0x2c0] sm:$0xff] }
 0xbc9   :  { %10056 = vmatprep.subr.mxu0 %v6428_v0  ;;  %10094 = vmatprep.subr.mxu1 %v6460_v15  ;;  %v6516_v0 = vld [vmem:[#allocation19 + $0x348] sm:$0xff]  ;;  %v6515_v15 = vld [vmem:[#allocation19 + $0x340] sm:$0xff] }
 0xbca   :  { %10057 = vmatpush3.msra.mxu0 %v6412_v45  ;;  %10095 = vmatpush3.msra.mxu1 %v6444_v31  ;;  %v6483_v45 = vld [vmem:[#allocation19 + $0x240] sm:$0xff]  ;;  %v6497_v31 = vld [vmem:[#allocation19 + $0x2b0] sm:$0xff] }
 0xbcb   :  { %10058 = vmatprep.subr.mxu0 %v6427_v63  ;;  %10096 = vmatprep.subr.mxu1 %v6459_v7  ;;  %v6498_v63 = vld [vmem:[#allocation19 + $0x2b8] sm:$0xff] }
 0xbcc   :  { %10059 = vmatpush3.msra.mxu0 %v6411_v36  ;;  %10097 = vmatpush3.msra.mxu1 %v6443_v32  ;;  %v6482_v36 = vld [vmem:[#allocation19 + $0x238] sm:$0xff]  ;;  %v6496_v32 = vld [vmem:[#allocation19 + $0x2a8] sm:$0xff] }
 0xbcd   :  { %10104 = vmatprep.subr.mxu0 %v6506_v49  ;;  %10941 = vmatprep.subr.mxu1 %v6522_v2  ;;  %v6514_v7 = vld [vmem:[#allocation19 + $0x338] sm:$0xff]  ;;  %v6481_v49 = vld [vmem:[#allocation19 + $0x230] sm:$0xff] }
 0xc66   :  { %v16018_v11 = vpop.f32.mrf.mxu1 }
 0xc67   :  { %v16020_v40 = vpop.f32.mrf.mxu0  ;;  %v6702_v42 = vrot.slane %v16018_v11, 2  ;;  %v6480_v11 = vld [vmem:[#allocation19 + $0x228] sm:$0xff] }
 0xc68   :  { %v16022_v59 = vpop.f32.mrf.mxu1  ;;  %v6706_v39 = vrot.slane %v16020_v40, 3 }
 0xc69   :  { %v16024_v9 = vpop.f32.mrf.mxu0  ;;  %v6693_v1 = vrot.slane %v16022_v59, 1  ;;  %v6701_v51 = vrot.slane %v16022_v59, 2 }
 0xc6a   :  { %v6690_v41 = vrot.slane %v16024_v9, 1  ;;  %v6705_v60 = vrot.slane %v16024_v9, 3 }
 0xc6b   :  { %v6703_v27 = vsel %vm1372_vm4, %v6701_v51, %v6702_v42 }
 0xc6c   :  { %v10940_v22 = vpop.f32.mrf.mxu1  ;;  %v16026_v30 = vpop.f32.mrf.mxu0  ;;  %v6707_v12 = vsel %vm1579_vm3, %v6705_v60, %v6706_v39 }
 0xc6d   :  { %v6879_v53 = vrot.slane %v10940_v22, 2  ;;  %v6882_v17 = vrot.slane %v16026_v30, 3  ;;  %v6512_v22 = vld [vmem:[#allocation19 + $0x328] sm:$0xff] }
 0xc6e   :  { %v6860_v26 = vpop.f32.mrf.mxu1  ;;  %v16028_v58 = vpop.f32.mrf.mxu0 }
 0xc6f   :  { %v16030_v29 = vrot.slane %v6860_v26, 1  ;;  %v16033_v21 = vrot.slane %v16028_v58, 1  ;;  %v6878_v48 = vrot.slane %v6860_v26, 2  ;;  %v6881_v38 = vrot.slane %v16028_v58, 3 }
 0xc70   :  { %v6875_v26 = vrot.slane %v16026_v30, 2  ;;  %v6477_v30 = vld [vmem:[#allocation19 + $0x210] sm:$0xff] }
 0xc71   :  { %v6884_v46 = vrot.slane %v16033_v21, 1  ;;  %v6897_v35 = vsel %vm1160_vm5, %v16022_v59, %v16030_v29  ;;  %v6896_v14 = vsel %vm1160_vm5, %v16024_v9, %v16033_v21  ;;  %v6885_v50 = vrot.slane %v16030_v29, 1  ;;  %v6495_v59 = vld [vmem:[#allocation19 + $0x2a0] sm:$0xff] }
 0xc72   :  { %6967 = vmatprep.mubr.f32.mxu0 %v6897_v35  ;;  %v16053_v33 = vsel %vm1372_vm4, %v6878_v48, %v6879_v53  ;;  %v16057_v23 = vsel %vm1579_vm3, %v6881_v38, %v6882_v17  ;;  %v6478_v35 = vld [vmem:[#allocation19 + $0x218] sm:$0xff]  ;;  %v6507_v48 = vld [vmem:[#allocation19 + $0x300] sm:$0xff] }
 0xc73   :  { %6968 = vmatmul.mubr.f32.vlgmr.msra.gmra.mxu0 %v6896_v14  ;;  %v6898_v54 = vsel %vm1160_vm5, %v6690_v41, %v6884_v46  ;;  %v6899_v43 = vsel %vm1160_vm5, %v6693_v1, %v6885_v50  ;;  %v6887_v61 = vrot.slane %v16053_v33, 1  ;;  %v6888_v34 = vrot.slane %v16057_v23, 1  ;;  %v6494_v41 = vld [vmem:[#allocation19 + $0x298] sm:$0xff] }
 0xc74   :  { %10105 = vmatpush3.msra.mxu0 %v6490_v44  ;;  %6972 = vmatprep.mubr.f32.mxu0 %v16030_v29  ;;  %v6874_v29 = vrot.slane %v16028_v58, 2  ;;  %v6493_v44 = vld [vmem:[#allocation19 + $0x290] sm:$0xff]  ;;  %v6510_v1 = vld [vmem:[#allocation19 + $0x318] sm:$0xff]  ;;  %v6492_v58 = vld [vmem:[#allocation19 + $0x288] sm:$0xff] }
 0xc75   :  { %7042 = vmatprep.mubr.f32.mxu1 %v6899_v43  ;;  %10106 = vmatprep.subr.mxu0 %v6505_v52  ;;  %v6901_v62 = vsel %vm1160_vm5, %v6703_v27, %v6887_v61  ;;  %v6902_v56 = vsel %vm1160_vm5, %v6707_v12, %v6888_v34  ;;  %v6697_v52 = vrot.slane %v16020_v40, 2 }
 0xc76   :  { %7043 = vmatmul.mubr.f32.vlgmr.msra.gmra.mxu1 %v6898_v54  ;;  %10107 = vmatpush3.msra.mxu0 %v6489_v20  ;;  %v6876_v14 = vsel %vm1372_vm4, %v6874_v29, %v6875_v26  ;;  %v6696_v54 = vrot.slane %v16024_v9, 2  ;;  %v6476_v20 = vld [vmem:[#allocation19 + $0x208] sm:$0xff] }
 0xc77   :  { %10942 = vmatpush3.msra.mxu1 %v6522_v2  ;;  %10108 = vmatprep.subr.mxu0 %v6504_v4  ;;  %v6513_v2 = vld [vmem:[#allocation19 + $0x330] sm:$0xff]  ;;  %v6886_v43 = vrot.slane %v6876_v14, 1  ;;  %v6491_v4 = vld [vmem:[#allocation19 + $0x280] sm:$0xff] }
 0xc78   :  { %10943 = vmatprep.subr.mxu1 %v6521_v19  ;;  %10109 = vmatpush3.msra.mxu0 %v6488_v13  ;;  %v6475_v13 = vld [vmem:[#allocation19 + $0x200] sm:$0xff] }
 0xc79   :  { %10944 = vmatpush3.msra.mxu1 %v6521_v19  ;;  %10110 = vmatprep.subr.mxu0 %v6503_v25  ;;  %v6508_v19 = vld [vmem:[#allocation19 + $0x308] sm:$0xff]  ;;  %v6698_v25 = vsel %vm1372_vm4, %v6696_v54, %v6697_v52  ;;  %v7236_v54 = vld [vmem:[%s16405_s16] sm:$0xff] }
 0xc7a   :  { %10945 = vmatprep.subr.mxu1 %v6520_v10  ;;  %10111 = vmatpush3.msra.mxu0 %v6487_v3  ;;  %v6900_v40 = vsel %vm1160_vm5, %v6698_v25, %v6886_v43  ;;  %v7268_v25 = vld [vmem:[#allocation20 + $0xf8] sm:$0xff] }
 0xc7b   :  { %10946 = vmatpush3.msra.mxu1 %v6520_v10  ;;  %10112 = vmatprep.subr.mxu0 %v6502_v16 }
 0xc7c   :  { %10947 = vmatprep.subr.mxu1 %v6519_v18  ;;  %10113 = vmatpush3.msra.mxu0 %v6486_v8 }
 0xc7d   :  { %10948 = vmatpush3.msra.mxu1 %v6519_v18  ;;  %10114 = vmatprep.subr.mxu0 %v6501_v55 }
 0xc7e   :  { %10949 = vmatprep.subr.mxu1 %v6518_v57  ;;  %10115 = vmatpush3.msra.mxu0 %v6485_v28 }
 0xc7f   :  { %10950 = vmatpush3.msra.mxu1 %v6518_v57  ;;  %6973 = vmatmul.mubr.f32.gmra.mxu0 %v16033_v21  ;;  %v6479_v21 = vld [vmem:[#allocation19 + $0x220] sm:$0xff] }
 0xc80   :  { %7047 = vmatprep.mubr.f32.mxu1 %v6885_v50  ;;  %10116 = vmatprep.subr.mxu0 %v6500_v47  ;;  %v6509_v50 = vld [vmem:[#allocation19 + $0x310] sm:$0xff] }
 0xc81   :  { %10951 = vmatprep.subr.mxu1 %v6517_v24  ;;  %7048 = vmatmul.mubr.f32.gmra.mxu1 %v6884_v46  ;;  %v6511_v46 = vld [vmem:[#allocation19 + $0x320] sm:$0xff] }
 0xc82   :  { %10117 = vmatpush3.msra.mxu0 %v6484_v6  ;;  %7117 = vmatprep.mubr.f32.mxu0 %v6901_v62 }
 0xc83   :  { %10952 = vmatpush3.msra.mxu1 %v6517_v24  ;;  %10118 = vmatprep.subr.mxu0 %v6499_v5 }
 0xc84   :  { %10953 = vmatprep.subr.mxu1 %v6516_v0  ;;  %10973 = vmatprep.mubr.f32.mxu1 %v6902_v56 }
 0xc85   :  { %10119 = vmatpush3.msra.mxu0 %v6483_v45  ;;  %10954 = vmatpush3.msra.mxu1 %v6516_v0 }
 0xc86   :  { %10120 = vmatprep.subr.mxu0 %v6498_v63  ;;  %10955 = vmatprep.subr.mxu1 %v6515_v15 }
 0xc87   :  { %10121 = vmatpush3.msra.mxu0 %v6482_v36  ;;  %10956 = vmatpush3.msra.mxu1 %v6515_v15 }
 0xc88   :  { %10122 = vmatprep.subr.mxu0 %v6497_v31  ;;  %10957 = vmatprep.subr.mxu1 %v6514_v7 }
 0xc89   :  { %10123 = vmatpush3.msra.mxu0 %v6481_v49  ;;  %10958 = vmatpush3.msra.mxu1 %v6514_v7 }
 0xc8a   :  { %10124 = vmatprep.subr.mxu0 %v6496_v32  ;;  %10959 = vmatprep.subr.mxu1 %v6513_v2 }
 0xc8b   :  { %10125 = vmatpush3.msra.mxu0 %v6480_v11  ;;  %10960 = vmatpush3.msra.mxu1 %v6513_v2 }
 0xc8c   :  { %10126 = vmatprep.subr.mxu0 %v6495_v59  ;;  %10961 = vmatprep.subr.mxu1 %v6512_v22 }
 0xc8d   :  { %10127 = vmatpush3.msra.mxu0 %v6479_v21  ;;  %10962 = vmatpush3.msra.mxu1 %v6512_v22 }
 0xc8e   :  { %10128 = vmatprep.subr.mxu0 %v6494_v41  ;;  %10963 = vmatprep.subr.mxu1 %v6511_v46 }
 0xc8f   :  { %10129 = vmatpush3.msra.mxu0 %v6478_v35  ;;  %10964 = vmatpush3.msra.mxu1 %v6511_v46 }
 0xc90   :  { %10130 = vmatprep.subr.mxu0 %v6493_v44  ;;  %10965 = vmatprep.subr.mxu1 %v6510_v1 }
 0xc91   :  { %10131 = vmatpush3.msra.mxu0 %v6477_v30  ;;  %10966 = vmatpush3.msra.mxu1 %v6510_v1 }
 0xc92   :  { %10132 = vmatprep.subr.mxu0 %v6492_v58  ;;  %10967 = vmatprep.subr.mxu1 %v6509_v50 }
 0xc93   :  { %10133 = vmatpush3.msra.mxu0 %v6476_v20  ;;  %10968 = vmatpush3.msra.mxu1 %v6509_v50  ;;  %v7235_v20 = vld [vmem:[%s16404_s15] sm:$0xff] }
 0xc94   :  { %10134 = vmatprep.subr.mxu0 %v6491_v4  ;;  %10969 = vmatprep.subr.mxu1 %v6508_v19 }
 0xc95   :  { %10135 = vmatpush3.msra.mxu0 %v6475_v13  ;;  %10970 = vmatpush3.msra.mxu1 %v6508_v19 }
 0xc96   :  { %7118 = vmatmul.mubr.f32.vlgmr.msra.gmra.mxu0 %v6900_v40  ;;  %10971 = vmatprep.subr.mxu1 %v6507_v48  ;;  %v7300_v40 = vld [vmem:[#allocation20 + $0x1f8] sm:$0xff] }
 0xc97   :  { %7122 = vmatprep.mubr.f32.mxu0 %v6887_v61  ;;  %10972 = vmatpush3.msra.mxu1 %v6507_v48 }
 0xc98   :  { %10974 = vmatmul.mubr.f32.vlgmr.msra.gmra.mxu1 %v6888_v34  ;;  %10976 = vmatprep.subr.mxu1 %v16810_v37 }
 0xc99   :  { %10981 = vmatprep.subr.mxu0 %v16810_v37  ;;  %10978 = vmatprep.mubr.msk.f32.mxu1 %vm11444_vm6, %v16810_v37 }
 0xc9a   :  { %7123 = vmatmul.mubr.f32.gmra.mxu0 %v6886_v43 }
 0xc9b   :  { %10983 = vmatprep.mubr.msk.f32.mxu0 %vm11444_vm6, %v16810_v37 }
 0xd33   :  { %v10060_v9 = vpop.f32.mrf.mxu0 }
 0xd35   :  { %v10061_v3 = vpop.f32.mrf.mxu0 }
 0xd36   :  { %v10098_v10 = vpop.f32.mrf.mxu1  ;;  %v10062_v28 = vadd.f32 %v10061_v3, %v10060_v9  ;;  %v7252_v9 = vld [vmem:[#allocation20 + $0x78] sm:$0xff]  ;;  %v7267_v3 = vld [vmem:[#allocation20 + $0xf0] sm:$0xff] }
 0xd38   :  { %v10099_v53 = vpop.f32.mrf.mxu1 }
 0xd39   :  { %v10100_v33 = vadd.f32 %v10099_v53, %v10098_v10  ;;  %v7284_v10 = vld [vmem:[#allocation20 + $0x178] sm:$0xff]  ;;  %v7299_v53 = vld [vmem:[#allocation20 + $0x1f0] sm:$0xff] }
 0xd3b   :  { %v7045_v61 = vadd.f32 %v10100_v33, %v10062_v28  ;;  %v7282_v33 = vld [vmem:[#allocation20 + $0x168] sm:$0xff]  ;;  %v7249_v28 = vld [vmem:[#allocation20 + $0x60] sm:$0xff] }
 0xd3f   :  { %v10063_v17 = vpop.f32.mrf.mxu0 }
 0xd41   :  { %v10101_v38 = vpop.f32.mrf.mxu1  ;;  %v10064_v16 = vpop.f32.mrf.mxu0 }
 0xd42   :  { %v10065_v47 = vadd.f32 %v10064_v16, %v10063_v17  ;;  %v7251_v17 = vld [vmem:[#allocation20 + $0x70] sm:$0xff]  ;;  %v7266_v16 = vld [vmem:[#allocation20 + $0xe8] sm:$0xff] }
 0xd43   :  { %v10102_v18 = vpop.f32.mrf.mxu1 }
 0xd44   :  { %v10103_v57 = vadd.f32 %v10102_v18, %v10101_v38  ;;  %v7283_v38 = vld [vmem:[#allocation20 + $0x170] sm:$0xff]  ;;  %v7298_v18 = vld [vmem:[#allocation20 + $0x1e8] sm:$0xff] }
 0xd46   :  { %v7050_v39 = vadd.f32 %v10103_v57, %v10065_v47  ;;  %v7297_v57 = vld [vmem:[#allocation20 + $0x1e0] sm:$0xff]  ;;  %v7296_v47 = vld [vmem:[#allocation20 + $0x1d8] sm:$0xff] }
 0xd56   :  { %v10136_v8 = vpop.f32.mrf.mxu0 }
 0xd58   :  { %v10137_v55 = vpop.f32.mrf.mxu0  ;;  %v10975_v60 = vpop.f32.mrf.mxu1 }
 0xd59   :  { %v10138_v51 = vadd.f32 %v10137_v55, %v10136_v8  ;;  %v7250_v8 = vld [vmem:[#allocation20 + $0x68] sm:$0xff]  ;;  %v7265_v55 = vld [vmem:[#allocation20 + $0xe0] sm:$0xff] }
 0xd5a   :  { %v10139_v23 = vpop.f32.mrf.mxu0  ;;  %v7194_v27 = vpop.f32.mrf.mxu1 }
 0xd5b   :  { %v7120_v6 = vadd.f32 %v10138_v51, %v7045_v61  ;;  %v7281_v51 = vld [vmem:[#allocation20 + $0x160] sm:$0xff]  ;;  %v7248_v61 = vld [vmem:[#allocation20 + $0x58] sm:$0xff] }
 0xd5c   :  { %v10140_v42 = vpop.f32.mrf.mxu0 }
 0xd5d   :  { %v10141_v24 = vadd.f32 %v10140_v42, %v10139_v23  ;;  %v7195_v62 = vadd.f32 %v7194_v27, %v7120_v6  ;;  %v7264_v23 = vld [vmem:[#allocation20 + $0xd8] sm:$0xff]  ;;  %v7279_v6 = vld [vmem:[#allocation20 + $0x150] sm:$0xff]  ;;  %v7294_v27 = vld [vmem:[#allocation20 + $0x1c8] sm:$0xff] }
 0xd5e   :  { %v7280_v42 = vld [vmem:[#allocation20 + $0x158] sm:$0xff] }
 0xd5f   :  { %v7125_v34 = vadd.f32 %v10141_v24, %v7050_v39  ;;  %v7263_v39 = vld [vmem:[#allocation20 + $0xd0] sm:$0xff] }
 0xd60   :  { %v7247_v24 = vld [vmem:[#allocation20 + $0x50] sm:$0xff] }
 0xd61   :  { %v7200_v5 = vadd.f32 %v10975_v60, %v7125_v34  ;;  %v7295_v60 = vld [vmem:[#allocation20 + $0x1d0] sm:$0xff]  ;;  %v7262_v34 = vld [vmem:[#allocation20 + $0xc8] sm:$0xff] }
 0xd63   :  { %v7203_v0 = vsel %vm1372_vm4, %v7200_v5, 0.0 }
 0xd64   :  { %v7204_v12 = vadd.f32 %v7203_v0, %v7195_v62  ;;  %v7261_v0 = vld [vmem:[#allocation20 + $0xc0] sm:$0xff] }
 0xd66   :  { %v7205_v45 = vrot.slane %v7204_v12, 4 }
 0xd68   :  { %v7206_v56 = vadd.f32 %v7205_v45, %v7204_v12  ;;  %v7293_v12 = vld [vmem:[#allocation20 + $0x1c0] sm:$0xff] }
 0xd69   :  { %v7245_v45 = vld [vmem:[#allocation20 + $0x40] sm:$0xff] }
 0xd6a   :  { %v7207_v63 = vrot.slane %v7206_v56, 2 }
 0xd6c   :  { %v7208_v15 = vadd.f32 %v7207_v63, %v7206_v56  ;;  %v7277_v56 = vld [vmem:[#allocation20 + $0x140] sm:$0xff]  ;;  %v7260_v63 = vld [vmem:[#allocation20 + $0xb8] sm:$0xff] }
 0xd6e   :  { %v7209_v36 = vrot.slane %v7208_v15, 1 }
 0xd70   :  { %v7210_v31 = vadd.f32 %v7209_v36, %v7208_v15  ;;  %v7292_v15 = vld [vmem:[#allocation20 + $0x1b8] sm:$0xff] }
 0xd71   :  { %v7244_v36 = vld [vmem:[#allocation20 + $0x38] sm:$0xff] }
 0xd72   :  { %v7211_v7 = vmul.f32 0.071428575, %v7210_v31  ;;  %v7276_v31 = vld [vmem:[#allocation20 + $0x138] sm:$0xff] }
 0xd74   :  { %v7212_v49 = vsub.f32 %v7195_v62, %v7211_v7  ;;  %v7213_v32 = vsub.f32 %v7200_v5, %v7211_v7  ;;  %v7246_v5 = vld [vmem:[#allocation20 + $0x48] sm:$0xff]  ;;  %v7259_v7 = vld [vmem:[#allocation20 + $0xb0] sm:$0xff] }
 0xd75   :  { %v7278_v62 = vld [vmem:[#allocation20 + $0x148] sm:$0xff] }
 0xd76   :  { %v7214_v2 = vmul.f32 %v7212_v49, %v7212_v49  ;;  %v7215_v11 = vmul.f32 %v7213_v32, %v7213_v32 }
 0xd78   :  { %v7216_v59 = vsel %vm1372_vm4, %v7215_v11, 0.0  ;;  %vm7349_vm4 = vcmask 56320   ;;  %v7258_v11 = vld [vmem:[#allocation20 + $0xa8] sm:$0xff] }
 0xd79   :  { %v7217_v22 = vadd.f32 %v7216_v59, %v7214_v2  ;;  %v7275_v2 = vld [vmem:[#allocation20 + $0x130] sm:$0xff]  ;;  %v7290_v59 = vld [vmem:[#allocation20 + $0x1a8] sm:$0xff] }
 0xd7b   :  { %v7218_v26 = vrot.slane %v7217_v22, 4 }
 0xd7d   :  { %v7219_v29 = vadd.f32 %v7218_v26, %v7217_v22  ;;  %v7242_v22 = vld [vmem:[#allocation20 + $0x28] sm:$0xff] }
 0xd7e   :  { %v7274_v26 = vld [vmem:[#allocation20 + $0x128] sm:$0xff] }
 0xd7f   :  { %v7220_v21 = vrot.slane %v7219_v29, 2 }
 0xd81   :  { %v7221_v41 = vadd.f32 %v7220_v21, %v7219_v29  ;;  %v7257_v29 = vld [vmem:[#allocation20 + $0xa0] sm:$0xff] }
 0xd82   :  { %v7289_v21 = vld [vmem:[#allocation20 + $0x1a0] sm:$0xff] }
 0xd83   :  { %v7222_v46 = vrot.slane %v7221_v41, 1 }
 0xd85   :  { %v7223_v35 = vadd.f32 %v7222_v46, %v7221_v41  ;;  %v7241_v41 = vld [vmem:[#allocation20 + $0x20] sm:$0xff] }
 0xd86   :  { %v7273_v46 = vld [vmem:[#allocation20 + $0x120] sm:$0xff] }
 0xd87   :  { %v7224_v44 = vmul.f32 0.071428575, %v7223_v35  ;;  %v7256_v35 = vld [vmem:[#allocation20 + $0x98] sm:$0xff] }
 0xd89   :  { %v7225_v1 = vadd.f32 1e-05, %v7224_v44  ;;  %v7288_v44 = vld [vmem:[#allocation20 + $0x198] sm:$0xff] }
 0xd8b   :  { %11121 = vrsqrt.f32 %v7225_v1  ;;  %v7240_v1 = vld [vmem:[#allocation20 + $0x18] sm:$0xff] }
 0xd98   :  { %v11122_v14 = vpop.eup %11121 }
 0xd99   :  { %v7228_v30 = vmul.f32 %v11122_v14, %v7213_v32  ;;  %v7227_v58 = vmul.f32 %v11122_v14, %v7212_v49  ;;  %v7291_v49 = vld [vmem:[#allocation20 + $0x1b0] sm:$0xff]  ;;  %v7272_v14 = vld [vmem:[#allocation20 + $0x118] sm:$0xff] }
 0xd9a   :  { %v7243_v32 = vld [vmem:[#allocation20 + $0x30] sm:$0xff] }
 0xd9b   :  { %v7232_v50 = vmul.f32 0.1, %v7228_v30  ;;  %vm7229_vm3 = vcmp.gt.f32.partialorder %v7227_v58, 0.0  ;;  %v7231_v52 = vmul.f32 0.1, %v7227_v58  ;;  %vm7230_vm10 = vcmp.gt.f32.partialorder %v7228_v30, 0.0 }
 0xd9d   :  { %v7233_v43 = vsel %vm7229_vm3, %v7227_v58, %v7231_v52  ;;  %v7234_v4 = vsel %vm7230_vm10, %v7228_v30, %v7232_v50  ;;  %v7255_v30 = vld [vmem:[#allocation20 + $0x90] sm:$0xff] }
 0xd9e   :  { %10977 = vmatpush3.msk.msra.mxu1 %vm1160_vm5, %v7233_v43  ;;  %v7512_v19 = vrot.slane %v7233_v43, 7  ;;  %10982 = vmatpush3.msk.msra.mxu0 %vm1160_vm5, %v7233_v43  ;;  %v7513_v13 = vrot.slane %v7234_v4, 7  ;;  %v7287_v58 = vld [vmem:[#allocation20 + $0x190] sm:$0xff]  ;;  %v7238_v43 = vld [vmem:[#allocation20 + $0x8] sm:$0xff] }
 0xd9f   :  { %10984 = vmatmul.mubr.msk.f32.vlgmr.msra.gmra.mxu0 %vm7349_vm4, %v7236_v54  ;;  %10979 = vmatmul.mubr.msk.f32.vlgmr.msra.gmra.mxu1 %vm7349_vm4, %v7235_v20  ;;  %v7239_v50 = vld [vmem:[#allocation20 + $0x10] sm:$0xff]  ;;  %v7270_v4 = vld [vmem:[#allocation20 + $0x108] sm:$0xff] }
 0xda0   :  { %10986 = vmatprep.subr.mxu1 %v16810_v37  ;;  %10991 = vmatprep.subr.mxu0 %v16810_v37  ;;  %v7514_v48 = vsel %vm879_vm2, %v7512_v19, %v7513_v13  ;;  %v7271_v52 = vld [vmem:[#allocation20 + $0x110] sm:$0xff]  ;;  %v7253_v19 = vld [vmem:[#allocation20 + $0x80] sm:$0xff] }
 0xda1   :  { %10987 = vmatpush3.msk.msra.mxu1 %vm1160_vm5, %v7514_v48  ;;  %10992 = vmatpush3.msk.msra.mxu0 %vm1160_vm5, %v7514_v48  ;;  %v7285_v13 = vld [vmem:[#allocation20 + $0x180] sm:$0xff]  ;;  %vm7678_vm5 = vcmask 1043456  }
 0xda2   :  { %10993 = vmatprep.mubr.msk.f32.mxu0 %vm11444_vm6, %v16810_v37  ;;  %10988 = vmatprep.mubr.msk.f32.mxu1 %vm11444_vm6, %v16810_v37  ;;  %v7237_v48 = vld [vmem:[#allocation20] sm:$0xff] }
 0xda3   :  { %10994 = vmatmul.mubr.msk.f32.vlgmr.msra.gmra.mxu0 %vm7349_vm4, %v7236_v54  ;;  %10989 = vmatmul.mubr.msk.f32.vlgmr.msra.gmra.mxu1 %vm7349_vm4, %v7235_v20  ;;  %v7254_v54 = vld [vmem:[#allocation20 + $0x88] sm:$0xff] }
 0xda4   :  { %10168 = vmatprep.subr.mxu1 %v7268_v25  ;;  %10203 = vmatprep.subr.mxu0 %v7300_v40  ;;  %v7286_v20 = vld [vmem:[#allocation20 + $0x188] sm:$0xff]  ;;  %v7269_v25 = vld [vmem:[#allocation20 + $0x100] sm:$0xff]  ;;  %v7332_v40 = vld [vmem:[#allocation20 + $0x2f8] sm:$0xff] }
 0xda5   :  { %10169 = vmatpush3.msra.mxu1 %v7252_v9  ;;  %10204 = vmatpush3.msra.mxu0 %v7284_v10 }
 0xda6   :  { %10170 = vmatprep.subr.mxu1 %v7267_v3  ;;  %10205 = vmatprep.subr.mxu0 %v7299_v53 }
 0xda7   :  { %10171 = vmatpush3.msra.mxu1 %v7251_v17  ;;  %10206 = vmatpush3.msra.mxu0 %v7283_v38 }
 0xda8   :  { %10172 = vmatprep.subr.mxu1 %v7266_v16  ;;  %10207 = vmatprep.subr.mxu0 %v7298_v18 }
 0xda9   :  { %10173 = vmatpush3.msra.mxu1 %v7250_v8  ;;  %10208 = vmatpush3.msra.mxu0 %v7282_v33 }
 0xdaa   :  { %10174 = vmatprep.subr.mxu1 %v7265_v55  ;;  %10209 = vmatprep.subr.mxu0 %v7297_v57 }
 0xdab   :  { %10175 = vmatpush3.msra.mxu1 %v7249_v28  ;;  %10210 = vmatpush3.msra.mxu0 %v7281_v51 }
 0xdac   :  { %10176 = vmatprep.subr.mxu1 %v7264_v23  ;;  %10211 = vmatprep.subr.mxu0 %v7296_v47 }
 0xdad   :  { %10177 = vmatpush3.msra.mxu1 %v7248_v61  ;;  %10212 = vmatpush3.msra.mxu0 %v7280_v42  ;;  %v7316_v42 = vld [vmem:[#allocation20 + $0x278] sm:$0xff] }
 0xdae   :  { %10178 = vmatprep.subr.mxu1 %v7263_v39  ;;  %10213 = vmatprep.subr.mxu0 %v7295_v60  ;;  %v7348_v39 = vld [vmem:[#allocation20 + $0x378] sm:$0xff] }
 0xdaf   :  { %10179 = vmatpush3.msra.mxu1 %v7247_v24  ;;  %10214 = vmatpush3.msra.mxu0 %v7279_v6  ;;  %v7331_v24 = vld [vmem:[#allocation20 + $0x2f0] sm:$0xff] }
 0xdb0   :  { %10180 = vmatprep.subr.mxu1 %v7262_v34  ;;  %10215 = vmatprep.subr.mxu0 %v7294_v27  ;;  %v7315_v6 = vld [vmem:[#allocation20 + $0x270] sm:$0xff]  ;;  %v7330_v27 = vld [vmem:[#allocation20 + $0x2e8] sm:$0xff] }
 0xdb1   :  { %10181 = vmatpush3.msra.mxu1 %v7246_v5  ;;  %10216 = vmatpush3.msra.mxu0 %v7278_v62  ;;  %v7347_v34 = vld [vmem:[#allocation20 + $0x370] sm:$0xff]  ;;  %v7314_v5 = vld [vmem:[#allocation20 + $0x268] sm:$0xff] }
 0xdb2   :  { %10182 = vmatprep.subr.mxu1 %v7261_v0  ;;  %10217 = vmatprep.subr.mxu0 %v7293_v12  ;;  %v7346_v62 = vld [vmem:[#allocation20 + $0x368] sm:$0xff]  ;;  %v7329_v0 = vld [vmem:[#allocation20 + $0x2e0] sm:$0xff] }
 0xdb3   :  { %10183 = vmatpush3.msra.mxu1 %v7245_v45  ;;  %10218 = vmatpush3.msra.mxu0 %v7277_v56  ;;  %v7313_v12 = vld [vmem:[#allocation20 + $0x260] sm:$0xff]  ;;  %v7328_v56 = vld [vmem:[#allocation20 + $0x2d8] sm:$0xff] }
 0xdb4   :  { %10184 = vmatprep.subr.mxu1 %v7260_v63  ;;  %10219 = vmatprep.subr.mxu0 %v7292_v15  ;;  %v7345_v45 = vld [vmem:[#allocation20 + $0x360] sm:$0xff]  ;;  %v7312_v63 = vld [vmem:[#allocation20 + $0x258] sm:$0xff] }
 0xdb5   :  { %10185 = vmatpush3.msra.mxu1 %v7244_v36  ;;  %10220 = vmatpush3.msra.mxu0 %v7276_v31  ;;  %v7344_v15 = vld [vmem:[#allocation20 + $0x358] sm:$0xff]  ;;  %v7327_v36 = vld [vmem:[#allocation20 + $0x2d0] sm:$0xff] }
 0xdb6   :  { %10186 = vmatprep.subr.mxu1 %v7259_v7  ;;  %10221 = vmatprep.subr.mxu0 %v7291_v49  ;;  %v7311_v31 = vld [vmem:[#allocation20 + $0x250] sm:$0xff]  ;;  %v7326_v49 = vld [vmem:[#allocation20 + $0x2c8] sm:$0xff] }
 0xdb7   :  { %10187 = vmatpush3.msra.mxu1 %v7243_v32  ;;  %10222 = vmatpush3.msra.mxu0 %v7275_v2  ;;  %v7343_v7 = vld [vmem:[#allocation20 + $0x350] sm:$0xff]  ;;  %v7310_v32 = vld [vmem:[#allocation20 + $0x248] sm:$0xff] }
 0xdb8   :  { %10188 = vmatprep.subr.mxu1 %v7258_v11  ;;  %10223 = vmatprep.subr.mxu0 %v7290_v59  ;;  %v7342_v2 = vld [vmem:[#allocation20 + $0x348] sm:$0xff]  ;;  %v7325_v11 = vld [vmem:[#allocation20 + $0x2c0] sm:$0xff] }
 0xdb9   :  { %10189 = vmatpush3.msra.mxu1 %v7242_v22  ;;  %10224 = vmatpush3.msra.mxu0 %v7274_v26  ;;  %v7309_v59 = vld [vmem:[#allocation20 + $0x240] sm:$0xff] }
 0xdba   :  { %10190 = vmatprep.subr.mxu1 %v7257_v29  ;;  %10225 = vmatprep.subr.mxu0 %v7289_v21  ;;  %v7341_v22 = vld [vmem:[#allocation20 + $0x340] sm:$0xff]  ;;  %v7324_v29 = vld [vmem:[#allocation20 + $0x2b8] sm:$0xff] }
 0xdbb   :  { %10191 = vmatpush3.msra.mxu1 %v7241_v41  ;;  %10226 = vmatpush3.msra.mxu0 %v7273_v46  ;;  %v7308_v21 = vld [vmem:[#allocation20 + $0x238] sm:$0xff] }
 0xdbc   :  { %10192 = vmatprep.subr.mxu1 %v7256_v35  ;;  %10227 = vmatprep.subr.mxu0 %v7288_v44  ;;  %v7340_v41 = vld [vmem:[#allocation20 + $0x338] sm:$0xff]  ;;  %v7323_v35 = vld [vmem:[#allocation20 + $0x2b0] sm:$0xff] }
 0xdbd   :  { %10193 = vmatpush3.msra.mxu1 %v7240_v1  ;;  %10228 = vmatpush3.msra.mxu0 %v7272_v14  ;;  %v7307_v44 = vld [vmem:[#allocation20 + $0x230] sm:$0xff] }
 0xdbe   :  { %10194 = vmatprep.subr.mxu1 %v7255_v30  ;;  %10229 = vmatprep.subr.mxu0 %v7287_v58  ;;  %v7339_v14 = vld [vmem:[#allocation20 + $0x330] sm:$0xff]  ;;  %v7322_v30 = vld [vmem:[#allocation20 + $0x2a8] sm:$0xff] }
 0xdbf   :  { %10195 = vmatpush3.msra.mxu1 %v7239_v50  ;;  %10230 = vmatpush3.msra.mxu0 %v7271_v52  ;;  %v7306_v58 = vld [vmem:[#allocation20 + $0x228] sm:$0xff]  ;;  %v7321_v52 = vld [vmem:[#allocation20 + $0x2a0] sm:$0xff] }
 0xdc0   :  { %10196 = vmatprep.subr.mxu1 %v7254_v54  ;;  %10231 = vmatprep.subr.mxu0 %v7286_v20  ;;  %v7338_v50 = vld [vmem:[#allocation20 + $0x328] sm:$0xff]  ;;  %v7305_v54 = vld [vmem:[#allocation20 + $0x220] sm:$0xff] }
 0xdc1   :  { %10197 = vmatpush3.msra.mxu1 %v7238_v43  ;;  %10232 = vmatpush3.msra.mxu0 %v7270_v4  ;;  %v7337_v20 = vld [vmem:[#allocation20 + $0x320] sm:$0xff]  ;;  %v7320_v43 = vld [vmem:[#allocation20 + $0x298] sm:$0xff] }
 0xdc2   :  { %10198 = vmatprep.subr.mxu1 %v7253_v19  ;;  %10233 = vmatprep.subr.mxu0 %v7285_v13  ;;  %v7304_v4 = vld [vmem:[#allocation20 + $0x218] sm:$0xff]  ;;  %v7319_v13 = vld [vmem:[#allocation20 + $0x290] sm:$0xff] }
 0xdc3   :  { %10199 = vmatpush3.msra.mxu1 %v7237_v48  ;;  %10234 = vmatpush3.msra.mxu0 %v7269_v25  ;;  %v7336_v19 = vld [vmem:[#allocation20 + $0x318] sm:$0xff]  ;;  %v7303_v48 = vld [vmem:[#allocation20 + $0x210] sm:$0xff] }
 0xdc4   :  { %10238 = vmatprep.subr.mxu1 %v7332_v40  ;;  %10996 = vmatprep.subr.mxu0 %v16810_v37  ;;  %v7335_v25 = vld [vmem:[#allocation20 + $0x310] sm:$0xff]  ;;  %v7318_v40 = vld [vmem:[#allocation20 + $0x288] sm:$0xff] }
 0xe5f   :  { %v16116_v9 = vpop.f32.mrf.mxu0  ;;  %v16118_v10 = vpop.f32.mrf.mxu1 }
 0xe60   :  { %v7503_v16 = vrot.slane %v16116_v9, 1  ;;  %v7500_v55 = vrot.slane %v16118_v10, 1  ;;  %v7507_v46 = vrot.slane %v16116_v9, 2 }
 0xe61   :  { %v10985_v3 = vpop.f32.mrf.mxu0  ;;  %v10980_v53 = vpop.f32.mrf.mxu1 }
 0xe62   :  { %v7334_v3 = vld [vmem:[#allocation20 + $0x308] sm:$0xff]  ;;  %v7317_v53 = vld [vmem:[#allocation20 + $0x280] sm:$0xff] }
 0xe63   :  { %v16120_v17 = vpop.f32.mrf.mxu0  ;;  %v16122_v38 = vpop.f32.mrf.mxu1 }
 0xe64   :  { %v7665_v18 = vrot.slane %v16120_v17, 4  ;;  %v9195_v8 = vrot.slane %v16120_v17, 5  ;;  %v7664_v33 = vrot.slane %v16122_v38, 4  ;;  %v9194_v57 = vrot.slane %v16122_v38, 5 }
 0xe65   :  { %v10995_v28 = vpop.f32.mrf.mxu0  ;;  %v10990_v51 = vpop.f32.mrf.mxu1  ;;  %v9197_v26 = vrot.slane %v16120_v17, 6  ;;  %v9196_v17 = vrot.slane %v16122_v38, 6 }
 0xe66   :  { %v7680_v23 = vsel %vm7678_vm5, %v16116_v9, %v7665_v18  ;;  %v7682_v47 = vsel %vm7678_vm5, %v7503_v16, %v9195_v8  ;;  %v7679_v61 = vsel %vm7678_vm5, %v16118_v10, %v7664_v33  ;;  %v7681_v60 = vsel %vm7678_vm5, %v7500_v55, %v9194_v57  ;;  %v7302_v9 = vld [vmem:[#allocation20 + $0x208] sm:$0xff]  ;;  %v7301_v18 = vld [vmem:[#allocation20 + $0x200] sm:$0xff] }
 0xe67   :  { %7750 = vmatprep.mubr.f32.mxu1 %v7680_v23  ;;  %7820 = vmatprep.mubr.f32.mxu0 %v7682_v47  ;;  %v7684_v1 = vsel %vm7678_vm5, %v7507_v46, %v9197_v26  ;;  %v9198_v16 = vrot.slane %v16122_v38, 7  ;;  %v7333_v8 = vld [vmem:[#allocation20 + $0x300] sm:$0xff]  ;;  %v7505_v33 = vrot.slane %v16118_v10, 2  ;;  %v7509_v55 = vrot.slane %v16118_v10, 3  ;;  %v7989_v46 = vld [vmem:[%s16408_s19] sm:$0xff] }
 0xe68   :  { %7751 = vmatmul.mubr.f32.vlgmr.msra.gmra.mxu1 %v7679_v61  ;;  %7821 = vmatmul.mubr.f32.vlgmr.msra.gmra.mxu0 %v7681_v60 }
 0xe69   :  { %10239 = vmatpush3.msra.mxu1 %v7316_v42  ;;  %10997 = vmatpush3.msra.mxu0 %v7348_v39  ;;  %v7683_v38 = vsel %vm7678_vm5, %v7505_v33, %v9196_v17  ;;  %v7685_v57 = vsel %vm7678_vm5, %v7509_v55, %v9198_v16  ;;  %v8077_v17 = vld [vmem:[#allocation22 + $0x2b8] sm:$0xff]  ;;  %v8012_v16 = vld [vmem:[#allocation22 + $0xb0] sm:$0xff]  ;;  %v8075_v33 = vld [vmem:[#allocation22 + $0x2a8] sm:$0xff] }
 0xe6a   :  { %10240 = vmatprep.subr.mxu1 %v7331_v24  ;;  %10998 = vmatprep.subr.mxu0 %v16810_v37  ;;  %v8010_v55 = vld [vmem:[#allocation22 + $0xa0] sm:$0xff] }
 0xe6b   :  { %10241 = vmatpush3.msra.mxu1 %v7315_v6  ;;  %10999 = vmatpush3.msra.mxu0 %v7347_v34 }
 0xe6c   :  { %10242 = vmatprep.subr.mxu1 %v7330_v27  ;;  %11000 = vmatprep.subr.mxu0 %v16810_v37 }
 0xe6d   :  { %10243 = vmatpush3.msra.mxu1 %v7314_v5  ;;  %11001 = vmatpush3.msra.mxu0 %v7346_v62 }
 0xe6e   :  { %10244 = vmatprep.subr.mxu1 %v7329_v0  ;;  %11002 = vmatprep.subr.mxu0 %v16810_v37 }
 0xe6f   :  { %10245 = vmatpush3.msra.mxu1 %v7313_v12  ;;  %11003 = vmatpush3.msra.mxu0 %v7345_v45 }
 0xe70   :  { %10246 = vmatprep.subr.mxu1 %v7328_v56  ;;  %11004 = vmatprep.subr.mxu0 %v16810_v37 }
 0xe71   :  { %10247 = vmatpush3.msra.mxu1 %v7312_v63  ;;  %11005 = vmatpush3.msra.mxu0 %v7344_v15 }
 0xe72   :  { %10248 = vmatprep.subr.mxu1 %v7327_v36  ;;  %11006 = vmatprep.subr.mxu0 %v16810_v37 }
 0xe73   :  { %10249 = vmatpush3.msra.mxu1 %v7311_v31  ;;  %11007 = vmatpush3.msra.mxu0 %v7343_v7 }
 0xe74   :  { %10250 = vmatprep.subr.mxu1 %v7326_v49  ;;  %11008 = vmatprep.subr.mxu0 %v16810_v37 }
 0xe75   :  { %10251 = vmatpush3.msra.mxu1 %v7310_v32  ;;  %11009 = vmatpush3.msra.mxu0 %v7342_v2 }
 0xe76   :  { %10252 = vmatprep.subr.mxu1 %v7325_v11  ;;  %11010 = vmatprep.subr.mxu0 %v16810_v37 }
 0xe77   :  { %10253 = vmatpush3.msra.mxu1 %v7309_v59  ;;  %11011 = vmatpush3.msra.mxu0 %v7341_v22 }
 0xe78   :  { %10254 = vmatprep.subr.mxu1 %v7324_v29  ;;  %11012 = vmatprep.subr.mxu0 %v16810_v37 }
 0xe79   :  { %10255 = vmatpush3.msra.mxu1 %v7308_v21  ;;  %11013 = vmatpush3.msra.mxu0 %v7340_v41 }
 0xe7a   :  { %10256 = vmatprep.subr.mxu1 %v7323_v35  ;;  %7890 = vmatprep.mubr.f32.mxu1 %v7684_v1 }
 0xe7b   :  { %11014 = vmatprep.subr.mxu0 %v16810_v37  ;;  %10257 = vmatpush3.msra.mxu1 %v7307_v44  ;;  %v7988_v44 = vld [vmem:[%s16407_s18] sm:$0xff] }
 0xe7c   :  { %11015 = vmatpush3.msra.mxu0 %v7339_v14  ;;  %10258 = vmatprep.subr.mxu1 %v7322_v30  ;;  %v8021_v14 = vld [vmem:[#allocation22 + $0xf8] sm:$0xff] }
 0xe7d   :  { %11016 = vmatprep.subr.mxu0 %v16810_v37  ;;  %10259 = vmatpush3.msra.mxu1 %v7306_v58  ;;  %v8085_v30 = vld [vmem:[#allocation22 + $0x2f8] sm:$0xff]  ;;  %v8020_v58 = vld [vmem:[#allocation22 + $0xf0] sm:$0xff] }
 0xe7e   :  { %11017 = vmatpush3.msra.mxu0 %v7338_v50  ;;  %10260 = vmatprep.subr.mxu1 %v7321_v52  ;;  %v8084_v50 = vld [vmem:[#allocation22 + $0x2f0] sm:$0xff]  ;;  %v8019_v52 = vld [vmem:[#allocation22 + $0xe8] sm:$0xff] }
 0xe7f   :  { %11018 = vmatprep.subr.mxu0 %v16810_v37  ;;  %10261 = vmatpush3.msra.mxu1 %v7305_v54  ;;  %v8083_v54 = vld [vmem:[#allocation22 + $0x2e8] sm:$0xff] }
 0xe80   :  { %11019 = vmatpush3.msra.mxu0 %v7337_v20  ;;  %10262 = vmatprep.subr.mxu1 %v7320_v43  ;;  %v8018_v20 = vld [vmem:[#allocation22 + $0xe0] sm:$0xff] }
 0xe81   :  { %11020 = vmatprep.subr.mxu0 %v16810_v37  ;;  %10263 = vmatpush3.msra.mxu1 %v7304_v4  ;;  %v8082_v43 = vld [vmem:[#allocation22 + $0x2e0] sm:$0xff]  ;;  %v8017_v4 = vld [vmem:[#allocation22 + $0xd8] sm:$0xff] }
 0xe82   :  { %11021 = vmatpush3.msra.mxu0 %v7336_v19  ;;  %10264 = vmatprep.subr.mxu1 %v7319_v13  ;;  %v8081_v19 = vld [vmem:[#allocation22 + $0x2d8] sm:$0xff]  ;;  %v8016_v13 = vld [vmem:[#allocation22 + $0xd0] sm:$0xff] }
 0xe83   :  { %11022 = vmatprep.subr.mxu0 %v16810_v37  ;;  %10265 = vmatpush3.msra.mxu1 %v7303_v48  ;;  %v8080_v48 = vld [vmem:[#allocation22 + $0x2d0] sm:$0xff] }
 0xe84   :  { %11023 = vmatpush3.msra.mxu0 %v7335_v25  ;;  %10266 = vmatprep.subr.mxu1 %v7318_v40  ;;  %v8015_v25 = vld [vmem:[#allocation22 + $0xc8] sm:$0xff] }
 0xe85   :  { %11024 = vmatprep.subr.mxu0 %v16810_v37  ;;  %10267 = vmatpush3.msra.mxu1 %v7302_v9  ;;  %v8079_v40 = vld [vmem:[#allocation22 + $0x2c8] sm:$0xff]  ;;  %v8014_v9 = vld [vmem:[#allocation22 + $0xc0] sm:$0xff] }
 0xe86   :  { %11025 = vmatpush3.msra.mxu0 %v7334_v3  ;;  %10268 = vmatprep.subr.mxu1 %v7317_v53  ;;  %v8078_v3 = vld [vmem:[#allocation22 + $0x2c0] sm:$0xff]  ;;  %v8013_v53 = vld [vmem:[#allocation22 + $0xb8] sm:$0xff] }
 0xe87   :  { %11026 = vmatprep.subr.mxu0 %v16810_v37  ;;  %10269 = vmatpush3.msra.mxu1 %v7301_v18  ;;  %v8076_v18 = vld [vmem:[#allocation22 + $0x2b0] sm:$0xff] }
 0xe88   :  { %11027 = vmatpush3.msra.mxu0 %v7333_v8  ;;  %11028 = vmatprep.mubr.msk.f32.mxu0 %vm11444_vm6, %v16810_v37  ;;  %v8011_v8 = vld [vmem:[#allocation22 + $0xa8] sm:$0xff] }
 0xe89   :  { %7891 = vmatmul.mubr.f32.vlgmr.msra.gmra.mxu1 %v7683_v38  ;;  %11029 = vmatmul.mubr.f32.vlgmr.msra.gmra.mxu0 %v7685_v57  ;;  %v8074_v38 = vld [vmem:[#allocation22 + $0x2a0] sm:$0xff]  ;;  %v8009_v57 = vld [vmem:[#allocation22 + $0x98] sm:$0xff] }
 0xe8a   :  { %11031 = vmatprep.subr.mxu1 %v16810_v37  ;;  %11036 = vmatprep.subr.mxu0 %v16810_v37 }
 0xe8b   :  { %11038 = vmatprep.mubr.msk.f32.mxu0 %vm11444_vm6, %v16810_v37  ;;  %11033 = vmatprep.mubr.msk.f32.mxu1 %vm11444_vm6, %v16810_v37 }
 0xf28   :  { %v10200_v10 = vpop.f32.mrf.mxu1  ;;  %v10235_v28 = vpop.f32.mrf.mxu0 }
 0xf2a   :  { %v10201_v51 = vpop.f32.mrf.mxu1  ;;  %v10236_v23 = vpop.f32.mrf.mxu0 }
 0xf2b   :  { %v10202_v47 = vadd.f32 %v10201_v51, %v10200_v10  ;;  %v10237_v61 = vadd.f32 %v10236_v23, %v10235_v28  ;;  %v8073_v10 = vld [vmem:[#allocation22 + $0x298] sm:$0xff]  ;;  %v8008_v28 = vld [vmem:[#allocation22 + $0x90] sm:$0xff]  ;;  %v8007_v23 = vld [vmem:[#allocation22 + $0x88] sm:$0xff] }
 0xf2c   :  { %v8072_v51 = vld [vmem:[#allocation22 + $0x290] sm:$0xff] }
 0xf2d   :  { %v7823_v6 = vadd.f32 %v10237_v61, %v10202_v47  ;;  %v8071_v47 = vld [vmem:[#allocation22 + $0x288] sm:$0xff]  ;;  %v8006_v61 = vld [vmem:[#allocation22 + $0x80] sm:$0xff] }
 0xf49   :  { %v10270_v42 = vpop.f32.mrf.mxu1  ;;  %v7962_v39 = vpop.f32.mrf.mxu0 }
 0xf4b   :  { %v10271_v60 = vpop.f32.mrf.mxu1  ;;  %v11030_v24 = vpop.f32.mrf.mxu0 }
 0xf4c   :  { %v10272_v34 = vadd.f32 %v10271_v60, %v10270_v42  ;;  %v8070_v42 = vld [vmem:[#allocation22 + $0x280] sm:$0xff]  ;;  %v8069_v60 = vld [vmem:[#allocation22 + $0x278] sm:$0xff]  ;;  %v8004_v24 = vld [vmem:[#allocation22 + $0x70] sm:$0xff] }
 0xf4e   :  { %v7893_v27 = vadd.f32 %v10272_v34, %v7823_v6  ;;  %v8068_v6 = vld [vmem:[#allocation22 + $0x270] sm:$0xff]  ;;  %v8003_v34 = vld [vmem:[#allocation22 + $0x68] sm:$0xff] }
 0xf50   :  { %v7963_v5 = vadd.f32 %v7962_v39, %v7893_v27  ;;  %v8005_v39 = vld [vmem:[#allocation22 + $0x78] sm:$0xff]  ;;  %v8067_v27 = vld [vmem:[#allocation22 + $0x268] sm:$0xff] }
 0xf52   :  { %v7966_v62 = vrot.slane %v7963_v5, 4 }
 0xf54   :  { %v7967_v0 = vadd.f32 %v7966_v62, %v7963_v5  ;;  %v8066_v62 = vld [vmem:[#allocation22 + $0x260] sm:$0xff] }
 0xf56   :  { %v7968_v12 = vrot.slane %v7967_v0, 2 }
 0xf58   :  { %v7969_v45 = vadd.f32 %v7968_v12, %v7967_v0  ;;  %v8001_v0 = vld [vmem:[#allocation22 + $0x58] sm:$0xff] }
 0xf59   :  { %v8065_v12 = vld [vmem:[#allocation22 + $0x258] sm:$0xff] }
 0xf5a   :  { %v7970_v56 = vrot.slane %v7969_v45, 1 }
 0xf5c   :  { %v7971_v63 = vadd.f32 %v7970_v56, %v7969_v45  ;;  %v8000_v45 = vld [vmem:[#allocation22 + $0x50] sm:$0xff] }
 0xf5d   :  { %v8064_v56 = vld [vmem:[#allocation22 + $0x250] sm:$0xff] }
 0xf5e   :  { %v7972_v15 = vmul.f32 0.125, %v7971_v63  ;;  %v7999_v63 = vld [vmem:[#allocation22 + $0x48] sm:$0xff] }
 0xf60   :  { %v7973_v36 = vsub.f32 %v7963_v5, %v7972_v15  ;;  %v8002_v5 = vld [vmem:[#allocation22 + $0x60] sm:$0xff]  ;;  %v8063_v15 = vld [vmem:[#allocation22 + $0x248] sm:$0xff] }
 0xf62   :  { %v7974_v31 = vmul.f32 %v7973_v36, %v7973_v36 }
 0xf64   :  { %v7975_v7 = vrot.slane %v7974_v31, 4 }
 0xf66   :  { %v7976_v49 = vadd.f32 %v7975_v7, %v7974_v31  ;;  %v8062_v31 = vld [vmem:[#allocation22 + $0x240] sm:$0xff]  ;;  %v7997_v7 = vld [vmem:[#allocation22 + $0x38] sm:$0xff] }
 0xf68   :  { %v7977_v32 = vrot.slane %v7976_v49, 2 }
 0xf6a   :  { %v7978_v2 = vadd.f32 %v7977_v32, %v7976_v49  ;;  %v8061_v49 = vld [vmem:[#allocation22 + $0x238] sm:$0xff]  ;;  %v7996_v32 = vld [vmem:[#allocation22 + $0x30] sm:$0xff] }
 0xf6c   :  { %v7979_v11 = vrot.slane %v7978_v2, 1 }
 0xf6e   :  { %v7980_v59 = vadd.f32 %v7979_v11, %v7978_v2  ;;  %v8060_v2 = vld [vmem:[#allocation22 + $0x230] sm:$0xff]  ;;  %v7995_v11 = vld [vmem:[#allocation22 + $0x28] sm:$0xff] }
 0xf70   :  { %v7981_v22 = vmul.f32 0.125, %v7980_v59  ;;  %v8059_v59 = vld [vmem:[#allocation22 + $0x228] sm:$0xff] }
 0xf72   :  { %v7982_v26 = vadd.f32 1e-05, %v7981_v22  ;;  %v7994_v22 = vld [vmem:[#allocation22 + $0x20] sm:$0xff] }
 0xf74   :  { %11123 = vrsqrt.f32 %v7982_v26  ;;  %v8058_v26 = vld [vmem:[#allocation22 + $0x220] sm:$0xff] }
 0xf81   :  { %v11124_v29 = vpop.eup %11123 }
 0xf82   :  { %v7984_v21 = vmul.f32 %v11124_v29, %v7973_v36  ;;  %v7998_v36 = vld [vmem:[#allocation22 + $0x40] sm:$0xff]  ;;  %v7993_v29 = vld [vmem:[#allocation22 + $0x18] sm:$0xff] }
 0xf84   :  { %vm7985_vm11 = vcmp.gt.f32.partialorder %v7984_v21, 0.0  ;;  %v7986_v41 = vmul.f32 0.1, %v7984_v21 }
 0xf86   :  { %v7987_v35 = vsel %vm7985_vm11, %v7984_v21, %v7986_v41  ;;  %v8057_v21 = vld [vmem:[#allocation22 + $0x218] sm:$0xff]  ;;  %v7992_v41 = vld [vmem:[#allocation22 + $0x10] sm:$0xff] }
 0xf87   :  { %11032 = vmatpush3.msk.msra.mxu1 %vm7678_vm5, %v7987_v35  ;;  %v8376_v1 = vrot.slane %v7987_v35, 4  ;;  %11037 = vmatpush3.msk.msra.mxu0 %vm7678_vm5, %v7987_v35  ;;  %v7991_v35 = vld [vmem:[#allocation22 + $0x8] sm:$0xff] }
 0xf88   :  { %11039 = vmatmul.mubr.msk.f32.vlgmr.msra.gmra.mxu0 %vm8214_vm12, %v7989_v46  ;;  %11041 = vmatprep.subr.mxu1 %v16810_v37 }
 0xf89   :  { %11046 = vmatprep.subr.mxu0 %v16810_v37  ;;  %11034 = vmatmul.mubr.msk.f32.vlgmr.msra.gmra.mxu1 %vm8214_vm12, %v7988_v44 }
 0xf8a   :  { %11042 = vmatpush3.msk.msra.mxu1 %vm7678_vm5, %v8376_v1  ;;  %11047 = vmatpush3.msk.msra.mxu0 %vm7678_vm5, %v8376_v1  ;;  %v7990_v1 = vld [vmem:[#allocation22] sm:$0xff] }
 0xf8b   :  { %11048 = vmatprep.mubr.msk.f32.mxu0 %vm11444_vm6, %v16810_v37  ;;  %11043 = vmatprep.mubr.msk.f32.mxu1 %vm11444_vm6, %v16810_v37 }
 0xf8c   :  { %11049 = vmatmul.mubr.msk.f32.vlgmr.msra.gmra.mxu0 %vm8214_vm12, %v7989_v46  ;;  %8547 = vmatprep.subr.mxu1 %v8021_v14  ;;  %v8056_v46 = vld [vmem:[#allocation22 + $0x210] sm:$0xff]  ;;  %v8054_v14 = vld [vmem:[#allocation22 + $0x200] sm:$0xff] }
 0xf8d   :  { %11044 = vmatmul.mubr.msk.f32.vlgmr.msra.gmra.mxu1 %vm8214_vm12, %v7988_v44  ;;  %8618 = vmatprep.subr.mxu0 %v8085_v30  ;;  %v8055_v44 = vld [vmem:[#allocation22 + $0x208] sm:$0xff]  ;;  %v8053_v30 = vld [vmem:[#allocation22 + $0x1f8] sm:$0xff] }
 0xf8e   :  { %8548 = vmatpush1.msra.mxu1 %v8020_v58  ;;  %8619 = vmatpush1.msra.mxu0 %v8084_v50  ;;  %v8117_v58 = vld [vmem:[#allocation22 + $0x3f8] sm:$0xff]  ;;  %v8052_v50 = vld [vmem:[#allocation22 + $0x1f0] sm:$0xff] }
 0xf8f   :  { %8549 = vmatprep.subr.mxu1 %v8019_v52  ;;  %8620 = vmatprep.subr.mxu0 %v8083_v54  ;;  %v8116_v52 = vld [vmem:[#allocation22 + $0x3f0] sm:$0xff]  ;;  %v8051_v54 = vld [vmem:[#allocation22 + $0x1e8] sm:$0xff] }
 0xf90   :  { %8550 = vmatpush1.msra.mxu1 %v8018_v20  ;;  %8621 = vmatpush1.msra.mxu0 %v8082_v43  ;;  %v8115_v20 = vld [vmem:[#allocation22 + $0x3e8] sm:$0xff]  ;;  %v8050_v43 = vld [vmem:[#allocation22 + $0x1e0] sm:$0xff] }
 0xf91   :  { %8551 = vmatprep.subr.mxu1 %v8017_v4  ;;  %8622 = vmatprep.subr.mxu0 %v8081_v19  ;;  %v8114_v4 = vld [vmem:[#allocation22 + $0x3e0] sm:$0xff]  ;;  %v8049_v19 = vld [vmem:[#allocation22 + $0x1d8] sm:$0xff] }
 0xf92   :  { %8552 = vmatpush1.msra.mxu1 %v8016_v13  ;;  %8623 = vmatpush1.msra.mxu0 %v8080_v48  ;;  %v8113_v13 = vld [vmem:[#allocation22 + $0x3d8] sm:$0xff]  ;;  %v8048_v48 = vld [vmem:[#allocation22 + $0x1d0] sm:$0xff] }
 0xf93   :  { %8553 = vmatprep.subr.mxu1 %v8015_v25  ;;  %8624 = vmatprep.subr.mxu0 %v8079_v40  ;;  %v8112_v25 = vld [vmem:[#allocation22 + $0x3d0] sm:$0xff]  ;;  %v8047_v40 = vld [vmem:[#allocation22 + $0x1c8] sm:$0xff] }
 0xf94   :  { %8554 = vmatpush1.msra.mxu1 %v8014_v9  ;;  %8625 = vmatpush1.msra.mxu0 %v8078_v3  ;;  %v8111_v9 = vld [vmem:[#allocation22 + $0x3c8] sm:$0xff]  ;;  %v8046_v3 = vld [vmem:[#allocation22 + $0x1c0] sm:$0xff] }
 0xf95   :  { %8555 = vmatprep.subr.mxu1 %v8013_v53  ;;  %8626 = vmatprep.subr.mxu0 %v8077_v17  ;;  %v8110_v53 = vld [vmem:[#allocation22 + $0x3c0] sm:$0xff]  ;;  %v8045_v17 = vld [vmem:[#allocation22 + $0x1b8] sm:$0xff] }
 0xf96   :  { %8556 = vmatpush1.msra.mxu1 %v8012_v16  ;;  %8627 = vmatpush1.msra.mxu0 %v8076_v18  ;;  %v8109_v16 = vld [vmem:[#allocation22 + $0x3b8] sm:$0xff]  ;;  %v8044_v18 = vld [vmem:[#allocation22 + $0x1b0] sm:$0xff] }
 0xf97   :  { %8557 = vmatprep.subr.mxu1 %v8011_v8  ;;  %8628 = vmatprep.subr.mxu0 %v8075_v33  ;;  %v8108_v8 = vld [vmem:[#allocation22 + $0x3b0] sm:$0xff]  ;;  %v8043_v33 = vld [vmem:[#allocation22 + $0x1a8] sm:$0xff] }
 0xf98   :  { %8558 = vmatpush1.msra.mxu1 %v8010_v55  ;;  %8629 = vmatpush1.msra.mxu0 %v8074_v38  ;;  %v8107_v55 = vld [vmem:[#allocation22 + $0x3a8] sm:$0xff]  ;;  %v8042_v38 = vld [vmem:[#allocation22 + $0x1a0] sm:$0xff] }
 0xf99   :  { %8559 = vmatprep.subr.mxu1 %v8009_v57  ;;  %8630 = vmatprep.subr.mxu0 %v8073_v10  ;;  %v8106_v57 = vld [vmem:[#allocation22 + $0x3a0] sm:$0xff]  ;;  %v8041_v10 = vld [vmem:[#allocation22 + $0x198] sm:$0xff] }
 0xf9a   :  { %8560 = vmatpush1.msra.mxu1 %v8008_v28  ;;  %8631 = vmatpush1.msra.mxu0 %v8072_v51  ;;  %v8105_v28 = vld [vmem:[#allocation22 + $0x398] sm:$0xff]  ;;  %v8040_v51 = vld [vmem:[#allocation22 + $0x190] sm:$0xff] }
 0xf9b   :  { %8561 = vmatprep.subr.mxu1 %v8007_v23  ;;  %8632 = vmatprep.subr.mxu0 %v8071_v47  ;;  %v8104_v23 = vld [vmem:[#allocation22 + $0x390] sm:$0xff]  ;;  %v8039_v47 = vld [vmem:[#allocation22 + $0x188] sm:$0xff] }
 0xf9c   :  { %8562 = vmatpush1.msra.mxu1 %v8006_v61  ;;  %8633 = vmatpush1.msra.mxu0 %v8070_v42  ;;  %v8103_v61 = vld [vmem:[#allocation22 + $0x388] sm:$0xff]  ;;  %v8038_v42 = vld [vmem:[#allocation22 + $0x180] sm:$0xff] }
 0xf9d   :  { %8563 = vmatprep.subr.mxu1 %v8005_v39  ;;  %8634 = vmatprep.subr.mxu0 %v8069_v60  ;;  %v8102_v39 = vld [vmem:[#allocation22 + $0x380] sm:$0xff]  ;;  %v8037_v60 = vld [vmem:[#allocation22 + $0x178] sm:$0xff] }
 0xf9e   :  { %8564 = vmatpush1.msra.mxu1 %v8004_v24  ;;  %8635 = vmatpush1.msra.mxu0 %v8068_v6  ;;  %v8101_v24 = vld [vmem:[#allocation22 + $0x378] sm:$0xff]  ;;  %v8036_v6 = vld [vmem:[#allocation22 + $0x170] sm:$0xff] }
 0xf9f   :  { %8565 = vmatprep.subr.mxu1 %v8003_v34  ;;  %8636 = vmatprep.subr.mxu0 %v8067_v27  ;;  %v8100_v34 = vld [vmem:[#allocation22 + $0x370] sm:$0xff]  ;;  %v8035_v27 = vld [vmem:[#allocation22 + $0x168] sm:$0xff] }
 0xfa0   :  { %8566 = vmatpush1.msra.mxu1 %v8002_v5  ;;  %8637 = vmatpush1.msra.mxu0 %v8066_v62  ;;  %v8099_v5 = vld [vmem:[#allocation22 + $0x368] sm:$0xff]  ;;  %v8034_v62 = vld [vmem:[#allocation22 + $0x160] sm:$0xff] }
 0xfa1   :  { %8567 = vmatprep.subr.mxu1 %v8001_v0  ;;  %8638 = vmatprep.subr.mxu0 %v8065_v12  ;;  %v8098_v0 = vld [vmem:[#allocation22 + $0x360] sm:$0xff]  ;;  %v8033_v12 = vld [vmem:[#allocation22 + $0x158] sm:$0xff] }
 0xfa2   :  { %8568 = vmatpush1.msra.mxu1 %v8000_v45  ;;  %8639 = vmatpush1.msra.mxu0 %v8064_v56  ;;  %v8097_v45 = vld [vmem:[#allocation22 + $0x358] sm:$0xff]  ;;  %v8032_v56 = vld [vmem:[#allocation22 + $0x150] sm:$0xff] }
 0xfa3   :  { %8569 = vmatprep.subr.mxu1 %v7999_v63  ;;  %8640 = vmatprep.subr.mxu0 %v8063_v15  ;;  %v8096_v63 = vld [vmem:[#allocation22 + $0x350] sm:$0xff]  ;;  %v8031_v15 = vld [vmem:[#allocation22 + $0x148] sm:$0xff] }
 0xfa4   :  { %8570 = vmatpush1.msra.mxu1 %v7998_v36  ;;  %8641 = vmatpush1.msra.mxu0 %v8062_v31  ;;  %v8095_v36 = vld [vmem:[#allocation22 + $0x348] sm:$0xff]  ;;  %v8030_v31 = vld [vmem:[#allocation22 + $0x140] sm:$0xff] }
 0xfa5   :  { %8571 = vmatprep.subr.mxu1 %v7997_v7  ;;  %8642 = vmatprep.subr.mxu0 %v8061_v49  ;;  %v8094_v7 = vld [vmem:[#allocation22 + $0x340] sm:$0xff]  ;;  %v8029_v49 = vld [vmem:[#allocation22 + $0x138] sm:$0xff] }
 0xfa6   :  { %8572 = vmatpush1.msra.mxu1 %v7996_v32  ;;  %8643 = vmatpush1.msra.mxu0 %v8060_v2  ;;  %v8093_v32 = vld [vmem:[#allocation22 + $0x338] sm:$0xff]  ;;  %v8028_v2 = vld [vmem:[#allocation22 + $0x130] sm:$0xff] }
 0xfa7   :  { %8573 = vmatprep.subr.mxu1 %v7995_v11  ;;  %8644 = vmatprep.subr.mxu0 %v8059_v59  ;;  %v8092_v11 = vld [vmem:[#allocation22 + $0x330] sm:$0xff]  ;;  %v8027_v59 = vld [vmem:[#allocation22 + $0x128] sm:$0xff] }
 0xfa8   :  { %8574 = vmatpush1.msra.mxu1 %v7994_v22  ;;  %8645 = vmatpush1.msra.mxu0 %v8058_v26  ;;  %v8091_v22 = vld [vmem:[#allocation22 + $0x328] sm:$0xff]  ;;  %v8026_v26 = vld [vmem:[#allocation22 + $0x120] sm:$0xff] }
 0xfa9   :  { %8575 = vmatprep.subr.mxu1 %v7993_v29  ;;  %8646 = vmatprep.subr.mxu0 %v8057_v21  ;;  %v8090_v29 = vld [vmem:[#allocation22 + $0x320] sm:$0xff]  ;;  %v8025_v21 = vld [vmem:[#allocation22 + $0x118] sm:$0xff] }
 0xfaa   :  { %8576 = vmatpush1.msra.mxu1 %v7992_v41  ;;  %8647 = vmatpush1.msra.mxu0 %v8056_v46  ;;  %v8089_v41 = vld [vmem:[#allocation22 + $0x318] sm:$0xff]  ;;  %v8024_v46 = vld [vmem:[#allocation22 + $0x110] sm:$0xff] }
 0xfab   :  { %8577 = vmatprep.subr.mxu1 %v7991_v35  ;;  %8648 = vmatprep.subr.mxu0 %v8055_v44  ;;  %v8088_v35 = vld [vmem:[#allocation22 + $0x310] sm:$0xff]  ;;  %v8023_v44 = vld [vmem:[#allocation22 + $0x108] sm:$0xff] }
 0xfac   :  { %8578 = vmatpush1.msra.mxu1 %v7990_v1  ;;  %8649 = vmatpush1.msra.mxu0 %v8054_v14  ;;  %v8087_v1 = vld [vmem:[#allocation22 + $0x308] sm:$0xff]  ;;  %v8022_v14 = vld [vmem:[#allocation22 + $0x100] sm:$0xff] }
 0xfad   :  { %8579 = vmatprep.subr.mxu1 %v8053_v30  ;;  %8650 = vmatprep.subr.mxu0 %v8117_v58  ;;  %v8086_v30 = vld [vmem:[#allocation22 + $0x300] sm:$0xff]  ;;  %v8149_v58 = vld [vmem:[#allocation22 + $0x4f8] sm:$0xff] }
 0xfae   :  { %8580 = vmatpush2.msra.mxu1 %v8052_v50  ;;  %8651 = vmatpush2.msra.mxu0 %v8116_v52  ;;  %v8213_v50 = vld [vmem:[#allocation22 + $0x6f8] sm:$0xff] }
 0xfaf   :  { %8581 = vmatprep.subr.mxu1 %v8051_v54  ;;  %8652 = vmatprep.subr.mxu0 %v8115_v20 }
 0xfb0   :  { %8582 = vmatpush2.msra.mxu1 %v8050_v43  ;;  %8653 = vmatpush2.msra.mxu0 %v8114_v4 }
 0xfb1   :  { %8583 = vmatprep.subr.mxu1 %v8049_v19  ;;  %8654 = vmatprep.subr.mxu0 %v8113_v13 }
 0xfb2   :  { %8584 = vmatpush2.msra.mxu1 %v8048_v48  ;;  %8655 = vmatpush2.msra.mxu0 %v8112_v25 }
 0xfb3   :  { %8585 = vmatprep.subr.mxu1 %v8047_v40  ;;  %8656 = vmatprep.subr.mxu0 %v8111_v9 }
 0xfb4   :  { %8586 = vmatpush2.msra.mxu1 %v8046_v3  ;;  %8657 = vmatpush2.msra.mxu0 %v8110_v53 }
 0xfb5   :  { %8587 = vmatprep.subr.mxu1 %v8045_v17  ;;  %8658 = vmatprep.subr.mxu0 %v8109_v16 }
 0xfb6   :  { %8588 = vmatpush2.msra.mxu1 %v8044_v18  ;;  %8659 = vmatpush2.msra.mxu0 %v8108_v8 }
 0xfb7   :  { %8589 = vmatprep.subr.mxu1 %v8043_v33  ;;  %8660 = vmatprep.subr.mxu0 %v8107_v55  ;;  %v8148_v33 = vld [vmem:[#allocation22 + $0x4f0] sm:$0xff] }
 0xfb8   :  { %8590 = vmatpush2.msra.mxu1 %v8042_v38  ;;  %8661 = vmatpush2.msra.mxu0 %v8106_v57  ;;  %v8212_v55 = vld [vmem:[#allocation22 + $0x6f0] sm:$0xff] }
 0xfb9   :  { %8591 = vmatprep.subr.mxu1 %v8041_v10  ;;  %8662 = vmatprep.subr.mxu0 %v8105_v28  ;;  %v8147_v28 = vld [vmem:[#allocation22 + $0x4e8] sm:$0xff] }
 0xfba   :  { %8592 = vmatpush2.msra.mxu1 %v8040_v51  ;;  %8663 = vmatpush2.msra.mxu0 %v8104_v23  ;;  %v8211_v51 = vld [vmem:[#allocation22 + $0x6e8] sm:$0xff]  ;;  %v8146_v23 = vld [vmem:[#allocation22 + $0x4e0] sm:$0xff] }
 0xfbb   :  { %8593 = vmatprep.subr.mxu1 %v8039_v47  ;;  %8664 = vmatprep.subr.mxu0 %v8103_v61  ;;  %v8210_v47 = vld [vmem:[#allocation22 + $0x6e0] sm:$0xff]  ;;  %v8145_v61 = vld [vmem:[#allocation22 + $0x4d8] sm:$0xff] }
 0xfbc   :  { %8594 = vmatpush2.msra.mxu1 %v8038_v42  ;;  %8665 = vmatpush2.msra.mxu0 %v8102_v39  ;;  %v8209_v42 = vld [vmem:[#allocation22 + $0x6d8] sm:$0xff]  ;;  %v8144_v39 = vld [vmem:[#allocation22 + $0x4d0] sm:$0xff] }
 0xfbd   :  { %8595 = vmatprep.subr.mxu1 %v8037_v60  ;;  %8666 = vmatprep.subr.mxu0 %v8101_v24  ;;  %v8208_v60 = vld [vmem:[#allocation22 + $0x6d0] sm:$0xff]  ;;  %v8143_v24 = vld [vmem:[#allocation22 + $0x4c8] sm:$0xff] }
 0xfbe   :  { %8596 = vmatpush2.msra.mxu1 %v8036_v6  ;;  %8667 = vmatpush2.msra.mxu0 %v8100_v34  ;;  %v8207_v6 = vld [vmem:[#allocation22 + $0x6c8] sm:$0xff]  ;;  %v8142_v34 = vld [vmem:[#allocation22 + $0x4c0] sm:$0xff] }
 0xfbf   :  { %8597 = vmatprep.subr.mxu1 %v8035_v27  ;;  %8668 = vmatprep.subr.mxu0 %v8099_v5  ;;  %v8206_v27 = vld [vmem:[#allocation22 + $0x6c0] sm:$0xff]  ;;  %v8141_v5 = vld [vmem:[#allocation22 + $0x4b8] sm:$0xff] }
 0xfc0   :  { %8598 = vmatpush2.msra.mxu1 %v8034_v62  ;;  %8669 = vmatpush2.msra.mxu0 %v8098_v0  ;;  %v8205_v62 = vld [vmem:[#allocation22 + $0x6b8] sm:$0xff]  ;;  %v8140_v0 = vld [vmem:[#allocation22 + $0x4b0] sm:$0xff] }
 0xfc1   :  { %8599 = vmatprep.subr.mxu1 %v8033_v12  ;;  %8670 = vmatprep.subr.mxu0 %v8097_v45  ;;  %v8204_v12 = vld [vmem:[#allocation22 + $0x6b0] sm:$0xff]  ;;  %v8139_v45 = vld [vmem:[#allocation22 + $0x4a8] sm:$0xff] }
 0xfc2   :  { %8600 = vmatpush2.msra.mxu1 %v8032_v56  ;;  %8671 = vmatpush2.msra.mxu0 %v8096_v63  ;;  %v8203_v56 = vld [vmem:[#allocation22 + $0x6a8] sm:$0xff]  ;;  %v8138_v63 = vld [vmem:[#allocation22 + $0x4a0] sm:$0xff] }
 0xfc3   :  { %8601 = vmatprep.subr.mxu1 %v8031_v15  ;;  %8672 = vmatprep.subr.mxu0 %v8095_v36  ;;  %v8202_v15 = vld [vmem:[#allocation22 + $0x6a0] sm:$0xff]  ;;  %v8137_v36 = vld [vmem:[#allocation22 + $0x498] sm:$0xff] }
 0xfc4   :  { %8602 = vmatpush2.msra.mxu1 %v8030_v31  ;;  %8673 = vmatpush2.msra.mxu0 %v8094_v7  ;;  %v8201_v31 = vld [vmem:[#allocation22 + $0x698] sm:$0xff]  ;;  %v8136_v7 = vld [vmem:[#allocation22 + $0x490] sm:$0xff] }
 0xfc5   :  { %8603 = vmatprep.subr.mxu1 %v8029_v49  ;;  %8674 = vmatprep.subr.mxu0 %v8093_v32  ;;  %v8200_v49 = vld [vmem:[#allocation22 + $0x690] sm:$0xff]  ;;  %v8135_v32 = vld [vmem:[#allocation22 + $0x488] sm:$0xff] }
 0xfc6   :  { %8604 = vmatpush2.msra.mxu1 %v8028_v2  ;;  %8675 = vmatpush2.msra.mxu0 %v8092_v11  ;;  %v8199_v2 = vld [vmem:[#allocation22 + $0x688] sm:$0xff]  ;;  %v8134_v11 = vld [vmem:[#allocation22 + $0x480] sm:$0xff] }
 0xfc7   :  { %8605 = vmatprep.subr.mxu1 %v8027_v59  ;;  %8676 = vmatprep.subr.mxu0 %v8091_v22  ;;  %v8198_v59 = vld [vmem:[#allocation22 + $0x680] sm:$0xff]  ;;  %v8133_v22 = vld [vmem:[#allocation22 + $0x478] sm:$0xff] }
 0xfc8   :  { %8606 = vmatpush2.msra.mxu1 %v8026_v26  ;;  %8677 = vmatpush2.msra.mxu0 %v8090_v29  ;;  %v8197_v26 = vld [vmem:[#allocation22 + $0x678] sm:$0xff]  ;;  %v8132_v29 = vld [vmem:[#allocation22 + $0x470] sm:$0xff] }
 0xfc9   :  { %8607 = vmatprep.subr.mxu1 %v8025_v21  ;;  %8678 = vmatprep.subr.mxu0 %v8089_v41  ;;  %v8196_v21 = vld [vmem:[#allocation22 + $0x670] sm:$0xff]  ;;  %v8131_v41 = vld [vmem:[#allocation22 + $0x468] sm:$0xff] }
 0xfca   :  { %8608 = vmatpush2.msra.mxu1 %v8024_v46  ;;  %8679 = vmatpush2.msra.mxu0 %v8088_v35  ;;  %v8195_v46 = vld [vmem:[#allocation22 + $0x668] sm:$0xff]  ;;  %v8130_v35 = vld [vmem:[#allocation22 + $0x460] sm:$0xff] }
 0xfcb   :  { %8609 = vmatprep.subr.mxu1 %v8023_v44  ;;  %8680 = vmatprep.subr.mxu0 %v8087_v1  ;;  %v8194_v44 = vld [vmem:[#allocation22 + $0x660] sm:$0xff]  ;;  %v8129_v1 = vld [vmem:[#allocation22 + $0x458] sm:$0xff] }
 0xfcc   :  { %8610 = vmatpush2.msra.mxu1 %v8022_v14  ;;  %8681 = vmatpush2.msra.mxu0 %v8086_v30  ;;  %v8193_v14 = vld [vmem:[#allocation22 + $0x658] sm:$0xff] }
 0xfcd   :  { %8689 = vmatprep.subr.mxu1 %v8149_v58  ;;  %8760 = vmatprep.subr.mxu0 %v8213_v50  ;;  %v8128_v58 = vld [vmem:[#allocation22 + $0x450] sm:$0xff] }
 0xfce   :  { %v8192_v50 = vld [vmem:[#allocation22 + $0x650] sm:$0xff] }
0x1048   :  { %v16188_v52 = vpop.f32.mrf.mxu0 }
0x1049   :  { %v16190_v54 = vpop.f32.mrf.mxu1  ;;  %v8368_v13 = vrot.slane %v16188_v52, 1  ;;  %v8372_v30 = vrot.slane %v16188_v52, 2 }
0x104a   :  { %v8370_v20 = vrot.slane %v16190_v54, 2  ;;  %v11040_v43 = vpop.f32.mrf.mxu0  ;;  %v8365_v9 = vrot.slane %v16190_v54, 1 }
0x104b   :  { %v11035_v4 = vpop.f32.mrf.mxu1 }
0x104c   :  { %v16193_v19 = vpop.f32.mrf.mxu0  ;;  %v8191_v4 = vld [vmem:[#allocation22 + $0x648] sm:$0xff] }
0x104d   :  { %v8527_v48 = vrot.slane %v16193_v19, 6  ;;  %v9208_v25 = vrot.slane %v16193_v19, 7  ;;  %v16198_v40 = vpop.f32.mrf.mxu1  ;;  %v8545_v43 = vsel %vm827_vm1, %v8372_v30, %v16193_v19  ;;  %v8186_v19 = vld [vmem:[#allocation22 + $0x620] sm:$0xff] }
0x104e   :  { %v8526_v3 = vrot.slane %v16198_v40, 6  ;;  %v9207_v53 = vrot.slane %v16198_v40, 7  ;;  %v11050_v17 = vpop.f32.mrf.mxu0  ;;  %v16205_v16 = vsel %vm827_vm1, %v8370_v20, %v16198_v40  ;;  %v8127_v20 = vld [vmem:[#allocation22 + $0x448] sm:$0xff]  ;;  %v8939_v30 = vld [vmem:[%s16410_s21 + $0xe8] sm:$0xff] }
0x104f   :  { %v8541_v18 = vsel %vm827_vm1, %v16188_v52, %v8527_v48  ;;  %v8543_v8 = vsel %vm827_vm1, %v8368_v13, %v9208_v25  ;;  %v11045_v38 = vpop.f32.mrf.mxu1  ;;  %v8126_v13 = vld [vmem:[#allocation22 + $0x440] sm:$0xff]  ;;  %v8125_v25 = vld [vmem:[#allocation22 + $0x438] sm:$0xff]  ;;  %v8187_v17 = vld [vmem:[#allocation22 + $0x628] sm:$0xff] }
0x1050   :  { %8611 = vmatprep.mubr.f32.mxu1 %v8541_v18  ;;  %8682 = vmatprep.mubr.f32.mxu0 %v8543_v8  ;;  %v8540_v57 = vsel %vm827_vm1, %v16190_v54, %v8526_v3  ;;  %v8542_v10 = vsel %vm827_vm1, %v8365_v9, %v9207_v53  ;;  %v8190_v48 = vld [vmem:[#allocation22 + $0x640] sm:$0xff]  ;;  %v8189_v52 = vld [vmem:[#allocation22 + $0x638] sm:$0xff]  ;;  %v8124_v9 = vld [vmem:[#allocation22 + $0x430] sm:$0xff] }
0x1051   :  { %8612 = vmatmul.mubr.f32.vlgmr.msra.gmra.mxu1 %v8540_v57  ;;  %8683 = vmatmul.mubr.f32.vlgmr.msra.gmra.mxu0 %v8542_v10  ;;  %v8188_v3 = vld [vmem:[#allocation22 + $0x630] sm:$0xff]  ;;  %v8123_v53 = vld [vmem:[#allocation22 + $0x428] sm:$0xff]  ;;  %v8122_v18 = vld [vmem:[#allocation22 + $0x420] sm:$0xff]  ;;  %v9211_v10 = vrot.slane %v16198_v40, 9 }
0x1052   :  { %8690 = vmatpush1.msra.mxu1 %v8148_v33  ;;  %8761 = vmatpush1.msra.mxu0 %v8212_v55  ;;  %v8121_v8 = vld [vmem:[#allocation22 + $0x418] sm:$0xff]  ;;  %v8120_v55 = vld [vmem:[#allocation22 + $0x410] sm:$0xff]  ;;  %v8119_v57 = vld [vmem:[#allocation22 + $0x408] sm:$0xff] }
0x1053   :  { %8691 = vmatprep.subr.mxu1 %v8147_v28  ;;  %8762 = vmatprep.subr.mxu0 %v8211_v51  ;;  %v8185_v33 = vld [vmem:[#allocation22 + $0x618] sm:$0xff]  ;;  %v8184_v38 = vld [vmem:[#allocation22 + $0x610] sm:$0xff]  ;;  %v8183_v28 = vld [vmem:[#allocation22 + $0x608] sm:$0xff] }
0x1054   :  { %8692 = vmatpush1.msra.mxu1 %v8146_v23  ;;  %8763 = vmatpush1.msra.mxu0 %v8210_v47  ;;  %v8118_v51 = vld [vmem:[#allocation22 + $0x400] sm:$0xff]  ;;  %v8374_v47 = vrot.slane %v16190_v54, 3  ;;  %v8175_v54 = vld [vmem:[#allocation22 + $0x5c8] sm:$0xff] }
0x1055   :  { %8693 = vmatprep.subr.mxu1 %v8145_v61  ;;  %8764 = vmatprep.subr.mxu0 %v8209_v42  ;;  %v8182_v23 = vld [vmem:[#allocation22 + $0x600] sm:$0xff]  ;;  %v8181_v61 = vld [vmem:[#allocation22 + $0x5f8] sm:$0xff]  ;;  %v8180_v42 = vld [vmem:[#allocation22 + $0x5f0] sm:$0xff] }
0x1056   :  { %8694 = vmatpush1.msra.mxu1 %v8144_v39  ;;  %8765 = vmatpush1.msra.mxu0 %v8208_v60  ;;  %v8546_v40 = vsel %vm827_vm1, %v8374_v47, %v9211_v10  ;;  %v8179_v39 = vld [vmem:[#allocation22 + $0x5e8] sm:$0xff]  ;;  %v8178_v60 = vld [vmem:[#allocation22 + $0x5e0] sm:$0xff]  ;;  %v8929_v47 = vld [vmem:[%s16410_s21 + $0x98] sm:$0xff] }
0x1057   :  { %8695 = vmatprep.subr.mxu1 %v8143_v24  ;;  %8766 = vmatprep.subr.mxu0 %v8207_v6  ;;  %v8177_v24 = vld [vmem:[#allocation22 + $0x5d8] sm:$0xff]  ;;  %v8176_v6 = vld [vmem:[#allocation22 + $0x5d0] sm:$0xff]  ;;  %v9031_v10 = vld [vmem:[%s16412_s23 + $0x48] sm:$0xff] }
0x1058   :  { %8696 = vmatpush1.msra.mxu1 %v8142_v34  ;;  %8767 = vmatpush1.msra.mxu0 %v8206_v27  ;;  %v8174_v34 = vld [vmem:[#allocation22 + $0x5c0] sm:$0xff]  ;;  %v8173_v27 = vld [vmem:[#allocation22 + $0x5b8] sm:$0xff] }
0x1059   :  { %8697 = vmatprep.subr.mxu1 %v8141_v5  ;;  %8768 = vmatprep.subr.mxu0 %v8205_v62  ;;  %v8172_v5 = vld [vmem:[#allocation22 + $0x5b0] sm:$0xff]  ;;  %v8171_v62 = vld [vmem:[#allocation22 + $0x5a8] sm:$0xff] }
0x105a   :  { %8698 = vmatpush1.msra.mxu1 %v8140_v0  ;;  %8769 = vmatpush1.msra.mxu0 %v8204_v12  ;;  %v8170_v0 = vld [vmem:[#allocation22 + $0x5a0] sm:$0xff]  ;;  %v8169_v12 = vld [vmem:[#allocation22 + $0x598] sm:$0xff] }
0x105b   :  { %8699 = vmatprep.subr.mxu1 %v8139_v45  ;;  %8770 = vmatprep.subr.mxu0 %v8203_v56  ;;  %v8168_v45 = vld [vmem:[#allocation22 + $0x590] sm:$0xff]  ;;  %v8167_v56 = vld [vmem:[#allocation22 + $0x588] sm:$0xff] }
0x105c   :  { %8700 = vmatpush1.msra.mxu1 %v8138_v63  ;;  %8771 = vmatpush1.msra.mxu0 %v8202_v15  ;;  %v8166_v63 = vld [vmem:[#allocation22 + $0x580] sm:$0xff]  ;;  %v8165_v15 = vld [vmem:[#allocation22 + $0x578] sm:$0xff] }
0x105d   :  { %8701 = vmatprep.subr.mxu1 %v8137_v36  ;;  %8772 = vmatprep.subr.mxu0 %v8201_v31  ;;  %v8164_v36 = vld [vmem:[#allocation22 + $0x570] sm:$0xff]  ;;  %v8163_v31 = vld [vmem:[#allocation22 + $0x568] sm:$0xff] }
0x105e   :  { %8702 = vmatpush1.msra.mxu1 %v8136_v7  ;;  %8773 = vmatpush1.msra.mxu0 %v8200_v49  ;;  %v8162_v7 = vld [vmem:[#allocation22 + $0x560] sm:$0xff]  ;;  %v8161_v49 = vld [vmem:[#allocation22 + $0x558] sm:$0xff] }
0x105f   :  { %8703 = vmatprep.subr.mxu1 %v8135_v32  ;;  %8774 = vmatprep.subr.mxu0 %v8199_v2  ;;  %v8160_v32 = vld [vmem:[#allocation22 + $0x550] sm:$0xff]  ;;  %v8159_v2 = vld [vmem:[#allocation22 + $0x548] sm:$0xff] }
0x1060   :  { %8704 = vmatpush1.msra.mxu1 %v8134_v11  ;;  %8775 = vmatpush1.msra.mxu0 %v8198_v59  ;;  %v8158_v11 = vld [vmem:[#allocation22 + $0x540] sm:$0xff]  ;;  %v8157_v59 = vld [vmem:[#allocation22 + $0x538] sm:$0xff] }
0x1061   :  { %8705 = vmatprep.subr.mxu1 %v8133_v22  ;;  %8776 = vmatprep.subr.mxu0 %v8197_v26  ;;  %v8156_v22 = vld [vmem:[#allocation22 + $0x530] sm:$0xff]  ;;  %v8155_v26 = vld [vmem:[#allocation22 + $0x528] sm:$0xff] }
0x1062   :  { %8706 = vmatpush1.msra.mxu1 %v8132_v29  ;;  %8777 = vmatpush1.msra.mxu0 %v8196_v21  ;;  %v8154_v29 = vld [vmem:[#allocation22 + $0x520] sm:$0xff]  ;;  %v8153_v21 = vld [vmem:[#allocation22 + $0x518] sm:$0xff] }
0x1063   :  { %8707 = vmatprep.subr.mxu1 %v8131_v41  ;;  %8778 = vmatprep.subr.mxu0 %v8195_v46  ;;  %v8152_v41 = vld [vmem:[#allocation22 + $0x510] sm:$0xff]  ;;  %v8151_v46 = vld [vmem:[#allocation22 + $0x508] sm:$0xff] }
0x1064   :  { %8708 = vmatpush1.msra.mxu1 %v8130_v35  ;;  %8779 = vmatpush1.msra.mxu0 %v8194_v44  ;;  %v8150_v35 = vld [vmem:[#allocation22 + $0x500] sm:$0xff]  ;;  %v8941_v44 = vld [vmem:[%s16410_s21 + $0xf8] sm:$0xff] }
0x1065   :  { %8709 = vmatprep.subr.mxu1 %v8129_v1  ;;  %8780 = vmatprep.subr.mxu0 %v8193_v14  ;;  %v8925_v1 = vld [vmem:[%s16410_s21 + $0x78] sm:$0xff]  ;;  %v8940_v14 = vld [vmem:[%s16410_s21 + $0xf0] sm:$0xff] }
0x1066   :  { %8710 = vmatpush1.msra.mxu1 %v8128_v58  ;;  %8753 = vmatprep.mubr.f32.mxu1 %v8545_v43  ;;  %v8923_v58 = vld [vmem:[%s16410_s21 + $0x68] sm:$0xff]  ;;  %v8937_v43 = vld [vmem:[%s16410_s21 + $0xd8] sm:$0xff] }
0x1067   :  { %8781 = vmatpush1.msra.mxu0 %v8192_v50  ;;  %8711 = vmatprep.subr.mxu1 %v8127_v20  ;;  %v8938_v50 = vld [vmem:[%s16410_s21 + $0xe0] sm:$0xff] }
0x1068   :  { %8782 = vmatprep.subr.mxu0 %v8191_v4  ;;  %8712 = vmatpush1.msra.mxu1 %v8126_v13  ;;  %v8922_v20 = vld [vmem:[%s16410_s21 + $0x60] sm:$0xff]  ;;  %v8921_v4 = vld [vmem:[%s16410_s21 + $0x58] sm:$0xff]  ;;  %v8936_v13 = vld [vmem:[%s16410_s21 + $0xd0] sm:$0xff] }
0x1069   :  { %8783 = vmatpush1.msra.mxu0 %v8190_v48  ;;  %8713 = vmatprep.subr.mxu1 %v8125_v25  ;;  %v8920_v48 = vld [vmem:[%s16410_s21 + $0x50] sm:$0xff]  ;;  %v8935_v25 = vld [vmem:[%s16410_s21 + $0xc8] sm:$0xff] }
0x106a   :  { %8784 = vmatprep.subr.mxu0 %v8189_v52  ;;  %8714 = vmatpush1.msra.mxu1 %v8124_v9  ;;  %v8919_v52 = vld [vmem:[%s16410_s21 + $0x48] sm:$0xff]  ;;  %v8934_v9 = vld [vmem:[%s16410_s21 + $0xc0] sm:$0xff] }
0x106b   :  { %8785 = vmatpush1.msra.mxu0 %v8188_v3  ;;  %8715 = vmatprep.subr.mxu1 %v8123_v53  ;;  %v8918_v3 = vld [vmem:[%s16410_s21 + $0x40] sm:$0xff]  ;;  %v8933_v53 = vld [vmem:[%s16410_s21 + $0xb8] sm:$0xff] }
0x106c   :  { %8786 = vmatprep.subr.mxu0 %v8187_v17  ;;  %8716 = vmatpush1.msra.mxu1 %v8122_v18  ;;  %v8917_v17 = vld [vmem:[%s16410_s21 + $0x38] sm:$0xff]  ;;  %v9034_v18 = vld [vmem:[%s16412_s23 + $0x60] sm:$0xf] }
0x106d   :  { %8787 = vmatpush1.msra.mxu0 %v8186_v19  ;;  %8717 = vmatprep.subr.mxu1 %v8121_v8  ;;  %v9033_v19 = vld [vmem:[%s16412_s23 + $0x58] sm:$0xff]  ;;  %v8932_v8 = vld [vmem:[%s16410_s21 + $0xb0] sm:$0xff] }
0x106e   :  { %8788 = vmatprep.subr.mxu0 %v8185_v33  ;;  %8718 = vmatpush1.msra.mxu1 %v8120_v55  ;;  %v8916_v33 = vld [vmem:[%s16410_s21 + $0x30] sm:$0xff] }
0x106f   :  { %8789 = vmatpush1.msra.mxu0 %v8184_v38  ;;  %8719 = vmatprep.subr.mxu1 %v8119_v57  ;;  %v9032_v55 = vld [vmem:[%s16412_s23 + $0x50] sm:$0xff]  ;;  %v8931_v38 = vld [vmem:[%s16410_s21 + $0xa8] sm:$0xff] }
0x1070   :  { %8790 = vmatprep.subr.mxu0 %v8183_v28  ;;  %8720 = vmatpush1.msra.mxu1 %v8118_v51  ;;  %v8915_v57 = vld [vmem:[%s16410_s21 + $0x28] sm:$0xff]  ;;  %v8930_v28 = vld [vmem:[%s16410_s21 + $0xa0] sm:$0xff] }
0x1071   :  { %8791 = vmatpush1.msra.mxu0 %v8182_v23  ;;  %8824 = vmatprep.mubr.f32.mxu0 %v16810_v37  ;;  %v8914_v51 = vld [vmem:[%s16410_s21 + $0x20] sm:$0xff] }
0x1072   :  { %8721 = vmatprep.subr.mxu1 %v8181_v61  ;;  %8825 = vmatmul.mubr.f32.vlgmr.msra.gmra.mxu0 %v8546_v40  ;;  %v9030_v23 = vld [vmem:[%s16412_s23 + $0x40] sm:$0xff]  ;;  %v8913_v61 = vld [vmem:[%s16410_s21 + $0x18] sm:$0xff]  ;;  %v8928_v40 = vld [vmem:[%s16410_s21 + $0x90] sm:$0xff] }
0x1073   :  { %8722 = vmatpush2.msra.mxu1 %v8180_v42  ;;  %10298 = vmatprep.subr.mxu0 %v8941_v44  ;;  %v9029_v42 = vld [vmem:[%s16412_s23 + $0x38] sm:$0xff] }
0x1074   :  { %8723 = vmatprep.subr.mxu1 %v8179_v39  ;;  %10299 = vmatpush3.msra.mxu0 %v8925_v1  ;;  %v8912_v39 = vld [vmem:[%s16410_s21 + $0x10] sm:$0xff] }
0x1075   :  { %8724 = vmatpush2.msra.mxu1 %v8178_v60  ;;  %10300 = vmatprep.subr.mxu0 %v8940_v14  ;;  %v9028_v60 = vld [vmem:[%s16412_s23 + $0x30] sm:$0xff] }
0x1076   :  { %8725 = vmatprep.subr.mxu1 %v8177_v24  ;;  %v8927_v24 = vld [vmem:[%s16410_s21 + $0x88] sm:$0xff] }
0x1077   :  { %8726 = vmatpush2.msra.mxu1 %v8176_v6  ;;  %v8911_v6 = vld [vmem:[%s16410_s21 + $0x8] sm:$0xff] }
0x1078   :  { %8727 = vmatprep.subr.mxu1 %v8175_v54  ;;  %v9027_v54 = vld [vmem:[%s16412_s23 + $0x28] sm:$0xff] }
0x1079   :  { %8728 = vmatpush2.msra.mxu1 %v8174_v34  ;;  %v8926_v34 = vld [vmem:[%s16410_s21 + $0x80] sm:$0xff] }
0x107a   :  { %8729 = vmatprep.subr.mxu1 %v8173_v27  ;;  %v8910_v27 = vld [vmem:[%s16410_s21] sm:$0xff] }
0x107b   :  { %8730 = vmatpush2.msra.mxu1 %v8172_v5 }
0x107c   :  { %8731 = vmatprep.subr.mxu1 %v8171_v62 }
0x107d   :  { %8732 = vmatpush2.msra.mxu1 %v8170_v0 }
0x107e   :  { %8733 = vmatprep.subr.mxu1 %v8169_v12 }
0x107f   :  { %8734 = vmatpush2.msra.mxu1 %v8168_v45 }
0x1080   :  { %8735 = vmatprep.subr.mxu1 %v8167_v56 }
0x1081   :  { %8736 = vmatpush2.msra.mxu1 %v8166_v63 }
0x1082   :  { %8737 = vmatprep.subr.mxu1 %v8165_v15 }
0x1083   :  { %8738 = vmatpush2.msra.mxu1 %v8164_v36 }
0x1084   :  { %8739 = vmatprep.subr.mxu1 %v8163_v31 }
0x1085   :  { %8740 = vmatpush2.msra.mxu1 %v8162_v7 }
0x1086   :  { %8741 = vmatprep.subr.mxu1 %v8161_v49 }
0x1087   :  { %8742 = vmatpush2.msra.mxu1 %v8160_v32 }
0x1088   :  { %8743 = vmatprep.subr.mxu1 %v8159_v2 }
0x1089   :  { %8744 = vmatpush2.msra.mxu1 %v8158_v11 }
0x108a   :  { %8745 = vmatprep.subr.mxu1 %v8157_v59 }
0x108b   :  { %8746 = vmatpush2.msra.mxu1 %v8156_v22 }
0x108c   :  { %8747 = vmatprep.subr.mxu1 %v8155_v26 }
0x108d   :  { %8748 = vmatpush2.msra.mxu1 %v8154_v29 }
0x108e   :  { %8749 = vmatprep.subr.mxu1 %v8153_v21 }
0x108f   :  { %8750 = vmatpush2.msra.mxu1 %v8152_v41 }
0x1090   :  { %8751 = vmatprep.subr.mxu1 %v8151_v46 }
0x1091   :  { %8752 = vmatpush2.msra.mxu1 %v8150_v35 }
0x1092   :  { %8754 = vmatmul.mubr.f32.vlgmr.msra.gmra.mxu1 %v16205_v16  ;;  %11051 = vmatprep.subr.mxu1 %v16810_v37  ;;  %v8924_v16 = vld [vmem:[%s16410_s21 + $0x70] sm:$0xff] }
0x1093   :  { %11077 = vmatprep.mubr.msk.f32.mxu1 %vm11444_vm6, %v16810_v37  ;;  %10301 = vmatpush3.msra.mxu0 %v8924_v16 }
0x1094   :  { %10302 = vmatprep.subr.mxu0 %v8939_v30  ;;  %11052 = vmatpush3.msk.msra.mxu1 %vm7678_vm5, %v9034_v18 }
0x1095   :  { %10303 = vmatpush3.msra.mxu0 %v8923_v58  ;;  %11053 = vmatprep.subr.mxu1 %v16810_v37 }
0x1096   :  { %10304 = vmatprep.subr.mxu0 %v8938_v50  ;;  %11054 = vmatpush3.msra.mxu1 %v9033_v19 }
0x1097   :  { %10305 = vmatpush3.msra.mxu0 %v8922_v20  ;;  %11055 = vmatprep.subr.mxu1 %v16810_v37 }
0x1098   :  { %10306 = vmatprep.subr.mxu0 %v8937_v43  ;;  %11056 = vmatpush3.msra.mxu1 %v9032_v55 }
0x1099   :  { %10307 = vmatpush3.msra.mxu0 %v8921_v4  ;;  %11057 = vmatprep.subr.mxu1 %v16810_v37 }
0x109a   :  { %10308 = vmatprep.subr.mxu0 %v8936_v13  ;;  %11058 = vmatpush3.msra.mxu1 %v9031_v10 }
0x109b   :  { %10309 = vmatpush3.msra.mxu0 %v8920_v48  ;;  %11059 = vmatprep.subr.mxu1 %v16810_v37 }
0x109c   :  { %10310 = vmatprep.subr.mxu0 %v8935_v25  ;;  %11060 = vmatpush3.msra.mxu1 %v9030_v23 }
0x109d   :  { %10311 = vmatpush3.msra.mxu0 %v8919_v52  ;;  %11061 = vmatprep.subr.mxu1 %v16810_v37 }
0x109e   :  { %10312 = vmatprep.subr.mxu0 %v8934_v9  ;;  %11062 = vmatpush3.msra.mxu1 %v9029_v42 }
0x109f   :  { %10313 = vmatpush3.msra.mxu0 %v8918_v3  ;;  %11063 = vmatprep.subr.mxu1 %v16810_v37 }
0x10a0   :  { %10314 = vmatprep.subr.mxu0 %v8933_v53  ;;  %11064 = vmatpush3.msra.mxu1 %v9028_v60 }
0x10a1   :  { %10315 = vmatpush3.msra.mxu0 %v8917_v17  ;;  %11065 = vmatprep.subr.mxu1 %v16810_v37 }
0x10a2   :  { %10316 = vmatprep.subr.mxu0 %v8932_v8  ;;  %11066 = vmatpush3.msra.mxu1 %v9027_v54 }
0x10a3   :  { %10317 = vmatpush3.msra.mxu0 %v8916_v33  ;;  %11067 = vmatprep.subr.mxu1 %v16810_v37 }
0x10a4   :  { %10318 = vmatprep.subr.mxu0 %v8931_v38 }
0x10a5   :  { %10319 = vmatpush3.msra.mxu0 %v8915_v57 }
0x10a6   :  { %10320 = vmatprep.subr.mxu0 %v8930_v28 }
0x10a7   :  { %10321 = vmatpush3.msra.mxu0 %v8914_v51 }
0x10a8   :  { %10322 = vmatprep.subr.mxu0 %v8929_v47 }
0x10a9   :  { %10323 = vmatpush3.msra.mxu0 %v8913_v61 }
0x10aa   :  { %10324 = vmatprep.subr.mxu0 %v8928_v40 }
0x10ab   :  { %10325 = vmatpush3.msra.mxu0 %v8912_v39 }
0x10ac   :  { %10326 = vmatprep.subr.mxu0 %v8927_v24 }
0x10ad   :  { %10327 = vmatpush3.msra.mxu0 %v8911_v6 }
0x10ae   :  { %10328 = vmatprep.subr.mxu0 %v8926_v34 }
0x10af   :  { %10329 = vmatpush3.msra.mxu0 %v8910_v27 }
0x1111   :  { %v8613_v5 = vpop.f32.mrf.mxu1  ;;  %v8684_v62 = vpop.f32.mrf.mxu0 }
0x1112   :  { %v8685_v45 = vadd.f32 %v8684_v62, %v8613_v5 }
0x1113   :  { %v8615_v0 = vpop.f32.mrf.mxu1  ;;  %v8686_v12 = vpop.f32.mrf.mxu0 }
0x1114   :  { %v8687_v15 = vadd.f32 %v8686_v12, %v8615_v0 }
0x1132   :  { %v8826_v56 = vpop.f32.mrf.mxu0 }
0x1134   :  { %v8828_v32 = vpop.f32.mrf.mxu0 }
0x1152   :  { %v8755_v63 = vpop.f32.mrf.mxu1 }
0x1153   :  { %v8756_v36 = vadd.f32 %v8755_v63, %v8685_v45 }
0x1154   :  { %v8757_v31 = vpop.f32.mrf.mxu1 }
0x1155   :  { %v8827_v7 = vadd.f32 %v8826_v56, %v8756_v36  ;;  %v8758_v49 = vadd.f32 %v8757_v31, %v8687_v15 }
0x1157   :  { %v8831_v2 = vsel %vm7678_vm5, %v8827_v7, 0.0  ;;  %v8829_v11 = vadd.f32 %v8828_v32, %v8758_v49 }
0x1158   :  { %v8832_v59 = vrot.slane %v8831_v2, 4 }
0x1159   :  { %v8838_v22 = vsel %vm7678_vm5, %v8829_v11, 0.0 }
0x115a   :  { %v8833_v26 = vadd.f32 %v8832_v59, %v8831_v2  ;;  %v8839_v29 = vrot.slane %v8838_v22, 4 }
0x115c   :  { %v8834_v21 = vrot.slane %v8833_v26, 2  ;;  %v8840_v41 = vadd.f32 %v8839_v29, %v8838_v22 }
0x115e   :  { %v8835_v46 = vadd.f32 %v8834_v21, %v8833_v26  ;;  %v8841_v35 = vrot.slane %v8840_v41, 2 }
0x1160   :  { %v8836_v44 = vrot.slane %v8835_v46, 1  ;;  %v8842_v1 = vadd.f32 %v8841_v35, %v8840_v41 }
0x1162   :  { %v8837_v14 = vadd.f32 %v8836_v44, %v8835_v46  ;;  %v8843_v16 = vrot.slane %v8842_v1, 1 }
0x1164   :  { %v8845_v30 = vmul.f32 0.25, %v8837_v14  ;;  %v8844_v58 = vadd.f32 %v8843_v16, %v8842_v1 }
0x1166   :  { %v8847_v50 = vsub.f32 %v8827_v7, %v8845_v30  ;;  %v8846_v20 = vmul.f32 0.25, %v8844_v58  ;;  %v9026_v30 = vld [vmem:[%s16412_s23 + $0x20] sm:$0xff]  ;;  %v9025_v58 = vld [vmem:[%s16412_s23 + $0x18] sm:$0xff] }
0x1167   :  { %11068 = vmatpush3.msra.mxu1 %v9026_v30 }
0x1168   :  { %v8849_v43 = vmul.f32 %v8847_v50, %v8847_v50  ;;  %v8848_v4 = vsub.f32 %v8829_v11, %v8846_v20  ;;  %11069 = vmatprep.subr.mxu1 %v16810_v37  ;;  %v9023_v20 = vld [vmem:[%s16412_s23 + $0x8] sm:$0xff] }
0x1169   :  { %11070 = vmatpush3.msra.mxu1 %v9025_v58 }
0x116a   :  { %v8851_v13 = vsel %vm7678_vm5, %v8849_v43, 0.0  ;;  %v8850_v48 = vmul.f32 %v8848_v4, %v8848_v4  ;;  %11071 = vmatprep.subr.mxu1 %v16810_v37  ;;  %v9022_v43 = vld [vmem:[%s16412_s23] sm:$0xff] }
0x116b   :  { %v8852_v25 = vrot.slane %v8851_v13, 4 }
0x116c   :  { %v8858_v52 = vsel %vm7678_vm5, %v8850_v48, 0.0 }
0x116d   :  { %v8853_v9 = vadd.f32 %v8852_v25, %v8851_v13  ;;  %v8859_v3 = vrot.slane %v8858_v52, 4  ;;  %v9212_v13 = vld [vmem:[%s16411_s22] ss:$0 sm:$0xff] }
0x116f   :  { %v8854_v53 = vrot.slane %v8853_v9, 2  ;;  %v8860_v17 = vadd.f32 %v8859_v3, %v8858_v52 }
0x1171   :  { %v8855_v18 = vadd.f32 %v8854_v53, %v8853_v9  ;;  %v8861_v19 = vrot.slane %v8860_v17, 2  ;;  %v9213_v53 = vld [vmem:[%s16413_s24] ss:$0 sm:$0xff] }
0x1173   :  { %v8856_v8 = vrot.slane %v8855_v18, 1  ;;  %v8862_v33 = vadd.f32 %v8861_v19, %v8860_v17 }
0x1175   :  { %v8857_v55 = vadd.f32 %v8856_v8, %v8855_v18  ;;  %v8863_v38 = vrot.slane %v8862_v33, 1 }
0x1177   :  { %v8865_v57 = vmul.f32 0.25, %v8857_v55  ;;  %v8864_v10 = vadd.f32 %v8863_v38, %v8862_v33 }
0x1179   :  { %v8867_v28 = vadd.f32 1e-05, %v8865_v57  ;;  %v8866_v51 = vmul.f32 0.25, %v8864_v10 }
0x117b   :  { %11125 = vrsqrt.f32 %v8867_v28  ;;  %v8868_v23 = vadd.f32 1e-05, %v8866_v51 }
0x117d   :  { %11127 = vrsqrt.f32 %v8868_v23 }
0x1188   :  { %v11126_v47 = vpop.eup %11125 }
0x1189   :  { %v8871_v61 = vmul.f32 %v11126_v47, %v8847_v50  ;;  %v9024_v50 = vld [vmem:[%s16412_s23 + $0x10] sm:$0xff]  ;;  %s11445_s23 = smov [#allocation23]  }
0x118a   :  { %v11128_v42 = vpop.eup %11127  ;;  %11072 = vmatpush3.msra.mxu1 %v9024_v50  ;;  %s9127_s20 = sshll.u32 %s11445_s23, 4  ;;  %s9128_s20 = int_to_ptr.vmem [resolvable:$true] %s9127_s20 }
0x118b   :  { %vm8873_vm6 = vcmp.gt.f32.partialorder %v8871_v61, 0.0  ;;  %v8875_v40 = vmul.f32 0.1, %v8871_v61  ;;  %v8872_v39 = vmul.f32 %v11128_v42, %v8848_v4  ;;  %11073 = vmatprep.subr.mxu1 %v16810_v37  ;;  %s11389_s22 = scalar_lea.vmem %s9128_s20, 32  ;;  %p11394_p10 = scmp.lt.s32.totalorder %s9128_s20, %s9128_s20 }
0x118c   :  { %11074 = vmatpush3.msra.mxu1 %v9023_v20  ;;  %p11390_p9 = scmp.ne.s32.totalorder %s9128_s20, %s11389_s22  ;;  %p11395_p11 = scmp.lt.s32.totalorder %s11389_s22, %s11389_s22 }
0x118d   :  { %v8877_v60 = vsel %vm8873_vm6, %v8871_v61, %v8875_v40  ;;  %vm8874_vm14 = vcmp.gt.f32.partialorder %v8872_v39, 0.0  ;;  %v8876_v24 = vmul.f32 0.1, %v8872_v39  ;;  %11075 = vmatprep.subr.mxu1 %v16810_v37 }
0x118e   :  { %v8879_v6 = vsel %vm827_vm1, %v8877_v60, -inf  ;;  %v8894_v54 = vsel %vm8893_vm13, %v8877_v60, -inf  ;;  %11076 = vmatpush3.msra.mxu1 %v9022_v43  ;;  %p11396_p12 = por %p11395_p11, %p11394_p10 }
0x118f   :  { %v8880_v34 = vrot.slane %v8879_v6, 4  ;;  %v8895_v27 = vrot.slane %v8894_v54, 4  ;;  %v8878_v5 = vsel %vm8874_vm14, %v8872_v39, %v8876_v24 }
0x1190   :  { %v8886_v62 = vsel %vm827_vm1, %v8878_v5, -inf  ;;  %v8901_v0 = vsel %vm8893_vm13, %v8878_v5, -inf  ;;  %p11397_p13 = pnand %p11396_p12, %p11390_p9 }
0x1191   :  { %v8881_v12 = vmax.f32 %v8879_v6, %v8880_v34  ;;  %v8896_v45 = vmax.f32 %v8894_v54, %v8895_v27  ;;  %v8887_v56 = vrot.slane %v8886_v62, 4  ;;  %v8902_v63 = vrot.slane %v8901_v0, 4 }
0x1193   :  { %v8888_v15 = vmax.f32 %v8886_v62, %v8887_v56  ;;  %v8903_v36 = vmax.f32 %v8901_v0, %v8902_v63  ;;  %v8882_v31 = vrot.slane %v8881_v12, 2  ;;  %v8897_v7 = vrot.slane %v8896_v45, 2 }
0x1195   :  { %v8889_v49 = vrot.slane %v8888_v15, 2  ;;  %v8904_v32 = vrot.slane %v8903_v36, 2  ;;  %v8883_v2 = vmax.f32 %v8881_v12, %v8882_v31  ;;  %v8898_v11 = vmax.f32 %v8896_v45, %v8897_v7 }
0x1197   :  { %v8890_v59 = vmax.f32 %v8888_v15, %v8889_v49  ;;  %v8905_v22 = vmax.f32 %v8903_v36, %v8904_v32  ;;  %v8884_v26 = vrot.slane %v8883_v2, 1  ;;  %v8899_v29 = vrot.slane %v8898_v11, 1 }
0x1199   :  { %v8891_v21 = vrot.slane %v8890_v59, 1  ;;  %v8906_v41 = vrot.slane %v8905_v22, 1  ;;  %v8885_v46 = vmax.f32 %v8883_v2, %v8884_v26  ;;  %v8900_v35 = vmax.f32 %v8898_v11, %v8899_v29 }
0x119b   :  { %v8892_v44 = vmax.f32 %v8890_v59, %v8891_v21  ;;  %v8907_v1 = vmax.f32 %v8905_v22, %v8906_v41  ;;  %v8908_v16 = vsel %vm879_vm2, %v8885_v46, %v8900_v35 }
0x119d   :  { %v8909_v14 = vsel %vm879_vm2, %v8892_v44, %v8907_v1  ;;  %vm9042_vm2 = vcmask 818176  }
0x119e   :  { %9013 = vmatprep.mubr.f32.mxu0 %v8909_v14 }
0x119f   :  { %9014 = vmatmul.mubr.f32.vlgmr.msra.gmra.mxu0 %v8908_v16 }
0x125f   :  { %v10330_v4 = vpop.f32.mrf.mxu0 }
0x1261   :  { %v10331_v48 = vpop.f32.mrf.mxu0 }
0x1262   :  { %v10332_v25 = vadd.f32 %v10331_v48, %v10330_v4 }
0x1264   :  { %v9016_v52 = vadd.f32 %v10332_v25, %v9212_v13 }
0x1266   :  { %vm9019_vm1 = vcmp.gt.f32.partialorder %v9016_v52, 0.0  ;;  %v9020_v9 = vmul.f32 0.1, %v9016_v52 }
0x1268   :  { %v9021_v3 = vsel %vm9019_vm1, %v9016_v52, %v9020_v9 }
0x1269   :  { %11078 = vmatmul.mubr.msk.f32.vlgmr.msra.gmra.mxu1 %vm9042_vm2, %v9021_v3 }
0x1329   :  { %v9115_v37 = vpop.f32.mrf.mxu1 }
0x132a   :  { %v9116_v17 = vadd.f32 %v9213_v53, %v9115_v37 }
0x132b   :  { %v11079_v18 = vpop.f32.mrf.mxu1 }
0x132c   :  { %9120 = vst.msk [vmem:[#allocation23] sm:$0x3] %vm9119_vm15, %v9116_v17 }
0x132d   :  { %11400 = shalt.err (!%p11397_p13)
}
0x132e   :  { %9130 = dma.vmem_to_hbm [thread:$0]  %s9128_s20, 32, %s16414_s25, [#allocation4]  }
0x132f   :  { %11423 = dma.done.wait [#allocation4], 32  }
0x1330   :  { %11424 = vsyncadd [#allocation4], 4294967264 }
0x1331   :  { %9134 = vsyncpa [#allocation3], 1 }
0x1332   :  { %9135 = vsyncpa [#allocation6], 1 }
0x1333   :  { %9136 = vsyncpa [#allocation9], 1 }
0x1334   :  { %9137 = vsyncpa [#allocation12], 1 }
0x1335   :  { %9138 = vsyncpa [#allocation15], 1 }
0x1336   :  { %9139 = vsyncpa [#allocation18], 1 }
0x1337   :  { %9140 = vsyncpa [#allocation21], 1 }
0x1338   :  { %9141 = vsyncpa [#allocation4], 1 }

</bundles_post_ra>
